<compile_context>
chip_gen: v7x
topology: tpu7x:2x2x1
jax: 0.10.0
libtpu: 0.0.40
codegen_flags: <defaults>
</compile_context>

<pallas_src>
import numpy as np
import jax
import jax.numpy as jnp
from jax import lax
from jax.experimental import pallas as pl
from jax.experimental.pallas import tpu as pltpu

EPS = 1e-5  # PyTorch BatchNorm2d default


# ------------------------------ kernel helpers ------------------------------- #

def _bn_relu(acc, p_ref):
    """Training-mode BatchNorm2d (batch stats, biased var, two-pass) + ReLU.

    acc:   (M, C) f32 pre-activation (conv bias omitted on purpose: it is
           exactly cancelled by the batch-mean subtraction; only valid for
           training-mode BN with batch statistics).
    p_ref: (2, C) packed [gamma; beta].
    """
    m = acc.shape[0]
    p = p_ref[...]
    gamma, beta = p[0:1, :], p[1:2, :]
    mean = jnp.sum(acc, axis=0, keepdims=True) * (1.0 / m)
    xc = acc - mean
    var = jnp.sum(xc * xc, axis=0, keepdims=True) * (1.0 / m)
    scale = gamma * lax.rsqrt(var + EPS)
    return jnp.maximum(xc * scale + beta, 0.0)


def _store_tap_slabs(act_ref, y):
    """Scatter the tap-major row blocks of y (4*m, C) f32 into lane slabs of
    act_ref (m, 4*C) bf16 so the next layer is a single K=4*C contraction."""
    m, c4 = act_ref.shape
    c = c4 // 4
    yb = y.astype(act_ref.dtype)
    for t in range(4):
        act_ref[:, t * c:(t + 1) * c] = yb[t * m:(t + 1) * m, :]


# ------------------------------ fused kernel --------------------------------- #

def fused_disc_kernel(patches1_ref, w1_ref, p1_ref, w2_ref, p2_ref,
                      w3_hbm_ref, p3_ref, w4_hbm_ref, p4_ref, w5_ref, b5_ref,
                      o_ref,
                      act1_ref, act2_ref, act3_ref, w3_ref, w4_ref, sem):
    # Kick off the big weight DMAs so they overlap conv1-conv3 compute.
    w3_cp = pltpu.make_async_copy(w3_hbm_ref, w3_ref, sem.at[0])
    w4_cp = pltpu.make_async_copy(w4_hbm_ref, w4_ref, sem.at[1])
    w3_cp.start()
    w4_cp.start()

    # conv1 (im2col GEMM, K=48) + BN1 + ReLU -> lane-slab scratch
    acc1 = jnp.dot(patches1_ref[...], w1_ref[...],
                   preferred_element_type=jnp.float32)          # (4*m2, 128) f32
    _store_tap_slabs(act1_ref, _bn_relu(acc1, p1_ref))

    # conv2: single K=4*128 contraction + BN2 + ReLU
    acc2 = jnp.dot(act1_ref[...], w2_ref[...],
                   preferred_element_type=jnp.float32)          # (4*m3, 256)
    _store_tap_slabs(act2_ref, _bn_relu(acc2, p2_ref))

    # conv3: single K=4*256 contraction + BN3 + ReLU
    w3_cp.wait()
    acc3 = jnp.dot(act2_ref[...], w3_ref[...],
                   preferred_element_type=jnp.float32)          # (4*m4, 512)
    _store_tap_slabs(act3_ref, _bn_relu(acc3, p3_ref))

    # conv4: single K=4*512 contraction + BN4 + ReLU (kept in f32, not stored)
    w4_cp.wait()
    acc4 = jnp.dot(act3_ref[...], w4_ref[...],
                   preferred_element_type=jnp.float32)          # (4*m5, 1024)
    y4 = _bn_relu(acc4, p4_ref)

    # conv5 (Cout=1) folded into the epilogue: VPU multiply + lane reduce.
    m5 = o_ref.shape[0]
    w5 = w5_ref[...]                                            # (4, 1024) f32
    rows = [jnp.sum(y4[t * m5:(t + 1) * m5, :] * w5[t:t + 1, :],
                    axis=1, keepdims=True) for t in range(4)]
    logit = rows[0] + rows[1] + rows[2] + rows[3]
    o_ref[...] = jax.nn.sigmoid(logit + b5_ref[0])


# ----------------------------- wrapper / packing ----------------------------- #

def _im2col(x_nhwc, k, s):
    """x: (N,H,W,C) -> patches (N*Ho*Wo, k*k*C), valid padding, stride s."""
    N, H, W, C = x_nhwc.shape
    Ho = (H - k) // s + 1
    Wo = (W - k) // s + 1
    cols = []
    for di in range(k):
        for dj in range(k):
            cols.append(x_nhwc[:, di:di + s * Ho:s, dj:dj + s * Wo:s, :])
    patches = jnp.stack(cols, axis=3)                 # (N,Ho,Wo,k*k,C)
    return patches.reshape(N * Ho * Wo, k * k * C), Ho, Wo


def _w_to_mat(w_oihw):
    """(Cout,Cin,kh,kw) -> (kh*kw*Cin, Cout), tap-major K (matches im2col/slabs)."""
    Cout, Cin, kh, kw = w_oihw.shape
    return jnp.transpose(w_oihw, (2, 3, 1, 0)).reshape(kh * kw * Cin, Cout)


def _row_permutation(N, ho1, wo1):
    """Row order for conv1's output so every later k=2/s=2 layer's im2col is
    exactly 4 tap-major row blocks of its input activation.  Pure numpy -> a
    trace-time constant (no per-call work)."""
    ho5, wo5 = ho1 // 16, wo1 // 16
    order = [(n, y, x) for n in range(N) for y in range(ho5) for x in range(wo5)]
    for _ in range(4):
        order = [(n, 2 * y + di, 2 * x + dj)
                 for (di, dj) in ((0, 0), (0, 1), (1, 0), (1, 1))
                 for (n, y, x) in order]
    return np.array([n * (ho1 * wo1) + y * wo1 + x for (n, y, x) in order],
                    dtype=np.int32)


def pack_discriminator_params(params):
    """One-time repack of the PyTorch-style params into kernel layouts.
    Call ONCE outside the per-step path; the packed tensors are reused by every
    forward call (removes ~30 MB of per-call HBM repack traffic)."""
    w1, _ = params["conv1"]
    w2, _ = params["conv2"]
    w3, _ = params["conv3"]
    w4, _ = params["conv4"]
    w5, b5 = params["conv5"]

    def pack_bn(bn):
        g, b = bn
        return jnp.stack([g, b], axis=0).astype(jnp.float32)

    packed = {
        "w1": _w_to_mat(w1).astype(jnp.bfloat16),          # (48, 128)
        "w2": _w_to_mat(w2).astype(jnp.bfloat16),          # (512, 256)
        "w3": _w_to_mat(w3).astype(jnp.bfloat16),          # (1024, 512)
        "w4": _w_to_mat(w4).astype(jnp.bfloat16),          # (2048, 1024)
        "w5": jnp.transpose(w5, (2, 3, 1, 0)).reshape(4, -1).astype(jnp.float32),
        "b5": b5.reshape(1).astype(jnp.float32),
        "p1": pack_bn(params["bn1"]),
        "p2": pack_bn(params["bn2"]),
        "p3": pack_bn(params["bn3"]),
        "p4": pack_bn(params["bn4"]),
    }
    return jax.tree_util.tree_map(jax.device_put, packed)


def discriminator_forward(x_nchw, packed):
    x = jnp.transpose(x_nchw, (0, 2, 3, 1)).astype(jnp.float32)  # NCHW -> NHWC
    N = x.shape[0]

    c1 = packed["w1"].shape[1]
    c2 = packed["w2"].shape[1]
    c3 = packed["w3"].shape[1]
    c4 = packed["w4"].shape[1]

    # conv1 im2col (k=4, s=2, overlapping) done once in plain JAX (input-sized).
    patches1, ho1, wo1 = _im2col(x, 4, 2)
    assert ho1 % 16 == 0 and wo1 % 16 == 0, "spatial must halve 4 more times"
    ho5, wo5 = ho1 // 16, wo1 // 16
    m1 = N * ho1 * wo1
    m2, m3, m4 = m1 // 4, m1 // 16, m1 // 64
    m5 = N * ho5 * wo5

    # Permute patch rows so every later layer's im2col is a block slice.
    perm = _row_permutation(N, ho1, wo1)
    patches1 = jnp.take(patches1, perm, axis=0).astype(jnp.bfloat16)

    vmem = pl.BlockSpec(memory_space=pltpu.MemorySpace.VMEM)
    smem = pl.BlockSpec(memory_space=pltpu.MemorySpace.SMEM)
    hbm = pl.BlockSpec(memory_space=pl.ANY)      # manual DMA inside the kernel

    out = pl.pallas_call(
        fused_disc_kernel,
        out_shape=jax.ShapeDtypeStruct((m5, 1), jnp.float32),
        in_specs=[vmem, vmem, vmem, vmem, vmem, hbm, vmem, hbm, vmem, vmem, smem],
        out_specs=vmem,
        scratch_shapes=[
            pltpu.VMEM((m2, 4 * c1), jnp.bfloat16),   # act1 lane slabs (128, 512)
            pltpu.VMEM((m3, 4 * c2), jnp.bfloat16),   # act2 lane slabs (32, 1024)
            pltpu.VMEM((m4, 4 * c3), jnp.bfloat16),   # act3 lane slabs (8, 2048)
            pltpu.VMEM((4 * c2, c3), jnp.bfloat16),   # w3 prefetch buffer
            pltpu.VMEM((4 * c3, c4), jnp.bfloat16),   # w4 prefetch buffer
            pltpu.SemaphoreType.DMA((2,)),
        ],
        compiler_params=pltpu.CompilerParams(
            vmem_limit_bytes=32 * 1024 * 1024),
    )(patches1, packed["w1"], packed["p1"], packed["w2"], packed["p2"],
      packed["w3"], packed["p3"], packed["w4"], packed["p4"],
      packed["w5"], packed["b5"])

    out = out.reshape(N, ho5, wo5, 1)
    return jnp.transpose(out, (0, 3, 1, 2))      # NHWC -> NCHW


# ----------------------------- pure-JAX reference ---------------------------- #

def _ref_conv(x, w, b, s):
    y = lax.conv_general_dilated(x, w, (s, s), "VALID",
                                 dimension_numbers=("NCHW", "OIHW", "NCHW"))
    return y + b[None, :, None, None]


def _ref_bn_relu(x, g, beta):
    mean = jnp.mean(x, axis=(0, 2, 3), keepdims=True)
    var = jnp.mean(jnp.square(x - mean), axis=(0, 2, 3), keepdims=True)
    y = (x - mean) * lax.rsqrt(var + EPS) \
        * g[None, :, None, None] + beta[None, :, None, None]
    return jnp.maximum(y, 0.0)


def reference_forward(x, params):
    x = _ref_bn_relu(_ref_conv(x, *params["conv1"], 2), *params["bn1"])
    x = _ref_bn_relu(_ref_conv(x, *params["conv2"], 2), *params["bn2"])
    x = _ref_bn_relu(_ref_conv(x, *params["conv3"], 2), *params["bn3"])
    x = _ref_bn_relu(_ref_conv(x, *params["conv4"], 2), *params["bn4"])
    return jax.nn.sigmoid(_ref_conv(x, *params["conv5"], 2))


# ----------------------------- params / main --------------------------------- #

def init_params(key, in_features):
    specs = [
        ("conv1", (128, in_features, 4, 4)),
        ("conv2", (256, 128, 2, 2)),
        ("conv3", (512, 256, 2, 2)),
        ("conv4", (1024, 512, 2, 2)),
        ("conv5", (1, 1024, 2, 2)),
    ]
    params = {}
    for name, shape in specs:
        key, kw, kb = jax.random.split(key, 3)
        params[name] = (0.05 * jax.random.normal(kw, shape, jnp.float32),
                        0.05 * jax.random.normal(kb, (shape[0],), jnp.float32))
    for name, c in [("bn1", 128), ("bn2", 256), ("bn3", 512), ("bn4", 1024)]:
        key, kg, kb = jax.random.split(key, 3)
        params[name] = (1.0 + 0.1 * jax.random.normal(kg, (c,), jnp.float32),
                        0.1 * jax.random.normal(kb, (c,), jnp.float32))
    return params


if __name__ == "__main__":
    key = jax.random.PRNGKey(0)
    k_x, k_p = jax.random.split(key)

    in_features, batch, spatial = 3, 2, 34  # 34 -> 16 -> 8 -> 4 -> 2 -> 1
    x = jax.random.normal(k_x, (batch, in_features, spatial, spatial), jnp.float32)
    params = init_params(k_p, in_features)

    # One-time weight repack (outside the per-call / jitted path).
    packed = pack_discriminator_params(params)

    fwd = jax.jit(discriminator_forward)
    out = jax.block_until_ready(fwd(x, packed))
    ref = jax.block_until_ready(jax.jit(reference_forward)(x, params))

    assert out.shape == (batch, 1, 1, 1), out.shape
    assert bool(jnp.all(jnp.isfinite(out)))
    # Tolerance covers bf16 MXU inputs AND bf16 activation storage
    # (f32 accumulation everywhere) vs. the f32 reference.
    assert jnp.allclose(out, ref, atol=4e-2, rtol=4e-2), (out, ref)

    print("KERNEL_OK")
</pallas_src>

<mosaic_0001>
module attributes {stable_mosaic.version = 11 : i64} {
  func.func @fused_disc_kernel(%arg0: memref<512x48xbf16, #tpu.memory_space<vmem>>, %arg1: memref<48x128xbf16, #tpu.memory_space<vmem>>, %arg2: memref<2x128xf32, #tpu.memory_space<vmem>>, %arg3: memref<512x256xbf16, #tpu.memory_space<vmem>>, %arg4: memref<2x256xf32, #tpu.memory_space<vmem>>, %arg5: memref<1024x512xbf16, #tpu.memory_space<any>>, %arg6: memref<2x512xf32, #tpu.memory_space<vmem>>, %arg7: memref<2048x1024xbf16, #tpu.memory_space<any>>, %arg8: memref<2x1024xf32, #tpu.memory_space<vmem>>, %arg9: memref<4x1024xf32, #tpu.memory_space<vmem>>, %arg10: memref<1xf32, #tpu.memory_space<smem>>, %arg11: memref<2x1xf32, #tpu.memory_space<vmem>>, %arg12: memref<128x512xbf16, #tpu.memory_space<vmem>>, %arg13: memref<32x1024xbf16, #tpu.memory_space<vmem>>, %arg14: memref<8x2048xbf16, #tpu.memory_space<vmem>>, %arg15: memref<1024x512xbf16, #tpu.memory_space<vmem>>, %arg16: memref<2048x1024xbf16, #tpu.memory_space<vmem>>, %arg17: memref<2x!tpu.dma_semaphore, #tpu.memory_space<semaphore_mem>>) attributes {dimension_semantics = [], scalar_prefetch = 0 : i64, scratch_operands = 6 : i64, tpu.core_type = #tpu.core_type<tc>} {
    %c0_i32 = arith.constant 0 : i32
    %0 = tpu.memref_slice %arg17[%c0_i32] : memref<2x!tpu.dma_semaphore, #tpu.memory_space<semaphore_mem>> -> memref<1x!tpu.dma_semaphore, #tpu.memory_space<semaphore_mem>>
    %1 = tpu.memref_squeeze %0 : memref<1x!tpu.dma_semaphore, #tpu.memory_space<semaphore_mem>> -> memref<!tpu.dma_semaphore, #tpu.memory_space<semaphore_mem>>
    tpu.enqueue_dma source(%arg5 : memref<1024x512xbf16, #tpu.memory_space<any>>) target(%arg15 : memref<1024x512xbf16, #tpu.memory_space<vmem>>) target_semaphore(%1 : memref<!tpu.dma_semaphore, #tpu.memory_space<semaphore_mem>>)
    %c1_i32 = arith.constant 1 : i32
    %2 = tpu.memref_slice %arg17[%c1_i32] : memref<2x!tpu.dma_semaphore, #tpu.memory_space<semaphore_mem>> -> memref<1x!tpu.dma_semaphore, #tpu.memory_space<semaphore_mem>>
    %3 = tpu.memref_squeeze %2 : memref<1x!tpu.dma_semaphore, #tpu.memory_space<semaphore_mem>> -> memref<!tpu.dma_semaphore, #tpu.memory_space<semaphore_mem>>
    tpu.enqueue_dma source(%arg7 : memref<2048x1024xbf16, #tpu.memory_space<any>>) target(%arg16 : memref<2048x1024xbf16, #tpu.memory_space<vmem>>) target_semaphore(%3 : memref<!tpu.dma_semaphore, #tpu.memory_space<semaphore_mem>>)
    %c0 = arith.constant 0 : index
    %c0_0 = arith.constant 0 : index
    %4 = vector.load %arg0[%c0, %c0_0] : memref<512x48xbf16, #tpu.memory_space<vmem>>, vector<512x48xbf16>
    %c0_1 = arith.constant 0 : index
    %c0_2 = arith.constant 0 : index
    %5 = vector.load %arg1[%c0_1, %c0_2] : memref<48x128xbf16, #tpu.memory_space<vmem>>, vector<48x128xbf16>
    %cst = arith.constant dense<0.000000e+00> : vector<512x128xf32>
    %6 = tpu.matmul %4, %5, %cst {dimension_numbers = #tpu.dot_dimension_numbers<[1], [0], [0], [1], [0, 0, 1, 1], [], []>} : vector<512x48xbf16>, vector<48x128xbf16>, vector<512x128xf32> -> vector<512x128xf32>
    %c0_3 = arith.constant 0 : index
    %c0_4 = arith.constant 0 : index
    %7 = vector.load %arg2[%c0_3, %c0_4] : memref<2x128xf32, #tpu.memory_space<vmem>>, vector<2x128xf32>
    %8 = vector.extract_strided_slice %7 {offsets = [0, 0], sizes = [1, 128], strides = [1, 1]} : vector<2x128xf32> to vector<1x128xf32>
    %9 = vector.extract_strided_slice %7 {offsets = [1, 0], sizes = [1, 128], strides = [1, 1]} : vector<2x128xf32> to vector<1x128xf32>
    %cst_5 = arith.constant dense<0.000000e+00> : vector<128xf32>
    %10 = vector.multi_reduction <add>, %6, %cst_5 [0] : vector<512x128xf32> to vector<128xf32>
    %11 = vector.shape_cast %10 : vector<128xf32> to vector<1x128xf32>
    %cst_6 = arith.constant 0.001953125 : f32
    %12 = vector.broadcast %cst_6 : f32 to vector<1x128xf32>
    %13 = arith.mulf %11, %12 : vector<1x128xf32>
    %14 = vector.broadcast %13 : vector<1x128xf32> to vector<512x128xf32>
    %15 = arith.subf %6, %14 : vector<512x128xf32>
    %16 = arith.mulf %15, %15 : vector<512x128xf32>
    %cst_7 = arith.constant dense<0.000000e+00> : vector<128xf32>
    %17 = vector.multi_reduction <add>, %16, %cst_7 [0] : vector<512x128xf32> to vector<128xf32>
    %18 = vector.shape_cast %17 : vector<128xf32> to vector<1x128xf32>
    %cst_8 = arith.constant 0.001953125 : f32
    %19 = vector.broadcast %cst_8 : f32 to vector<1x128xf32>
    %20 = arith.mulf %18, %19 : vector<1x128xf32>
    %cst_9 = arith.constant 9.99999974E-6 : f32
    %21 = vector.broadcast %cst_9 : f32 to vector<1x128xf32>
    %22 = arith.addf %20, %21 : vector<1x128xf32>
    %23 = math.rsqrt %22 : vector<1x128xf32>
    %24 = arith.mulf %8, %23 : vector<1x128xf32>
    %25 = vector.broadcast %24 : vector<1x128xf32> to vector<512x128xf32>
    %26 = arith.mulf %15, %25 : vector<512x128xf32>
    %27 = vector.broadcast %9 : vector<1x128xf32> to vector<512x128xf32>
    %28 = arith.addf %26, %27 : vector<512x128xf32>
    %cst_10 = arith.constant 0.000000e+00 : f32
    %29 = vector.broadcast %cst_10 : f32 to vector<512x128xf32>
    %30 = arith.maximumf %28, %29 : vector<512x128xf32>
    %31 = arith.truncf %30 : vector<512x128xf32> to vector<512x128xbf16>
    %32 = vector.extract_strided_slice %31 {offsets = [0, 0], sizes = [128, 128], strides = [1, 1]} : vector<512x128xbf16> to vector<128x128xbf16>
    %c0_11 = arith.constant 0 : index
    %c0_12 = arith.constant 0 : index
    %33 = vector.load %arg12[%c0_11, %c0_12] : memref<128x512xbf16, #tpu.memory_space<vmem>>, vector<128x128xbf16>
    tpu.vector_store %arg12[%c0_11, %c0_12], %32 {strides = array<i32>} : memref<128x512xbf16, #tpu.memory_space<vmem>>, vector<128x128xbf16>,
    %34 = vector.extract_strided_slice %31 {offsets = [128, 0], sizes = [128, 128], strides = [1, 1]} : vector<512x128xbf16> to vector<128x128xbf16>
    %c0_13 = arith.constant 0 : index
    %c128 = arith.constant 128 : index
    %35 = vector.load %arg12[%c0_13, %c128] : memref<128x512xbf16, #tpu.memory_space<vmem>>, vector<128x128xbf16>
    tpu.vector_store %arg12[%c0_13, %c128], %34 {strides = array<i32>} : memref<128x512xbf16, #tpu.memory_space<vmem>>, vector<128x128xbf16>,
    %36 = vector.extract_strided_slice %31 {offsets = [256, 0], sizes = [128, 128], strides = [1, 1]} : vector<512x128xbf16> to vector<128x128xbf16>
    %c0_14 = arith.constant 0 : index
    %c256 = arith.constant 256 : index
    %37 = vector.load %arg12[%c0_14, %c256] : memref<128x512xbf16, #tpu.memory_space<vmem>>, vector<128x128xbf16>
    tpu.vector_store %arg12[%c0_14, %c256], %36 {strides = array<i32>} : memref<128x512xbf16, #tpu.memory_space<vmem>>, vector<128x128xbf16>,
    %38 = vector.extract_strided_slice %31 {offsets = [384, 0], sizes = [128, 128], strides = [1, 1]} : vector<512x128xbf16> to vector<128x128xbf16>
    %c0_15 = arith.constant 0 : index
    %c384 = arith.constant 384 : index
    %39 = vector.load %arg12[%c0_15, %c384] : memref<128x512xbf16, #tpu.memory_space<vmem>>, vector<128x128xbf16>
    tpu.vector_store %arg12[%c0_15, %c384], %38 {strides = array<i32>} : memref<128x512xbf16, #tpu.memory_space<vmem>>, vector<128x128xbf16>,
    %c0_16 = arith.constant 0 : index
    %c0_17 = arith.constant 0 : index
    %40 = vector.load %arg12[%c0_16, %c0_17] : memref<128x512xbf16, #tpu.memory_space<vmem>>, vector<128x512xbf16>
    %c0_18 = arith.constant 0 : index
    %c0_19 = arith.constant 0 : index
    %41 = vector.load %arg3[%c0_18, %c0_19] : memref<512x256xbf16, #tpu.memory_space<vmem>>, vector<512x256xbf16>
    %cst_20 = arith.constant dense<0.000000e+00> : vector<128x256xf32>
    %42 = tpu.matmul %40, %41, %cst_20 {dimension_numbers = #tpu.dot_dimension_numbers<[1], [0], [0], [1], [0, 0, 1, 1], [], []>} : vector<128x512xbf16>, vector<512x256xbf16>, vector<128x256xf32> -> vector<128x256xf32>
    %c0_21 = arith.constant 0 : index
    %c0_22 = arith.constant 0 : index
    %43 = vector.load %arg4[%c0_21, %c0_22] : memref<2x256xf32, #tpu.memory_space<vmem>>, vector<2x256xf32>
    %44 = vector.extract_strided_slice %43 {offsets = [0, 0], sizes = [1, 256], strides = [1, 1]} : vector<2x256xf32> to vector<1x256xf32>
    %45 = vector.extract_strided_slice %43 {offsets = [1, 0], sizes = [1, 256], strides = [1, 1]} : vector<2x256xf32> to vector<1x256xf32>
    %cst_23 = arith.constant dense<0.000000e+00> : vector<256xf32>
    %46 = vector.multi_reduction <add>, %42, %cst_23 [0] : vector<128x256xf32> to vector<256xf32>
    %47 = vector.shape_cast %46 : vector<256xf32> to vector<1x256xf32>
    %cst_24 = arith.constant 7.812500e-03 : f32
    %48 = vector.broadcast %cst_24 : f32 to vector<1x256xf32>
    %49 = arith.mulf %47, %48 : vector<1x256xf32>
    %50 = vector.broadcast %49 : vector<1x256xf32> to vector<128x256xf32>
    %51 = arith.subf %42, %50 : vector<128x256xf32>
    %52 = arith.mulf %51, %51 : vector<128x256xf32>
    %cst_25 = arith.constant dense<0.000000e+00> : vector<256xf32>
    %53 = vector.multi_reduction <add>, %52, %cst_25 [0] : vector<128x256xf32> to vector<256xf32>
    %54 = vector.shape_cast %53 : vector<256xf32> to vector<1x256xf32>
    %cst_26 = arith.constant 7.812500e-03 : f32
    %55 = vector.broadcast %cst_26 : f32 to vector<1x256xf32>
    %56 = arith.mulf %54, %55 : vector<1x256xf32>
    %cst_27 = arith.constant 9.99999974E-6 : f32
    %57 = vector.broadcast %cst_27 : f32 to vector<1x256xf32>
    %58 = arith.addf %56, %57 : vector<1x256xf32>
    %59 = math.rsqrt %58 : vector<1x256xf32>
    %60 = arith.mulf %44, %59 : vector<1x256xf32>
    %61 = vector.broadcast %60 : vector<1x256xf32> to vector<128x256xf32>
    %62 = arith.mulf %51, %61 : vector<128x256xf32>
    %63 = vector.broadcast %45 : vector<1x256xf32> to vector<128x256xf32>
    %64 = arith.addf %62, %63 : vector<128x256xf32>
    %cst_28 = arith.constant 0.000000e+00 : f32
    %65 = vector.broadcast %cst_28 : f32 to vector<128x256xf32>
    %66 = arith.maximumf %64, %65 : vector<128x256xf32>
    %67 = arith.truncf %66 : vector<128x256xf32> to vector<128x256xbf16>
    %68 = vector.extract_strided_slice %67 {offsets = [0, 0], sizes = [32, 256], strides = [1, 1]} : vector<128x256xbf16> to vector<32x256xbf16>
    %c0_29 = arith.constant 0 : index
    %c0_30 = arith.constant 0 : index
    %69 = vector.load %arg13[%c0_29, %c0_30] : memref<32x1024xbf16, #tpu.memory_space<vmem>>, vector<32x256xbf16>
    tpu.vector_store %arg13[%c0_29, %c0_30], %68 {strides = array<i32>} : memref<32x1024xbf16, #tpu.memory_space<vmem>>, vector<32x256xbf16>,
    %70 = vector.extract_strided_slice %67 {offsets = [32, 0], sizes = [32, 256], strides = [1, 1]} : vector<128x256xbf16> to vector<32x256xbf16>
    %c0_31 = arith.constant 0 : index
    %c256_32 = arith.constant 256 : index
    %71 = vector.load %arg13[%c0_31, %c256_32] : memref<32x1024xbf16, #tpu.memory_space<vmem>>, vector<32x256xbf16>
    tpu.vector_store %arg13[%c0_31, %c256_32], %70 {strides = array<i32>} : memref<32x1024xbf16, #tpu.memory_space<vmem>>, vector<32x256xbf16>,
    %72 = vector.extract_strided_slice %67 {offsets = [64, 0], sizes = [32, 256], strides = [1, 1]} : vector<128x256xbf16> to vector<32x256xbf16>
    %c0_33 = arith.constant 0 : index
    %c512 = arith.constant 512 : index
    %73 = vector.load %arg13[%c0_33, %c512] : memref<32x1024xbf16, #tpu.memory_space<vmem>>, vector<32x256xbf16>
    tpu.vector_store %arg13[%c0_33, %c512], %72 {strides = array<i32>} : memref<32x1024xbf16, #tpu.memory_space<vmem>>, vector<32x256xbf16>,
    %74 = vector.extract_strided_slice %67 {offsets = [96, 0], sizes = [32, 256], strides = [1, 1]} : vector<128x256xbf16> to vector<32x256xbf16>
    %c0_34 = arith.constant 0 : index
    %c768 = arith.constant 768 : index
    %75 = vector.load %arg13[%c0_34, %c768] : memref<32x1024xbf16, #tpu.memory_space<vmem>>, vector<32x256xbf16>
    tpu.vector_store %arg13[%c0_34, %c768], %74 {strides = array<i32>} : memref<32x1024xbf16, #tpu.memory_space<vmem>>, vector<32x256xbf16>,
    %c0_i32_35 = arith.constant 0 : i32
    %76 = tpu.memref_slice %arg17[%c0_i32_35] : memref<2x!tpu.dma_semaphore, #tpu.memory_space<semaphore_mem>> -> memref<1x!tpu.dma_semaphore, #tpu.memory_space<semaphore_mem>>
    %77 = tpu.memref_squeeze %76 : memref<1x!tpu.dma_semaphore, #tpu.memory_space<semaphore_mem>> -> memref<!tpu.dma_semaphore, #tpu.memory_space<semaphore_mem>>
    tpu.wait_dma2 semaphore(%77 : memref<!tpu.dma_semaphore, #tpu.memory_space<semaphore_mem>>) src(%arg5 : memref<1024x512xbf16, #tpu.memory_space<any>>) dst(%arg15 : memref<1024x512xbf16, #tpu.memory_space<vmem>>)
    %c0_36 = arith.constant 0 : index
    %c0_37 = arith.constant 0 : index
    %78 = vector.load %arg13[%c0_36, %c0_37] : memref<32x1024xbf16, #tpu.memory_space<vmem>>, vector<32x1024xbf16>
    %c0_38 = arith.constant 0 : index
    %c0_39 = arith.constant 0 : index
    %79 = vector.load %arg15[%c0_38, %c0_39] : memref<1024x512xbf16, #tpu.memory_space<vmem>>, vector<1024x512xbf16>
    %cst_40 = arith.constant dense<0.000000e+00> : vector<32x512xf32>
    %80 = tpu.matmul %78, %79, %cst_40 {dimension_numbers = #tpu.dot_dimension_numbers<[1], [0], [0], [1], [0, 0, 1, 1], [], []>} : vector<32x1024xbf16>, vector<1024x512xbf16>, vector<32x512xf32> -> vector<32x512xf32>
    %c0_41 = arith.constant 0 : index
    %c0_42 = arith.constant 0 : index
    %81 = vector.load %arg6[%c0_41, %c0_42] : memref<2x512xf32, #tpu.memory_space<vmem>>, vector<2x512xf32>
    %82 = vector.extract_strided_slice %81 {offsets = [0, 0], sizes = [1, 512], strides = [1, 1]} : vector<2x512xf32> to vector<1x512xf32>
    %83 = vector.extract_strided_slice %81 {offsets = [1, 0], sizes = [1, 512], strides = [1, 1]} : vector<2x512xf32> to vector<1x512xf32>
    %cst_43 = arith.constant dense<0.000000e+00> : vector<512xf32>
    %84 = vector.multi_reduction <add>, %80, %cst_43 [0] : vector<32x512xf32> to vector<512xf32>
    %85 = vector.shape_cast %84 : vector<512xf32> to vector<1x512xf32>
    %cst_44 = arith.constant 3.125000e-02 : f32
    %86 = vector.broadcast %cst_44 : f32 to vector<1x512xf32>
    %87 = arith.mulf %85, %86 : vector<1x512xf32>
    %88 = vector.broadcast %87 : vector<1x512xf32> to vector<32x512xf32>
    %89 = arith.subf %80, %88 : vector<32x512xf32>
    %90 = arith.mulf %89, %89 : vector<32x512xf32>
    %cst_45 = arith.constant dense<0.000000e+00> : vector<512xf32>
    %91 = vector.multi_reduction <add>, %90, %cst_45 [0] : vector<32x512xf32> to vector<512xf32>
    %92 = vector.shape_cast %91 : vector<512xf32> to vector<1x512xf32>
    %cst_46 = arith.constant 3.125000e-02 : f32
    %93 = vector.broadcast %cst_46 : f32 to vector<1x512xf32>
    %94 = arith.mulf %92, %93 : vector<1x512xf32>
    %cst_47 = arith.constant 9.99999974E-6 : f32
    %95 = vector.broadcast %cst_47 : f32 to vector<1x512xf32>
    %96 = arith.addf %94, %95 : vector<1x512xf32>
    %97 = math.rsqrt %96 : vector<1x512xf32>
    %98 = arith.mulf %82, %97 : vector<1x512xf32>
    %99 = vector.broadcast %98 : vector<1x512xf32> to vector<32x512xf32>
    %100 = arith.mulf %89, %99 : vector<32x512xf32>
    %101 = vector.broadcast %83 : vector<1x512xf32> to vector<32x512xf32>
    %102 = arith.addf %100, %101 : vector<32x512xf32>
    %cst_48 = arith.constant 0.000000e+00 : f32
    %103 = vector.broadcast %cst_48 : f32 to vector<32x512xf32>
    %104 = arith.maximumf %102, %103 : vector<32x512xf32>
    %105 = arith.truncf %104 : vector<32x512xf32> to vector<32x512xbf16>
    %106 = vector.extract_strided_slice %105 {offsets = [0, 0], sizes = [8, 512], strides = [1, 1]} : vector<32x512xbf16> to vector<8x512xbf16>
    %c0_49 = arith.constant 0 : index
    %c0_50 = arith.constant 0 : index
    %107 = vector.load %arg14[%c0_49, %c0_50] : memref<8x2048xbf16, #tpu.memory_space<vmem>>, vector<8x512xbf16>
    tpu.vector_store %arg14[%c0_49, %c0_50], %106 {strides = array<i32>} : memref<8x2048xbf16, #tpu.memory_space<vmem>>, vector<8x512xbf16>,
    %108 = vector.extract_strided_slice %105 {offsets = [8, 0], sizes = [8, 512], strides = [1, 1]} : vector<32x512xbf16> to vector<8x512xbf16>
    %c0_51 = arith.constant 0 : index
    %c512_52 = arith.constant 512 : index
    %109 = vector.load %arg14[%c0_51, %c512_52] : memref<8x2048xbf16, #tpu.memory_space<vmem>>, vector<8x512xbf16>
    tpu.vector_store %arg14[%c0_51, %c512_52], %108 {strides = array<i32>} : memref<8x2048xbf16, #tpu.memory_space<vmem>>, vector<8x512xbf16>,
    %110 = vector.extract_strided_slice %105 {offsets = [16, 0], sizes = [8, 512], strides = [1, 1]} : vector<32x512xbf16> to vector<8x512xbf16>
    %c0_53 = arith.constant 0 : index
    %c1024 = arith.constant 1024 : index
    %111 = vector.load %arg14[%c0_53, %c1024] : memref<8x2048xbf16, #tpu.memory_space<vmem>>, vector<8x512xbf16>
    tpu.vector_store %arg14[%c0_53, %c1024], %110 {strides = array<i32>} : memref<8x2048xbf16, #tpu.memory_space<vmem>>, vector<8x512xbf16>,
    %112 = vector.extract_strided_slice %105 {offsets = [24, 0], sizes = [8, 512], strides = [1, 1]} : vector<32x512xbf16> to vector<8x512xbf16>
    %c0_54 = arith.constant 0 : index
    %c1536 = arith.constant 1536 : index
    %113 = vector.load %arg14[%c0_54, %c1536] : memref<8x2048xbf16, #tpu.memory_space<vmem>>, vector<8x512xbf16>
    tpu.vector_store %arg14[%c0_54, %c1536], %112 {strides = array<i32>} : memref<8x2048xbf16, #tpu.memory_space<vmem>>, vector<8x512xbf16>,
    %c1_i32_55 = arith.constant 1 : i32
    %114 = tpu.memref_slice %arg17[%c1_i32_55] : memref<2x!tpu.dma_semaphore, #tpu.memory_space<semaphore_mem>> -> memref<1x!tpu.dma_semaphore, #tpu.memory_space<semaphore_mem>>
    %115 = tpu.memref_squeeze %114 : memref<1x!tpu.dma_semaphore, #tpu.memory_space<semaphore_mem>> -> memref<!tpu.dma_semaphore, #tpu.memory_space<semaphore_mem>>
    tpu.wait_dma2 semaphore(%115 : memref<!tpu.dma_semaphore, #tpu.memory_space<semaphore_mem>>) src(%arg7 : memref<2048x1024xbf16, #tpu.memory_space<any>>) dst(%arg16 : memref<2048x1024xbf16, #tpu.memory_space<vmem>>)
    %c0_56 = arith.constant 0 : index
    %c0_57 = arith.constant 0 : index
    %116 = vector.load %arg14[%c0_56, %c0_57] : memref<8x2048xbf16, #tpu.memory_space<vmem>>, vector<8x2048xbf16>
    %c0_58 = arith.constant 0 : index
    %c0_59 = arith.constant 0 : index
    %117 = vector.load %arg16[%c0_58, %c0_59] : memref<2048x1024xbf16, #tpu.memory_space<vmem>>, vector<2048x1024xbf16>
    %cst_60 = arith.constant dense<0.000000e+00> : vector<8x1024xf32>
    %118 = tpu.matmul %116, %117, %cst_60 {dimension_numbers = #tpu.dot_dimension_numbers<[1], [0], [0], [1], [0, 0, 1, 1], [], []>} : vector<8x2048xbf16>, vector<2048x1024xbf16>, vector<8x1024xf32> -> vector<8x1024xf32>
    %c0_61 = arith.constant 0 : index
    %c0_62 = arith.constant 0 : index
    %119 = vector.load %arg8[%c0_61, %c0_62] : memref<2x1024xf32, #tpu.memory_space<vmem>>, vector<2x1024xf32>
    %120 = vector.extract_strided_slice %119 {offsets = [0, 0], sizes = [1, 1024], strides = [1, 1]} : vector<2x1024xf32> to vector<1x1024xf32>
    %121 = vector.extract_strided_slice %119 {offsets = [1, 0], sizes = [1, 1024], strides = [1, 1]} : vector<2x1024xf32> to vector<1x1024xf32>
    %cst_63 = arith.constant dense<0.000000e+00> : vector<1024xf32>
    %122 = vector.multi_reduction <add>, %118, %cst_63 [0] : vector<8x1024xf32> to vector<1024xf32>
    %123 = vector.shape_cast %122 : vector<1024xf32> to vector<1x1024xf32>
    %cst_64 = arith.constant 1.250000e-01 : f32
    %124 = vector.broadcast %cst_64 : f32 to vector<1x1024xf32>
    %125 = arith.mulf %123, %124 : vector<1x1024xf32>
    %126 = vector.broadcast %125 : vector<1x1024xf32> to vector<8x1024xf32>
    %127 = arith.subf %118, %126 : vector<8x1024xf32>
    %128 = arith.mulf %127, %127 : vector<8x1024xf32>
    %cst_65 = arith.constant dense<0.000000e+00> : vector<1024xf32>
    %129 = vector.multi_reduction <add>, %128, %cst_65 [0] : vector<8x1024xf32> to vector<1024xf32>
    %130 = vector.shape_cast %129 : vector<1024xf32> to vector<1x1024xf32>
    %cst_66 = arith.constant 1.250000e-01 : f32
    %131 = vector.broadcast %cst_66 : f32 to vector<1x1024xf32>
    %132 = arith.mulf %130, %131 : vector<1x1024xf32>
    %cst_67 = arith.constant 9.99999974E-6 : f32
    %133 = vector.broadcast %cst_67 : f32 to vector<1x1024xf32>
    %134 = arith.addf %132, %133 : vector<1x1024xf32>
    %135 = math.rsqrt %134 : vector<1x1024xf32>
    %136 = arith.mulf %120, %135 : vector<1x1024xf32>
    %137 = vector.broadcast %136 : vector<1x1024xf32> to vector<8x1024xf32>
    %138 = arith.mulf %127, %137 : vector<8x1024xf32>
    %139 = vector.broadcast %121 : vector<1x1024xf32> to vector<8x1024xf32>
    %140 = arith.addf %138, %139 : vector<8x1024xf32>
    %cst_68 = arith.constant 0.000000e+00 : f32
    %141 = vector.broadcast %cst_68 : f32 to vector<8x1024xf32>
    %142 = arith.maximumf %140, %141 : vector<8x1024xf32>
    %c0_69 = arith.constant 0 : index
    %c0_70 = arith.constant 0 : index
    %143 = vector.load %arg9[%c0_69, %c0_70] : memref<4x1024xf32, #tpu.memory_space<vmem>>, vector<4x1024xf32>
    %144 = vector.extract_strided_slice %142 {offsets = [0, 0], sizes = [2, 1024], strides = [1, 1]} : vector<8x1024xf32> to vector<2x1024xf32>
    %145 = vector.extract_strided_slice %143 {offsets = [0, 0], sizes = [1, 1024], strides = [1, 1]} : vector<4x1024xf32> to vector<1x1024xf32>
    %146 = vector.broadcast %145 : vector<1x1024xf32> to vector<2x1024xf32>
    %147 = arith.mulf %144, %146 : vector<2x1024xf32>
    %cst_71 = arith.constant dense<0.000000e+00> : vector<2xf32>
    %148 = vector.multi_reduction <add>, %147, %cst_71 [1] : vector<2x1024xf32> to vector<2xf32>
    %149 = vector.shape_cast %148 : vector<2xf32> to vector<2x1xf32>
    %150 = vector.extract_strided_slice %142 {offsets = [2, 0], sizes = [2, 1024], strides = [1, 1]} : vector<8x1024xf32> to vector<2x1024xf32>
    %151 = vector.extract_strided_slice %143 {offsets = [1, 0], sizes = [1, 1024], strides = [1, 1]} : vector<4x1024xf32> to vector<1x1024xf32>
    %152 = vector.broadcast %151 : vector<1x1024xf32> to vector<2x1024xf32>
    %153 = arith.mulf %150, %152 : vector<2x1024xf32>
    %cst_72 = arith.constant dense<0.000000e+00> : vector<2xf32>
    %154 = vector.multi_reduction <add>, %153, %cst_72 [1] : vector<2x1024xf32> to vector<2xf32>
    %155 = vector.shape_cast %154 : vector<2xf32> to vector<2x1xf32>
    %156 = vector.extract_strided_slice %142 {offsets = [4, 0], sizes = [2, 1024], strides = [1, 1]} : vector<8x1024xf32> to vector<2x1024xf32>
    %157 = vector.extract_strided_slice %143 {offsets = [2, 0], sizes = [1, 1024], strides = [1, 1]} : vector<4x1024xf32> to vector<1x1024xf32>
    %158 = vector.broadcast %157 : vector<1x1024xf32> to vector<2x1024xf32>
    %159 = arith.mulf %156, %158 : vector<2x1024xf32>
    %cst_73 = arith.constant dense<0.000000e+00> : vector<2xf32>
    %160 = vector.multi_reduction <add>, %159, %cst_73 [1] : vector<2x1024xf32> to vector<2xf32>
    %161 = vector.shape_cast %160 : vector<2xf32> to vector<2x1xf32>
    %162 = vector.extract_strided_slice %142 {offsets = [6, 0], sizes = [2, 1024], strides = [1, 1]} : vector<8x1024xf32> to vector<2x1024xf32>
    %163 = vector.extract_strided_slice %143 {offsets = [3, 0], sizes = [1, 1024], strides = [1, 1]} : vector<4x1024xf32> to vector<1x1024xf32>
    %164 = vector.broadcast %163 : vector<1x1024xf32> to vector<2x1024xf32>
    %165 = arith.mulf %162, %164 : vector<2x1024xf32>
    %cst_74 = arith.constant dense<0.000000e+00> : vector<2xf32>
    %166 = vector.multi_reduction <add>, %165, %cst_74 [1] : vector<2x1024xf32> to vector<2xf32>
    %167 = vector.shape_cast %166 : vector<2xf32> to vector<2x1xf32>
    %168 = arith.addf %149, %155 : vector<2x1xf32>
    %169 = arith.addf %168, %161 : vector<2x1xf32>
    %170 = arith.addf %169, %167 : vector<2x1xf32>
    %c0_75 = arith.constant 0 : index
    %171 = memref.load %arg10[%c0_75] : memref<1xf32, #tpu.memory_space<smem>>
    %172 = vector.broadcast %171 : f32 to vector<2x1xf32>
    %173 = arith.addf %170, %172 : vector<2x1xf32>
    %174 = arith.negf %173 : vector<2x1xf32>
    %175 = math.exp %174 : vector<2x1xf32>
    %cst_76 = arith.constant 1.000000e+00 : f32
    %176 = vector.broadcast %cst_76 : f32 to vector<2x1xf32>
    %177 = arith.addf %176, %175 : vector<2x1xf32>
    %178 = arith.divf %176, %177 : vector<2x1xf32>
    %c0_77 = arith.constant 0 : index
    %c0_78 = arith.constant 0 : index
    %179 = vector.load %arg11[%c0_77, %c0_78] : memref<2x1xf32, #tpu.memory_space<vmem>>, vector<2x1xf32>
    tpu.vector_store %arg11[%c0_77, %c0_78], %178 {strides = array<i32>} : memref<2x1xf32, #tpu.memory_space<vmem>>, vector<2x1xf32>,
    return
  }
}

</mosaic_0001>

<bundles_post_ra>
// kernel: discriminator_forward.1
= control target key start
LH: loop header
LB: loop body
LE: loop exit
PB: predicated region body
PF: predicated region fallthrough
CT: control target
= control target key end

     0   :  { %17 = vsyncpa [#allocation10], 0  ;;  %s15289_s0 = inlined_call_operand.vmem [shape: bf16[512,48], index: 0, kind: input, shape index: {}]   ;;  %s15290_s1 = inlined_call_operand.hbm [shape: bf16[48,128], index: 1, kind: input, shape index: {}]   ;;  %s15291_s2 = inlined_call_operand.hbm [shape: f32[2,128], index: 2, kind: input, shape index: {}]   ;;  %s15292_s3 = inlined_call_operand.vmem [shape: bf16[512,256], index: 3, kind: input, shape index: {}]   ;;  %s15293_s4 = inlined_call_operand.hbm [shape: f32[2,256], index: 4, kind: input, shape index: {}]   ;;  %s15294_s5 = inlined_call_operand.vmem [shape: bf16[1024,512], index: 5, kind: input, shape index: {}]   ;;  %s15295_s6 = inlined_call_operand.hbm [shape: f32[2,512], index: 6, kind: input, shape index: {}]   ;;  %s15296_s7 = inlined_call_operand.hbm [shape: bf16[2048,1024], index: 7, kind: input, shape index: {}]   ;;  %s15297_s8 = inlined_call_operand.hbm [shape: f32[2,1024], index: 8, kind: input, shape index: {}]   ;;  %s15298_s9 = inlined_call_operand.hbm [shape: f32[4,1024], index: 9, kind: input, shape index: {}]   ;;  %s15299_s10 = inlined_call_operand.<no memory space> [shape: f32[1], index: 10, kind: input, shape index: {}]   ;;  %s15300_s11 = inlined_call_operand.vmem [shape: f32[2,1], index: 11, kind: output, shape index: {}]  }
   0x1   :  { %18 = vsyncpa [#allocation12], 0 }
   0x2   :  { %19 = vsyncpa [#allocation15], 0 }
   0x3   :  { %20 = vsyncpa [#allocation18], 0  ;;  %s11559_s17 = smov [#allocation11]   ;;  %s11560_s19 = smov [#allocation14]  }
   0x4   :  { %s41_s18 = sshll.u32 %s11559_s17, 4  ;;  %s63_s20 = sshll.u32 %s11560_s19, 4  ;;  %s42_s18 = int_to_ptr.vmem [resolvable:$true] %s41_s18  ;;  %s64_s20 = int_to_ptr.vmem [resolvable:$true] %s63_s20 }
   0x5   :  { %s11415_s23 = scalar_lea.hbm %s15291_s2, 32 }
   0x6   :  { %p11416_p0 = scmp.ne.s32.totalorder %s15291_s2, %s11415_s23  ;;  %p11419_p1 = scmp.lt.u32.totalorder %s11415_s23, %s15291_s2 }
   0x8   :  { %p11421_p2 = pnand %p11419_p1, %p11416_p0 }
   0xa   :  { %11424 = shalt.err (!%p11421_p2)
}
   0xb   :  { %s11425_s28 = scalar_lea.vmem %s42_s18, 32  ;;  %p11430_p4 = scmp.lt.s32.totalorder %s42_s18, %s42_s18 }
   0xc   :  { %p11426_p3 = scmp.ne.s32.totalorder %s42_s18, %s11425_s28  ;;  %p11431_p5 = scmp.lt.s32.totalorder %s11425_s28, %s11425_s28 }
   0xe   :  { %p11432_p6 = por %p11431_p5, %p11430_p4 }
  0x10   :  { %p11433_p7 = pnand %p11432_p6, %p11426_p3 }
  0x12   :  { %11436 = shalt.err (!%p11433_p7)
}
  0x13   :  { %44 = dma.hbm_to_vmem [thread:$0]  %s15291_s2, 32, %s42_s18, [#allocation12]  }
  0x14   :  { %s11437_s14 = scalar_lea.hbm %s15295_s6, 128 }
  0x15   :  { %p11438_p8 = scmp.ne.s32.totalorder %s15295_s6, %s11437_s14  ;;  %p11441_p9 = scmp.lt.u32.totalorder %s11437_s14, %s15295_s6 }
  0x17   :  { %p11443_p10 = pnand %p11441_p9, %p11438_p8 }
  0x19   :  { %11446 = shalt.err (!%p11443_p10)
}
  0x1a   :  { %s11447_s21 = scalar_lea.vmem %s64_s20, 128  ;;  %p11452_p12 = scmp.lt.s32.totalorder %s64_s20, %s64_s20 }
  0x1b   :  { %p11448_p11 = scmp.ne.s32.totalorder %s64_s20, %s11447_s21  ;;  %p11453_p13 = scmp.lt.s32.totalorder %s11447_s21, %s11447_s21 }
  0x1d   :  { %p11454_p0 = por %p11453_p13, %p11452_p12 }
  0x1f   :  { %p11455_p1 = pnand %p11454_p0, %p11448_p11 }
  0x21   :  { %11458 = shalt.err (!%p11455_p1)
}
  0x22   :  { %66 = dma.hbm_to_vmem [thread:$0]  %s15295_s6, 128, %s64_s20, [#allocation15]  }
  0x23   :  { %s11561_s22 = smov [#allocation9]   ;;  %s11459_s26 = scalar_lea.hbm %s15290_s1, 384 }
  0x24   :  { %s28_s23 = sshll.u32 %s11561_s22, 4  ;;  %p11460_p2 = scmp.ne.s32.totalorder %s15290_s1, %s11459_s26  ;;  %s29_s23 = int_to_ptr.vmem [resolvable:$true] %s28_s23 }
  0x25   :  { %p11463_p3 = scmp.lt.u32.totalorder %s11459_s26, %s15290_s1 }
  0x27   :  { %p11465_p4 = pnand %p11463_p3, %p11460_p2 }
  0x29   :  { %11468 = shalt.err (!%p11465_p4)
}
  0x2a   :  { %s11469_s12 = scalar_lea.vmem %s29_s23, 384  ;;  %p11474_p6 = scmp.lt.s32.totalorder %s29_s23, %s29_s23 }
  0x2b   :  { %p11470_p5 = scmp.ne.s32.totalorder %s29_s23, %s11469_s12  ;;  %p11475_p7 = scmp.lt.s32.totalorder %s11469_s12, %s11469_s12 }
  0x2d   :  { %p11476_p8 = por %p11475_p7, %p11474_p6 }
  0x2f   :  { %p11477_p9 = pnand %p11476_p8, %p11470_p5 }
  0x31   :  { %11480 = shalt.err (!%p11477_p9)
}
  0x32   :  { %s11562_s6 = smov 64   ;;  %s11563_s20 = smov 4  }
  0x33   :  { %34 = dma.hbm_to_vmem [thread:$0]  %s15290_s1, 384, %s29_s23, [#allocation10], %s11562_s6, %s11562_s6, %s11563_s20  }
  0x34   :  { %s11564_s15 = smov [#allocation13]   ;;  %s11565_s17 = smov [#allocation16]  }
  0x35   :  { %s53_s16 = sshll.u32 %s11564_s15, 4  ;;  %s73_s19 = sshll.u32 %s11565_s17, 4  ;;  %s54_s16 = int_to_ptr.vmem [resolvable:$true] %s53_s16  ;;  %s74_s19 = int_to_ptr.vmem [resolvable:$true] %s73_s19 }
  0x36   :  { %s11481_s18 = scalar_lea.hbm %s15293_s4, 64 }
  0x37   :  { %p11482_p10 = scmp.ne.s32.totalorder %s15293_s4, %s11481_s18  ;;  %p11485_p11 = scmp.lt.u32.totalorder %s11481_s18, %s15293_s4 }
  0x39   :  { %p11487_p12 = pnand %p11485_p11, %p11482_p10 }
  0x3b   :  { %11490 = shalt.err (!%p11487_p12)
}
  0x3c   :  { %s11491_s1 = scalar_lea.vmem %s54_s16, 64  ;;  %p11496_p0 = scmp.lt.s32.totalorder %s54_s16, %s54_s16 }
  0x3d   :  { %p11492_p13 = scmp.ne.s32.totalorder %s54_s16, %s11491_s1  ;;  %p11497_p1 = scmp.lt.s32.totalorder %s11491_s1, %s11491_s1 }
  0x3f   :  { %p11498_p2 = por %p11497_p1, %p11496_p0 }
  0x41   :  { %p11499_p3 = pnand %p11498_p2, %p11492_p13 }
  0x43   :  { %11502 = shalt.err (!%p11499_p3)
}
  0x44   :  { %56 = dma.hbm_to_vmem [thread:$0]  %s15293_s4, 64, %s54_s16, [#allocation12]  }
  0x45   :  { %s11503_s30 = scalar_lea.hbm %s15297_s8, 256 }
  0x46   :  { %p11504_p4 = scmp.ne.s32.totalorder %s15297_s8, %s11503_s30  ;;  %p11507_p5 = scmp.lt.u32.totalorder %s11503_s30, %s15297_s8 }
  0x48   :  { %p11509_p6 = pnand %p11507_p5, %p11504_p4 }
  0x4a   :  { %11512 = shalt.err (!%p11509_p6)
}
  0x4b   :  { %s11513_s17 = scalar_lea.vmem %s74_s19, 256  ;;  %p11518_p8 = scmp.lt.s32.totalorder %s74_s19, %s74_s19 }
  0x4c   :  { %p11514_p7 = scmp.ne.s32.totalorder %s74_s19, %s11513_s17  ;;  %p11519_p9 = scmp.lt.s32.totalorder %s11513_s17, %s11513_s17 }
  0x4e   :  { %p11520_p10 = por %p11519_p9, %p11518_p8 }
  0x50   :  { %p11521_p11 = pnand %p11520_p10, %p11514_p7 }
  0x52   :  { %11524 = shalt.err (!%p11521_p11)
}
  0x53   :  { %76 = dma.hbm_to_vmem [thread:$0]  %s15297_s8, 256, %s74_s19, [#allocation15]  }
  0x54   :  { %s11566_s21 = smov [#allocation17]   ;;  %s11525_s24 = scalar_lea.hbm %s15298_s9, 512 }
  0x55   :  { %s83_s2 = sshll.u32 %s11566_s21, 4  ;;  %p11526_p12 = scmp.ne.s32.totalorder %s15298_s9, %s11525_s24  ;;  %s84_s2 = int_to_ptr.vmem [resolvable:$true] %s83_s2 }
  0x56   :  { %p11529_p13 = scmp.lt.u32.totalorder %s11525_s24, %s15298_s9 }
  0x58   :  { %p11531_p0 = pnand %p11529_p13, %p11526_p12 }
  0x5a   :  { %11534 = shalt.err (!%p11531_p0)
}
  0x5b   :  { %s11535_s27 = scalar_lea.vmem %s84_s2, 512  ;;  %p11540_p2 = scmp.lt.s32.totalorder %s84_s2, %s84_s2 }
  0x5c   :  { %p11536_p1 = scmp.ne.s32.totalorder %s84_s2, %s11535_s27  ;;  %p11541_p3 = scmp.lt.s32.totalorder %s11535_s27, %s11535_s27 }
  0x5e   :  { %p11542_p4 = por %p11541_p3, %p11540_p2 }
  0x60   :  { %p11543_p5 = pnand %p11542_p4, %p11536_p1 }
  0x62   :  { %11546 = shalt.err (!%p11543_p5)
}
  0x63   :  { %86 = dma.hbm_to_vmem [thread:$0]  %s15298_s9, 512, %s84_s2, [#allocation18]  }
  0x64   :  { %11547 = dma.done.wait [#allocation10], 384  }
  0x65   :  { %11548 = vsyncadd [#allocation10], 4294966912 }
  0x66   :  { %11549 = dma.done.wait [#allocation12], 96  }
  0x67   :  { %11550 = vsyncadd [#allocation12], 4294967200 }
  0x68   :  { %11551 = dma.done.wait [#allocation15], 384  }
  0x69   :  { %11552 = vsyncadd [#allocation15], 4294966912 }
  0x6a   :  { %11553 = dma.done.wait [#allocation18], 512  }
  0x6b   :  { %11554 = vsyncadd [#allocation18], 4294966784  ;;  %v125_v0 = vld [vmem:[%s15294_s5] sm:$0xf]  ;;  %v127_v1 = vld [vmem:[%s15294_s5 + $0x10] sm:$0xf] }
  0x6c   :  { %v129_v2 = vld [vmem:[%s15294_s5 + $0x4] sm:$0xf]  ;;  %126 = vst [vmem:[#allocation5] sm:$0xf] %v125_v0  ;;  %128 = vst [vmem:[#allocation5 + $0x4] sm:$0xf] %v127_v1 }
  0x6d   :  { %130 = vst [vmem:[#allocation5 + $0x8] sm:$0xf] %v129_v2  ;;  %v131_v3 = vld [vmem:[%s15294_s5 + $0x14] sm:$0xf]  ;;  %v133_v4 = vld [vmem:[%s15294_s5 + $0x8] sm:$0xf] }
  0x6e   :  { %v135_v5 = vld [vmem:[%s15294_s5 + $0x18] sm:$0xf]  ;;  %132 = vst [vmem:[#allocation5 + $0xc] sm:$0xf] %v131_v3  ;;  %134 = vst [vmem:[#allocation5 + $0x10] sm:$0xf] %v133_v4 }
  0x6f   :  { %136 = vst [vmem:[#allocation5 + $0x14] sm:$0xf] %v135_v5  ;;  %v137_v6 = vld [vmem:[%s15294_s5 + $0xc] sm:$0xf]  ;;  %v139_v7 = vld [vmem:[%s15294_s5 + $0x1c] sm:$0xff]  }
  0x70   :  { %v143_v8 = vld [vmem:[%s15294_s5 + $0x30] sm:$0xf]  ;;  %138 = vst [vmem:[#allocation5 + $0x18] sm:$0xf] %v137_v6  ;;  %140 = vst [vmem:[#allocation5 + $0x1c] sm:$0xff] %v139_v7   ;;  %v155_v14 = vld [vmem:[%s15294_s5 + $0x3c] sm:$0xff]  }
  0x71   :  { %144 = vst [vmem:[#allocation5 + $0x24] sm:$0xf] %v143_v8  ;;  %v145_v9 = vld [vmem:[%s15294_s5 + $0x24] sm:$0xf]  ;;  %v147_v10 = vld [vmem:[%s15294_s5 + $0x34] sm:$0xf] }
  0x72   :  { %v149_v11 = vld [vmem:[%s15294_s5 + $0x28] sm:$0xf]  ;;  %146 = vst [vmem:[#allocation5 + $0x28] sm:$0xf] %v145_v9  ;;  %148 = vst [vmem:[#allocation5 + $0x2c] sm:$0xf] %v147_v10 }
  0x73   :  { %150 = vst [vmem:[#allocation5 + $0x30] sm:$0xf] %v149_v11  ;;  %v151_v12 = vld [vmem:[%s15294_s5 + $0x38] sm:$0xf]  ;;  %v153_v13 = vld [vmem:[%s15294_s5 + $0x2c] sm:$0xf] }
  0x74   :  { %152 = vst [vmem:[#allocation5 + $0x34] sm:$0xf] %v151_v12  ;;  %154 = vst [vmem:[#allocation5 + $0x38] sm:$0xf] %v153_v13  ;;  %v159_v15 = vld [vmem:[%s15294_s5 + $0x50] sm:$0xf] }
  0x75   :  { %156 = vst [vmem:[#allocation5 + $0x3c] sm:$0xff] %v155_v14   ;;  %v161_v16 = vld [vmem:[%s15294_s5 + $0x44] sm:$0xf]  ;;  %v163_v17 = vld [vmem:[%s15294_s5 + $0x54] sm:$0xf]  ;;  %v171_v21 = vld [vmem:[%s15294_s5 + $0x5c] sm:$0xff]  }
  0x76   :  { %160 = vst [vmem:[#allocation5 + $0x44] sm:$0xf] %v159_v15  ;;  %162 = vst [vmem:[#allocation5 + $0x48] sm:$0xf] %v161_v16  ;;  %v165_v18 = vld [vmem:[%s15294_s5 + $0x48] sm:$0xf] }
  0x77   :  { %164 = vst [vmem:[#allocation5 + $0x4c] sm:$0xf] %v163_v17  ;;  %v167_v19 = vld [vmem:[%s15294_s5 + $0x58] sm:$0xf]  ;;  %v169_v20 = vld [vmem:[%s15294_s5 + $0x4c] sm:$0xf] }
  0x78   :  { %166 = vst [vmem:[#allocation5 + $0x50] sm:$0xf] %v165_v18  ;;  %168 = vst [vmem:[#allocation5 + $0x54] sm:$0xf] %v167_v19  ;;  %v175_v22 = vld [vmem:[%s15294_s5 + $0x70] sm:$0xf] }
  0x79   :  { %170 = vst [vmem:[#allocation5 + $0x58] sm:$0xf] %v169_v20  ;;  %v177_v23 = vld [vmem:[%s15294_s5 + $0x64] sm:$0xf]  ;;  %172 = vst [vmem:[#allocation5 + $0x5c] sm:$0xff] %v171_v21   ;;  %v187_v28 = vld [vmem:[%s15294_s5 + $0x7c] sm:$0xff]  }
  0x7a   :  { %176 = vst [vmem:[#allocation5 + $0x64] sm:$0xf] %v175_v22  ;;  %178 = vst [vmem:[#allocation5 + $0x68] sm:$0xf] %v177_v23  ;;  %v179_v24 = vld [vmem:[%s15294_s5 + $0x74] sm:$0xf] }
  0x7b   :  { %v181_v25 = vld [vmem:[%s15294_s5 + $0x68] sm:$0xf]  ;;  %v183_v26 = vld [vmem:[%s15294_s5 + $0x78] sm:$0xf]  ;;  %180 = vst [vmem:[#allocation5 + $0x6c] sm:$0xf] %v179_v24 }
  0x7c   :  { %182 = vst [vmem:[#allocation5 + $0x70] sm:$0xf] %v181_v25  ;;  %184 = vst [vmem:[#allocation5 + $0x74] sm:$0xf] %v183_v26  ;;  %v185_v27 = vld [vmem:[%s15294_s5 + $0x6c] sm:$0xf] }
  0x7d   :  { %v191_v29 = vld [vmem:[%s15294_s5 + $0x90] sm:$0xf]  ;;  %186 = vst [vmem:[#allocation5 + $0x78] sm:$0xf] %v185_v27  ;;  %188 = vst [vmem:[#allocation5 + $0x7c] sm:$0xff] %v187_v28   ;;  %v203_v35 = vld [vmem:[%s15294_s5 + $0x9c] sm:$0xff]  }
  0x7e   :  { %192 = vst [vmem:[#allocation5 + $0x84] sm:$0xf] %v191_v29  ;;  %v193_v30 = vld [vmem:[%s15294_s5 + $0x84] sm:$0xf]  ;;  %v195_v31 = vld [vmem:[%s15294_s5 + $0x94] sm:$0xf] }
  0x7f   :  { %v197_v32 = vld [vmem:[%s15294_s5 + $0x88] sm:$0xf]  ;;  %194 = vst [vmem:[#allocation5 + $0x88] sm:$0xf] %v193_v30  ;;  %196 = vst [vmem:[#allocation5 + $0x8c] sm:$0xf] %v195_v31 }
  0x80   :  { %198 = vst [vmem:[#allocation5 + $0x90] sm:$0xf] %v197_v32  ;;  %v199_v33 = vld [vmem:[%s15294_s5 + $0x98] sm:$0xf]  ;;  %v201_v34 = vld [vmem:[%s15294_s5 + $0x8c] sm:$0xf] }
  0x81   :  { %200 = vst [vmem:[#allocation5 + $0x94] sm:$0xf] %v199_v33  ;;  %202 = vst [vmem:[#allocation5 + $0x98] sm:$0xf] %v201_v34  ;;  %v207_v36 = vld [vmem:[%s15294_s5 + $0xb0] sm:$0xf] }
  0x82   :  { %204 = vst [vmem:[#allocation5 + $0x9c] sm:$0xff] %v203_v35   ;;  %v209_v37 = vld [vmem:[%s15294_s5 + $0xa4] sm:$0xf]  ;;  %v211_v38 = vld [vmem:[%s15294_s5 + $0xb4] sm:$0xf]  ;;  %v219_v42 = vld [vmem:[%s15294_s5 + $0xbc] sm:$0xff]  }
  0x83   :  { %208 = vst [vmem:[#allocation5 + $0xa4] sm:$0xf] %v207_v36  ;;  %210 = vst [vmem:[#allocation5 + $0xa8] sm:$0xf] %v209_v37  ;;  %v213_v39 = vld [vmem:[%s15294_s5 + $0xa8] sm:$0xf] }
  0x84   :  { %212 = vst [vmem:[#allocation5 + $0xac] sm:$0xf] %v211_v38  ;;  %v215_v40 = vld [vmem:[%s15294_s5 + $0xb8] sm:$0xf]  ;;  %v217_v41 = vld [vmem:[%s15294_s5 + $0xac] sm:$0xf] }
  0x85   :  { %214 = vst [vmem:[#allocation5 + $0xb0] sm:$0xf] %v213_v39  ;;  %216 = vst [vmem:[#allocation5 + $0xb4] sm:$0xf] %v215_v40  ;;  %v223_v43 = vld [vmem:[%s15294_s5 + $0xd0] sm:$0xf] }
  0x86   :  { %218 = vst [vmem:[#allocation5 + $0xb8] sm:$0xf] %v217_v41  ;;  %v225_v44 = vld [vmem:[%s15294_s5 + $0xc4] sm:$0xf]  ;;  %220 = vst [vmem:[#allocation5 + $0xbc] sm:$0xff] %v219_v42   ;;  %v235_v49 = vld [vmem:[%s15294_s5 + $0xdc] sm:$0xff]  }
  0x87   :  { %224 = vst [vmem:[#allocation5 + $0xc4] sm:$0xf] %v223_v43  ;;  %226 = vst [vmem:[#allocation5 + $0xc8] sm:$0xf] %v225_v44  ;;  %v227_v45 = vld [vmem:[%s15294_s5 + $0xd4] sm:$0xf] }
  0x88   :  { %v229_v46 = vld [vmem:[%s15294_s5 + $0xc8] sm:$0xf]  ;;  %v231_v47 = vld [vmem:[%s15294_s5 + $0xd8] sm:$0xf]  ;;  %228 = vst [vmem:[#allocation5 + $0xcc] sm:$0xf] %v227_v45 }
  0x89   :  { %230 = vst [vmem:[#allocation5 + $0xd0] sm:$0xf] %v229_v46  ;;  %232 = vst [vmem:[#allocation5 + $0xd4] sm:$0xf] %v231_v47  ;;  %v233_v48 = vld [vmem:[%s15294_s5 + $0xcc] sm:$0xf] }
  0x8a   :  { %v239_v50 = vld [vmem:[%s15294_s5 + $0xf0] sm:$0xf]  ;;  %234 = vst [vmem:[#allocation5 + $0xd8] sm:$0xf] %v233_v48  ;;  %236 = vst [vmem:[#allocation5 + $0xdc] sm:$0xff] %v235_v49   ;;  %v251_v56 = vld [vmem:[%s15294_s5 + $0xfc] sm:$0xff]  }
  0x8b   :  { %240 = vst [vmem:[#allocation5 + $0xe4] sm:$0xf] %v239_v50  ;;  %v241_v51 = vld [vmem:[%s15294_s5 + $0xe4] sm:$0xf]  ;;  %v243_v52 = vld [vmem:[%s15294_s5 + $0xf4] sm:$0xf] }
  0x8c   :  { %v245_v53 = vld [vmem:[%s15294_s5 + $0xe8] sm:$0xf]  ;;  %242 = vst [vmem:[#allocation5 + $0xe8] sm:$0xf] %v241_v51  ;;  %244 = vst [vmem:[#allocation5 + $0xec] sm:$0xf] %v243_v52 }
  0x8d   :  { %246 = vst [vmem:[#allocation5 + $0xf0] sm:$0xf] %v245_v53  ;;  %v247_v54 = vld [vmem:[%s15294_s5 + $0xf8] sm:$0xf]  ;;  %v249_v55 = vld [vmem:[%s15294_s5 + $0xec] sm:$0xf] }
  0x8e   :  { %248 = vst [vmem:[#allocation5 + $0xf4] sm:$0xf] %v247_v54  ;;  %250 = vst [vmem:[#allocation5 + $0xf8] sm:$0xf] %v249_v55  ;;  %v255_v57 = vld [vmem:[%s15294_s5 + $0x110] sm:$0xf] }
  0x8f   :  { %252 = vst [vmem:[#allocation5 + $0xfc] sm:$0xff] %v251_v56   ;;  %v257_v58 = vld [vmem:[%s15294_s5 + $0x104] sm:$0xf]  ;;  %v259_v59 = vld [vmem:[%s15294_s5 + $0x114] sm:$0xf]  ;;  %v267_v63 = vld [vmem:[%s15294_s5 + $0x11c] sm:$0xff]  }
  0x90   :  { %256 = vst [vmem:[#allocation5 + $0x104] sm:$0xf] %v255_v57  ;;  %258 = vst [vmem:[#allocation5 + $0x108] sm:$0xf] %v257_v58  ;;  %v261_v60 = vld [vmem:[%s15294_s5 + $0x108] sm:$0xf] }
  0x91   :  { %260 = vst [vmem:[#allocation5 + $0x10c] sm:$0xf] %v259_v59  ;;  %v263_v61 = vld [vmem:[%s15294_s5 + $0x118] sm:$0xf]  ;;  %v265_v62 = vld [vmem:[%s15294_s5 + $0x10c] sm:$0xf] }
  0x92   :  { %262 = vst [vmem:[#allocation5 + $0x110] sm:$0xf] %v261_v60  ;;  %264 = vst [vmem:[#allocation5 + $0x114] sm:$0xf] %v263_v61  ;;  %v271_v0 = vld [vmem:[%s15294_s5 + $0x130] sm:$0xf] }
  0x93   :  { %266 = vst [vmem:[#allocation5 + $0x118] sm:$0xf] %v265_v62  ;;  %v273_v1 = vld [vmem:[%s15294_s5 + $0x124] sm:$0xf]  ;;  %268 = vst [vmem:[#allocation5 + $0x11c] sm:$0xff] %v267_v63   ;;  %v283_v6 = vld [vmem:[%s15294_s5 + $0x13c] sm:$0xff]  }
  0x94   :  { %272 = vst [vmem:[#allocation5 + $0x124] sm:$0xf] %v271_v0  ;;  %274 = vst [vmem:[#allocation5 + $0x128] sm:$0xf] %v273_v1  ;;  %v275_v2 = vld [vmem:[%s15294_s5 + $0x134] sm:$0xf] }
  0x95   :  { %v277_v3 = vld [vmem:[%s15294_s5 + $0x128] sm:$0xf]  ;;  %v279_v4 = vld [vmem:[%s15294_s5 + $0x138] sm:$0xf]  ;;  %276 = vst [vmem:[#allocation5 + $0x12c] sm:$0xf] %v275_v2 }
  0x96   :  { %278 = vst [vmem:[#allocation5 + $0x130] sm:$0xf] %v277_v3  ;;  %280 = vst [vmem:[#allocation5 + $0x134] sm:$0xf] %v279_v4  ;;  %v281_v5 = vld [vmem:[%s15294_s5 + $0x12c] sm:$0xf] }
  0x97   :  { %v287_v7 = vld [vmem:[%s15294_s5 + $0x150] sm:$0xf]  ;;  %282 = vst [vmem:[#allocation5 + $0x138] sm:$0xf] %v281_v5  ;;  %284 = vst [vmem:[#allocation5 + $0x13c] sm:$0xff] %v283_v6   ;;  %v299_v13 = vld [vmem:[%s15294_s5 + $0x15c] sm:$0xff]  }
  0x98   :  { %288 = vst [vmem:[#allocation5 + $0x144] sm:$0xf] %v287_v7  ;;  %v289_v8 = vld [vmem:[%s15294_s5 + $0x144] sm:$0xf]  ;;  %v291_v9 = vld [vmem:[%s15294_s5 + $0x154] sm:$0xf] }
  0x99   :  { %v293_v10 = vld [vmem:[%s15294_s5 + $0x148] sm:$0xf]  ;;  %290 = vst [vmem:[#allocation5 + $0x148] sm:$0xf] %v289_v8  ;;  %292 = vst [vmem:[#allocation5 + $0x14c] sm:$0xf] %v291_v9 }
  0x9a   :  { %294 = vst [vmem:[#allocation5 + $0x150] sm:$0xf] %v293_v10  ;;  %v295_v11 = vld [vmem:[%s15294_s5 + $0x158] sm:$0xf]  ;;  %v297_v12 = vld [vmem:[%s15294_s5 + $0x14c] sm:$0xf] }
  0x9b   :  { %296 = vst [vmem:[#allocation5 + $0x154] sm:$0xf] %v295_v11  ;;  %298 = vst [vmem:[#allocation5 + $0x158] sm:$0xf] %v297_v12  ;;  %v303_v14 = vld [vmem:[%s15294_s5 + $0x170] sm:$0xf] }
  0x9c   :  { %300 = vst [vmem:[#allocation5 + $0x15c] sm:$0xff] %v299_v13   ;;  %v305_v15 = vld [vmem:[%s15294_s5 + $0x164] sm:$0xf]  ;;  %v307_v16 = vld [vmem:[%s15294_s5 + $0x174] sm:$0xf]  ;;  %v315_v20 = vld [vmem:[%s15294_s5 + $0x17c] sm:$0xff]  }
  0x9d   :  { %304 = vst [vmem:[#allocation5 + $0x164] sm:$0xf] %v303_v14  ;;  %306 = vst [vmem:[#allocation5 + $0x168] sm:$0xf] %v305_v15  ;;  %v309_v17 = vld [vmem:[%s15294_s5 + $0x168] sm:$0xf] }
  0x9e   :  { %308 = vst [vmem:[#allocation5 + $0x16c] sm:$0xf] %v307_v16  ;;  %v311_v18 = vld [vmem:[%s15294_s5 + $0x178] sm:$0xf]  ;;  %v313_v19 = vld [vmem:[%s15294_s5 + $0x16c] sm:$0xf] }
  0x9f   :  { %310 = vst [vmem:[#allocation5 + $0x170] sm:$0xf] %v309_v17  ;;  %312 = vst [vmem:[#allocation5 + $0x174] sm:$0xf] %v311_v18  ;;  %v319_v21 = vld [vmem:[%s15294_s5 + $0x190] sm:$0xf] }
  0xa0   :  { %314 = vst [vmem:[#allocation5 + $0x178] sm:$0xf] %v313_v19  ;;  %v321_v22 = vld [vmem:[%s15294_s5 + $0x184] sm:$0xf]  ;;  %316 = vst [vmem:[#allocation5 + $0x17c] sm:$0xff] %v315_v20   ;;  %v331_v27 = vld [vmem:[%s15294_s5 + $0x19c] sm:$0xff]  }
  0xa1   :  { %320 = vst [vmem:[#allocation5 + $0x184] sm:$0xf] %v319_v21  ;;  %322 = vst [vmem:[#allocation5 + $0x188] sm:$0xf] %v321_v22  ;;  %v323_v23 = vld [vmem:[%s15294_s5 + $0x194] sm:$0xf] }
  0xa2   :  { %v325_v24 = vld [vmem:[%s15294_s5 + $0x188] sm:$0xf]  ;;  %v327_v25 = vld [vmem:[%s15294_s5 + $0x198] sm:$0xf]  ;;  %324 = vst [vmem:[#allocation5 + $0x18c] sm:$0xf] %v323_v23 }
  0xa3   :  { %326 = vst [vmem:[#allocation5 + $0x190] sm:$0xf] %v325_v24  ;;  %328 = vst [vmem:[#allocation5 + $0x194] sm:$0xf] %v327_v25  ;;  %v329_v26 = vld [vmem:[%s15294_s5 + $0x18c] sm:$0xf] }
  0xa4   :  { %v335_v28 = vld [vmem:[%s15294_s5 + $0x1b0] sm:$0xf]  ;;  %330 = vst [vmem:[#allocation5 + $0x198] sm:$0xf] %v329_v26  ;;  %332 = vst [vmem:[#allocation5 + $0x19c] sm:$0xff] %v331_v27   ;;  %v347_v34 = vld [vmem:[%s15294_s5 + $0x1bc] sm:$0xff]  }
  0xa5   :  { %336 = vst [vmem:[#allocation5 + $0x1a4] sm:$0xf] %v335_v28  ;;  %v337_v29 = vld [vmem:[%s15294_s5 + $0x1a4] sm:$0xf]  ;;  %v339_v30 = vld [vmem:[%s15294_s5 + $0x1b4] sm:$0xf] }
  0xa6   :  { %v341_v31 = vld [vmem:[%s15294_s5 + $0x1a8] sm:$0xf]  ;;  %338 = vst [vmem:[#allocation5 + $0x1a8] sm:$0xf] %v337_v29  ;;  %340 = vst [vmem:[#allocation5 + $0x1ac] sm:$0xf] %v339_v30 }
  0xa7   :  { %342 = vst [vmem:[#allocation5 + $0x1b0] sm:$0xf] %v341_v31  ;;  %v343_v32 = vld [vmem:[%s15294_s5 + $0x1b8] sm:$0xf]  ;;  %v345_v33 = vld [vmem:[%s15294_s5 + $0x1ac] sm:$0xf] }
  0xa8   :  { %344 = vst [vmem:[#allocation5 + $0x1b4] sm:$0xf] %v343_v32  ;;  %346 = vst [vmem:[#allocation5 + $0x1b8] sm:$0xf] %v345_v33  ;;  %v351_v35 = vld [vmem:[%s15294_s5 + $0x1d0] sm:$0xf] }
  0xa9   :  { %348 = vst [vmem:[#allocation5 + $0x1bc] sm:$0xff] %v347_v34   ;;  %v353_v36 = vld [vmem:[%s15294_s5 + $0x1c4] sm:$0xf]  ;;  %v355_v37 = vld [vmem:[%s15294_s5 + $0x1d4] sm:$0xf]  ;;  %v363_v41 = vld [vmem:[%s15294_s5 + $0x1dc] sm:$0xff]  }
  0xaa   :  { %352 = vst [vmem:[#allocation5 + $0x1c4] sm:$0xf] %v351_v35  ;;  %354 = vst [vmem:[#allocation5 + $0x1c8] sm:$0xf] %v353_v36  ;;  %v357_v38 = vld [vmem:[%s15294_s5 + $0x1c8] sm:$0xf] }
  0xab   :  { %356 = vst [vmem:[#allocation5 + $0x1cc] sm:$0xf] %v355_v37  ;;  %v359_v39 = vld [vmem:[%s15294_s5 + $0x1d8] sm:$0xf]  ;;  %v361_v40 = vld [vmem:[%s15294_s5 + $0x1cc] sm:$0xf] }
  0xac   :  { %358 = vst [vmem:[#allocation5 + $0x1d0] sm:$0xf] %v357_v38  ;;  %360 = vst [vmem:[#allocation5 + $0x1d4] sm:$0xf] %v359_v39  ;;  %v367_v42 = vld [vmem:[%s15294_s5 + $0x1f0] sm:$0xf] }
  0xad   :  { %362 = vst [vmem:[#allocation5 + $0x1d8] sm:$0xf] %v361_v40  ;;  %v369_v43 = vld [vmem:[%s15294_s5 + $0x1e4] sm:$0xf]  ;;  %364 = vst [vmem:[#allocation5 + $0x1dc] sm:$0xff] %v363_v41   ;;  %v379_v48 = vld [vmem:[%s15294_s5 + $0x1fc] sm:$0xff]  }
  0xae   :  { %368 = vst [vmem:[#allocation5 + $0x1e4] sm:$0xf] %v367_v42  ;;  %370 = vst [vmem:[#allocation5 + $0x1e8] sm:$0xf] %v369_v43  ;;  %v371_v44 = vld [vmem:[%s15294_s5 + $0x1f4] sm:$0xf] }
  0xaf   :  { %v373_v45 = vld [vmem:[%s15294_s5 + $0x1e8] sm:$0xf]  ;;  %v375_v46 = vld [vmem:[%s15294_s5 + $0x1f8] sm:$0xf]  ;;  %372 = vst [vmem:[#allocation5 + $0x1ec] sm:$0xf] %v371_v44 }
  0xb0   :  { %374 = vst [vmem:[#allocation5 + $0x1f0] sm:$0xf] %v373_v45  ;;  %376 = vst [vmem:[#allocation5 + $0x1f4] sm:$0xf] %v375_v46  ;;  %v377_v47 = vld [vmem:[%s15294_s5 + $0x1ec] sm:$0xf] }
  0xb1   :  { %v383_v49 = vld [vmem:[%s15294_s5 + $0x210] sm:$0xf]  ;;  %378 = vst [vmem:[#allocation5 + $0x1f8] sm:$0xf] %v377_v47  ;;  %380 = vst [vmem:[#allocation5 + $0x1fc] sm:$0xff] %v379_v48   ;;  %v395_v55 = vld [vmem:[%s15294_s5 + $0x21c] sm:$0xff]  }
  0xb2   :  { %384 = vst [vmem:[#allocation5 + $0x204] sm:$0xf] %v383_v49  ;;  %v385_v50 = vld [vmem:[%s15294_s5 + $0x204] sm:$0xf]  ;;  %v387_v51 = vld [vmem:[%s15294_s5 + $0x214] sm:$0xf] }
  0xb3   :  { %v389_v52 = vld [vmem:[%s15294_s5 + $0x208] sm:$0xf]  ;;  %386 = vst [vmem:[#allocation5 + $0x208] sm:$0xf] %v385_v50  ;;  %388 = vst [vmem:[#allocation5 + $0x20c] sm:$0xf] %v387_v51 }
  0xb4   :  { %390 = vst [vmem:[#allocation5 + $0x210] sm:$0xf] %v389_v52  ;;  %v391_v53 = vld [vmem:[%s15294_s5 + $0x218] sm:$0xf]  ;;  %v393_v54 = vld [vmem:[%s15294_s5 + $0x20c] sm:$0xf] }
  0xb5   :  { %392 = vst [vmem:[#allocation5 + $0x214] sm:$0xf] %v391_v53  ;;  %394 = vst [vmem:[#allocation5 + $0x218] sm:$0xf] %v393_v54  ;;  %v399_v56 = vld [vmem:[%s15294_s5 + $0x230] sm:$0xf] }
  0xb6   :  { %396 = vst [vmem:[#allocation5 + $0x21c] sm:$0xff] %v395_v55   ;;  %v401_v57 = vld [vmem:[%s15294_s5 + $0x224] sm:$0xf]  ;;  %v403_v58 = vld [vmem:[%s15294_s5 + $0x234] sm:$0xf]  ;;  %v411_v62 = vld [vmem:[%s15294_s5 + $0x23c] sm:$0xff]  }
  0xb7   :  { %400 = vst [vmem:[#allocation5 + $0x224] sm:$0xf] %v399_v56  ;;  %402 = vst [vmem:[#allocation5 + $0x228] sm:$0xf] %v401_v57  ;;  %v405_v59 = vld [vmem:[%s15294_s5 + $0x228] sm:$0xf] }
  0xb8   :  { %404 = vst [vmem:[#allocation5 + $0x22c] sm:$0xf] %v403_v58  ;;  %v407_v60 = vld [vmem:[%s15294_s5 + $0x238] sm:$0xf]  ;;  %v409_v61 = vld [vmem:[%s15294_s5 + $0x22c] sm:$0xf] }
  0xb9   :  { %406 = vst [vmem:[#allocation5 + $0x230] sm:$0xf] %v405_v59  ;;  %408 = vst [vmem:[#allocation5 + $0x234] sm:$0xf] %v407_v60  ;;  %v415_v63 = vld [vmem:[%s15294_s5 + $0x250] sm:$0xf] }
  0xba   :  { %410 = vst [vmem:[#allocation5 + $0x238] sm:$0xf] %v409_v61  ;;  %v417_v0 = vld [vmem:[%s15294_s5 + $0x244] sm:$0xf]  ;;  %412 = vst [vmem:[#allocation5 + $0x23c] sm:$0xff] %v411_v62   ;;  %v427_v5 = vld [vmem:[%s15294_s5 + $0x25c] sm:$0xff]  }
  0xbb   :  { %416 = vst [vmem:[#allocation5 + $0x244] sm:$0xf] %v415_v63  ;;  %418 = vst [vmem:[#allocation5 + $0x248] sm:$0xf] %v417_v0  ;;  %v419_v1 = vld [vmem:[%s15294_s5 + $0x254] sm:$0xf] }
  0xbc   :  { %v421_v2 = vld [vmem:[%s15294_s5 + $0x248] sm:$0xf]  ;;  %v423_v3 = vld [vmem:[%s15294_s5 + $0x258] sm:$0xf]  ;;  %420 = vst [vmem:[#allocation5 + $0x24c] sm:$0xf] %v419_v1 }
  0xbd   :  { %422 = vst [vmem:[#allocation5 + $0x250] sm:$0xf] %v421_v2  ;;  %424 = vst [vmem:[#allocation5 + $0x254] sm:$0xf] %v423_v3  ;;  %v425_v4 = vld [vmem:[%s15294_s5 + $0x24c] sm:$0xf] }
  0xbe   :  { %v431_v6 = vld [vmem:[%s15294_s5 + $0x270] sm:$0xf]  ;;  %426 = vst [vmem:[#allocation5 + $0x258] sm:$0xf] %v425_v4  ;;  %428 = vst [vmem:[#allocation5 + $0x25c] sm:$0xff] %v427_v5   ;;  %v443_v12 = vld [vmem:[%s15294_s5 + $0x27c] sm:$0xff]  }
  0xbf   :  { %432 = vst [vmem:[#allocation5 + $0x264] sm:$0xf] %v431_v6  ;;  %v433_v7 = vld [vmem:[%s15294_s5 + $0x264] sm:$0xf]  ;;  %v435_v8 = vld [vmem:[%s15294_s5 + $0x274] sm:$0xf] }
  0xc0   :  { %v437_v9 = vld [vmem:[%s15294_s5 + $0x268] sm:$0xf]  ;;  %434 = vst [vmem:[#allocation5 + $0x268] sm:$0xf] %v433_v7  ;;  %436 = vst [vmem:[#allocation5 + $0x26c] sm:$0xf] %v435_v8 }
  0xc1   :  { %438 = vst [vmem:[#allocation5 + $0x270] sm:$0xf] %v437_v9  ;;  %v439_v10 = vld [vmem:[%s15294_s5 + $0x278] sm:$0xf]  ;;  %v441_v11 = vld [vmem:[%s15294_s5 + $0x26c] sm:$0xf] }
  0xc2   :  { %440 = vst [vmem:[#allocation5 + $0x274] sm:$0xf] %v439_v10  ;;  %442 = vst [vmem:[#allocation5 + $0x278] sm:$0xf] %v441_v11  ;;  %v447_v13 = vld [vmem:[%s15294_s5 + $0x290] sm:$0xf] }
  0xc3   :  { %444 = vst [vmem:[#allocation5 + $0x27c] sm:$0xff] %v443_v12   ;;  %v449_v14 = vld [vmem:[%s15294_s5 + $0x284] sm:$0xf]  ;;  %v451_v15 = vld [vmem:[%s15294_s5 + $0x294] sm:$0xf]  ;;  %v459_v19 = vld [vmem:[%s15294_s5 + $0x29c] sm:$0xff]  }
  0xc4   :  { %448 = vst [vmem:[#allocation5 + $0x284] sm:$0xf] %v447_v13  ;;  %450 = vst [vmem:[#allocation5 + $0x288] sm:$0xf] %v449_v14  ;;  %v453_v16 = vld [vmem:[%s15294_s5 + $0x288] sm:$0xf] }
  0xc5   :  { %452 = vst [vmem:[#allocation5 + $0x28c] sm:$0xf] %v451_v15  ;;  %v455_v17 = vld [vmem:[%s15294_s5 + $0x298] sm:$0xf]  ;;  %v457_v18 = vld [vmem:[%s15294_s5 + $0x28c] sm:$0xf] }
  0xc6   :  { %454 = vst [vmem:[#allocation5 + $0x290] sm:$0xf] %v453_v16  ;;  %456 = vst [vmem:[#allocation5 + $0x294] sm:$0xf] %v455_v17  ;;  %v463_v20 = vld [vmem:[%s15294_s5 + $0x2b0] sm:$0xf] }
  0xc7   :  { %458 = vst [vmem:[#allocation5 + $0x298] sm:$0xf] %v457_v18  ;;  %v465_v21 = vld [vmem:[%s15294_s5 + $0x2a4] sm:$0xf]  ;;  %460 = vst [vmem:[#allocation5 + $0x29c] sm:$0xff] %v459_v19   ;;  %v475_v26 = vld [vmem:[%s15294_s5 + $0x2bc] sm:$0xff]  }
  0xc8   :  { %464 = vst [vmem:[#allocation5 + $0x2a4] sm:$0xf] %v463_v20  ;;  %466 = vst [vmem:[#allocation5 + $0x2a8] sm:$0xf] %v465_v21  ;;  %v467_v22 = vld [vmem:[%s15294_s5 + $0x2b4] sm:$0xf] }
  0xc9   :  { %v469_v23 = vld [vmem:[%s15294_s5 + $0x2a8] sm:$0xf]  ;;  %v471_v24 = vld [vmem:[%s15294_s5 + $0x2b8] sm:$0xf]  ;;  %468 = vst [vmem:[#allocation5 + $0x2ac] sm:$0xf] %v467_v22 }
  0xca   :  { %470 = vst [vmem:[#allocation5 + $0x2b0] sm:$0xf] %v469_v23  ;;  %472 = vst [vmem:[#allocation5 + $0x2b4] sm:$0xf] %v471_v24  ;;  %v473_v25 = vld [vmem:[%s15294_s5 + $0x2ac] sm:$0xf] }
  0xcb   :  { %v479_v27 = vld [vmem:[%s15294_s5 + $0x2d0] sm:$0xf]  ;;  %474 = vst [vmem:[#allocation5 + $0x2b8] sm:$0xf] %v473_v25  ;;  %476 = vst [vmem:[#allocation5 + $0x2bc] sm:$0xff] %v475_v26   ;;  %v491_v33 = vld [vmem:[%s15294_s5 + $0x2dc] sm:$0xff]  }
  0xcc   :  { %480 = vst [vmem:[#allocation5 + $0x2c4] sm:$0xf] %v479_v27  ;;  %v481_v28 = vld [vmem:[%s15294_s5 + $0x2c4] sm:$0xf]  ;;  %v483_v29 = vld [vmem:[%s15294_s5 + $0x2d4] sm:$0xf] }
  0xcd   :  { %v485_v30 = vld [vmem:[%s15294_s5 + $0x2c8] sm:$0xf]  ;;  %482 = vst [vmem:[#allocation5 + $0x2c8] sm:$0xf] %v481_v28  ;;  %484 = vst [vmem:[#allocation5 + $0x2cc] sm:$0xf] %v483_v29 }
  0xce   :  { %486 = vst [vmem:[#allocation5 + $0x2d0] sm:$0xf] %v485_v30  ;;  %v487_v31 = vld [vmem:[%s15294_s5 + $0x2d8] sm:$0xf]  ;;  %v489_v32 = vld [vmem:[%s15294_s5 + $0x2cc] sm:$0xf] }
  0xcf   :  { %488 = vst [vmem:[#allocation5 + $0x2d4] sm:$0xf] %v487_v31  ;;  %490 = vst [vmem:[#allocation5 + $0x2d8] sm:$0xf] %v489_v32  ;;  %v495_v34 = vld [vmem:[%s15294_s5 + $0x2f0] sm:$0xf] }
  0xd0   :  { %492 = vst [vmem:[#allocation5 + $0x2dc] sm:$0xff] %v491_v33   ;;  %v497_v35 = vld [vmem:[%s15294_s5 + $0x2e4] sm:$0xf]  ;;  %v499_v36 = vld [vmem:[%s15294_s5 + $0x2f4] sm:$0xf]  ;;  %v507_v40 = vld [vmem:[%s15294_s5 + $0x2fc] sm:$0xff]  }
  0xd1   :  { %496 = vst [vmem:[#allocation5 + $0x2e4] sm:$0xf] %v495_v34  ;;  %498 = vst [vmem:[#allocation5 + $0x2e8] sm:$0xf] %v497_v35  ;;  %v501_v37 = vld [vmem:[%s15294_s5 + $0x2e8] sm:$0xf] }
  0xd2   :  { %500 = vst [vmem:[#allocation5 + $0x2ec] sm:$0xf] %v499_v36  ;;  %v503_v38 = vld [vmem:[%s15294_s5 + $0x2f8] sm:$0xf]  ;;  %v505_v39 = vld [vmem:[%s15294_s5 + $0x2ec] sm:$0xf] }
  0xd3   :  { %502 = vst [vmem:[#allocation5 + $0x2f0] sm:$0xf] %v501_v37  ;;  %504 = vst [vmem:[#allocation5 + $0x2f4] sm:$0xf] %v503_v38  ;;  %v511_v41 = vld [vmem:[%s15294_s5 + $0x310] sm:$0xf] }
  0xd4   :  { %506 = vst [vmem:[#allocation5 + $0x2f8] sm:$0xf] %v505_v39  ;;  %v513_v42 = vld [vmem:[%s15294_s5 + $0x304] sm:$0xf]  ;;  %508 = vst [vmem:[#allocation5 + $0x2fc] sm:$0xff] %v507_v40   ;;  %v523_v47 = vld [vmem:[%s15294_s5 + $0x31c] sm:$0xff]  }
  0xd5   :  { %512 = vst [vmem:[#allocation5 + $0x304] sm:$0xf] %v511_v41  ;;  %514 = vst [vmem:[#allocation5 + $0x308] sm:$0xf] %v513_v42  ;;  %v515_v43 = vld [vmem:[%s15294_s5 + $0x314] sm:$0xf] }
  0xd6   :  { %v517_v44 = vld [vmem:[%s15294_s5 + $0x308] sm:$0xf]  ;;  %v519_v45 = vld [vmem:[%s15294_s5 + $0x318] sm:$0xf]  ;;  %516 = vst [vmem:[#allocation5 + $0x30c] sm:$0xf] %v515_v43 }
  0xd7   :  { %518 = vst [vmem:[#allocation5 + $0x310] sm:$0xf] %v517_v44  ;;  %520 = vst [vmem:[#allocation5 + $0x314] sm:$0xf] %v519_v45  ;;  %v521_v46 = vld [vmem:[%s15294_s5 + $0x30c] sm:$0xf] }
  0xd8   :  { %v527_v48 = vld [vmem:[%s15294_s5 + $0x330] sm:$0xf]  ;;  %522 = vst [vmem:[#allocation5 + $0x318] sm:$0xf] %v521_v46  ;;  %524 = vst [vmem:[#allocation5 + $0x31c] sm:$0xff] %v523_v47   ;;  %v539_v54 = vld [vmem:[%s15294_s5 + $0x33c] sm:$0xff]  }
  0xd9   :  { %528 = vst [vmem:[#allocation5 + $0x324] sm:$0xf] %v527_v48  ;;  %v529_v49 = vld [vmem:[%s15294_s5 + $0x324] sm:$0xf]  ;;  %v531_v50 = vld [vmem:[%s15294_s5 + $0x334] sm:$0xf] }
  0xda   :  { %v533_v51 = vld [vmem:[%s15294_s5 + $0x328] sm:$0xf]  ;;  %530 = vst [vmem:[#allocation5 + $0x328] sm:$0xf] %v529_v49  ;;  %532 = vst [vmem:[#allocation5 + $0x32c] sm:$0xf] %v531_v50 }
  0xdb   :  { %534 = vst [vmem:[#allocation5 + $0x330] sm:$0xf] %v533_v51  ;;  %v535_v52 = vld [vmem:[%s15294_s5 + $0x338] sm:$0xf]  ;;  %v537_v53 = vld [vmem:[%s15294_s5 + $0x32c] sm:$0xf] }
  0xdc   :  { %536 = vst [vmem:[#allocation5 + $0x334] sm:$0xf] %v535_v52  ;;  %538 = vst [vmem:[#allocation5 + $0x338] sm:$0xf] %v537_v53  ;;  %v543_v55 = vld [vmem:[%s15294_s5 + $0x350] sm:$0xf] }
  0xdd   :  { %540 = vst [vmem:[#allocation5 + $0x33c] sm:$0xff] %v539_v54   ;;  %v545_v56 = vld [vmem:[%s15294_s5 + $0x344] sm:$0xf]  ;;  %v547_v57 = vld [vmem:[%s15294_s5 + $0x354] sm:$0xf]  ;;  %v555_v61 = vld [vmem:[%s15294_s5 + $0x35c] sm:$0xff]  }
  0xde   :  { %544 = vst [vmem:[#allocation5 + $0x344] sm:$0xf] %v543_v55  ;;  %546 = vst [vmem:[#allocation5 + $0x348] sm:$0xf] %v545_v56  ;;  %v549_v58 = vld [vmem:[%s15294_s5 + $0x348] sm:$0xf] }
  0xdf   :  { %548 = vst [vmem:[#allocation5 + $0x34c] sm:$0xf] %v547_v57  ;;  %v551_v59 = vld [vmem:[%s15294_s5 + $0x358] sm:$0xf]  ;;  %v553_v60 = vld [vmem:[%s15294_s5 + $0x34c] sm:$0xf] }
  0xe0   :  { %550 = vst [vmem:[#allocation5 + $0x350] sm:$0xf] %v549_v58  ;;  %552 = vst [vmem:[#allocation5 + $0x354] sm:$0xf] %v551_v59  ;;  %v559_v62 = vld [vmem:[%s15294_s5 + $0x370] sm:$0xf] }
  0xe1   :  { %554 = vst [vmem:[#allocation5 + $0x358] sm:$0xf] %v553_v60  ;;  %v561_v63 = vld [vmem:[%s15294_s5 + $0x364] sm:$0xf]  ;;  %556 = vst [vmem:[#allocation5 + $0x35c] sm:$0xff] %v555_v61   ;;  %v571_v4 = vld [vmem:[%s15294_s5 + $0x37c] sm:$0xff]  }
  0xe2   :  { %560 = vst [vmem:[#allocation5 + $0x364] sm:$0xf] %v559_v62  ;;  %562 = vst [vmem:[#allocation5 + $0x368] sm:$0xf] %v561_v63  ;;  %v563_v0 = vld [vmem:[%s15294_s5 + $0x374] sm:$0xf] }
  0xe3   :  { %v565_v1 = vld [vmem:[%s15294_s5 + $0x368] sm:$0xf]  ;;  %v567_v2 = vld [vmem:[%s15294_s5 + $0x378] sm:$0xf]  ;;  %564 = vst [vmem:[#allocation5 + $0x36c] sm:$0xf] %v563_v0 }
  0xe4   :  { %566 = vst [vmem:[#allocation5 + $0x370] sm:$0xf] %v565_v1  ;;  %568 = vst [vmem:[#allocation5 + $0x374] sm:$0xf] %v567_v2  ;;  %v569_v3 = vld [vmem:[%s15294_s5 + $0x36c] sm:$0xf] }
  0xe5   :  { %v575_v5 = vld [vmem:[%s15294_s5 + $0x390] sm:$0xf]  ;;  %570 = vst [vmem:[#allocation5 + $0x378] sm:$0xf] %v569_v3  ;;  %572 = vst [vmem:[#allocation5 + $0x37c] sm:$0xff] %v571_v4   ;;  %v587_v11 = vld [vmem:[%s15294_s5 + $0x39c] sm:$0xff]  }
  0xe6   :  { %576 = vst [vmem:[#allocation5 + $0x384] sm:$0xf] %v575_v5  ;;  %v577_v6 = vld [vmem:[%s15294_s5 + $0x384] sm:$0xf]  ;;  %v579_v7 = vld [vmem:[%s15294_s5 + $0x394] sm:$0xf] }
  0xe7   :  { %v581_v8 = vld [vmem:[%s15294_s5 + $0x388] sm:$0xf]  ;;  %578 = vst [vmem:[#allocation5 + $0x388] sm:$0xf] %v577_v6  ;;  %580 = vst [vmem:[#allocation5 + $0x38c] sm:$0xf] %v579_v7 }
  0xe8   :  { %582 = vst [vmem:[#allocation5 + $0x390] sm:$0xf] %v581_v8  ;;  %v583_v9 = vld [vmem:[%s15294_s5 + $0x398] sm:$0xf]  ;;  %v585_v10 = vld [vmem:[%s15294_s5 + $0x38c] sm:$0xf] }
  0xe9   :  { %584 = vst [vmem:[#allocation5 + $0x394] sm:$0xf] %v583_v9  ;;  %586 = vst [vmem:[#allocation5 + $0x398] sm:$0xf] %v585_v10  ;;  %v591_v12 = vld [vmem:[%s15294_s5 + $0x3b0] sm:$0xf] }
  0xea   :  { %588 = vst [vmem:[#allocation5 + $0x39c] sm:$0xff] %v587_v11   ;;  %v593_v13 = vld [vmem:[%s15294_s5 + $0x3a4] sm:$0xf]  ;;  %v595_v14 = vld [vmem:[%s15294_s5 + $0x3b4] sm:$0xf]  ;;  %v603_v18 = vld [vmem:[%s15294_s5 + $0x3bc] sm:$0xff]  }
  0xeb   :  { %592 = vst [vmem:[#allocation5 + $0x3a4] sm:$0xf] %v591_v12  ;;  %594 = vst [vmem:[#allocation5 + $0x3a8] sm:$0xf] %v593_v13  ;;  %v597_v15 = vld [vmem:[%s15294_s5 + $0x3a8] sm:$0xf] }
  0xec   :  { %596 = vst [vmem:[#allocation5 + $0x3ac] sm:$0xf] %v595_v14  ;;  %v599_v16 = vld [vmem:[%s15294_s5 + $0x3b8] sm:$0xf]  ;;  %v601_v17 = vld [vmem:[%s15294_s5 + $0x3ac] sm:$0xf] }
  0xed   :  { %598 = vst [vmem:[#allocation5 + $0x3b0] sm:$0xf] %v597_v15  ;;  %600 = vst [vmem:[#allocation5 + $0x3b4] sm:$0xf] %v599_v16  ;;  %v607_v19 = vld [vmem:[%s15294_s5 + $0x3d0] sm:$0xf] }
  0xee   :  { %602 = vst [vmem:[#allocation5 + $0x3b8] sm:$0xf] %v601_v17  ;;  %v609_v20 = vld [vmem:[%s15294_s5 + $0x3c4] sm:$0xf]  ;;  %604 = vst [vmem:[#allocation5 + $0x3bc] sm:$0xff] %v603_v18   ;;  %v619_v25 = vld [vmem:[%s15294_s5 + $0x3dc] sm:$0xff]  }
  0xef   :  { %608 = vst [vmem:[#allocation5 + $0x3c4] sm:$0xf] %v607_v19  ;;  %610 = vst [vmem:[#allocation5 + $0x3c8] sm:$0xf] %v609_v20  ;;  %v611_v21 = vld [vmem:[%s15294_s5 + $0x3d4] sm:$0xf] }
  0xf0   :  { %v613_v22 = vld [vmem:[%s15294_s5 + $0x3c8] sm:$0xf]  ;;  %v615_v23 = vld [vmem:[%s15294_s5 + $0x3d8] sm:$0xf]  ;;  %612 = vst [vmem:[#allocation5 + $0x3cc] sm:$0xf] %v611_v21 }
  0xf1   :  { %614 = vst [vmem:[#allocation5 + $0x3d0] sm:$0xf] %v613_v22  ;;  %616 = vst [vmem:[#allocation5 + $0x3d4] sm:$0xf] %v615_v23  ;;  %v617_v24 = vld [vmem:[%s15294_s5 + $0x3cc] sm:$0xf] }
  0xf2   :  { %v623_v26 = vld [vmem:[%s15294_s5 + $0x3f0] sm:$0xf]  ;;  %618 = vst [vmem:[#allocation5 + $0x3d8] sm:$0xf] %v617_v24  ;;  %620 = vst [vmem:[#allocation5 + $0x3dc] sm:$0xff] %v619_v25   ;;  %v635_v32 = vld [vmem:[%s15294_s5 + $0x3fc] sm:$0xff]  }
  0xf3   :  { %624 = vst [vmem:[#allocation5 + $0x3e4] sm:$0xf] %v623_v26  ;;  %v625_v27 = vld [vmem:[%s15294_s5 + $0x3e4] sm:$0xf]  ;;  %v627_v28 = vld [vmem:[%s15294_s5 + $0x3f4] sm:$0xf] }
  0xf4   :  { %v629_v29 = vld [vmem:[%s15294_s5 + $0x3e8] sm:$0xf]  ;;  %626 = vst [vmem:[#allocation5 + $0x3e8] sm:$0xf] %v625_v27  ;;  %628 = vst [vmem:[#allocation5 + $0x3ec] sm:$0xf] %v627_v28 }
  0xf5   :  { %630 = vst [vmem:[#allocation5 + $0x3f0] sm:$0xf] %v629_v29  ;;  %v631_v30 = vld [vmem:[%s15294_s5 + $0x3f8] sm:$0xf]  ;;  %v633_v31 = vld [vmem:[%s15294_s5 + $0x3ec] sm:$0xf] }
  0xf6   :  { %632 = vst [vmem:[#allocation5 + $0x3f4] sm:$0xf] %v631_v30  ;;  %634 = vst [vmem:[#allocation5 + $0x3f8] sm:$0xf] %v633_v31  ;;  %v639_v33 = vld [vmem:[%s15294_s5 + $0x410] sm:$0xf] }
  0xf7   :  { %636 = vst [vmem:[#allocation5 + $0x3fc] sm:$0xff] %v635_v32   ;;  %v641_v34 = vld [vmem:[%s15294_s5 + $0x404] sm:$0xf]  ;;  %v643_v35 = vld [vmem:[%s15294_s5 + $0x414] sm:$0xf]  ;;  %v651_v39 = vld [vmem:[%s15294_s5 + $0x41c] sm:$0xff]  }
  0xf8   :  { %640 = vst [vmem:[#allocation5 + $0x404] sm:$0xf] %v639_v33  ;;  %642 = vst [vmem:[#allocation5 + $0x408] sm:$0xf] %v641_v34  ;;  %v645_v36 = vld [vmem:[%s15294_s5 + $0x408] sm:$0xf] }
  0xf9   :  { %644 = vst [vmem:[#allocation5 + $0x40c] sm:$0xf] %v643_v35  ;;  %v647_v37 = vld [vmem:[%s15294_s5 + $0x418] sm:$0xf]  ;;  %v649_v38 = vld [vmem:[%s15294_s5 + $0x40c] sm:$0xf] }
  0xfa   :  { %646 = vst [vmem:[#allocation5 + $0x410] sm:$0xf] %v645_v36  ;;  %648 = vst [vmem:[#allocation5 + $0x414] sm:$0xf] %v647_v37  ;;  %v655_v40 = vld [vmem:[%s15294_s5 + $0x430] sm:$0xf] }
  0xfb   :  { %650 = vst [vmem:[#allocation5 + $0x418] sm:$0xf] %v649_v38  ;;  %v657_v41 = vld [vmem:[%s15294_s5 + $0x424] sm:$0xf]  ;;  %652 = vst [vmem:[#allocation5 + $0x41c] sm:$0xff] %v651_v39   ;;  %v667_v46 = vld [vmem:[%s15294_s5 + $0x43c] sm:$0xff]  }
  0xfc   :  { %656 = vst [vmem:[#allocation5 + $0x424] sm:$0xf] %v655_v40  ;;  %658 = vst [vmem:[#allocation5 + $0x428] sm:$0xf] %v657_v41  ;;  %v659_v42 = vld [vmem:[%s15294_s5 + $0x434] sm:$0xf] }
  0xfd   :  { %v661_v43 = vld [vmem:[%s15294_s5 + $0x428] sm:$0xf]  ;;  %v663_v44 = vld [vmem:[%s15294_s5 + $0x438] sm:$0xf]  ;;  %660 = vst [vmem:[#allocation5 + $0x42c] sm:$0xf] %v659_v42 }
  0xfe   :  { %662 = vst [vmem:[#allocation5 + $0x430] sm:$0xf] %v661_v43  ;;  %664 = vst [vmem:[#allocation5 + $0x434] sm:$0xf] %v663_v44  ;;  %v665_v45 = vld [vmem:[%s15294_s5 + $0x42c] sm:$0xf] }
  0xff   :  { %v671_v47 = vld [vmem:[%s15294_s5 + $0x450] sm:$0xf]  ;;  %666 = vst [vmem:[#allocation5 + $0x438] sm:$0xf] %v665_v45  ;;  %668 = vst [vmem:[#allocation5 + $0x43c] sm:$0xff] %v667_v46   ;;  %v683_v53 = vld [vmem:[%s15294_s5 + $0x45c] sm:$0xff]  }
 0x100   :  { %672 = vst [vmem:[#allocation5 + $0x444] sm:$0xf] %v671_v47  ;;  %v673_v48 = vld [vmem:[%s15294_s5 + $0x444] sm:$0xf]  ;;  %v675_v49 = vld [vmem:[%s15294_s5 + $0x454] sm:$0xf] }
 0x101   :  { %v677_v50 = vld [vmem:[%s15294_s5 + $0x448] sm:$0xf]  ;;  %674 = vst [vmem:[#allocation5 + $0x448] sm:$0xf] %v673_v48  ;;  %676 = vst [vmem:[#allocation5 + $0x44c] sm:$0xf] %v675_v49 }
 0x102   :  { %678 = vst [vmem:[#allocation5 + $0x450] sm:$0xf] %v677_v50  ;;  %v679_v51 = vld [vmem:[%s15294_s5 + $0x458] sm:$0xf]  ;;  %v681_v52 = vld [vmem:[%s15294_s5 + $0x44c] sm:$0xf] }
 0x103   :  { %680 = vst [vmem:[#allocation5 + $0x454] sm:$0xf] %v679_v51  ;;  %682 = vst [vmem:[#allocation5 + $0x458] sm:$0xf] %v681_v52  ;;  %v687_v54 = vld [vmem:[%s15294_s5 + $0x470] sm:$0xf] }
 0x104   :  { %684 = vst [vmem:[#allocation5 + $0x45c] sm:$0xff] %v683_v53   ;;  %v689_v55 = vld [vmem:[%s15294_s5 + $0x464] sm:$0xf]  ;;  %v691_v56 = vld [vmem:[%s15294_s5 + $0x474] sm:$0xf]  ;;  %v699_v60 = vld [vmem:[%s15294_s5 + $0x47c] sm:$0xff]  }
 0x105   :  { %688 = vst [vmem:[#allocation5 + $0x464] sm:$0xf] %v687_v54  ;;  %690 = vst [vmem:[#allocation5 + $0x468] sm:$0xf] %v689_v55  ;;  %v693_v57 = vld [vmem:[%s15294_s5 + $0x468] sm:$0xf] }
 0x106   :  { %692 = vst [vmem:[#allocation5 + $0x46c] sm:$0xf] %v691_v56  ;;  %v695_v58 = vld [vmem:[%s15294_s5 + $0x478] sm:$0xf]  ;;  %v697_v59 = vld [vmem:[%s15294_s5 + $0x46c] sm:$0xf] }
 0x107   :  { %694 = vst [vmem:[#allocation5 + $0x470] sm:$0xf] %v693_v57  ;;  %696 = vst [vmem:[#allocation5 + $0x474] sm:$0xf] %v695_v58  ;;  %v703_v61 = vld [vmem:[%s15294_s5 + $0x490] sm:$0xf] }
 0x108   :  { %698 = vst [vmem:[#allocation5 + $0x478] sm:$0xf] %v697_v59  ;;  %v705_v62 = vld [vmem:[%s15294_s5 + $0x484] sm:$0xf]  ;;  %700 = vst [vmem:[#allocation5 + $0x47c] sm:$0xff] %v699_v60   ;;  %v715_v3 = vld [vmem:[%s15294_s5 + $0x49c] sm:$0xff]  }
 0x109   :  { %704 = vst [vmem:[#allocation5 + $0x484] sm:$0xf] %v703_v61  ;;  %706 = vst [vmem:[#allocation5 + $0x488] sm:$0xf] %v705_v62  ;;  %v707_v63 = vld [vmem:[%s15294_s5 + $0x494] sm:$0xf] }
 0x10a   :  { %v709_v0 = vld [vmem:[%s15294_s5 + $0x488] sm:$0xf]  ;;  %v711_v1 = vld [vmem:[%s15294_s5 + $0x498] sm:$0xf]  ;;  %708 = vst [vmem:[#allocation5 + $0x48c] sm:$0xf] %v707_v63 }
 0x10b   :  { %710 = vst [vmem:[#allocation5 + $0x490] sm:$0xf] %v709_v0  ;;  %712 = vst [vmem:[#allocation5 + $0x494] sm:$0xf] %v711_v1  ;;  %v713_v2 = vld [vmem:[%s15294_s5 + $0x48c] sm:$0xf] }
 0x10c   :  { %v719_v4 = vld [vmem:[%s15294_s5 + $0x4b0] sm:$0xf]  ;;  %714 = vst [vmem:[#allocation5 + $0x498] sm:$0xf] %v713_v2  ;;  %716 = vst [vmem:[#allocation5 + $0x49c] sm:$0xff] %v715_v3   ;;  %v731_v10 = vld [vmem:[%s15294_s5 + $0x4bc] sm:$0xff]  }
 0x10d   :  { %720 = vst [vmem:[#allocation5 + $0x4a4] sm:$0xf] %v719_v4  ;;  %v721_v5 = vld [vmem:[%s15294_s5 + $0x4a4] sm:$0xf]  ;;  %v723_v6 = vld [vmem:[%s15294_s5 + $0x4b4] sm:$0xf] }
 0x10e   :  { %v725_v7 = vld [vmem:[%s15294_s5 + $0x4a8] sm:$0xf]  ;;  %722 = vst [vmem:[#allocation5 + $0x4a8] sm:$0xf] %v721_v5  ;;  %724 = vst [vmem:[#allocation5 + $0x4ac] sm:$0xf] %v723_v6 }
 0x10f   :  { %726 = vst [vmem:[#allocation5 + $0x4b0] sm:$0xf] %v725_v7  ;;  %v727_v8 = vld [vmem:[%s15294_s5 + $0x4b8] sm:$0xf]  ;;  %v729_v9 = vld [vmem:[%s15294_s5 + $0x4ac] sm:$0xf] }
 0x110   :  { %728 = vst [vmem:[#allocation5 + $0x4b4] sm:$0xf] %v727_v8  ;;  %730 = vst [vmem:[#allocation5 + $0x4b8] sm:$0xf] %v729_v9  ;;  %v735_v11 = vld [vmem:[%s15294_s5 + $0x4d0] sm:$0xf] }
 0x111   :  { %732 = vst [vmem:[#allocation5 + $0x4bc] sm:$0xff] %v731_v10   ;;  %v737_v12 = vld [vmem:[%s15294_s5 + $0x4c4] sm:$0xf]  ;;  %v739_v13 = vld [vmem:[%s15294_s5 + $0x4d4] sm:$0xf]  ;;  %v747_v17 = vld [vmem:[%s15294_s5 + $0x4dc] sm:$0xff]  }
 0x112   :  { %736 = vst [vmem:[#allocation5 + $0x4c4] sm:$0xf] %v735_v11  ;;  %738 = vst [vmem:[#allocation5 + $0x4c8] sm:$0xf] %v737_v12  ;;  %v741_v14 = vld [vmem:[%s15294_s5 + $0x4c8] sm:$0xf] }
 0x113   :  { %740 = vst [vmem:[#allocation5 + $0x4cc] sm:$0xf] %v739_v13  ;;  %v743_v15 = vld [vmem:[%s15294_s5 + $0x4d8] sm:$0xf]  ;;  %v745_v16 = vld [vmem:[%s15294_s5 + $0x4cc] sm:$0xf] }
 0x114   :  { %742 = vst [vmem:[#allocation5 + $0x4d0] sm:$0xf] %v741_v14  ;;  %744 = vst [vmem:[#allocation5 + $0x4d4] sm:$0xf] %v743_v15  ;;  %v751_v18 = vld [vmem:[%s15294_s5 + $0x4f0] sm:$0xf] }
 0x115   :  { %746 = vst [vmem:[#allocation5 + $0x4d8] sm:$0xf] %v745_v16  ;;  %v753_v19 = vld [vmem:[%s15294_s5 + $0x4e4] sm:$0xf]  ;;  %748 = vst [vmem:[#allocation5 + $0x4dc] sm:$0xff] %v747_v17   ;;  %v763_v24 = vld [vmem:[%s15294_s5 + $0x4fc] sm:$0xff]  }
 0x116   :  { %752 = vst [vmem:[#allocation5 + $0x4e4] sm:$0xf] %v751_v18  ;;  %754 = vst [vmem:[#allocation5 + $0x4e8] sm:$0xf] %v753_v19  ;;  %v755_v20 = vld [vmem:[%s15294_s5 + $0x4f4] sm:$0xf] }
 0x117   :  { %v757_v21 = vld [vmem:[%s15294_s5 + $0x4e8] sm:$0xf]  ;;  %v759_v22 = vld [vmem:[%s15294_s5 + $0x4f8] sm:$0xf]  ;;  %756 = vst [vmem:[#allocation5 + $0x4ec] sm:$0xf] %v755_v20 }
 0x118   :  { %758 = vst [vmem:[#allocation5 + $0x4f0] sm:$0xf] %v757_v21  ;;  %760 = vst [vmem:[#allocation5 + $0x4f4] sm:$0xf] %v759_v22  ;;  %v761_v23 = vld [vmem:[%s15294_s5 + $0x4ec] sm:$0xf] }
 0x119   :  { %v767_v25 = vld [vmem:[%s15294_s5 + $0x510] sm:$0xf]  ;;  %762 = vst [vmem:[#allocation5 + $0x4f8] sm:$0xf] %v761_v23  ;;  %764 = vst [vmem:[#allocation5 + $0x4fc] sm:$0xff] %v763_v24   ;;  %v779_v31 = vld [vmem:[%s15294_s5 + $0x51c] sm:$0xff]  }
 0x11a   :  { %768 = vst [vmem:[#allocation5 + $0x504] sm:$0xf] %v767_v25  ;;  %v769_v26 = vld [vmem:[%s15294_s5 + $0x504] sm:$0xf]  ;;  %v771_v27 = vld [vmem:[%s15294_s5 + $0x514] sm:$0xf] }
 0x11b   :  { %v773_v28 = vld [vmem:[%s15294_s5 + $0x508] sm:$0xf]  ;;  %770 = vst [vmem:[#allocation5 + $0x508] sm:$0xf] %v769_v26  ;;  %772 = vst [vmem:[#allocation5 + $0x50c] sm:$0xf] %v771_v27 }
 0x11c   :  { %774 = vst [vmem:[#allocation5 + $0x510] sm:$0xf] %v773_v28  ;;  %v775_v29 = vld [vmem:[%s15294_s5 + $0x518] sm:$0xf]  ;;  %v777_v30 = vld [vmem:[%s15294_s5 + $0x50c] sm:$0xf] }
 0x11d   :  { %776 = vst [vmem:[#allocation5 + $0x514] sm:$0xf] %v775_v29  ;;  %778 = vst [vmem:[#allocation5 + $0x518] sm:$0xf] %v777_v30  ;;  %v783_v32 = vld [vmem:[%s15294_s5 + $0x530] sm:$0xf] }
 0x11e   :  { %780 = vst [vmem:[#allocation5 + $0x51c] sm:$0xff] %v779_v31   ;;  %v785_v33 = vld [vmem:[%s15294_s5 + $0x524] sm:$0xf]  ;;  %v787_v34 = vld [vmem:[%s15294_s5 + $0x534] sm:$0xf]  ;;  %v795_v38 = vld [vmem:[%s15294_s5 + $0x53c] sm:$0xff]  }
 0x11f   :  { %784 = vst [vmem:[#allocation5 + $0x524] sm:$0xf] %v783_v32  ;;  %786 = vst [vmem:[#allocation5 + $0x528] sm:$0xf] %v785_v33  ;;  %v789_v35 = vld [vmem:[%s15294_s5 + $0x528] sm:$0xf] }
 0x120   :  { %788 = vst [vmem:[#allocation5 + $0x52c] sm:$0xf] %v787_v34  ;;  %v791_v36 = vld [vmem:[%s15294_s5 + $0x538] sm:$0xf]  ;;  %v793_v37 = vld [vmem:[%s15294_s5 + $0x52c] sm:$0xf] }
 0x121   :  { %790 = vst [vmem:[#allocation5 + $0x530] sm:$0xf] %v789_v35  ;;  %792 = vst [vmem:[#allocation5 + $0x534] sm:$0xf] %v791_v36  ;;  %v799_v39 = vld [vmem:[%s15294_s5 + $0x550] sm:$0xf] }
 0x122   :  { %794 = vst [vmem:[#allocation5 + $0x538] sm:$0xf] %v793_v37  ;;  %v801_v40 = vld [vmem:[%s15294_s5 + $0x544] sm:$0xf]  ;;  %796 = vst [vmem:[#allocation5 + $0x53c] sm:$0xff] %v795_v38   ;;  %v811_v45 = vld [vmem:[%s15294_s5 + $0x55c] sm:$0xff]  }
 0x123   :  { %800 = vst [vmem:[#allocation5 + $0x544] sm:$0xf] %v799_v39  ;;  %802 = vst [vmem:[#allocation5 + $0x548] sm:$0xf] %v801_v40  ;;  %v803_v41 = vld [vmem:[%s15294_s5 + $0x554] sm:$0xf] }
 0x124   :  { %v805_v42 = vld [vmem:[%s15294_s5 + $0x548] sm:$0xf]  ;;  %v807_v43 = vld [vmem:[%s15294_s5 + $0x558] sm:$0xf]  ;;  %804 = vst [vmem:[#allocation5 + $0x54c] sm:$0xf] %v803_v41 }
 0x125   :  { %806 = vst [vmem:[#allocation5 + $0x550] sm:$0xf] %v805_v42  ;;  %808 = vst [vmem:[#allocation5 + $0x554] sm:$0xf] %v807_v43  ;;  %v809_v44 = vld [vmem:[%s15294_s5 + $0x54c] sm:$0xf] }
 0x126   :  { %v815_v46 = vld [vmem:[%s15294_s5 + $0x570] sm:$0xf]  ;;  %810 = vst [vmem:[#allocation5 + $0x558] sm:$0xf] %v809_v44  ;;  %812 = vst [vmem:[#allocation5 + $0x55c] sm:$0xff] %v811_v45   ;;  %v827_v52 = vld [vmem:[%s15294_s5 + $0x57c] sm:$0xff]  }
 0x127   :  { %816 = vst [vmem:[#allocation5 + $0x564] sm:$0xf] %v815_v46  ;;  %v817_v47 = vld [vmem:[%s15294_s5 + $0x564] sm:$0xf]  ;;  %v819_v48 = vld [vmem:[%s15294_s5 + $0x574] sm:$0xf] }
 0x128   :  { %v821_v49 = vld [vmem:[%s15294_s5 + $0x568] sm:$0xf]  ;;  %818 = vst [vmem:[#allocation5 + $0x568] sm:$0xf] %v817_v47  ;;  %820 = vst [vmem:[#allocation5 + $0x56c] sm:$0xf] %v819_v48 }
 0x129   :  { %822 = vst [vmem:[#allocation5 + $0x570] sm:$0xf] %v821_v49  ;;  %v823_v50 = vld [vmem:[%s15294_s5 + $0x578] sm:$0xf]  ;;  %v825_v51 = vld [vmem:[%s15294_s5 + $0x56c] sm:$0xf] }
 0x12a   :  { %824 = vst [vmem:[#allocation5 + $0x574] sm:$0xf] %v823_v50  ;;  %826 = vst [vmem:[#allocation5 + $0x578] sm:$0xf] %v825_v51  ;;  %v831_v53 = vld [vmem:[%s15294_s5 + $0x590] sm:$0xf] }
 0x12b   :  { %828 = vst [vmem:[#allocation5 + $0x57c] sm:$0xff] %v827_v52   ;;  %v833_v54 = vld [vmem:[%s15294_s5 + $0x584] sm:$0xf]  ;;  %v835_v55 = vld [vmem:[%s15294_s5 + $0x594] sm:$0xf]  ;;  %v843_v59 = vld [vmem:[%s15294_s5 + $0x59c] sm:$0xff]  }
 0x12c   :  { %832 = vst [vmem:[#allocation5 + $0x584] sm:$0xf] %v831_v53  ;;  %834 = vst [vmem:[#allocation5 + $0x588] sm:$0xf] %v833_v54  ;;  %v837_v56 = vld [vmem:[%s15294_s5 + $0x588] sm:$0xf] }
 0x12d   :  { %836 = vst [vmem:[#allocation5 + $0x58c] sm:$0xf] %v835_v55  ;;  %v839_v57 = vld [vmem:[%s15294_s5 + $0x598] sm:$0xf]  ;;  %v841_v58 = vld [vmem:[%s15294_s5 + $0x58c] sm:$0xf] }
 0x12e   :  { %838 = vst [vmem:[#allocation5 + $0x590] sm:$0xf] %v837_v56  ;;  %840 = vst [vmem:[#allocation5 + $0x594] sm:$0xf] %v839_v57  ;;  %v847_v60 = vld [vmem:[%s15294_s5 + $0x5b0] sm:$0xf] }
 0x12f   :  { %842 = vst [vmem:[#allocation5 + $0x598] sm:$0xf] %v841_v58  ;;  %v849_v61 = vld [vmem:[%s15294_s5 + $0x5a4] sm:$0xf]  ;;  %844 = vst [vmem:[#allocation5 + $0x59c] sm:$0xff] %v843_v59   ;;  %v859_v2 = vld [vmem:[%s15294_s5 + $0x5bc] sm:$0xff]  }
 0x130   :  { %848 = vst [vmem:[#allocation5 + $0x5a4] sm:$0xf] %v847_v60  ;;  %850 = vst [vmem:[#allocation5 + $0x5a8] sm:$0xf] %v849_v61  ;;  %v851_v62 = vld [vmem:[%s15294_s5 + $0x5b4] sm:$0xf] }
 0x131   :  { %v853_v63 = vld [vmem:[%s15294_s5 + $0x5a8] sm:$0xf]  ;;  %v855_v0 = vld [vmem:[%s15294_s5 + $0x5b8] sm:$0xf]  ;;  %852 = vst [vmem:[#allocation5 + $0x5ac] sm:$0xf] %v851_v62 }
 0x132   :  { %854 = vst [vmem:[#allocation5 + $0x5b0] sm:$0xf] %v853_v63  ;;  %856 = vst [vmem:[#allocation5 + $0x5b4] sm:$0xf] %v855_v0  ;;  %v857_v1 = vld [vmem:[%s15294_s5 + $0x5ac] sm:$0xf] }
 0x133   :  { %v863_v3 = vld [vmem:[%s15294_s5 + $0x5d0] sm:$0xf]  ;;  %858 = vst [vmem:[#allocation5 + $0x5b8] sm:$0xf] %v857_v1  ;;  %860 = vst [vmem:[#allocation5 + $0x5bc] sm:$0xff] %v859_v2   ;;  %v875_v9 = vld [vmem:[%s15294_s5 + $0x5dc] sm:$0xff]  }
 0x134   :  { %864 = vst [vmem:[#allocation5 + $0x5c4] sm:$0xf] %v863_v3  ;;  %v865_v4 = vld [vmem:[%s15294_s5 + $0x5c4] sm:$0xf]  ;;  %v867_v5 = vld [vmem:[%s15294_s5 + $0x5d4] sm:$0xf] }
 0x135   :  { %v869_v6 = vld [vmem:[%s15294_s5 + $0x5c8] sm:$0xf]  ;;  %866 = vst [vmem:[#allocation5 + $0x5c8] sm:$0xf] %v865_v4  ;;  %868 = vst [vmem:[#allocation5 + $0x5cc] sm:$0xf] %v867_v5 }
 0x136   :  { %870 = vst [vmem:[#allocation5 + $0x5d0] sm:$0xf] %v869_v6  ;;  %v871_v7 = vld [vmem:[%s15294_s5 + $0x5d8] sm:$0xf]  ;;  %v873_v8 = vld [vmem:[%s15294_s5 + $0x5cc] sm:$0xf] }
 0x137   :  { %872 = vst [vmem:[#allocation5 + $0x5d4] sm:$0xf] %v871_v7  ;;  %874 = vst [vmem:[#allocation5 + $0x5d8] sm:$0xf] %v873_v8  ;;  %v879_v10 = vld [vmem:[%s15294_s5 + $0x5f0] sm:$0xf] }
 0x138   :  { %876 = vst [vmem:[#allocation5 + $0x5dc] sm:$0xff] %v875_v9   ;;  %v881_v11 = vld [vmem:[%s15294_s5 + $0x5e4] sm:$0xf]  ;;  %v883_v12 = vld [vmem:[%s15294_s5 + $0x5f4] sm:$0xf]  ;;  %v891_v16 = vld [vmem:[%s15294_s5 + $0x5fc] sm:$0xff]  }
 0x139   :  { %880 = vst [vmem:[#allocation5 + $0x5e4] sm:$0xf] %v879_v10  ;;  %882 = vst [vmem:[#allocation5 + $0x5e8] sm:$0xf] %v881_v11  ;;  %v885_v13 = vld [vmem:[%s15294_s5 + $0x5e8] sm:$0xf] }
 0x13a   :  { %884 = vst [vmem:[#allocation5 + $0x5ec] sm:$0xf] %v883_v12  ;;  %v887_v14 = vld [vmem:[%s15294_s5 + $0x5f8] sm:$0xf]  ;;  %v889_v15 = vld [vmem:[%s15294_s5 + $0x5ec] sm:$0xf] }
 0x13b   :  { %886 = vst [vmem:[#allocation5 + $0x5f0] sm:$0xf] %v885_v13  ;;  %888 = vst [vmem:[#allocation5 + $0x5f4] sm:$0xf] %v887_v14  ;;  %v895_v17 = vld [vmem:[%s15294_s5 + $0x610] sm:$0xf] }
 0x13c   :  { %890 = vst [vmem:[#allocation5 + $0x5f8] sm:$0xf] %v889_v15  ;;  %v897_v18 = vld [vmem:[%s15294_s5 + $0x604] sm:$0xf]  ;;  %892 = vst [vmem:[#allocation5 + $0x5fc] sm:$0xff] %v891_v16   ;;  %v907_v23 = vld [vmem:[%s15294_s5 + $0x61c] sm:$0xff]  }
 0x13d   :  { %896 = vst [vmem:[#allocation5 + $0x604] sm:$0xf] %v895_v17  ;;  %898 = vst [vmem:[#allocation5 + $0x608] sm:$0xf] %v897_v18  ;;  %v899_v19 = vld [vmem:[%s15294_s5 + $0x614] sm:$0xf] }
 0x13e   :  { %v901_v20 = vld [vmem:[%s15294_s5 + $0x608] sm:$0xf]  ;;  %v903_v21 = vld [vmem:[%s15294_s5 + $0x618] sm:$0xf]  ;;  %900 = vst [vmem:[#allocation5 + $0x60c] sm:$0xf] %v899_v19 }
 0x13f   :  { %902 = vst [vmem:[#allocation5 + $0x610] sm:$0xf] %v901_v20  ;;  %904 = vst [vmem:[#allocation5 + $0x614] sm:$0xf] %v903_v21  ;;  %v905_v22 = vld [vmem:[%s15294_s5 + $0x60c] sm:$0xf] }
 0x140   :  { %v911_v24 = vld [vmem:[%s15294_s5 + $0x630] sm:$0xf]  ;;  %906 = vst [vmem:[#allocation5 + $0x618] sm:$0xf] %v905_v22  ;;  %908 = vst [vmem:[#allocation5 + $0x61c] sm:$0xff] %v907_v23   ;;  %v923_v30 = vld [vmem:[%s15294_s5 + $0x63c] sm:$0xff]  }
 0x141   :  { %912 = vst [vmem:[#allocation5 + $0x624] sm:$0xf] %v911_v24  ;;  %v913_v25 = vld [vmem:[%s15294_s5 + $0x624] sm:$0xf]  ;;  %v915_v26 = vld [vmem:[%s15294_s5 + $0x634] sm:$0xf] }
 0x142   :  { %v917_v27 = vld [vmem:[%s15294_s5 + $0x628] sm:$0xf]  ;;  %914 = vst [vmem:[#allocation5 + $0x628] sm:$0xf] %v913_v25  ;;  %916 = vst [vmem:[#allocation5 + $0x62c] sm:$0xf] %v915_v26 }
 0x143   :  { %918 = vst [vmem:[#allocation5 + $0x630] sm:$0xf] %v917_v27  ;;  %v919_v28 = vld [vmem:[%s15294_s5 + $0x638] sm:$0xf]  ;;  %v921_v29 = vld [vmem:[%s15294_s5 + $0x62c] sm:$0xf] }
 0x144   :  { %920 = vst [vmem:[#allocation5 + $0x634] sm:$0xf] %v919_v28  ;;  %922 = vst [vmem:[#allocation5 + $0x638] sm:$0xf] %v921_v29  ;;  %v927_v31 = vld [vmem:[%s15294_s5 + $0x650] sm:$0xf] }
 0x145   :  { %924 = vst [vmem:[#allocation5 + $0x63c] sm:$0xff] %v923_v30   ;;  %v929_v32 = vld [vmem:[%s15294_s5 + $0x644] sm:$0xf]  ;;  %v931_v33 = vld [vmem:[%s15294_s5 + $0x654] sm:$0xf]  ;;  %v939_v37 = vld [vmem:[%s15294_s5 + $0x65c] sm:$0xff]  }
 0x146   :  { %928 = vst [vmem:[#allocation5 + $0x644] sm:$0xf] %v927_v31  ;;  %930 = vst [vmem:[#allocation5 + $0x648] sm:$0xf] %v929_v32  ;;  %v933_v34 = vld [vmem:[%s15294_s5 + $0x648] sm:$0xf] }
 0x147   :  { %932 = vst [vmem:[#allocation5 + $0x64c] sm:$0xf] %v931_v33  ;;  %v935_v35 = vld [vmem:[%s15294_s5 + $0x658] sm:$0xf]  ;;  %v937_v36 = vld [vmem:[%s15294_s5 + $0x64c] sm:$0xf] }
 0x148   :  { %934 = vst [vmem:[#allocation5 + $0x650] sm:$0xf] %v933_v34  ;;  %936 = vst [vmem:[#allocation5 + $0x654] sm:$0xf] %v935_v35  ;;  %v943_v38 = vld [vmem:[%s15294_s5 + $0x670] sm:$0xf] }
 0x149   :  { %938 = vst [vmem:[#allocation5 + $0x658] sm:$0xf] %v937_v36  ;;  %v945_v39 = vld [vmem:[%s15294_s5 + $0x664] sm:$0xf]  ;;  %940 = vst [vmem:[#allocation5 + $0x65c] sm:$0xff] %v939_v37   ;;  %v955_v44 = vld [vmem:[%s15294_s5 + $0x67c] sm:$0xff]  }
 0x14a   :  { %944 = vst [vmem:[#allocation5 + $0x664] sm:$0xf] %v943_v38  ;;  %946 = vst [vmem:[#allocation5 + $0x668] sm:$0xf] %v945_v39  ;;  %v947_v40 = vld [vmem:[%s15294_s5 + $0x674] sm:$0xf] }
 0x14b   :  { %v949_v41 = vld [vmem:[%s15294_s5 + $0x668] sm:$0xf]  ;;  %v951_v42 = vld [vmem:[%s15294_s5 + $0x678] sm:$0xf]  ;;  %948 = vst [vmem:[#allocation5 + $0x66c] sm:$0xf] %v947_v40 }
 0x14c   :  { %950 = vst [vmem:[#allocation5 + $0x670] sm:$0xf] %v949_v41  ;;  %952 = vst [vmem:[#allocation5 + $0x674] sm:$0xf] %v951_v42  ;;  %v953_v43 = vld [vmem:[%s15294_s5 + $0x66c] sm:$0xf] }
 0x14d   :  { %v959_v45 = vld [vmem:[%s15294_s5 + $0x690] sm:$0xf]  ;;  %954 = vst [vmem:[#allocation5 + $0x678] sm:$0xf] %v953_v43  ;;  %956 = vst [vmem:[#allocation5 + $0x67c] sm:$0xff] %v955_v44   ;;  %v971_v51 = vld [vmem:[%s15294_s5 + $0x69c] sm:$0xff]  }
 0x14e   :  { %960 = vst [vmem:[#allocation5 + $0x684] sm:$0xf] %v959_v45  ;;  %v961_v46 = vld [vmem:[%s15294_s5 + $0x684] sm:$0xf]  ;;  %v963_v47 = vld [vmem:[%s15294_s5 + $0x694] sm:$0xf] }
 0x14f   :  { %v965_v48 = vld [vmem:[%s15294_s5 + $0x688] sm:$0xf]  ;;  %962 = vst [vmem:[#allocation5 + $0x688] sm:$0xf] %v961_v46  ;;  %964 = vst [vmem:[#allocation5 + $0x68c] sm:$0xf] %v963_v47 }
 0x150   :  { %966 = vst [vmem:[#allocation5 + $0x690] sm:$0xf] %v965_v48  ;;  %v967_v49 = vld [vmem:[%s15294_s5 + $0x698] sm:$0xf]  ;;  %v969_v50 = vld [vmem:[%s15294_s5 + $0x68c] sm:$0xf] }
 0x151   :  { %968 = vst [vmem:[#allocation5 + $0x694] sm:$0xf] %v967_v49  ;;  %970 = vst [vmem:[#allocation5 + $0x698] sm:$0xf] %v969_v50  ;;  %v975_v52 = vld [vmem:[%s15294_s5 + $0x6b0] sm:$0xf] }
 0x152   :  { %972 = vst [vmem:[#allocation5 + $0x69c] sm:$0xff] %v971_v51   ;;  %v977_v53 = vld [vmem:[%s15294_s5 + $0x6a4] sm:$0xf]  ;;  %v979_v54 = vld [vmem:[%s15294_s5 + $0x6b4] sm:$0xf]  ;;  %v987_v58 = vld [vmem:[%s15294_s5 + $0x6bc] sm:$0xff]  }
 0x153   :  { %976 = vst [vmem:[#allocation5 + $0x6a4] sm:$0xf] %v975_v52  ;;  %978 = vst [vmem:[#allocation5 + $0x6a8] sm:$0xf] %v977_v53  ;;  %v981_v55 = vld [vmem:[%s15294_s5 + $0x6a8] sm:$0xf] }
 0x154   :  { %980 = vst [vmem:[#allocation5 + $0x6ac] sm:$0xf] %v979_v54  ;;  %v983_v56 = vld [vmem:[%s15294_s5 + $0x6b8] sm:$0xf]  ;;  %v985_v57 = vld [vmem:[%s15294_s5 + $0x6ac] sm:$0xf] }
 0x155   :  { %982 = vst [vmem:[#allocation5 + $0x6b0] sm:$0xf] %v981_v55  ;;  %984 = vst [vmem:[#allocation5 + $0x6b4] sm:$0xf] %v983_v56  ;;  %v991_v59 = vld [vmem:[%s15294_s5 + $0x6d0] sm:$0xf] }
 0x156   :  { %986 = vst [vmem:[#allocation5 + $0x6b8] sm:$0xf] %v985_v57  ;;  %v993_v60 = vld [vmem:[%s15294_s5 + $0x6c4] sm:$0xf]  ;;  %988 = vst [vmem:[#allocation5 + $0x6bc] sm:$0xff] %v987_v58   ;;  %v1003_v1 = vld [vmem:[%s15294_s5 + $0x6dc] sm:$0xff]  }
 0x157   :  { %992 = vst [vmem:[#allocation5 + $0x6c4] sm:$0xf] %v991_v59  ;;  %994 = vst [vmem:[#allocation5 + $0x6c8] sm:$0xf] %v993_v60  ;;  %v995_v61 = vld [vmem:[%s15294_s5 + $0x6d4] sm:$0xf] }
 0x158   :  { %v997_v62 = vld [vmem:[%s15294_s5 + $0x6c8] sm:$0xf]  ;;  %v999_v63 = vld [vmem:[%s15294_s5 + $0x6d8] sm:$0xf]  ;;  %996 = vst [vmem:[#allocation5 + $0x6cc] sm:$0xf] %v995_v61 }
 0x159   :  { %998 = vst [vmem:[#allocation5 + $0x6d0] sm:$0xf] %v997_v62  ;;  %1000 = vst [vmem:[#allocation5 + $0x6d4] sm:$0xf] %v999_v63  ;;  %v1001_v0 = vld [vmem:[%s15294_s5 + $0x6cc] sm:$0xf] }
 0x15a   :  { %v1007_v2 = vld [vmem:[%s15294_s5 + $0x6f0] sm:$0xf]  ;;  %1002 = vst [vmem:[#allocation5 + $0x6d8] sm:$0xf] %v1001_v0  ;;  %1004 = vst [vmem:[#allocation5 + $0x6dc] sm:$0xff] %v1003_v1   ;;  %v1019_v8 = vld [vmem:[%s15294_s5 + $0x6fc] sm:$0xff]  }
 0x15b   :  { %1008 = vst [vmem:[#allocation5 + $0x6e4] sm:$0xf] %v1007_v2  ;;  %v1009_v3 = vld [vmem:[%s15294_s5 + $0x6e4] sm:$0xf]  ;;  %v1011_v4 = vld [vmem:[%s15294_s5 + $0x6f4] sm:$0xf] }
 0x15c   :  { %v1013_v5 = vld [vmem:[%s15294_s5 + $0x6e8] sm:$0xf]  ;;  %1010 = vst [vmem:[#allocation5 + $0x6e8] sm:$0xf] %v1009_v3  ;;  %1012 = vst [vmem:[#allocation5 + $0x6ec] sm:$0xf] %v1011_v4 }
 0x15d   :  { %1014 = vst [vmem:[#allocation5 + $0x6f0] sm:$0xf] %v1013_v5  ;;  %v1015_v6 = vld [vmem:[%s15294_s5 + $0x6f8] sm:$0xf]  ;;  %v1017_v7 = vld [vmem:[%s15294_s5 + $0x6ec] sm:$0xf] }
 0x15e   :  { %1016 = vst [vmem:[#allocation5 + $0x6f4] sm:$0xf] %v1015_v6  ;;  %1018 = vst [vmem:[#allocation5 + $0x6f8] sm:$0xf] %v1017_v7  ;;  %v1023_v9 = vld [vmem:[%s15294_s5 + $0x710] sm:$0xf] }
 0x15f   :  { %1020 = vst [vmem:[#allocation5 + $0x6fc] sm:$0xff] %v1019_v8   ;;  %v1025_v10 = vld [vmem:[%s15294_s5 + $0x704] sm:$0xf]  ;;  %v1027_v11 = vld [vmem:[%s15294_s5 + $0x714] sm:$0xf]  ;;  %v1035_v15 = vld [vmem:[%s15294_s5 + $0x71c] sm:$0xff]  }
 0x160   :  { %1024 = vst [vmem:[#allocation5 + $0x704] sm:$0xf] %v1023_v9  ;;  %1026 = vst [vmem:[#allocation5 + $0x708] sm:$0xf] %v1025_v10  ;;  %v1029_v12 = vld [vmem:[%s15294_s5 + $0x708] sm:$0xf] }
 0x161   :  { %1028 = vst [vmem:[#allocation5 + $0x70c] sm:$0xf] %v1027_v11  ;;  %v1031_v13 = vld [vmem:[%s15294_s5 + $0x718] sm:$0xf]  ;;  %v1033_v14 = vld [vmem:[%s15294_s5 + $0x70c] sm:$0xf] }
 0x162   :  { %1030 = vst [vmem:[#allocation5 + $0x710] sm:$0xf] %v1029_v12  ;;  %1032 = vst [vmem:[#allocation5 + $0x714] sm:$0xf] %v1031_v13  ;;  %v1039_v16 = vld [vmem:[%s15294_s5 + $0x730] sm:$0xf] }
 0x163   :  { %1034 = vst [vmem:[#allocation5 + $0x718] sm:$0xf] %v1033_v14  ;;  %v1041_v17 = vld [vmem:[%s15294_s5 + $0x724] sm:$0xf]  ;;  %1036 = vst [vmem:[#allocation5 + $0x71c] sm:$0xff] %v1035_v15   ;;  %v1051_v22 = vld [vmem:[%s15294_s5 + $0x73c] sm:$0xff]  }
 0x164   :  { %1040 = vst [vmem:[#allocation5 + $0x724] sm:$0xf] %v1039_v16  ;;  %1042 = vst [vmem:[#allocation5 + $0x728] sm:$0xf] %v1041_v17  ;;  %v1043_v18 = vld [vmem:[%s15294_s5 + $0x734] sm:$0xf] }
 0x165   :  { %v1045_v19 = vld [vmem:[%s15294_s5 + $0x728] sm:$0xf]  ;;  %v1047_v20 = vld [vmem:[%s15294_s5 + $0x738] sm:$0xf]  ;;  %1044 = vst [vmem:[#allocation5 + $0x72c] sm:$0xf] %v1043_v18 }
 0x166   :  { %1046 = vst [vmem:[#allocation5 + $0x730] sm:$0xf] %v1045_v19  ;;  %1048 = vst [vmem:[#allocation5 + $0x734] sm:$0xf] %v1047_v20  ;;  %v1049_v21 = vld [vmem:[%s15294_s5 + $0x72c] sm:$0xf] }
 0x167   :  { %v1055_v23 = vld [vmem:[%s15294_s5 + $0x750] sm:$0xf]  ;;  %1050 = vst [vmem:[#allocation5 + $0x738] sm:$0xf] %v1049_v21  ;;  %1052 = vst [vmem:[#allocation5 + $0x73c] sm:$0xff] %v1051_v22   ;;  %v1067_v29 = vld [vmem:[%s15294_s5 + $0x75c] sm:$0xff]  }
 0x168   :  { %1056 = vst [vmem:[#allocation5 + $0x744] sm:$0xf] %v1055_v23  ;;  %v1057_v24 = vld [vmem:[%s15294_s5 + $0x744] sm:$0xf]  ;;  %v1059_v25 = vld [vmem:[%s15294_s5 + $0x754] sm:$0xf] }
 0x169   :  { %v1061_v26 = vld [vmem:[%s15294_s5 + $0x748] sm:$0xf]  ;;  %1058 = vst [vmem:[#allocation5 + $0x748] sm:$0xf] %v1057_v24  ;;  %1060 = vst [vmem:[#allocation5 + $0x74c] sm:$0xf] %v1059_v25 }
 0x16a   :  { %1062 = vst [vmem:[#allocation5 + $0x750] sm:$0xf] %v1061_v26  ;;  %v1063_v27 = vld [vmem:[%s15294_s5 + $0x758] sm:$0xf]  ;;  %v1065_v28 = vld [vmem:[%s15294_s5 + $0x74c] sm:$0xf] }
 0x16b   :  { %1064 = vst [vmem:[#allocation5 + $0x754] sm:$0xf] %v1063_v27  ;;  %1066 = vst [vmem:[#allocation5 + $0x758] sm:$0xf] %v1065_v28  ;;  %v1071_v30 = vld [vmem:[%s15294_s5 + $0x770] sm:$0xf] }
 0x16c   :  { %1068 = vst [vmem:[#allocation5 + $0x75c] sm:$0xff] %v1067_v29   ;;  %v1073_v31 = vld [vmem:[%s15294_s5 + $0x764] sm:$0xf]  ;;  %v1075_v32 = vld [vmem:[%s15294_s5 + $0x774] sm:$0xf]  ;;  %v1083_v36 = vld [vmem:[%s15294_s5 + $0x77c] sm:$0xff]  }
 0x16d   :  { %1072 = vst [vmem:[#allocation5 + $0x764] sm:$0xf] %v1071_v30  ;;  %1074 = vst [vmem:[#allocation5 + $0x768] sm:$0xf] %v1073_v31  ;;  %v1077_v33 = vld [vmem:[%s15294_s5 + $0x768] sm:$0xf] }
 0x16e   :  { %1076 = vst [vmem:[#allocation5 + $0x76c] sm:$0xf] %v1075_v32  ;;  %v1079_v34 = vld [vmem:[%s15294_s5 + $0x778] sm:$0xf]  ;;  %v1081_v35 = vld [vmem:[%s15294_s5 + $0x76c] sm:$0xf] }
 0x16f   :  { %1078 = vst [vmem:[#allocation5 + $0x770] sm:$0xf] %v1077_v33  ;;  %1080 = vst [vmem:[#allocation5 + $0x774] sm:$0xf] %v1079_v34  ;;  %v1087_v37 = vld [vmem:[%s15294_s5 + $0x790] sm:$0xf] }
 0x170   :  { %1082 = vst [vmem:[#allocation5 + $0x778] sm:$0xf] %v1081_v35  ;;  %v1089_v38 = vld [vmem:[%s15294_s5 + $0x784] sm:$0xf]  ;;  %1084 = vst [vmem:[#allocation5 + $0x77c] sm:$0xff] %v1083_v36   ;;  %v1099_v43 = vld [vmem:[%s15294_s5 + $0x79c] sm:$0xff]  }
 0x171   :  { %1088 = vst [vmem:[#allocation5 + $0x784] sm:$0xf] %v1087_v37  ;;  %1090 = vst [vmem:[#allocation5 + $0x788] sm:$0xf] %v1089_v38  ;;  %v1091_v39 = vld [vmem:[%s15294_s5 + $0x794] sm:$0xf] }
 0x172   :  { %v1093_v40 = vld [vmem:[%s15294_s5 + $0x788] sm:$0xf]  ;;  %v1095_v41 = vld [vmem:[%s15294_s5 + $0x798] sm:$0xf]  ;;  %1092 = vst [vmem:[#allocation5 + $0x78c] sm:$0xf] %v1091_v39 }
 0x173   :  { %1094 = vst [vmem:[#allocation5 + $0x790] sm:$0xf] %v1093_v40  ;;  %1096 = vst [vmem:[#allocation5 + $0x794] sm:$0xf] %v1095_v41  ;;  %v1097_v42 = vld [vmem:[%s15294_s5 + $0x78c] sm:$0xf] }
 0x174   :  { %v1103_v44 = vld [vmem:[%s15294_s5 + $0x7b0] sm:$0xf]  ;;  %1098 = vst [vmem:[#allocation5 + $0x798] sm:$0xf] %v1097_v42  ;;  %1100 = vst [vmem:[#allocation5 + $0x79c] sm:$0xff] %v1099_v43   ;;  %v1115_v50 = vld [vmem:[%s15294_s5 + $0x7bc] sm:$0xff]  }
 0x175   :  { %1104 = vst [vmem:[#allocation5 + $0x7a4] sm:$0xf] %v1103_v44  ;;  %v1105_v45 = vld [vmem:[%s15294_s5 + $0x7a4] sm:$0xf]  ;;  %v1107_v46 = vld [vmem:[%s15294_s5 + $0x7b4] sm:$0xf] }
 0x176   :  { %v1109_v47 = vld [vmem:[%s15294_s5 + $0x7a8] sm:$0xf]  ;;  %1106 = vst [vmem:[#allocation5 + $0x7a8] sm:$0xf] %v1105_v45  ;;  %1108 = vst [vmem:[#allocation5 + $0x7ac] sm:$0xf] %v1107_v46 }
 0x177   :  { %1110 = vst [vmem:[#allocation5 + $0x7b0] sm:$0xf] %v1109_v47  ;;  %v1111_v48 = vld [vmem:[%s15294_s5 + $0x7b8] sm:$0xf]  ;;  %v1113_v49 = vld [vmem:[%s15294_s5 + $0x7ac] sm:$0xf] }
 0x178   :  { %1112 = vst [vmem:[#allocation5 + $0x7b4] sm:$0xf] %v1111_v48  ;;  %1114 = vst [vmem:[#allocation5 + $0x7b8] sm:$0xf] %v1113_v49  ;;  %v1119_v51 = vld [vmem:[%s15294_s5 + $0x7d0] sm:$0xf] }
 0x179   :  { %1116 = vst [vmem:[#allocation5 + $0x7bc] sm:$0xff] %v1115_v50   ;;  %v1121_v52 = vld [vmem:[%s15294_s5 + $0x7c4] sm:$0xf]  ;;  %v1123_v53 = vld [vmem:[%s15294_s5 + $0x7d4] sm:$0xf]  ;;  %v1131_v57 = vld [vmem:[%s15294_s5 + $0x7dc] sm:$0xff]  }
 0x17a   :  { %1120 = vst [vmem:[#allocation5 + $0x7c4] sm:$0xf] %v1119_v51  ;;  %1122 = vst [vmem:[#allocation5 + $0x7c8] sm:$0xf] %v1121_v52  ;;  %v1125_v54 = vld [vmem:[%s15294_s5 + $0x7c8] sm:$0xf] }
 0x17b   :  { %1124 = vst [vmem:[#allocation5 + $0x7cc] sm:$0xf] %v1123_v53  ;;  %v1127_v55 = vld [vmem:[%s15294_s5 + $0x7d8] sm:$0xf]  ;;  %v1129_v56 = vld [vmem:[%s15294_s5 + $0x7cc] sm:$0xf] }
 0x17c   :  { %1126 = vst [vmem:[#allocation5 + $0x7d0] sm:$0xf] %v1125_v54  ;;  %1128 = vst [vmem:[#allocation5 + $0x7d4] sm:$0xf] %v1127_v55  ;;  %v1135_v58 = vld [vmem:[%s15294_s5 + $0x7f0] sm:$0xf] }
 0x17d   :  { %1130 = vst [vmem:[#allocation5 + $0x7d8] sm:$0xf] %v1129_v56  ;;  %v1137_v59 = vld [vmem:[%s15294_s5 + $0x7e4] sm:$0xf]  ;;  %1132 = vst [vmem:[#allocation5 + $0x7dc] sm:$0xff] %v1131_v57  }
 0x17e   :  { %1136 = vst [vmem:[#allocation5 + $0x7e4] sm:$0xf] %v1135_v58  ;;  %1138 = vst [vmem:[#allocation5 + $0x7e8] sm:$0xf] %v1137_v59  ;;  %v1139_v60 = vld [vmem:[%s15294_s5 + $0x7f4] sm:$0xf] }
 0x17f   :  { %v1141_v61 = vld [vmem:[%s15294_s5 + $0x7e8] sm:$0xf]  ;;  %v1143_v62 = vld [vmem:[%s15294_s5 + $0x7f8] sm:$0xf]  ;;  %1140 = vst [vmem:[#allocation5 + $0x7ec] sm:$0xf] %v1139_v60 }
 0x180   :  { %1142 = vst [vmem:[#allocation5 + $0x7f0] sm:$0xf] %v1141_v61  ;;  %1144 = vst [vmem:[#allocation5 + $0x7f4] sm:$0xf] %v1143_v62  ;;  %v1145_v63 = vld [vmem:[%s15294_s5 + $0x7ec] sm:$0xf] }
 0x181   :  { %v1147_v0 = vld [vmem:[%s15294_s5 + $0x7fc] sm:$0xf]  ;;  %1146 = vst [vmem:[#allocation5 + $0x7f8] sm:$0xf] %v1145_v63 }
 0x182   :  { %1148 = vst [vmem:[#allocation5 + $0x7fc] sm:$0xf] %v1147_v0 }
 0x183   :  { %4284 = vsyncadd [#allocation7], 32768  ;;  %s4290_s29 = sld [smem:[#allocation0]]   ;;  %s11567_s30 = smov [#allocation6]   ;;  %vm4569_vm0 = vcmask 392192  }
 0x184   :  { %s4298_s12 = sshll.u32 %s11567_s30, 4  ;;  %s11568_s13 = smov 1024   ;;  %s4299_s12 = int_to_ptr.vmem [resolvable:$true] %s4298_s12 }
 0x185   :  { %4302 = sst [smem:[#allocation21]] %s11568_s13  ;;  %s11569_s14 = smov 8  }
 0x186   :  { %4304 = sst [smem:[#allocation21 + $0x1]] %s11568_s13  ;;  %s11570_s15 = smov 128  }
 0x187   :  { %4306 = sst [smem:[#allocation21 + $0x2]] %s11569_s14  ;;  %s11571_s4 = smov 2  }
 0x188   :  { %4308 = sst [smem:[#allocation21 + $0x3]] %s11562_s6  ;;  %s11572_s5 = smov 512  }
 0x189   :  { %s10752_s9 = sshll.u32 %s4290_s29, 26  ;;  %4310 = sst [smem:[#allocation21 + $0x4]] %s11570_s15 }
 0x18a   :  { %s10753_s17 = sadd.s32 134217728, %s10752_s9  ;;  %4312 = sst [smem:[#allocation21 + $0x5]] %s11571_s4 }
 0x18b   :  { %4316 = sst [smem:[#allocation21 + $0x7]] %s11562_s6  ;;  %s11573_s16 = smov [#allocation7 + $0x1]  }
 0x18c   :  { %4314 = sst [smem:[#allocation21 + $0x6]] %s11572_s5  ;;  %s11574_s21 = smov [#allocation20]  }
 0x18d   :  { %4318 = sst [smem:[#allocation21 + $0x8]] %s11563_s20 }
 0x18e   :  { %4320 = dma.general %s15296_s7, 131072, %s4299_s12, %s11573_s16, %s11574_s21, [#allocation21], %s10753_s17, 0  }
 0x18f   :  { %v11250_v1 = vld [vmem:[#allocation9] sm:$0xff]   ;;  %v11251_v2 = vld [vmem:[#allocation9 + $0x8] sm:$0xff]   ;;  %v11252_v4 = vld [vmem:[#allocation9 + $0x10] sm:$0xff]  }
 0x190   :  { %10971 = vmatprep.subr.bf16.mxu0 %v11250_v1  ;;  %v11253_v3 = vld [vmem:[%s15289_s0] sm:$0xff]   ;;  %v11254_v5 = vld [vmem:[%s15289_s0 + $0x8] sm:$0xff]   ;;  %v11255_v6 = vld [vmem:[%s15289_s0 + $0x10] sm:$0xff]  }
 0x191   :  { %10972 = vmatpush3.bf16.msra.mxu0 %v11250_v1  ;;  %10977 = vmatprep.mubr.msk.bf16.mxu0 %vm4569_vm0, %v11253_v3  ;;  %v11256_v7 = vld [vmem:[%s15289_s0 + $0x18] sm:$0xff]   ;;  %v11257_v8 = vld [vmem:[%s15289_s0 + $0x20] sm:$0xff]   ;;  %v11258_v9 = vld [vmem:[%s15289_s0 + $0x28] sm:$0xff]  }
 0x192   :  { %10973 = vmatprep.subr.bf16.mxu0 %v11251_v2  ;;  %v11259_v10 = vld [vmem:[%s15289_s0 + $0x30] sm:$0xff]   ;;  %v11260_v11 = vld [vmem:[%s15289_s0 + $0x38] sm:$0xff]   ;;  %v11261_v12 = vld [vmem:[%s15289_s0 + $0x40] sm:$0xff]  }
 0x193   :  { %v11262_v13 = vld [vmem:[%s15289_s0 + $0x48] sm:$0xff]   ;;  %v11263_v14 = vld [vmem:[%s15289_s0 + $0x50] sm:$0xff]   ;;  %v11264_v15 = vld [vmem:[%s15289_s0 + $0x58] sm:$0xff]  }
 0x194   :  { %v11265_v16 = vld [vmem:[%s15289_s0 + $0x60] sm:$0xff]   ;;  %v11266_v17 = vld [vmem:[%s15289_s0 + $0x68] sm:$0xff]   ;;  %v11267_v18 = vld [vmem:[%s15289_s0 + $0x70] sm:$0xff]  }
 0x195   :  { %10974 = vmatpush3.bf16.msra.mxu0 %v11251_v2  ;;  %v11268_v19 = vld [vmem:[%s15289_s0 + $0x78] sm:$0xff]   ;;  %v11269_v20 = vld [vmem:[%s15289_s0 + $0x80] sm:$0xff]   ;;  %v11270_v21 = vld [vmem:[%s15289_s0 + $0x88] sm:$0xff]  }
 0x196   :  { %10975 = vmatprep.subr.bf16.mxu0 %v11252_v4  ;;  %v11271_v22 = vld [vmem:[%s15289_s0 + $0x90] sm:$0xff]   ;;  %v11272_v23 = vld [vmem:[%s15289_s0 + $0x98] sm:$0xff]   ;;  %v11273_v24 = vld [vmem:[%s15289_s0 + $0xa0] sm:$0xff]  }
 0x197   :  { %v11274_v25 = vld [vmem:[%s15289_s0 + $0xa8] sm:$0xff]   ;;  %v11275_v26 = vld [vmem:[%s15289_s0 + $0xb0] sm:$0xff]   ;;  %v11276_v27 = vld [vmem:[%s15289_s0 + $0xb8] sm:$0xff]  }
 0x198   :  { %v11277_v28 = vld [vmem:[%s15289_s0 + $0xc0] sm:$0xff]   ;;  %v11278_v29 = vld [vmem:[%s15289_s0 + $0xc8] sm:$0xff]   ;;  %v11279_v30 = vld [vmem:[%s15289_s0 + $0xd0] sm:$0xff]  }
 0x199   :  { %10976 = vmatpush3.bf16.msra.mxu0 %v11252_v4  ;;  %v11280_v31 = vld [vmem:[%s15289_s0 + $0xd8] sm:$0xff]   ;;  %v11281_v32 = vld [vmem:[%s15289_s0 + $0xe0] sm:$0xff]   ;;  %v11282_v33 = vld [vmem:[%s15289_s0 + $0xe8] sm:$0xff]  }
 0x19a   :  { %v11283_v34 = vld [vmem:[%s15289_s0 + $0xf0] sm:$0xff]   ;;  %v11284_v35 = vld [vmem:[%s15289_s0 + $0xf8] sm:$0xff]  }
 0x19c   :  { %10978 = vmatmul.mubr.msk.bf16.vlgmr.msra.gmra.mrb[0].mxu0 %vm4569_vm0, %v11254_v5 }
 0x19d   :  { %10981 = vmatprep.mubr.msk.bf16.mxu0 %vm4569_vm0, %v11255_v6 }
 0x1a4   :  { %10982 = vmatmul.mubr.msk.bf16.gmra.mrb[4].mxu0 %vm4569_vm0, %v11256_v7 }
 0x1a5   :  { %10985 = vmatprep.mubr.msk.bf16.mxu0 %vm4569_vm0, %v11257_v8 }
 0x1ac   :  { %10986 = vmatmul.mubr.msk.bf16.gmra.mrb[8].mxu0 %vm4569_vm0, %v11258_v9 }
 0x1ad   :  { %10989 = vmatprep.mubr.msk.bf16.mxu0 %vm4569_vm0, %v11259_v10 }
 0x1b4   :  { %10990 = vmatmul.mubr.msk.bf16.gmra.mrb[12].mxu0 %vm4569_vm0, %v11260_v11 }
 0x1b5   :  { %10993 = vmatprep.mubr.msk.bf16.mxu0 %vm4569_vm0, %v11261_v12 }
 0x1bc   :  { %10994 = vmatmul.mubr.msk.bf16.gmra.mrb[16].mxu0 %vm4569_vm0, %v11262_v13 }
 0x1bd   :  { %10997 = vmatprep.mubr.msk.bf16.mxu0 %vm4569_vm0, %v11263_v14 }
 0x1c4   :  { %10998 = vmatmul.mubr.msk.bf16.gmra.mrb[20].mxu0 %vm4569_vm0, %v11264_v15 }
 0x1c5   :  { %11001 = vmatprep.mubr.msk.bf16.mxu0 %vm4569_vm0, %v11265_v16 }
 0x1cc   :  { %11002 = vmatmul.mubr.msk.bf16.gmra.mrb[24].mxu0 %vm4569_vm0, %v11266_v17 }
 0x1cd   :  { %11005 = vmatprep.mubr.msk.bf16.mxu0 %vm4569_vm0, %v11267_v18 }
 0x1d4   :  { %11006 = vmatmul.mubr.msk.bf16.gmra.mrb[28].mxu0 %vm4569_vm0, %v11268_v19 }
 0x1d5   :  { %11009 = vmatprep.mubr.msk.bf16.mxu0 %vm4569_vm0, %v11269_v20 }
 0x1dc   :  { %11010 = vmatmul.mubr.msk.bf16.gmra.mrb[32].mxu0 %vm4569_vm0, %v11270_v21 }
 0x1dd   :  { %11013 = vmatprep.mubr.msk.bf16.mxu0 %vm4569_vm0, %v11271_v22 }
 0x1e4   :  { %11014 = vmatmul.mubr.msk.bf16.gmra.mrb[36].mxu0 %vm4569_vm0, %v11272_v23 }
 0x1e5   :  { %11017 = vmatprep.mubr.msk.bf16.mxu0 %vm4569_vm0, %v11273_v24 }
 0x1ec   :  { %11018 = vmatmul.mubr.msk.bf16.gmra.mrb[40].mxu0 %vm4569_vm0, %v11274_v25 }
 0x1ed   :  { %11021 = vmatprep.mubr.msk.bf16.mxu0 %vm4569_vm0, %v11275_v26 }
 0x1f4   :  { %11022 = vmatmul.mubr.msk.bf16.gmra.mrb[44].mxu0 %vm4569_vm0, %v11276_v27 }
 0x1f5   :  { %11025 = vmatprep.mubr.msk.bf16.mxu0 %vm4569_vm0, %v11277_v28 }
 0x1fc   :  { %11026 = vmatmul.mubr.msk.bf16.gmra.mrb[48].mxu0 %vm4569_vm0, %v11278_v29 }
 0x1fd   :  { %11029 = vmatprep.mubr.msk.bf16.mxu0 %vm4569_vm0, %v11279_v30 }
 0x204   :  { %11030 = vmatmul.mubr.msk.bf16.gmra.mrb[52].mxu0 %vm4569_vm0, %v11280_v31 }
 0x205   :  { %11033 = vmatprep.mubr.msk.bf16.mxu0 %vm4569_vm0, %v11281_v32 }
 0x20c   :  { %11034 = vmatmul.mubr.msk.bf16.gmra.mrb[56].mxu0 %vm4569_vm0, %v11282_v33 }
 0x20d   :  { %11037 = vmatprep.mubr.msk.bf16.mxu0 %vm4569_vm0, %v11283_v34 }
 0x214   :  { %11038 = vmatmul.mubr.msk.bf16.gmra.mrb[60].mxu0 %vm4569_vm0, %v11284_v35 }
 0x26f   :  { %v13192_v36 = vpop.f32.mrb[0].mxu0 }
 0x270   :  { %v13194_v37 = vpop.f32.mrb[1].mxu0 }
 0x271   :  { %v13196_v38 = vpop.f32.mrb[2].mxu0 }
 0x272   :  { %v13198_v39 = vpop.f32.mrb[3].mxu0 }
 0x273   :  { %v4956_v40 = vadd.f32 %v13198_v39, %v13194_v37 }
 0x275   :  { %v4957_v41 = vadd.f32 %v13192_v36, %v4956_v40 }
 0x277   :  { %v13203_v42 = vpop.f32.mrb[4].mxu0  ;;  %v4958_v43 = vadd.f32 %v13196_v38, %v4957_v41 }
 0x278   :  { %v13206_v44 = vpop.f32.mrb[5].mxu0 }
 0x279   :  { %v4959_v45 = vadd.f32 %v4958_v43, %v13206_v44  ;;  %v13209_v46 = vpop.f32.mrb[6].mxu0 }
 0x27a   :  { %v13211_v47 = vpop.f32.mrb[7].mxu0 }
 0x27b   :  { %v4960_v48 = vadd.f32 %v4959_v45, %v13211_v47 }
 0x27d   :  { %v4961_v49 = vadd.f32 %v13203_v42, %v4960_v48 }
 0x27f   :  { %v13215_v50 = vpop.f32.mrb[8].mxu0  ;;  %v4962_v51 = vadd.f32 %v13209_v46, %v4961_v49 }
 0x280   :  { %v13218_v52 = vpop.f32.mrb[9].mxu0 }
 0x281   :  { %v4963_v53 = vadd.f32 %v4962_v51, %v13218_v52  ;;  %v13221_v54 = vpop.f32.mrb[10].mxu0 }
 0x282   :  { %v13223_v55 = vpop.f32.mrb[11].mxu0 }
 0x283   :  { %v4964_v56 = vadd.f32 %v4963_v53, %v13223_v55 }
 0x285   :  { %v4965_v57 = vadd.f32 %v13215_v50, %v4964_v56 }
 0x287   :  { %v13227_v58 = vpop.f32.mrb[12].mxu0  ;;  %v4966_v59 = vadd.f32 %v13221_v54, %v4965_v57 }
 0x288   :  { %v13230_v60 = vpop.f32.mrb[13].mxu0 }
 0x289   :  { %v4967_v61 = vadd.f32 %v4966_v59, %v13230_v60  ;;  %v13233_v62 = vpop.f32.mrb[14].mxu0 }
 0x28a   :  { %v13235_v63 = vpop.f32.mrb[15].mxu0 }
 0x28b   :  { %v4968_v0 = vadd.f32 %v4967_v61, %v13235_v63 }
 0x28d   :  { %v4969_v1 = vadd.f32 %v13227_v58, %v4968_v0 }
 0x28f   :  { %v13239_v2 = vpop.f32.mrb[16].mxu0  ;;  %v4970_v3 = vadd.f32 %v13233_v62, %v4969_v1 }
 0x290   :  { %v13242_v4 = vpop.f32.mrb[17].mxu0 }
 0x291   :  { %v4971_v5 = vadd.f32 %v4970_v3, %v13242_v4  ;;  %v13245_v6 = vpop.f32.mrb[18].mxu0 }
 0x292   :  { %v13247_v7 = vpop.f32.mrb[19].mxu0 }
 0x293   :  { %v4972_v8 = vadd.f32 %v4971_v5, %v13247_v7 }
 0x295   :  { %v4973_v9 = vadd.f32 %v13239_v2, %v4972_v8 }
 0x297   :  { %v13251_v10 = vpop.f32.mrb[20].mxu0  ;;  %v4974_v11 = vadd.f32 %v13245_v6, %v4973_v9 }
 0x298   :  { %v13254_v12 = vpop.f32.mrb[21].mxu0 }
 0x299   :  { %v4975_v13 = vadd.f32 %v4974_v11, %v13254_v12  ;;  %v13257_v14 = vpop.f32.mrb[22].mxu0 }
 0x29a   :  { %v13259_v15 = vpop.f32.mrb[23].mxu0 }
 0x29b   :  { %v4976_v16 = vadd.f32 %v4975_v13, %v13259_v15 }
 0x29d   :  { %v4977_v17 = vadd.f32 %v13251_v10, %v4976_v16 }
 0x29f   :  { %v13263_v18 = vpop.f32.mrb[24].mxu0  ;;  %v4978_v19 = vadd.f32 %v13257_v14, %v4977_v17 }
 0x2a0   :  { %v13266_v20 = vpop.f32.mrb[25].mxu0 }
 0x2a1   :  { %v4979_v21 = vadd.f32 %v4978_v19, %v13266_v20  ;;  %v13269_v22 = vpop.f32.mrb[26].mxu0 }
 0x2a2   :  { %v13271_v23 = vpop.f32.mrb[27].mxu0 }
 0x2a3   :  { %v4980_v24 = vadd.f32 %v4979_v21, %v13271_v23 }
 0x2a5   :  { %v4981_v25 = vadd.f32 %v13263_v18, %v4980_v24 }
 0x2a7   :  { %v13275_v26 = vpop.f32.mrb[28].mxu0  ;;  %v4982_v27 = vadd.f32 %v13269_v22, %v4981_v25 }
 0x2a8   :  { %v13278_v28 = vpop.f32.mrb[29].mxu0 }
 0x2a9   :  { %v4983_v29 = vadd.f32 %v4982_v27, %v13278_v28  ;;  %v13281_v30 = vpop.f32.mrb[30].mxu0 }
 0x2aa   :  { %v13283_v31 = vpop.f32.mrb[31].mxu0 }
 0x2ab   :  { %v4984_v32 = vadd.f32 %v4983_v29, %v13283_v31 }
 0x2ad   :  { %v4985_v33 = vadd.f32 %v13275_v26, %v4984_v32 }
 0x2af   :  { %v13287_v34 = vpop.f32.mrb[32].mxu0  ;;  %v4986_v35 = vadd.f32 %v13281_v30, %v4985_v33 }
 0x2b0   :  { %v13290_v40 = vpop.f32.mrb[33].mxu0 }
 0x2b1   :  { %v4987_v41 = vadd.f32 %v4986_v35, %v13290_v40  ;;  %v13293_v43 = vpop.f32.mrb[34].mxu0 }
 0x2b2   :  { %v13295_v45 = vpop.f32.mrb[35].mxu0 }
 0x2b3   :  { %v4988_v48 = vadd.f32 %v4987_v41, %v13295_v45 }
 0x2b5   :  { %v4989_v49 = vadd.f32 %v13287_v34, %v4988_v48 }
 0x2b7   :  { %v13299_v51 = vpop.f32.mrb[36].mxu0  ;;  %v4990_v53 = vadd.f32 %v13293_v43, %v4989_v49 }
 0x2b8   :  { %v13302_v56 = vpop.f32.mrb[37].mxu0 }
 0x2b9   :  { %v4991_v57 = vadd.f32 %v4990_v53, %v13302_v56  ;;  %v13305_v59 = vpop.f32.mrb[38].mxu0 }
 0x2ba   :  { %v13307_v61 = vpop.f32.mrb[39].mxu0 }
 0x2bb   :  { %v4992_v0 = vadd.f32 %v4991_v57, %v13307_v61 }
 0x2bd   :  { %v4993_v1 = vadd.f32 %v13299_v51, %v4992_v0 }
 0x2bf   :  { %v13311_v3 = vpop.f32.mrb[40].mxu0  ;;  %v4994_v5 = vadd.f32 %v13305_v59, %v4993_v1 }
 0x2c0   :  { %v13314_v8 = vpop.f32.mrb[41].mxu0 }
 0x2c1   :  { %v4995_v9 = vadd.f32 %v4994_v5, %v13314_v8  ;;  %v13317_v11 = vpop.f32.mrb[42].mxu0 }
 0x2c2   :  { %v13319_v13 = vpop.f32.mrb[43].mxu0 }
 0x2c3   :  { %v4996_v16 = vadd.f32 %v4995_v9, %v13319_v13 }
 0x2c5   :  { %v4997_v17 = vadd.f32 %v13311_v3, %v4996_v16 }
 0x2c7   :  { %v13323_v19 = vpop.f32.mrb[44].mxu0  ;;  %v4998_v21 = vadd.f32 %v13317_v11, %v4997_v17 }
 0x2c8   :  { %v13326_v24 = vpop.f32.mrb[45].mxu0 }
 0x2c9   :  { %v4999_v25 = vadd.f32 %v4998_v21, %v13326_v24  ;;  %v13329_v27 = vpop.f32.mrb[46].mxu0 }
 0x2ca   :  { %v13331_v29 = vpop.f32.mrb[47].mxu0 }
 0x2cb   :  { %v5000_v32 = vadd.f32 %v4999_v25, %v13331_v29 }
 0x2cd   :  { %v5001_v33 = vadd.f32 %v13323_v19, %v5000_v32 }
 0x2cf   :  { %v13335_v35 = vpop.f32.mrb[48].mxu0  ;;  %v5002_v41 = vadd.f32 %v13329_v27, %v5001_v33 }
 0x2d0   :  { %15342 = vst [vmem:[#allocation28_spill] sm:$0xff] %v13335_v35  ;;  %v13338_v48 = vpop.f32.mrb[49].mxu0 }
 0x2d1   :  { %15343 = vst [vmem:[#allocation29_spill] sm:$0xff] %v13338_v48  ;;  %v5003_v49 = vadd.f32 %v5002_v41, %v13338_v48  ;;  %v13341_v53 = vpop.f32.mrb[50].mxu0 }
 0x2d2   :  { %15344 = vst [vmem:[#allocation30_spill] sm:$0xff] %v13341_v53  ;;  %v13343_v57 = vpop.f32.mrb[51].mxu0 }
 0x2d3   :  { %15345 = vst [vmem:[#allocation31_spill] sm:$0xff] %v13343_v57  ;;  %v5004_v0 = vadd.f32 %v5003_v49, %v13343_v57 }
 0x2d5   :  { %v5005_v1 = vadd.f32 %v13335_v35, %v5004_v0 }
 0x2d7   :  { %v13347_v5 = vpop.f32.mrb[52].mxu0  ;;  %v5006_v9 = vadd.f32 %v13341_v53, %v5005_v1 }
 0x2d8   :  { %15346 = vst [vmem:[#allocation32_spill] sm:$0xff] %v13347_v5  ;;  %v13350_v16 = vpop.f32.mrb[53].mxu0 }
 0x2d9   :  { %15347 = vst [vmem:[#allocation33_spill] sm:$0xff] %v13350_v16  ;;  %v5007_v17 = vadd.f32 %v5006_v9, %v13350_v16  ;;  %v13353_v21 = vpop.f32.mrb[54].mxu0 }
 0x2da   :  { %15348 = vst [vmem:[#allocation34_spill] sm:$0xff] %v13353_v21  ;;  %v13355_v25 = vpop.f32.mrb[55].mxu0 }
 0x2db   :  { %15349 = vst [vmem:[#allocation35_spill] sm:$0xff] %v13355_v25  ;;  %v5008_v32 = vadd.f32 %v5007_v17, %v13355_v25 }
 0x2dd   :  { %v5009_v33 = vadd.f32 %v13347_v5, %v5008_v32 }
 0x2df   :  { %v13359_v41 = vpop.f32.mrb[56].mxu0  ;;  %v5010_v49 = vadd.f32 %v13353_v21, %v5009_v33 }
 0x2e0   :  { %15350 = vst [vmem:[#allocation36_spill] sm:$0xff] %v13359_v41  ;;  %v13362_v0 = vpop.f32.mrb[57].mxu0 }
 0x2e1   :  { %15351 = vst [vmem:[#allocation37_spill] sm:$0xff] %v13362_v0  ;;  %v5011_v1 = vadd.f32 %v5010_v49, %v13362_v0  ;;  %v13365_v53 = vpop.f32.mrb[58].mxu0 }
 0x2e2   :  { %15352 = vst [vmem:[#allocation38_spill] sm:$0xff] %v13365_v53  ;;  %v13367_v35 = vpop.f32.mrb[59].mxu0 }
 0x2e3   :  { %15353 = vst [vmem:[#allocation39_spill] sm:$0xff] %v13367_v35  ;;  %v5012_v9 = vadd.f32 %v5011_v1, %v13367_v35 }
 0x2e5   :  { %v5013_v16 = vadd.f32 %v13359_v41, %v5012_v9 }
 0x2e7   :  { %v13371_v57 = vpop.f32.mrb[60].mxu0  ;;  %v5014_v17 = vadd.f32 %v13365_v53, %v5013_v16 }
 0x2e8   :  { %v13374_v32 = vpop.f32.mrb[61].mxu0 }
 0x2e9   :  { %15354 = vst [vmem:[#allocation40_spill] sm:$0xff] %v13374_v32  ;;  %v5015_v33 = vadd.f32 %v5014_v17, %v13374_v32  ;;  %v13377_v21 = vpop.f32.mrb[62].mxu0 }
 0x2ea   :  { %v13379_v5 = vpop.f32.mrb[63].mxu0 }
 0x2eb   :  { %v5016_v49 = vadd.f32 %v5015_v33, %v13379_v5 }
 0x2ed   :  { %v5017_v0 = vadd.f32 %v13371_v57, %v5016_v49  ;;  %v15377_v49 = vld [vmem:[#allocation30_spill] sm:$0xff] }
 0x2ef   :  { %v5018_v1 = vadd.f32 %v13377_v21, %v5017_v0  ;;  %v15375_v0 = vld [vmem:[#allocation28_spill] sm:$0xff] }
 0x2f1   :  { %v5019_v35 = vrot.slane %v5018_v1, 4 }
 0x2f3   :  { %v5020_v9 = vadd.f32 %v5019_v35, %v5018_v1  ;;  %v15379_v1 = vld [vmem:[#allocation33_spill] sm:$0xff] }
 0x2f5   :  { %v5021_v41 = vrot.slane %v5020_v9, 2 }
 0x2f7   :  { %v5022_v25 = vadd.f32 %v5021_v41, %v5020_v9  ;;  %v15373_v41 = vld [vmem:[#allocation31_spill] sm:$0xff] }
 0x2f8   :  { %v15381_v9 = vld [vmem:[#allocation35_spill] sm:$0xff] }
 0x2f9   :  { %v5023_v48 = vrot.slane %v5022_v25, 1 }
 0x2fb   :  { %v5024_v16 = vadd.f32 %v5023_v48, %v5022_v25  ;;  %v15371_v25 = vld [vmem:[#allocation29_spill] sm:$0xff] }
 0x2fd   :  { %v13384_v53 = vmul.f32 0.001953125, %v5024_v16 }
 0x2ff   :  { %v13388_v17 = vsub.f32 %v13194_v37, %v13384_v53  ;;  %v13392_v32 = vsub.f32 %v13198_v39, %v13384_v53  ;;  %v13396_v33 = vsub.f32 %v13192_v36, %v13384_v53  ;;  %v13400_v35 = vsub.f32 %v13196_v38, %v13384_v53 }
 0x300   :  { %v13404_v48 = vsub.f32 %v13206_v44, %v13384_v53  ;;  %v13408_v37 = vsub.f32 %v13211_v47, %v13384_v53  ;;  %v13412_v39 = vsub.f32 %v13203_v42, %v13384_v53  ;;  %v13416_v36 = vsub.f32 %v13209_v46, %v13384_v53 }
 0x301   :  { %15355 = vst [vmem:[#allocation41_spill] sm:$0xff] %v13392_v32  ;;  %15356 = vst [vmem:[#allocation42_spill] sm:$0xff] %v13396_v33  ;;  %v13420_v38 = vsub.f32 %v13218_v52, %v13384_v53  ;;  %v13424_v44 = vsub.f32 %v13223_v55, %v13384_v53  ;;  %v13428_v47 = vsub.f32 %v13215_v50, %v13384_v53 }
 0x302   :  { %v13432_v42 = vsub.f32 %v13221_v54, %v13384_v53  ;;  %v13436_v46 = vsub.f32 %v13230_v60, %v13384_v53  ;;  %v13440_v52 = vsub.f32 %v13235_v63, %v13384_v53  ;;  %v13444_v55 = vsub.f32 %v13227_v58, %v13384_v53 }
 0x303   :  { %15357 = vst [vmem:[#allocation43_spill] sm:$0xff] %v13420_v38  ;;  %15358 = vst [vmem:[#allocation44_spill] sm:$0xff] %v13424_v44  ;;  %v13448_v50 = vsub.f32 %v13233_v62, %v13384_v53  ;;  %v13452_v54 = vsub.f32 %v13242_v4, %v13384_v53  ;;  %v13456_v60 = vsub.f32 %v13247_v7, %v13384_v53 }
 0x304   :  { %15359 = vst [vmem:[#allocation45_spill] sm:$0xff] %v13428_v47  ;;  %15360 = vst [vmem:[#allocation46_spill] sm:$0xff] %v13432_v42  ;;  %v13460_v63 = vsub.f32 %v13239_v2, %v13384_v53  ;;  %v13464_v58 = vsub.f32 %v13245_v6, %v13384_v53  ;;  %v13468_v62 = vsub.f32 %v13254_v12, %v13384_v53 }
 0x305   :  { %15361 = vst [vmem:[#allocation47_spill] sm:$0xff] %v13436_v46  ;;  %15362 = vst [vmem:[#allocation48_spill] sm:$0xff] %v13440_v52  ;;  %v13472_v4 = vsub.f32 %v13259_v15, %v13384_v53  ;;  %v13476_v7 = vsub.f32 %v13251_v10, %v13384_v53  ;;  %v13480_v2 = vsub.f32 %v13257_v14, %v13384_v53 }
 0x306   :  { %15363 = vst [vmem:[#allocation49_spill] sm:$0xff] %v13444_v55  ;;  %15364 = vst [vmem:[#allocation50_spill] sm:$0xff] %v13448_v50  ;;  %v13484_v6 = vsub.f32 %v13266_v20, %v13384_v53  ;;  %v13488_v12 = vsub.f32 %v13271_v23, %v13384_v53  ;;  %v13492_v15 = vsub.f32 %v13263_v18, %v13384_v53 }
 0x307   :  { %v13496_v10 = vsub.f32 %v13269_v22, %v13384_v53  ;;  %v13500_v14 = vsub.f32 %v13278_v28, %v13384_v53  ;;  %v13504_v20 = vsub.f32 %v13283_v31, %v13384_v53  ;;  %v13508_v23 = vsub.f32 %v13275_v26, %v13384_v53 }
 0x308   :  { %15365 = vst [vmem:[#allocation51_spill] sm:$0xff] %v13492_v15  ;;  %v13512_v18 = vsub.f32 %v13281_v30, %v13384_v53  ;;  %v13516_v22 = vsub.f32 %v13290_v40, %v13384_v53  ;;  %v13520_v28 = vsub.f32 %v13295_v45, %v13384_v53  ;;  %v13524_v31 = vsub.f32 %v13287_v34, %v13384_v53 }
 0x309   :  { %15366 = vst [vmem:[#allocation52_spill] sm:$0xff] %v13496_v10  ;;  %15367 = vst [vmem:[#allocation53_spill] sm:$0xff] %v13500_v14  ;;  %v13528_v26 = vsub.f32 %v13293_v43, %v13384_v53  ;;  %v13532_v30 = vsub.f32 %v13302_v56, %v13384_v53  ;;  %v13536_v40 = vsub.f32 %v13307_v61, %v13384_v53 }
 0x30a   :  { %15368 = vst [vmem:[#allocation54_spill] sm:$0xff] %v13504_v20  ;;  %15369 = vst [vmem:[#allocation55_spill] sm:$0xff] %v13508_v23  ;;  %v13540_v45 = vsub.f32 %v13299_v51, %v13384_v53  ;;  %v13544_v34 = vsub.f32 %v13305_v59, %v13384_v53  ;;  %v13548_v43 = vsub.f32 %v13314_v8, %v13384_v53 }
 0x30b   :  { %15370 = vst [vmem:[#allocation56_spill] sm:$0xff] %v13512_v18  ;;  %v13552_v56 = vsub.f32 %v13319_v13, %v13384_v53  ;;  %v13556_v61 = vsub.f32 %v13311_v3, %v13384_v53  ;;  %v13560_v51 = vsub.f32 %v13317_v11, %v13384_v53  ;;  %v13564_v59 = vsub.f32 %v13326_v24, %v13384_v53 }
 0x30c   :  { %v13568_v8 = vsub.f32 %v13331_v29, %v13384_v53  ;;  %v13572_v13 = vsub.f32 %v13323_v19, %v13384_v53  ;;  %v13576_v3 = vsub.f32 %v13329_v27, %v13384_v53  ;;  %v13580_v11 = vsub.f32 %v15371_v25, %v13384_v53  ;;  %v15383_v25 = vld [vmem:[#allocation32_spill] sm:$0xff] }
 0x30d   :  { %v13584_v24 = vsub.f32 %v15373_v41, %v13384_v53  ;;  %v13588_v29 = vsub.f32 %v15375_v0, %v13384_v53  ;;  %v13592_v19 = vsub.f32 %v15377_v49, %v13384_v53  ;;  %v13596_v27 = vsub.f32 %v15379_v1, %v13384_v53 }
 0x30e   :  { %15372 = vst [vmem:[#allocation29_spill] sm:$0xff] %v13580_v11  ;;  %v13600_v16 = vsub.f32 %v15381_v9, %v13384_v53  ;;  %v13604_v41 = vsub.f32 %v15383_v25, %v13384_v53 }
 0x30f   :  { %15374 = vst [vmem:[#allocation31_spill] sm:$0xff] %v13584_v24  ;;  %15376 = vst [vmem:[#allocation28_spill] sm:$0xff] %v13588_v29  ;;  %v15385_v24 = vld [vmem:[#allocation34_spill] sm:$0xff]  ;;  %v15386_v29 = vld [vmem:[#allocation37_spill] sm:$0xff] }
 0x310   :  { %15378 = vst [vmem:[#allocation30_spill] sm:$0xff] %v13592_v19  ;;  %15380 = vst [vmem:[#allocation33_spill] sm:$0xff] %v13596_v27  ;;  %v13608_v0 = vsub.f32 %v15385_v24, %v13384_v53  ;;  %v13612_v49 = vsub.f32 %v15386_v29, %v13384_v53  ;;  %v15387_v19 = vld [vmem:[#allocation39_spill] sm:$0xff]  ;;  %v15388_v27 = vld [vmem:[#allocation36_spill] sm:$0xff]  ;;  %v13632_v29 = vsub.f32 %v13379_v5, %v13384_v53 }
 0x311   :  { %15382 = vst [vmem:[#allocation35_spill] sm:$0xff] %v13600_v16  ;;  %15384 = vst [vmem:[#allocation32_spill] sm:$0xff] %v13604_v41  ;;  %v13616_v1 = vsub.f32 %v15387_v19, %v13384_v53  ;;  %v13620_v9 = vsub.f32 %v15388_v27, %v13384_v53  ;;  %v15389_v16 = vld [vmem:[#allocation38_spill] sm:$0xff]  ;;  %v15391_v41 = vld [vmem:[#allocation40_spill] sm:$0xff]  ;;  %v13636_v19 = vsub.f32 %v13371_v57, %v13384_v53 }
 0x312   :  { %v13624_v25 = vsub.f32 %v15389_v16, %v13384_v53  ;;  %v13628_v24 = vsub.f32 %v15391_v41, %v13384_v53  ;;  %v13640_v27 = vsub.f32 %v13377_v21, %v13384_v53  ;;  %v5090_v16 = vmul.f32 %v13388_v17, %v13388_v17  ;;  %v11285_v5 = vld [vmem:[%s15292_s3 + $0x4] ss:$8 sps:$4 sm:$0xff]   ;;  %v11287_v53 = vld [vmem:[%s15292_s3] ss:$8 sps:$4 sm:$0xff]  }
 0x313   :  { %15393 = vst [vmem:[#allocation39_spill] sm:$0xff] %v13636_v19  ;;  %v5092_v41 = vmul.f32 %v13396_v33, %v13396_v33  ;;  %v5093_v57 = vmul.f32 %v13400_v35, %v13400_v35  ;;  %5907 = vmatprep.subr.bf16.mxu1 %v11285_v5  ;;  %v5094_v21 = vmul.f32 %v13404_v48, %v13404_v48 }
 0x314   :  { %15390 = vst [vmem:[#allocation34_spill] sm:$0xff] %v13624_v25  ;;  %15392 = vst [vmem:[#allocation37_spill] sm:$0xff] %v13628_v24  ;;  %v5091_v25 = vmul.f32 %v13392_v32, %v13392_v32  ;;  %5908 = vmatpush1.bf16.msra.mxu1 %v11287_v53 }
 0x316   :  { %v5154_v24 = vadd.f32 %v5091_v25, %v5090_v16  ;;  %v11288_v25 = vld [vmem:[%s15292_s3 + $0x14] ss:$8 sps:$4 sm:$0xff]   ;;  %v5095_v16 = vmul.f32 %v13408_v37, %v13408_v37 }
 0x317   :  { %5909 = vmatprep.subr.bf16.mxu1 %v11288_v25 }
 0x318   :  { %v5155_v19 = vadd.f32 %v5154_v24, %v5092_v41  ;;  %v11290_v24 = vld [vmem:[%s15292_s3 + $0x10] ss:$8 sps:$4 sm:$0xff]   ;;  %v5096_v41 = vmul.f32 %v13412_v39, %v13412_v39 }
 0x319   :  { %5910 = vmatpush1.bf16.msra.mxu1 %v11290_v24 }
 0x31a   :  { %v5156_v32 = vadd.f32 %v5155_v19, %v5093_v57  ;;  %v11291_v19 = vld [vmem:[%s15292_s3 + $0x24] ss:$8 sps:$4 sm:$0xff]   ;;  %v5097_v57 = vmul.f32 %v13416_v36, %v13416_v36 }
 0x31b   :  { %5911 = vmatprep.subr.bf16.mxu1 %v11291_v19 }
 0x31c   :  { %v5157_v33 = vadd.f32 %v5156_v32, %v5094_v21  ;;  %v11293_v32 = vld [vmem:[%s15292_s3 + $0x20] ss:$8 sps:$4 sm:$0xff]   ;;  %v5098_v21 = vmul.f32 %v13420_v38, %v13420_v38  ;;  %v5227_v38 = vlaneseq }
 0x31d   :  { %5912 = vmatpush1.bf16.msra.mxu1 %v11293_v32 }
 0x31e   :  { %v5158_v5 = vadd.f32 %v5157_v33, %v5095_v16  ;;  %v11294_v33 = vld [vmem:[%s15292_s3 + $0x34] ss:$8 sps:$4 sm:$0xff]   ;;  %v5099_v16 = vmul.f32 %v13424_v44, %v13424_v44 }
 0x31f   :  { %5913 = vmatprep.subr.bf16.mxu1 %v11294_v33 }
 0x320   :  { %v5159_v53 = vadd.f32 %v5158_v5, %v5096_v41  ;;  %v11296_v41 = vld [vmem:[%s15292_s3 + $0x30] ss:$8 sps:$4 sm:$0xff]   ;;  %v5100_v5 = vmul.f32 %v13428_v47, %v13428_v47 }
 0x321   :  { %5914 = vmatpush1.bf16.msra.mxu1 %v11296_v41 }
 0x322   :  { %v5160_v25 = vadd.f32 %v5159_v53, %v5097_v57  ;;  %v11297_v57 = vld [vmem:[%s15292_s3 + $0x44] ss:$8 sps:$4 sm:$0xff]   ;;  %v5101_v53 = vmul.f32 %v13432_v42, %v13432_v42 }
 0x323   :  { %5915 = vmatprep.subr.bf16.mxu1 %v11297_v57 }
 0x324   :  { %v5161_v24 = vadd.f32 %v5160_v25, %v5098_v21  ;;  %v11299_v21 = vld [vmem:[%s15292_s3 + $0x40] ss:$8 sps:$4 sm:$0xff]   ;;  %v5102_v25 = vmul.f32 %v13436_v46, %v13436_v46 }
 0x325   :  { %5916 = vmatpush1.bf16.msra.mxu1 %v11299_v21 }
 0x326   :  { %v5162_v19 = vadd.f32 %v5161_v24, %v5099_v16  ;;  %v11300_v16 = vld [vmem:[%s15292_s3 + $0x54] ss:$8 sps:$4 sm:$0xff]   ;;  %v5103_v24 = vmul.f32 %v13440_v52, %v13440_v52 }
 0x327   :  { %5917 = vmatprep.subr.bf16.mxu1 %v11300_v16 }
 0x328   :  { %v5163_v32 = vadd.f32 %v5162_v19, %v5100_v5  ;;  %v11302_v5 = vld [vmem:[%s15292_s3 + $0x50] ss:$8 sps:$4 sm:$0xff]   ;;  %v5104_v19 = vmul.f32 %v13444_v55, %v13444_v55 }
 0x329   :  { %5918 = vmatpush1.bf16.msra.mxu1 %v11302_v5 }
 0x32a   :  { %v5164_v33 = vadd.f32 %v5163_v32, %v5101_v53  ;;  %v11303_v53 = vld [vmem:[%s15292_s3 + $0x64] ss:$8 sps:$4 sm:$0xff]   ;;  %v5105_v32 = vmul.f32 %v13448_v50, %v13448_v50 }
 0x32b   :  { %5919 = vmatprep.subr.bf16.mxu1 %v11303_v53 }
 0x32c   :  { %v5165_v41 = vadd.f32 %v5164_v33, %v5102_v25  ;;  %v11305_v25 = vld [vmem:[%s15292_s3 + $0x60] ss:$8 sps:$4 sm:$0xff]   ;;  %v5106_v33 = vmul.f32 %v13452_v54, %v13452_v54 }
 0x32d   :  { %5920 = vmatpush1.bf16.msra.mxu1 %v11305_v25 }
 0x32e   :  { %v5166_v57 = vadd.f32 %v5165_v41, %v5103_v24  ;;  %v11306_v24 = vld [vmem:[%s15292_s3 + $0x74] ss:$8 sps:$4 sm:$0xff]   ;;  %v5107_v41 = vmul.f32 %v13456_v60, %v13456_v60 }
 0x32f   :  { %5921 = vmatprep.subr.bf16.mxu1 %v11306_v24 }
 0x330   :  { %v5167_v21 = vadd.f32 %v5166_v57, %v5104_v19  ;;  %v11308_v19 = vld [vmem:[%s15292_s3 + $0x70] ss:$8 sps:$4 sm:$0xff]   ;;  %v5108_v57 = vmul.f32 %v13460_v63, %v13460_v63 }
 0x331   :  { %5922 = vmatpush1.bf16.msra.mxu1 %v11308_v19 }
 0x332   :  { %v5168_v16 = vadd.f32 %v5167_v21, %v5105_v32  ;;  %v11309_v32 = vld [vmem:[%s15292_s3 + $0x84] ss:$8 sps:$4 sm:$0xff]   ;;  %v5109_v21 = vmul.f32 %v13464_v58, %v13464_v58 }
 0x333   :  { %5923 = vmatprep.subr.bf16.mxu1 %v11309_v32 }
 0x334   :  { %v5169_v5 = vadd.f32 %v5168_v16, %v5106_v33  ;;  %v11311_v33 = vld [vmem:[%s15292_s3 + $0x80] ss:$8 sps:$4 sm:$0xff]   ;;  %v5110_v16 = vmul.f32 %v13468_v62, %v13468_v62 }
 0x335   :  { %5924 = vmatpush1.bf16.msra.mxu1 %v11311_v33 }
 0x336   :  { %v5170_v53 = vadd.f32 %v5169_v5, %v5107_v41  ;;  %v11312_v41 = vld [vmem:[%s15292_s3 + $0x94] ss:$8 sps:$4 sm:$0xff]   ;;  %v5111_v5 = vmul.f32 %v13472_v4, %v13472_v4 }
 0x337   :  { %5925 = vmatprep.subr.bf16.mxu1 %v11312_v41 }
 0x338   :  { %v5171_v25 = vadd.f32 %v5170_v53, %v5108_v57  ;;  %v11314_v57 = vld [vmem:[%s15292_s3 + $0x90] ss:$8 sps:$4 sm:$0xff]   ;;  %v5112_v53 = vmul.f32 %v13476_v7, %v13476_v7 }
 0x339   :  { %5926 = vmatpush1.bf16.msra.mxu1 %v11314_v57 }
 0x33a   :  { %v5172_v24 = vadd.f32 %v5171_v25, %v5109_v21  ;;  %v11315_v21 = vld [vmem:[%s15292_s3 + $0xa4] ss:$8 sps:$4 sm:$0xff]   ;;  %v5113_v25 = vmul.f32 %v13480_v2, %v13480_v2 }
 0x33b   :  { %5927 = vmatprep.subr.bf16.mxu1 %v11315_v21 }
 0x33c   :  { %v5173_v19 = vadd.f32 %v5172_v24, %v5110_v16  ;;  %v11317_v16 = vld [vmem:[%s15292_s3 + $0xa0] ss:$8 sps:$4 sm:$0xff]   ;;  %v5114_v24 = vmul.f32 %v13484_v6, %v13484_v6 }
 0x33d   :  { %5928 = vmatpush1.bf16.msra.mxu1 %v11317_v16 }
 0x33e   :  { %v5174_v32 = vadd.f32 %v5173_v19, %v5111_v5  ;;  %v11318_v5 = vld [vmem:[%s15292_s3 + $0xb4] ss:$8 sps:$4 sm:$0xff]   ;;  %v5115_v19 = vmul.f32 %v13488_v12, %v13488_v12 }
 0x33f   :  { %5929 = vmatprep.subr.bf16.mxu1 %v11318_v5 }
 0x340   :  { %v5175_v33 = vadd.f32 %v5174_v32, %v5112_v53  ;;  %v11320_v53 = vld [vmem:[%s15292_s3 + $0xb0] ss:$8 sps:$4 sm:$0xff]   ;;  %v5116_v32 = vmul.f32 %v13492_v15, %v13492_v15 }
 0x341   :  { %5930 = vmatpush1.bf16.msra.mxu1 %v11320_v53 }
 0x342   :  { %v5176_v41 = vadd.f32 %v5175_v33, %v5113_v25  ;;  %v11321_v25 = vld [vmem:[%s15292_s3 + $0xc4] ss:$8 sps:$4 sm:$0xff]   ;;  %v5117_v33 = vmul.f32 %v13496_v10, %v13496_v10 }
 0x343   :  { %5931 = vmatprep.subr.bf16.mxu1 %v11321_v25 }
 0x344   :  { %v5177_v57 = vadd.f32 %v5176_v41, %v5114_v24  ;;  %v11323_v24 = vld [vmem:[%s15292_s3 + $0xc0] ss:$8 sps:$4 sm:$0xff]   ;;  %v5118_v41 = vmul.f32 %v13500_v14, %v13500_v14 }
 0x345   :  { %5932 = vmatpush1.bf16.msra.mxu1 %v11323_v24 }
 0x346   :  { %v5178_v21 = vadd.f32 %v5177_v57, %v5115_v19  ;;  %v11324_v19 = vld [vmem:[%s15292_s3 + $0xd4] ss:$8 sps:$4 sm:$0xff]   ;;  %v5119_v57 = vmul.f32 %v13504_v20, %v13504_v20 }
 0x347   :  { %5933 = vmatprep.subr.bf16.mxu1 %v11324_v19 }
 0x348   :  { %v5179_v16 = vadd.f32 %v5178_v21, %v5116_v32  ;;  %v11326_v32 = vld [vmem:[%s15292_s3 + $0xd0] ss:$8 sps:$4 sm:$0xff]   ;;  %v5120_v21 = vmul.f32 %v13508_v23, %v13508_v23 }
 0x349   :  { %5934 = vmatpush1.bf16.msra.mxu1 %v11326_v32 }
 0x34a   :  { %v5180_v5 = vadd.f32 %v5179_v16, %v5117_v33  ;;  %v11327_v33 = vld [vmem:[%s15292_s3 + $0xe4] ss:$8 sps:$4 sm:$0xff]   ;;  %v5121_v16 = vmul.f32 %v13512_v18, %v13512_v18 }
 0x34b   :  { %5935 = vmatprep.subr.bf16.mxu1 %v11327_v33 }
 0x34c   :  { %v5181_v53 = vadd.f32 %v5180_v5, %v5118_v41  ;;  %v11329_v41 = vld [vmem:[%s15292_s3 + $0xe0] ss:$8 sps:$4 sm:$0xff]   ;;  %v5122_v5 = vmul.f32 %v13516_v22, %v13516_v22 }
 0x34d   :  { %5936 = vmatpush1.bf16.msra.mxu1 %v11329_v41  ;;  %v11335_v41 = vld [vmem:[%s15292_s3 + $0x104] ss:$8 sps:$4 sm:$0xff]  }
 0x34e   :  { %v5182_v25 = vadd.f32 %v5181_v53, %v5119_v57  ;;  %v11330_v57 = vld [vmem:[%s15292_s3 + $0xf4] ss:$8 sps:$4 sm:$0xff]   ;;  %v5123_v53 = vmul.f32 %v13520_v28, %v13520_v28 }
 0x34f   :  { %5937 = vmatprep.subr.bf16.mxu1 %v11330_v57  ;;  %v5127_v57 = vmul.f32 %v13536_v40, %v13536_v40 }
 0x350   :  { %v5183_v24 = vadd.f32 %v5182_v25, %v5120_v21  ;;  %v11332_v21 = vld [vmem:[%s15292_s3 + $0xf0] ss:$8 sps:$4 sm:$0xff]   ;;  %v5124_v25 = vmul.f32 %v13524_v31, %v13524_v31 }
 0x351   :  { %5938 = vmatpush1.bf16.msra.mxu1 %v11332_v21  ;;  %v5129_v21 = vmul.f32 %v13544_v34, %v13544_v34 }
 0x352   :  { %v5184_v19 = vadd.f32 %v5183_v24, %v5121_v16  ;;  %v5125_v16 = vmul.f32 %v13528_v26, %v13528_v26  ;;  %6020 = vmatprep.subr.bf16.mxu1 %v11335_v41  ;;  %v5132_v41 = vmul.f32 %v13556_v61, %v13556_v61 }
 0x354   :  { %v5185_v32 = vadd.f32 %v5184_v19, %v5122_v5  ;;  %v5126_v5 = vmul.f32 %v13532_v30, %v13532_v30 }
 0x356   :  { %v5186_v33 = vadd.f32 %v5185_v32, %v5123_v53  ;;  %v5128_v53 = vmul.f32 %v13540_v45, %v13540_v45 }
 0x358   :  { %v5187_v24 = vadd.f32 %v5186_v33, %v5124_v25  ;;  %v5130_v33 = vmul.f32 %v13548_v43, %v13548_v43 }
 0x35a   :  { %v5188_v19 = vadd.f32 %v5187_v24, %v5125_v16  ;;  %v5131_v16 = vmul.f32 %v13552_v56, %v13552_v56 }
 0x35c   :  { %v5189_v50 = vadd.f32 %v5188_v19, %v5126_v5  ;;  %v5133_v19 = vmul.f32 %v13560_v51, %v13560_v51 }
 0x35e   :  { %v5190_v32 = vadd.f32 %v5189_v50, %v5127_v57  ;;  %v5134_v57 = vmul.f32 %v13564_v59, %v13564_v59 }
 0x360   :  { %v5191_v25 = vadd.f32 %v5190_v32, %v5128_v53  ;;  %v5135_v32 = vmul.f32 %v13568_v8, %v13568_v8 }
 0x362   :  { %v5192_v55 = vadd.f32 %v5191_v25, %v5129_v21  ;;  %v5136_v25 = vmul.f32 %v13572_v13, %v13572_v13 }
 0x364   :  { %v5193_v24 = vadd.f32 %v5192_v55, %v5130_v33  ;;  %v5137_v33 = vmul.f32 %v13576_v3, %v13576_v3 }
 0x366   :  { %v5194_v5 = vadd.f32 %v5193_v24, %v5131_v16  ;;  %v5138_v24 = vmul.f32 %v13580_v11, %v13580_v11 }
 0x368   :  { %v5195_v50 = vadd.f32 %v5194_v5, %v5132_v41  ;;  %v15394_v5 = vld [vmem:[#allocation31_spill] sm:$0xff] }
 0x369   :  { %v5139_v18 = vmul.f32 %v15394_v5, %v15394_v5 }
 0x36a   :  { %v5196_v53 = vadd.f32 %v5195_v50, %v5133_v19  ;;  %v15395_v50 = vld [vmem:[#allocation28_spill] sm:$0xff] }
 0x36b   :  { %v5140_v23 = vmul.f32 %v15395_v50, %v15395_v50 }
 0x36c   :  { %v5197_v21 = vadd.f32 %v5196_v53, %v5134_v57  ;;  %v15396_v53 = vld [vmem:[#allocation30_spill] sm:$0xff] }
 0x36d   :  { %v5141_v52 = vmul.f32 %v15396_v53, %v15396_v53 }
 0x36e   :  { %v5198_v55 = vadd.f32 %v5197_v21, %v5135_v32  ;;  %v15397_v21 = vld [vmem:[#allocation33_spill] sm:$0xff] }
 0x36f   :  { %v5142_v46 = vmul.f32 %v15397_v21, %v15397_v21 }
 0x370   :  { %v5199_v16 = vadd.f32 %v5198_v55, %v5136_v25  ;;  %v15398_v55 = vld [vmem:[#allocation35_spill] sm:$0xff] }
 0x371   :  { %v5143_v11 = vmul.f32 %v15398_v55, %v15398_v55 }
 0x372   :  { %v5200_v41 = vadd.f32 %v5199_v16, %v5137_v33  ;;  %v15399_v16 = vld [vmem:[#allocation32_spill] sm:$0xff] }
 0x373   :  { %v5144_v5 = vmul.f32 %v15399_v16, %v15399_v16 }
 0x374   :  { %v5201_v19 = vadd.f32 %v5200_v41, %v5138_v24  ;;  %v5145_v41 = vmul.f32 %v13608_v0, %v13608_v0 }
 0x376   :  { %v5202_v57 = vadd.f32 %v5201_v19, %v5139_v18  ;;  %v5146_v19 = vmul.f32 %v13612_v49, %v13612_v49 }
 0x378   :  { %v5203_v32 = vadd.f32 %v5202_v57, %v5140_v23  ;;  %v5147_v57 = vmul.f32 %v13616_v1, %v13616_v1 }
 0x37a   :  { %v5204_v25 = vadd.f32 %v5203_v32, %v5141_v52  ;;  %v5148_v32 = vmul.f32 %v13620_v9, %v13620_v9 }
 0x37c   :  { %v5205_v33 = vadd.f32 %v5204_v25, %v5142_v46  ;;  %v15400_v25 = vld [vmem:[#allocation34_spill] sm:$0xff] }
 0x37d   :  { %v5149_v20 = vmul.f32 %v15400_v25, %v15400_v25 }
 0x37e   :  { %v5206_v24 = vadd.f32 %v5205_v33, %v5143_v11  ;;  %v15401_v33 = vld [vmem:[#allocation37_spill] sm:$0xff] }
 0x37f   :  { %v5150_v14 = vmul.f32 %v15401_v33, %v15401_v33 }
 0x380   :  { %v5207_v18 = vadd.f32 %v5206_v24, %v5144_v5  ;;  %v5151_v24 = vmul.f32 %v13632_v29, %v13632_v29 }
 0x382   :  { %v5208_v23 = vadd.f32 %v5207_v18, %v5145_v41  ;;  %v15402_v18 = vld [vmem:[#allocation39_spill] sm:$0xff] }
 0x383   :  { %v5152_v42 = vmul.f32 %v15402_v18, %v15402_v18 }
 0x384   :  { %v5209_v52 = vadd.f32 %v5208_v23, %v5146_v19  ;;  %v5153_v23 = vmul.f32 %v13640_v27, %v13640_v27 }
 0x386   :  { %v5210_v46 = vadd.f32 %v5209_v52, %v5147_v57 }
 0x388   :  { %v5211_v11 = vadd.f32 %v5210_v46, %v5148_v32 }
 0x38a   :  { %v5212_v5 = vadd.f32 %v5211_v11, %v5149_v20 }
 0x38c   :  { %v5213_v41 = vadd.f32 %v5212_v5, %v5150_v14  ;;  %v13869_v14 = vshrl.u32 %v5227_v38, 7  ;;  %v4955_v5 = vld [vmem:[#allocation11] sm:$0x3] }
 0x38e   :  { %v5214_v19 = vadd.f32 %v5213_v41, %v5151_v24  ;;  %v13872_v24 = vsub.s32 0, %v13869_v14  ;;  %v13875_v41 = vsub.s32 1, %v13869_v14 }
 0x390   :  { %v5215_v57 = vadd.f32 %v5214_v19, %v5152_v42  ;;  %15403 = vst [vmem:[#allocation36_spill] sm:$0xff] %v13872_v24 }
 0x392   :  { %v5216_v52 = vadd.f32 %v5215_v57, %v5153_v23  ;;  %v15404_v23 = vld [vmem:[#allocation41_spill] sm:$0xff] }
 0x394   :  { %v5217_v47 = vrot.slane %v5216_v52, 4 }
 0x396   :  { %v5218_v10 = vadd.f32 %v5217_v47, %v5216_v52  ;;  %v15405_v52 = vld [vmem:[#allocation42_spill] sm:$0xff] }
 0x398   :  { %v5219_v32 = vrot.slane %v5218_v10, 2 }
 0x39a   :  { %v5220_v46 = vadd.f32 %v5219_v32, %v5218_v10 }
 0x39c   :  { %v5221_v15 = vrot.slane %v5220_v46, 1 }
 0x39e   :  { %v5222_v44 = vadd.f32 %v5221_v15, %v5220_v46  ;;  %v13881_v15 = vrot.slane %v4955_v5, %v13875_v41 }
 0x3a0   :  { %v5223_v20 = vmul.f32 0.001953125, %v5222_v44 }
 0x3a2   :  { %v5224_v11 = vadd.f32 1e-05, %v5223_v20 }
 0x3a4   :  { %11381 = vrsqrt.f32 %v5224_v11 }
 0x3ae   :  { %v11382_v42 = vpop.eup %11381 }
 0x3af   :  { %v5226_v19 = vmul.f32 %v11382_v42, %v4955_v5 }
 0x3b1   :  { %v13878_v47 = vrot.slane %v5226_v19, %v13872_v24 }
 0x3b3   :  { %v5292_v44 = vmul.f32 %v13878_v47, %v13632_v29  ;;  %v5231_v10 = vmul.f32 %v13878_v47, %v13388_v17  ;;  %v5232_v57 = vmul.f32 %v13878_v47, %v15404_v23  ;;  %v13894_v32 = vmul.f32 %v13878_v47, %v15405_v52 }
 0x3b4   :  { %v13898_v46 = vmul.f32 %v13878_v47, %v13400_v35  ;;  %v13902_v29 = vmul.f32 %v13878_v47, %v13404_v48  ;;  %v13906_v20 = vmul.f32 %v13878_v47, %v13408_v37  ;;  %v13910_v17 = vmul.f32 %v13878_v47, %v13452_v54 }
 0x3b5   :  { %v13886_v38 = vadd.f32 %v13881_v15, %v5292_v44  ;;  %v13914_v11 = vmul.f32 %v13878_v47, %v13456_v60  ;;  %v5249_v35 = vmul.f32 %v13878_v47, %v13460_v63  ;;  %v5250_v5 = vmul.f32 %v13878_v47, %v13464_v58 }
 0x3b6   :  { %v13922_v48 = vmul.f32 %v13878_v47, %v13468_v62  ;;  %v13926_v37 = vmul.f32 %v13878_v47, %v13472_v4  ;;  %v5263_v54 = vmul.f32 %v13878_v47, %v13516_v22  ;;  %v5264_v60 = vmul.f32 %v13878_v47, %v13520_v28 }
 0x3b7   :  { %v5265_v63 = vmul.f32 %v13878_v47, %v13524_v31  ;;  %v5266_v58 = vmul.f32 %v13878_v47, %v13528_v26  ;;  %v5267_v62 = vmul.f32 %v13878_v47, %v13532_v30  ;;  %v5268_v42 = vmul.f32 %v13878_v47, %v13536_v40 }
 0x3b8   :  { %v5269_v4 = vmul.f32 %v13878_v47, %v13540_v45  ;;  %v5270_v22 = vmul.f32 %v13878_v47, %v13544_v34  ;;  %v5271_v28 = vmul.f32 %v13878_v47, %v13548_v43  ;;  %v5272_v31 = vmul.f32 %v13878_v47, %v13552_v56 }
 0x3b9   :  { %v5273_v26 = vmul.f32 %v13878_v47, %v13556_v61  ;;  %v5274_v30 = vmul.f32 %v13878_v47, %v13560_v51  ;;  %v5275_v40 = vmul.f32 %v13878_v47, %v13564_v59  ;;  %v5276_v45 = vmul.f32 %v13878_v47, %v13568_v8 }
 0x3ba   :  { %v5277_v34 = vmul.f32 %v13878_v47, %v13572_v13  ;;  %v5278_v43 = vmul.f32 %v13878_v47, %v13576_v3  ;;  %v5281_v56 = vmul.f32 %v13878_v47, %v15395_v50  ;;  %v5282_v61 = vmul.f32 %v13878_v47, %v15396_v53 }
 0x3bb   :  { %v5283_v51 = vmul.f32 %v13878_v47, %v15397_v21  ;;  %v5284_v59 = vmul.f32 %v13878_v47, %v15398_v55  ;;  %v5285_v8 = vmul.f32 %v13878_v47, %v15399_v16  ;;  %v5286_v13 = vmul.f32 %v13878_v47, %v13608_v0 }
 0x3bc   :  { %v5287_v3 = vmul.f32 %v13878_v47, %v13612_v49  ;;  %v5288_v50 = vmul.f32 %v13878_v47, %v13616_v1  ;;  %v5289_v53 = vmul.f32 %v13878_v47, %v13620_v9  ;;  %v5290_v21 = vmul.f32 %v13878_v47, %v15400_v25 }
 0x3bd   :  { %v5291_v55 = vmul.f32 %v13878_v47, %v15401_v33  ;;  %v5293_v16 = vmul.f32 %v13878_v47, %v15402_v18  ;;  %v5294_v0 = vmul.f32 %v13878_v47, %v13640_v27  ;;  %v5299_v49 = vadd.f32 %v13881_v15, %v5231_v10 }
 0x3be   :  { %v5300_v19 = vadd.f32 %v13881_v15, %v5232_v57  ;;  %v5331_v1 = vadd.f32 %v13881_v15, %v5263_v54  ;;  %v5332_v9 = vadd.f32 %v13881_v15, %v5264_v60  ;;  %v13991_v44 = vadd.f32 %v13881_v15, %v5265_v63 }
 0x3bf   :  { %v13994_v25 = vadd.f32 %v13881_v15, %v5266_v58  ;;  %v13997_v33 = vadd.f32 %v13881_v15, %v5267_v62  ;;  %v14000_v18 = vadd.f32 %v13881_v15, %v5268_v42  ;;  %v14003_v27 = vadd.f32 %v13881_v15, %v5269_v4 }
 0x3c0   :  { %v14006_v10 = vadd.f32 %v13881_v15, %v5270_v22  ;;  %v14009_v23 = vadd.f32 %v13881_v15, %v5271_v28  ;;  %v14012_v57 = vadd.f32 %v13881_v15, %v5272_v31  ;;  %v14015_v52 = vadd.f32 %v13881_v15, %v5273_v26 }
 0x3c1   :  { %v14018_v54 = vadd.f32 %v13881_v15, %v5274_v30  ;;  %v14021_v60 = vadd.f32 %v13881_v15, %v5275_v40  ;;  %v14024_v63 = vadd.f32 %v13881_v15, %v5276_v45  ;;  %v14027_v58 = vadd.f32 %v13881_v15, %v5277_v34 }
 0x3c2   :  { %v14030_v62 = vadd.f32 %v13881_v15, %v5278_v43  ;;  %v5317_v42 = vadd.f32 %v13881_v15, %v5249_v35  ;;  %v5318_v4 = vadd.f32 %v13881_v15, %v5250_v5  ;;  %v14035_v22 = vadd.f32 %v13881_v15, %v5281_v56 }
 0x3c3   :  { %v14038_v28 = vadd.f32 %v13881_v15, %v5282_v61  ;;  %v14041_v31 = vadd.f32 %v13881_v15, %v5283_v51  ;;  %v14044_v26 = vadd.f32 %v13881_v15, %v5284_v59  ;;  %v14047_v30 = vadd.f32 %v13881_v15, %v5285_v8 }
 0x3c4   :  { %v14050_v40 = vadd.f32 %v13881_v15, %v5286_v13  ;;  %v14053_v35 = vadd.f32 %v13881_v15, %v5287_v3  ;;  %v14056_v5 = vadd.f32 %v13881_v15, %v5288_v50  ;;  %v14059_v45 = vadd.f32 %v13881_v15, %v5289_v53 }
 0x3c5   :  { %v14062_v34 = vadd.f32 %v13881_v15, %v5290_v21  ;;  %v14065_v43 = vadd.f32 %v13881_v15, %v5291_v55  ;;  %v14068_v56 = vadd.f32 %v13881_v15, %v5293_v16  ;;  %v14071_v61 = vadd.f32 %v13881_v15, %v5294_v0 }
 0x3c6   :  { %v5395_v51 = vmax.f32 %v5331_v1, 0.0  ;;  %v5396_v59 = vmax.f32 %v5332_v9, 0.0  ;;  %v5315_v8 = vadd.f32 %v13881_v15, %v13910_v17  ;;  %v5316_v13 = vadd.f32 %v13881_v15, %v13914_v11 }
 0x3c7   :  { %v5363_v3 = vmax.f32 %v5299_v49, 0.0  ;;  %v5253_v50 = vmul.f32 %v13878_v47, %v13476_v7  ;;  %v5254_v53 = vmul.f32 %v13878_v47, %v13480_v2  ;;  %v5364_v21 = vmax.f32 %v5300_v19, 0.0  ;;  %v11333_v7 = vld [vmem:[%s15292_s3 + $0x100] ss:$8 sps:$4 sm:$0xff]  }
 0x3c8   :  { %v5381_v55 = vmax.f32 %v5317_v42, 0.0  ;;  %v14081_v16 = vpack.c.bf16 %v5396_v59, %v5395_v51  ;;  %v5379_v0 = vmax.f32 %v5315_v8, 0.0  ;;  %v5380_v1 = vmax.f32 %v5316_v13, 0.0 }
 0x3c9   :  { %v5382_v9 = vmax.f32 %v5318_v4, 0.0  ;;  %v5427_v24 = vpack.c.bf16 %v5364_v21, %v5363_v3  ;;  %v5301_v17 = vadd.f32 %v13881_v15, %v13894_v32  ;;  %v5302_v11 = vadd.f32 %v13881_v15, %v13898_v46  ;;  %v11338_v32 = vld [vmem:[%s15292_s3 + $0x114] ss:$8 sps:$4 sm:$0xff]  }
 0x3ca   :  { %v5435_v49 = vpack.c.bf16 %v5380_v1, %v5379_v0  ;;  %v5303_v2 = vadd.f32 %v13881_v15, %v13902_v29  ;;  %v5319_v19 = vadd.f32 %v13881_v15, %v13922_v48  ;;  %v5320_v42 = vadd.f32 %v13881_v15, %v13926_v37 }
 0x3cb   :  { %v5304_v46 = vadd.f32 %v13881_v15, %v13906_v20  ;;  %v5321_v4 = vadd.f32 %v13881_v15, %v5253_v50  ;;  %v5322_v51 = vadd.f32 %v13881_v15, %v5254_v53  ;;  %v5436_v59 = vpack.c.bf16 %v5382_v9, %v5381_v55  ;;  %v11336_v20 = vld [vmem:[%s15292_s3 + $0x110] ss:$8 sps:$4 sm:$0xff]  }
 0x3cc   :  { %5939 = vmatprep.mubr.bf16.mxu1 %v5435_v49  ;;  %v5237_v29 = vmul.f32 %v13878_v47, %v13412_v39  ;;  %v5238_v48 = vmul.f32 %v13878_v47, %v13416_v36  ;;  %v5255_v37 = vmul.f32 %v13878_v47, %v13484_v6  ;;  %v5256_v8 = vmul.f32 %v13878_v47, %v13488_v12  ;;  %v11341_v39 = vld [vmem:[%s15292_s3 + $0x124] ss:$8 sps:$4 sm:$0xff]   ;;  %v11344_v49 = vld [vmem:[%s15292_s3 + $0x134] ss:$8 sps:$4 sm:$0xff]  }
 0x3cd   :  { %5940 = vmatmul.mubr.bf16.vlgmr.msra.gmra.mrb[0].mxu1 %v5427_v24  ;;  %v5365_v13 = vmax.f32 %v5301_v17, 0.0  ;;  %v5366_v3 = vmax.f32 %v5302_v11, 0.0  ;;  %v5383_v36 = vmax.f32 %v5319_v19, 0.0  ;;  %v5384_v24 = vmax.f32 %v5320_v42, 0.0  ;;  %v11339_v17 = vld [vmem:[%s15292_s3 + $0x120] ss:$8 sps:$4 sm:$0xff]  }
 0x3ce   :  { %6021 = vmatpush1.bf16.msra.mxu1 %v11333_v7  ;;  %5949 = vmatprep.mubr.bf16.mxu1 %v5436_v59  ;;  %v5367_v50 = vmax.f32 %v5303_v2, 0.0  ;;  %v5368_v6 = vmax.f32 %v5304_v46, 0.0  ;;  %v5385_v53 = vmax.f32 %v5321_v4, 0.0  ;;  %v5386_v21 = vmax.f32 %v5322_v51, 0.0 }
 0x3cf   :  { %6022 = vmatprep.subr.bf16.mxu1 %v11338_v32  ;;  %v5424_v12 = vmax.f32 %v13886_v38, 0.0  ;;  %v14119_v55 = vadd.f32 %v13881_v15, %v5237_v29  ;;  %v14122_v0 = vadd.f32 %v13881_v15, %v5238_v48  ;;  %v14125_v1 = vadd.f32 %v13881_v15, %v5255_v37 }
 0x3d0   :  { %v14128_v9 = vadd.f32 %v13881_v15, %v5256_v8  ;;  %v5428_v11 = vpack.c.bf16 %v5366_v3, %v5365_v13  ;;  %v5437_v38 = vpack.c.bf16 %v5384_v24, %v5383_v36  ;;  %v5413_v7 = vmax.f32 %v14035_v22, 0.0 }
 0x3d1   :  { %v5414_v2 = vmax.f32 %v14038_v28, 0.0  ;;  %v5397_v19 = vmax.f32 %v13991_v44, 0.0  ;;  %v5429_v42 = vpack.c.bf16 %v5368_v6, %v5367_v50  ;;  %v5438_v32 = vpack.c.bf16 %v5386_v21, %v5385_v53  ;;  %v11342_v44 = vld [vmem:[%s15292_s3 + $0x130] ss:$8 sps:$4 sm:$0xff]  }
 0x3d2   :  { %6023 = vmatpush1.bf16.msra.mxu1 %v11336_v20  ;;  %v5398_v46 = vmax.f32 %v13994_v25, 0.0  ;;  %v5415_v4 = vmax.f32 %v14041_v31, 0.0  ;;  %v5416_v59 = vmax.f32 %v14044_v26, 0.0  ;;  %v5399_v29 = vmax.f32 %v13997_v33, 0.0  ;;  %v11347_v33 = vld [vmem:[%s15292_s3 + $0x144] ss:$8 sps:$4 sm:$0xff]  }
 0x3d3   :  { %6024 = vmatprep.subr.bf16.mxu1 %v11341_v39  ;;  %v14141_v51 = vpack.c.bf16 %v5414_v2, %v5413_v7  ;;  %v5400_v48 = vmax.f32 %v14000_v18, 0.0  ;;  %v5417_v25 = vmax.f32 %v14047_v30, 0.0  ;;  %v5418_v28 = vmax.f32 %v14050_v40, 0.0  ;;  %v15408_v7 = vld [vmem:[#allocation51_spill] sm:$0xff] }
 0x3d4   :  { %v14149_v22 = vpack.c.bf16 %v5398_v46, %v5397_v19  ;;  %v5401_v31 = vmax.f32 %v14003_v27, 0.0  ;;  %v14157_v18 = vpack.c.bf16 %v5416_v59, %v5415_v4  ;;  %v5402_v37 = vmax.f32 %v14006_v10, 0.0  ;;  %v11345_v10 = vld [vmem:[%s15292_s3 + $0x140] ss:$8 sps:$4 sm:$0xff]   ;;  %v15409_v19 = vld [vmem:[#allocation52_spill] sm:$0xff] }
 0x3d5   :  { %5950 = vmatmul.mubr.bf16.gmra.mrb[4].mxu1 %v5428_v11  ;;  %v14159_v26 = vpack.c.bf16 %v5400_v48, %v5399_v29  ;;  %v5419_v8 = vmax.f32 %v14053_v35, 0.0  ;;  %v14163_v20 = vpack.c.bf16 %v5418_v28, %v5417_v25  ;;  %v5420_v30 = vmax.f32 %v14056_v5, 0.0  ;;  %v15406_v11 = vld [vmem:[#allocation43_spill] sm:$0xff]  ;;  %v11351_v4 = vld [vmem:[%s15292_s3 + $0x160] ss:$8 sps:$4 sm:$0xff]  }
 0x3d6   :  { %6025 = vmatpush1.bf16.msra.mxu1 %v11339_v17  ;;  %5959 = vmatprep.mubr.bf16.mxu1 %v5437_v38  ;;  %v5403_v40 = vmax.f32 %v14009_v23, 0.0  ;;  %v5404_v27 = vmax.f32 %v14012_v57, 0.0  ;;  %v14168_v13 = vpack.c.bf16 %v5402_v37, %v5401_v31  ;;  %v5421_v3 = vmax.f32 %v14059_v45, 0.0  ;;  %v11350_v45 = vld [vmem:[%s15292_s3 + $0x154] ss:$8 sps:$4 sm:$0xff]   ;;  %v15411_v31 = vld [vmem:[#allocation46_spill] sm:$0xff] }
 0x3d7   :  { %6026 = vmatprep.subr.bf16.mxu1 %v11344_v49  ;;  %v5422_v39 = vmax.f32 %v14062_v34, 0.0  ;;  %v5405_v36 = vmax.f32 %v14015_v52, 0.0  ;;  %v14176_v35 = vpack.c.bf16 %v5420_v30, %v5419_v8  ;;  %v5406_v23 = vmax.f32 %v14018_v54, 0.0  ;;  %v11356_v29 = vld [vmem:[%s15292_s3 + $0x174] ss:$8 sps:$4 sm:$0xff]  }
 0x3d8   :  { %v14178_v5 = vpack.c.bf16 %v5404_v27, %v5403_v40  ;;  %v5423_v57 = vmax.f32 %v14065_v43, 0.0  ;;  %v5407_v52 = vmax.f32 %v14021_v60, 0.0  ;;  %v5408_v24 = vmax.f32 %v14024_v63, 0.0  ;;  %v11348_v63 = vld [vmem:[%s15292_s3 + $0x150] ss:$8 sps:$4 sm:$0xff]   ;;  %v15410_v25 = vld [vmem:[#allocation45_spill] sm:$0xff] }
 0x3d9   :  { %v14185_v34 = vpack.c.bf16 %v5422_v39, %v5421_v3  ;;  %v5425_v50 = vmax.f32 %v14068_v56, 0.0  ;;  %v14190_v6 = vpack.c.bf16 %v5406_v23, %v5405_v36  ;;  %v5426_v54 = vmax.f32 %v14071_v61, 0.0  ;;  %v11359_v37 = vld [vmem:[%s15292_s3 + $0x184] ss:$8 sps:$4 sm:$0xff]   ;;  %v11357_v23 = vld [vmem:[%s15292_s3 + $0x180] ss:$8 sps:$4 sm:$0xff]  }
 0x3da   :  { %6027 = vmatpush1.bf16.msra.mxu1 %v11342_v44  ;;  %v14192_v53 = vpack.c.bf16 %v5424_v12, %v5423_v57  ;;  %v5409_v43 = vmax.f32 %v14027_v58, 0.0  ;;  %v14196_v21 = vpack.c.bf16 %v5408_v24, %v5407_v52  ;;  %v5410_v17 = vmax.f32 %v14030_v62, 0.0  ;;  %v15407_v12 = vld [vmem:[#allocation44_spill] sm:$0xff]  ;;  %v11353_v58 = vld [vmem:[%s15292_s3 + $0x164] ss:$8 sps:$4 sm:$0xff]  }
 0x3db   :  { %6028 = vmatprep.subr.bf16.mxu1 %v11347_v33  ;;  %v5239_v60 = vmul.f32 %v13878_v47, %v15406_v11  ;;  %v14204_v56 = vpack.c.bf16 %v5426_v54, %v5425_v50  ;;  %v5240_v61 = vmul.f32 %v13878_v47, %v15407_v12  ;;  %v5369_v62 = vmax.f32 %v14119_v55, 0.0  ;;  %v11354_v44 = vld [vmem:[%s15292_s3 + $0x170] ss:$8 sps:$4 sm:$0xff]   ;;  %v15412_v40 = vld [vmem:[#allocation53_spill] sm:$0xff]  ;;  %v15413_v3 = vld [vmem:[#allocation54_spill] sm:$0xff] }
 0x3dc   :  { %v5370_v38 = vmax.f32 %v14122_v0, 0.0  ;;  %v14213_v49 = vpack.c.bf16 %v5410_v17, %v5409_v43  ;;  %v5257_v2 = vmul.f32 %v13878_v47, %v15408_v7  ;;  %v5388_v46 = vmax.f32 %v14128_v9, 0.0  ;;  %v11362_v24 = vld [vmem:[%s15292_s3 + $0x194] ss:$8 sps:$4 sm:$0xff]   ;;  %v11360_v17 = vld [vmem:[%s15292_s3 + $0x190] ss:$8 sps:$4 sm:$0xff]  }
 0x3dd   :  { %5960 = vmatmul.mubr.bf16.gmra.mrb[8].mxu1 %v5429_v42  ;;  %v5258_v42 = vmul.f32 %v13878_v47, %v15409_v19  ;;  %v5307_v55 = vadd.f32 %v13881_v15, %v5239_v60  ;;  %v5308_v0 = vadd.f32 %v13881_v15, %v5240_v61  ;;  %v5241_v28 = vmul.f32 %v13878_v47, %v15410_v25  ;;  %v15414_v11 = vld [vmem:[#allocation47_spill] sm:$0xff] }
 0x3de   :  { %6029 = vmatpush1.bf16.msra.mxu1 %v11345_v10  ;;  %5969 = vmatprep.mubr.bf16.mxu1 %v5438_v32  ;;  %v5387_v32 = vmax.f32 %v14125_v1, 0.0  ;;  %v5430_v59 = vpack.c.bf16 %v5370_v38, %v5369_v62  ;;  %v5325_v48 = vadd.f32 %v13881_v15, %v5257_v2  ;;  %v5242_v33 = vmul.f32 %v13878_v47, %v15411_v31  ;;  %v11365_v61 = vld [vmem:[%s15292_s3 + $0x1a4] ss:$8 sps:$4 sm:$0xff]   ;;  %v15417_v2 = vld [vmem:[#allocation56_spill] sm:$0xff] }
 0x3df   :  { %6030 = vmatprep.subr.bf16.mxu1 %v11350_v45  ;;  %v5326_v1 = vadd.f32 %v13881_v15, %v5258_v42  ;;  %v5371_v8 = vmax.f32 %v5307_v55, 0.0  ;;  %v5372_v30 = vmax.f32 %v5308_v0, 0.0  ;;  %v5259_v27 = vmul.f32 %v13878_v47, %v15412_v40  ;;  %v15416_v38 = vld [vmem:[#allocation55_spill] sm:$0xff] }
 0x3e0   :  { %v5439_v9 = vpack.c.bf16 %v5388_v46, %v5387_v32  ;;  %v5260_v39 = vmul.f32 %v13878_v47, %v15413_v3  ;;  %v5389_v36 = vmax.f32 %v5325_v48, 0.0  ;;  %v5309_v57 = vadd.f32 %v13881_v15, %v5241_v28  ;;  %v11363_v46 = vld [vmem:[%s15292_s3 + $0x1a0] ss:$8 sps:$4 sm:$0xff]  }
 0x3e1   :  { %v5390_v10 = vmax.f32 %v5326_v1, 0.0  ;;  %v5310_v45 = vadd.f32 %v13881_v15, %v5242_v33  ;;  %v5431_v52 = vpack.c.bf16 %v5372_v30, %v5371_v8  ;;  %v5327_v50 = vadd.f32 %v13881_v15, %v5259_v27  ;;  %v15419_v28 = vld [vmem:[#allocation50_spill] sm:$0xff]  ;;  %v15420_v30 = vld [vmem:[#allocation29_spill] sm:$0xff]  ;;  %v15421_v27 = vld [vmem:[#allocation31_spill] sm:$0xff] }
 0x3e2   :  { %6031 = vmatpush1.bf16.msra.mxu1 %v11348_v63  ;;  %v5328_v54 = vadd.f32 %v13881_v15, %v5260_v39  ;;  %v5243_v60 = vmul.f32 %v13878_v47, %v15414_v11  ;;  %v15415_v63 = vld [vmem:[#allocation48_spill] sm:$0xff]  ;;  %v5261_v7 = vmul.f32 %v13878_v47, %v15416_v38  ;;  %v5262_v19 = vmul.f32 %v13878_v47, %v15417_v2  ;;  %v11371_v33 = vld [vmem:[%s15292_s3 + $0x1c4] ss:$8 sps:$4 sm:$0xff]  }
 0x3e3   :  { %6032 = vmatprep.subr.bf16.mxu1 %v11353_v58  ;;  %v5440_v43 = vpack.c.bf16 %v5390_v10, %v5389_v36  ;;  %v5244_v12 = vmul.f32 %v13878_v47, %v15415_v63  ;;  %v5373_v58 = vmax.f32 %v5309_v57, 0.0  ;;  %v5374_v62 = vmax.f32 %v5310_v45, 0.0  ;;  %v11369_v10 = vld [vmem:[%s15292_s3 + $0x1c0] ss:$8 sps:$4 sm:$0xff]  }
 0x3e4   :  { %v5391_v42 = vmax.f32 %v5327_v50, 0.0  ;;  %v5392_v32 = vmax.f32 %v5328_v54, 0.0  ;;  %v5330_v48 = vadd.f32 %v13881_v15, %v5262_v19  ;;  %v5246_v31 = vmul.f32 %v13878_v47, %v15419_v28  ;;  %v11372_v54 = vld [vmem:[%s15292_s3 + $0x1d0] ss:$8 sps:$4 sm:$0xff]  }
 0x3e5   :  { %5970 = vmatmul.mubr.bf16.gmra.mrb[12].mxu1 %v5430_v59  ;;  %v5312_v55 = vadd.f32 %v13881_v15, %v5244_v12  ;;  %v5432_v0 = vpack.c.bf16 %v5374_v62, %v5373_v58  ;;  %v11368_v59 = vld [vmem:[%s15292_s3 + $0x1b4] ss:$8 sps:$4 sm:$0xff]   ;;  %v5279_v40 = vmul.f32 %v13878_v47, %v15420_v30  ;;  %v5280_v3 = vmul.f32 %v13878_v47, %v15421_v27  ;;  %v11378_v62 = vld [vmem:[%s15292_s3 + $0x1f0] ss:$8 sps:$4 sm:$0xff]  }
 0x3e6   :  { %6033 = vmatpush1.bf16.msra.mxu1 %v11351_v4  ;;  %5979 = vmatprep.mubr.bf16.mxu1 %v5439_v9  ;;  %v5311_v4 = vadd.f32 %v13881_v15, %v5243_v60  ;;  %v5441_v1 = vpack.c.bf16 %v5392_v32, %v5391_v42  ;;  %v11366_v9 = vld [vmem:[%s15292_s3 + $0x1b0] ss:$8 sps:$4 sm:$0xff]   ;;  %v5394_v36 = vmax.f32 %v5330_v48, 0.0  ;;  %v5314_v57 = vadd.f32 %v13881_v15, %v5246_v31 }
 0x3e7   :  { %6034 = vmatprep.subr.bf16.mxu1 %v11356_v29  ;;  %v5329_v29 = vadd.f32 %v13881_v15, %v5261_v7  ;;  %v5376_v8 = vmax.f32 %v5312_v55, 0.0 }
 0x3e8   :  { %v5378_v11 = vmax.f32 %v5314_v57, 0.0 }
 0x3e9   :  { %v5393_v39 = vmax.f32 %v5329_v29, 0.0 }
 0x3ea   :  { %6035 = vmatpush1.bf16.msra.mxu1 %v11354_v44  ;;  %v15418_v44 = vld [vmem:[#allocation49_spill] sm:$0xff] }
 0x3eb   :  { %6036 = vmatprep.subr.bf16.mxu1 %v11359_v37  ;;  %v5245_v25 = vmul.f32 %v13878_v47, %v15418_v44  ;;  %v5375_v37 = vmax.f32 %v5311_v4, 0.0  ;;  %v5348_v47 = vadd.f32 %v13881_v15, %v5280_v3  ;;  %v5442_v50 = vpack.c.bf16 %v5394_v36, %v5393_v39 }
 0x3ed   :  { %5980 = vmatmul.mubr.bf16.gmra.mrb[16].mxu1 %v5431_v52  ;;  %v5433_v45 = vpack.c.bf16 %v5376_v8, %v5375_v37  ;;  %v11374_v52 = vld [vmem:[%s15292_s3 + $0x1d4] ss:$8 sps:$4 sm:$0xff]   ;;  %v5412_v63 = vmax.f32 %v5348_v47, 0.0 }
 0x3ee   :  { %6037 = vmatpush1.bf16.msra.mxu1 %v11357_v23  ;;  %5989 = vmatprep.mubr.bf16.mxu1 %v5440_v43  ;;  %v5313_v23 = vadd.f32 %v13881_v15, %v5245_v25  ;;  %v11377_v43 = vld [vmem:[%s15292_s3 + $0x1e4] ss:$8 sps:$4 sm:$0xff]  }
 0x3ef   :  { %6038 = vmatprep.subr.bf16.mxu1 %v11362_v24  ;;  %v5347_v24 = vadd.f32 %v13881_v15, %v5279_v40  ;;  %v11375_v15 = vld [vmem:[%s15292_s3 + $0x1e0] ss:$8 sps:$4 sm:$0xff]  }
 0x3f1   :  { %v5411_v60 = vmax.f32 %v5347_v24, 0.0 }
 0x3f2   :  { %6039 = vmatpush1.bf16.msra.mxu1 %v11360_v17  ;;  %v5377_v17 = vmax.f32 %v5313_v23, 0.0 }
 0x3f3   :  { %6040 = vmatprep.subr.bf16.mxu1 %v11365_v61  ;;  %v11380_v61 = vld [vmem:[%s15292_s3 + $0x1f4] ss:$8 sps:$4 sm:$0xff]   ;;  %v5451_v58 = vpack.c.bf16 %v5412_v63, %v5411_v60 }
 0x3f4   :  { %v5434_v12 = vpack.c.bf16 %v5378_v11, %v5377_v17 }
 0x3f5   :  { %5990 = vmatmul.mubr.bf16.gmra.mrb[20].mxu1 %v5432_v0 }
 0x3f6   :  { %6041 = vmatpush1.bf16.msra.mxu1 %v11363_v46  ;;  %5999 = vmatprep.mubr.bf16.mxu1 %v5441_v1 }
 0x3f7   :  { %6042 = vmatprep.subr.bf16.mxu1 %v11368_v59 }
 0x3fa   :  { %6043 = vmatpush1.bf16.msra.mxu1 %v11366_v9 }
 0x3fb   :  { %6044 = vmatprep.subr.bf16.mxu1 %v11371_v33 }
 0x3fd   :  { %6000 = vmatmul.mubr.bf16.gmra.mrb[24].mxu1 %v5433_v45 }
 0x3fe   :  { %6045 = vmatpush1.bf16.msra.mxu1 %v11369_v10  ;;  %6009 = vmatprep.mubr.bf16.mxu1 %v5442_v50 }
 0x3ff   :  { %6046 = vmatprep.subr.bf16.mxu1 %v11374_v52 }
 0x402   :  { %6047 = vmatpush1.bf16.msra.mxu1 %v11372_v54 }
 0x403   :  { %6048 = vmatprep.subr.bf16.mxu1 %v11377_v43 }
 0x405   :  { %6010 = vmatmul.mubr.bf16.gmra.mrb[28].mxu1 %v5434_v12 }
 0x406   :  { %6049 = vmatpush1.bf16.msra.mxu1 %v11375_v15  ;;  %6052 = vmatprep.mubr.bf16.mxu1 %v5451_v58 }
 0x407   :  { %6050 = vmatprep.subr.bf16.mxu1 %v11380_v61 }
 0x40a   :  { %6051 = vmatpush1.bf16.msra.mxu1 %v11378_v62 }
 0x40d   :  { %6053 = vmatmul.mubr.bf16.vlgmr.msra.gmra.mrb[0].mxu1 %v14081_v16 }
 0x40e   :  { %6062 = vmatprep.mubr.bf16.mxu1 %v14141_v51 }
 0x415   :  { %6063 = vmatmul.mubr.bf16.gmra.mrb[4].mxu1 %v14149_v22 }
 0x416   :  { %6072 = vmatprep.mubr.bf16.mxu1 %v14157_v18 }
 0x41d   :  { %6073 = vmatmul.mubr.bf16.gmra.mrb[8].mxu1 %v14159_v26 }
 0x41e   :  { %6082 = vmatprep.mubr.bf16.mxu1 %v14163_v20 }
 0x425   :  { %6083 = vmatmul.mubr.bf16.gmra.mrb[12].mxu1 %v14168_v13 }
 0x426   :  { %6092 = vmatprep.mubr.bf16.mxu1 %v14176_v35 }
 0x42d   :  { %6093 = vmatmul.mubr.bf16.gmra.mrb[16].mxu1 %v14178_v5 }
 0x42e   :  { %6102 = vmatprep.mubr.bf16.mxu1 %v14185_v34 }
 0x435   :  { %6103 = vmatmul.mubr.bf16.gmra.mrb[20].mxu1 %v14190_v6 }
 0x436   :  { %6112 = vmatprep.mubr.bf16.mxu1 %v14192_v53 }
 0x43d   :  { %6113 = vmatmul.mubr.bf16.gmra.mrb[24].mxu1 %v14196_v21 }
 0x43e   :  { %6122 = vmatprep.mubr.bf16.mxu1 %v14204_v56 }
 0x445   :  { %6123 = vmatmul.mubr.bf16.gmra.mrb[28].mxu1 %v14213_v49 }
 0x4e0   :  { %v14333_v16 = vpop.f32.mrb[0].mxu1 }
 0x4e1   :  { %v14335_v51 = vpop.f32.mrb[1].mxu1 }
 0x4e2   :  { %v14337_v22 = vpop.f32.mrb[2].mxu1 }
 0x4e3   :  { %v6134_v18 = vadd.f32 %v14337_v22, %v14333_v16  ;;  %v14341_v26 = vpop.f32.mrb[3].mxu1 }
 0x4e4   :  { %v6155_v20 = vadd.f32 %v14341_v26, %v14335_v51 }
 0x4e8   :  { %v14345_v13 = vpop.f32.mrb[4].mxu1 }
 0x4e9   :  { %v6135_v35 = vadd.f32 %v6134_v18, %v14345_v13  ;;  %v14348_v5 = vpop.f32.mrb[5].mxu1 }
 0x4ea   :  { %v6156_v34 = vadd.f32 %v6155_v20, %v14348_v5  ;;  %v14351_v6 = vpop.f32.mrb[6].mxu1 }
 0x4eb   :  { %v6136_v53 = vadd.f32 %v6135_v35, %v14351_v6  ;;  %v14354_v21 = vpop.f32.mrb[7].mxu1 }
 0x4ec   :  { %v6157_v56 = vadd.f32 %v6156_v34, %v14354_v21 }
 0x4f0   :  { %v14357_v49 = vpop.f32.mrb[8].mxu1 }
 0x4f1   :  { %v6137_v38 = vadd.f32 %v6136_v53, %v14357_v49  ;;  %v14360_v7 = vpop.f32.mrb[9].mxu1 }
 0x4f2   :  { %v6158_v2 = vadd.f32 %v6157_v56, %v14360_v7  ;;  %v6078_v19 = vpop.f32.mrb[10].mxu1 }
 0x4f3   :  { %v6138_v42 = vadd.f32 %v6137_v38, %v6078_v19  ;;  %v14363_v32 = vpop.f32.mrb[11].mxu1 }
 0x4f4   :  { %v6159_v46 = vadd.f32 %v6158_v2, %v14363_v32 }
 0x4f8   :  { %v6084_v4 = vpop.f32.mrb[12].mxu1 }
 0x4f9   :  { %v6139_v55 = vadd.f32 %v6138_v42, %v6084_v4  ;;  %v14366_v0 = vpop.f32.mrb[13].mxu1 }
 0x4fa   :  { %v6160_v59 = vadd.f32 %v6159_v46, %v14366_v0  ;;  %v6088_v29 = vpop.f32.mrb[14].mxu1 }
 0x4fb   :  { %v6140_v48 = vadd.f32 %v6139_v55, %v6088_v29  ;;  %v14369_v1 = vpop.f32.mrb[15].mxu1 }
 0x4fc   :  { %v6161_v9 = vadd.f32 %v6160_v59, %v14369_v1 }
 0x500   :  { %v6094_v44 = vpop.f32.mrb[16].mxu1 }
 0x501   :  { %v6141_v25 = vadd.f32 %v6140_v48, %v6094_v44  ;;  %v14372_v28 = vpop.f32.mrb[17].mxu1 }
 0x502   :  { %v6162_v31 = vadd.f32 %v6161_v9, %v14372_v28  ;;  %v6098_v33 = vpop.f32.mrb[18].mxu1 }
 0x503   :  { %v6142_v37 = vadd.f32 %v6141_v25, %v6098_v33  ;;  %v14375_v8 = vpop.f32.mrb[19].mxu1 }
 0x504   :  { %v6163_v30 = vadd.f32 %v6162_v31, %v14375_v8 }
 0x508   :  { %v6104_v40 = vpop.f32.mrb[20].mxu1 }
 0x509   :  { %v6143_v27 = vadd.f32 %v6142_v37, %v6104_v40  ;;  %v14378_v3 = vpop.f32.mrb[21].mxu1 }
 0x50a   :  { %v6164_v39 = vadd.f32 %v6163_v30, %v14378_v3  ;;  %v6108_v36 = vpop.f32.mrb[22].mxu1 }
 0x50b   :  { %v6144_v10 = vadd.f32 %v6143_v27, %v6108_v36  ;;  %v14381_v23 = vpop.f32.mrb[23].mxu1 }
 0x50c   :  { %v6165_v57 = vadd.f32 %v6164_v39, %v14381_v23 }
 0x510   :  { %v6114_v45 = vpop.f32.mrb[24].mxu1 }
 0x511   :  { %v6145_v52 = vadd.f32 %v6144_v10, %v6114_v45  ;;  %v6116_v24 = vpop.f32.mrb[25].mxu1 }
 0x512   :  { %v6166_v47 = vadd.f32 %v6165_v57, %v6116_v24  ;;  %v6118_v50 = vpop.f32.mrb[26].mxu1 }
 0x513   :  { %v6146_v54 = vadd.f32 %v6145_v52, %v6118_v50  ;;  %v6120_v43 = vpop.f32.mrb[27].mxu1 }
 0x514   :  { %v6167_v17 = vadd.f32 %v6166_v47, %v6120_v43 }
 0x518   :  { %v6124_v11 = vpop.f32.mrb[28].mxu1 }
 0x519   :  { %v6147_v60 = vadd.f32 %v6146_v54, %v6124_v11  ;;  %v6126_v63 = vpop.f32.mrb[29].mxu1 }
 0x51a   :  { %v6168_v15 = vadd.f32 %v6167_v17, %v6126_v63  ;;  %v6128_v12 = vpop.f32.mrb[30].mxu1 }
 0x51b   :  { %v6148_v61 = vadd.f32 %v6147_v60, %v6128_v12  ;;  %v6130_v58 = vpop.f32.mrb[31].mxu1 }
 0x51c   :  { %v6169_v62 = vadd.f32 %v6168_v15, %v6130_v58 }
 0x51d   :  { %v6149_v18 = vrot.slane %v6148_v61, 4 }
 0x51e   :  { %v6170_v20 = vrot.slane %v6169_v62, 4 }
 0x51f   :  { %v6150_v35 = vadd.f32 %v6149_v18, %v6148_v61 }
 0x520   :  { %v6171_v34 = vadd.f32 %v6170_v20, %v6169_v62 }
 0x521   :  { %v6151_v53 = vrot.slane %v6150_v35, 2 }
 0x522   :  { %v6172_v56 = vrot.slane %v6171_v34, 2 }
 0x523   :  { %v6152_v38 = vadd.f32 %v6151_v53, %v6150_v35 }
 0x524   :  { %v6173_v2 = vadd.f32 %v6172_v56, %v6171_v34 }
 0x525   :  { %v6153_v42 = vrot.slane %v6152_v38, 1 }
 0x526   :  { %v6174_v46 = vrot.slane %v6173_v2, 1 }
 0x527   :  { %v6154_v55 = vadd.f32 %v6153_v42, %v6152_v38 }
 0x528   :  { %v6175_v48 = vadd.f32 %v6174_v46, %v6173_v2 }
 0x529   :  { %v6176_v59 = vmul.f32 0.0078125, %v6154_v55 }
 0x52b   :  { %v14385_v9 = vsub.f32 %v14333_v16, %v6176_v59  ;;  %v14388_v25 = vsub.f32 %v14337_v22, %v6176_v59  ;;  %v14391_v31 = vsub.f32 %v14345_v13, %v6176_v59  ;;  %v14394_v37 = vsub.f32 %v14351_v6, %v6176_v59 }
 0x52c   :  { %v14397_v30 = vsub.f32 %v14357_v49, %v6176_v59  ;;  %v14399_v27 = vsub.f32 %v6078_v19, %v6176_v59  ;;  %v14401_v39 = vsub.f32 %v6084_v4, %v6176_v59  ;;  %v14403_v10 = vsub.f32 %v6088_v29, %v6176_v59 }
 0x52d   :  { %v14405_v16 = vsub.f32 %v6094_v44, %v6176_v59  ;;  %v14407_v57 = vsub.f32 %v6098_v33, %v6176_v59  ;;  %v14409_v22 = vsub.f32 %v6104_v40, %v6176_v59  ;;  %v14411_v13 = vsub.f32 %v6108_v36, %v6176_v59 }
 0x52e   :  { %v14413_v52 = vsub.f32 %v6114_v45, %v6176_v59  ;;  %v14415_v6 = vsub.f32 %v6118_v50, %v6176_v59  ;;  %v14417_v49 = vsub.f32 %v6124_v11, %v6176_v59  ;;  %v14419_v19 = vsub.f32 %v6128_v12, %v6176_v59 }
 0x52f   :  { %v6210_v4 = vmul.f32 %v14385_v9, %v14385_v9  ;;  %v6212_v29 = vmul.f32 %v14388_v25, %v14388_v25  ;;  %v6177_v44 = vmul.f32 0.0078125, %v6175_v48  ;;  %v6214_v33 = vmul.f32 %v14391_v31, %v14391_v31 }
 0x530   :  { %v6216_v40 = vmul.f32 %v14394_v37, %v14394_v37  ;;  %v6226_v53 = vmul.f32 %v14405_v16, %v14405_v16  ;;  %v6228_v42 = vmul.f32 %v14407_v57, %v14407_v57  ;;  %v6230_v48 = vmul.f32 %v14409_v22, %v14409_v22 }
 0x531   :  { %v6242_v36 = vadd.f32 %v6212_v29, %v6210_v4  ;;  %v14430_v45 = vsub.f32 %v14335_v51, %v6177_v44  ;;  %v14433_v47 = vsub.f32 %v14341_v26, %v6177_v44  ;;  %v14436_v50 = vsub.f32 %v14348_v5, %v6177_v44 }
 0x532   :  { %v14439_v54 = vsub.f32 %v14354_v21, %v6177_v44  ;;  %v14442_v17 = vsub.f32 %v14360_v7, %v6177_v44  ;;  %v14445_v11 = vsub.f32 %v14363_v32, %v6177_v44  ;;  %v14448_v60 = vsub.f32 %v14366_v0, %v6177_v44 }
 0x533   :  { %v6243_v51 = vadd.f32 %v6242_v36, %v6214_v33  ;;  %v14451_v15 = vsub.f32 %v14369_v1, %v6177_v44  ;;  %v14454_v26 = vsub.f32 %v14372_v28, %v6177_v44  ;;  %v14457_v5 = vsub.f32 %v14375_v8, %v6177_v44 }
 0x534   :  { %v14460_v21 = vsub.f32 %v14378_v3, %v6177_v44  ;;  %v14463_v7 = vsub.f32 %v14381_v23, %v6177_v44  ;;  %v14465_v32 = vsub.f32 %v6116_v24, %v6177_v44  ;;  %v14467_v0 = vsub.f32 %v6120_v43, %v6177_v44 }
 0x535   :  { %v6218_v1 = vmul.f32 %v14397_v30, %v14397_v30  ;;  %v6244_v12 = vadd.f32 %v6243_v51, %v6216_v40  ;;  %v14471_v61 = vsub.f32 %v6126_v63, %v6177_v44  ;;  %v14473_v28 = vsub.f32 %v6130_v58, %v6177_v44 }
 0x536   :  { %v6211_v8 = vmul.f32 %v14430_v45, %v14430_v45  ;;  %v6213_v3 = vmul.f32 %v14433_v47, %v14433_v47  ;;  %v6220_v23 = vmul.f32 %v14399_v27, %v14399_v27  ;;  %v6222_v43 = vmul.f32 %v14401_v39, %v14401_v39 }
 0x537   :  { %v6245_v24 = vadd.f32 %v6244_v12, %v6218_v1  ;;  %v6215_v63 = vmul.f32 %v14436_v50, %v14436_v50  ;;  %v6224_v58 = vmul.f32 %v14403_v10, %v14403_v10  ;;  %v6217_v35 = vmul.f32 %v14439_v54, %v14439_v54 }
 0x538   :  { %v6263_v18 = vadd.f32 %v6213_v3, %v6211_v8  ;;  %v6219_v38 = vmul.f32 %v14442_v17, %v14442_v17  ;;  %v6221_v55 = vmul.f32 %v14445_v11, %v14445_v11  ;;  %v6223_v29 = vmul.f32 %v14448_v60, %v14448_v60 }
 0x539   :  { %v6246_v62 = vadd.f32 %v6245_v24, %v6220_v23  ;;  %v6232_v33 = vmul.f32 %v14411_v13, %v14411_v13  ;;  %v6225_v36 = vmul.f32 %v14451_v15, %v14451_v15  ;;  %v6234_v1 = vmul.f32 %v14413_v52, %v14413_v52 }
 0x53a   :  { %v6264_v34 = vadd.f32 %v6263_v18, %v6215_v63  ;;  %v6227_v8 = vmul.f32 %v14454_v26, %v14454_v26  ;;  %v6236_v23 = vmul.f32 %v14415_v6, %v14415_v6  ;;  %v6238_v63 = vmul.f32 %v14417_v49, %v14417_v49 }
 0x53b   :  { %v6247_v20 = vadd.f32 %v6246_v62, %v6222_v43  ;;  %v6229_v43 = vmul.f32 %v14457_v5, %v14457_v5 }
 0x53c   :  { %v6265_v2 = vadd.f32 %v6264_v34, %v6217_v35  ;;  %v6240_v35 = vmul.f32 %v14419_v19, %v14419_v19 }
 0x53d   :  { %v6248_v56 = vadd.f32 %v6247_v20, %v6224_v58  ;;  %v6231_v58 = vmul.f32 %v14460_v21, %v14460_v21 }
 0x53e   :  { %v6266_v59 = vadd.f32 %v6265_v2, %v6219_v38  ;;  %v6235_v2 = vmul.f32 %v14465_v32, %v14465_v32 }
 0x53f   :  { %v6249_v46 = vadd.f32 %v6248_v56, %v6226_v53  ;;  %v6233_v53 = vmul.f32 %v14463_v7, %v14463_v7 }
 0x540   :  { %v6267_v44 = vadd.f32 %v6266_v59, %v6221_v55  ;;  %v6237_v55 = vmul.f32 %v14467_v0, %v14467_v0 }
 0x541   :  { %v6250_v4 = vadd.f32 %v6249_v46, %v6228_v42 }
 0x542   :  { %v6268_v51 = vadd.f32 %v6267_v44, %v6223_v29 }
 0x543   :  { %v6251_v40 = vadd.f32 %v6250_v4, %v6230_v48  ;;  %v6239_v4 = vmul.f32 %v14471_v61, %v14471_v61 }
 0x544   :  { %v6269_v3 = vadd.f32 %v6268_v51, %v6225_v36 }
 0x545   :  { %v6252_v12 = vadd.f32 %v6251_v40, %v6232_v33  ;;  %v6241_v33 = vmul.f32 %v14473_v28, %v14473_v28 }
 0x546   :  { %v6270_v62 = vadd.f32 %v6269_v3, %v6227_v8 }
 0x547   :  { %v6253_v24 = vadd.f32 %v6252_v12, %v6234_v1 }
 0x548   :  { %v6271_v20 = vadd.f32 %v6270_v62, %v6229_v43 }
 0x549   :  { %v6254_v18 = vadd.f32 %v6253_v24, %v6236_v23 }
 0x54a   :  { %v6272_v56 = vadd.f32 %v6271_v20, %v6231_v58 }
 0x54b   :  { %v6255_v34 = vadd.f32 %v6254_v18, %v6238_v63 }
 0x54c   :  { %v6273_v42 = vadd.f32 %v6272_v56, %v6233_v53 }
 0x54d   :  { %v6256_v38 = vadd.f32 %v6255_v34, %v6240_v35  ;;  %v11575_v35 = vmov 1983009808  }
 0x54e   :  { %v6274_v59 = vadd.f32 %v6273_v42, %v6235_v2  ;;  %v6294_v34 = vunpack.c.l.s4 %v11575_v35 }
 0x54f   :  { %v6257_v46 = vrot.slane %v6256_v38, 4 }
 0x550   :  { %v6275_v29 = vadd.f32 %v6274_v59, %v6237_v55  ;;  %v6295_v53 = vunpack.c.0.s8 %v6294_v34  ;;  %v14533_v55 = vsub.s32 3, %v13869_v14 }
 0x551   :  { %v6258_v48 = vadd.f32 %v6257_v46, %v6256_v38  ;;  %v6133_v46 = vld [vmem:[#allocation13] sm:$0xf] }
 0x552   :  { %v6276_v40 = vadd.f32 %v6275_v29, %v6239_v4  ;;  %v14530_v38 = vsub.s32 %v6295_v53, %v13869_v14  ;;  %v6357_v29 = vrot.slane %v6133_v46, %v13875_v41 }
 0x553   :  { %v6259_v44 = vrot.slane %v6258_v48, 2 }
 0x554   :  { %v6277_v51 = vadd.f32 %v6276_v40, %v6241_v33  ;;  %v15422_v33 = vld [vmem:[#allocation36_spill] sm:$0xff] }
 0x555   :  { %v6260_v36 = vadd.f32 %v6259_v44, %v6258_v48  ;;  %v14537_v48 = vsub.s32 2, %v13869_v14  ;;  %v6361_v44 = vrot.slane %v6133_v46, %v14533_v55 }
 0x556   :  { %v6278_v12 = vrot.slane %v6277_v51, 4 }
 0x557   :  { %v6261_v1 = vrot.slane %v6260_v36, 1 }
 0x558   :  { %v6279_v3 = vadd.f32 %v6278_v12, %v6277_v51  ;;  %v14546_v12 = vrot.slane %v6357_v29, %v13875_v41 }
 0x559   :  { %v6262_v8 = vadd.f32 %v6261_v1, %v6260_v36 }
 0x55a   :  { %v6280_v23 = vrot.slane %v6279_v3, 2 }
 0x55b   :  { %v6284_v24 = vmul.f32 0.0078125, %v6262_v8  ;;  %v14549_v8 = vrot.slane %v6361_v44, %v13875_v41 }
 0x55c   :  { %v6281_v43 = vadd.f32 %v6280_v23, %v6279_v3 }
 0x55d   :  { %v6286_v63 = vadd.f32 1e-05, %v6284_v24 }
 0x55e   :  { %v6282_v62 = vrot.slane %v6281_v43, 1 }
 0x55f   :  { %11383 = vrsqrt.f32 %v6286_v63 }
 0x560   :  { %v6283_v18 = vadd.f32 %v6282_v62, %v6281_v43 }
 0x562   :  { %v6285_v58 = vmul.f32 0.0078125, %v6283_v18 }
 0x564   :  { %v6287_v20 = vadd.f32 1e-05, %v6285_v58 }
 0x566   :  { %11385 = vrsqrt.f32 %v6287_v20 }
 0x569   :  { %v11384_v56 = vpop.eup %11383 }
 0x570   :  { %v11386_v2 = vpop.eup %11385 }
 0x571   :  { %v6292_v42 = vcombine.low %v11384_v56, %v11386_v2 }
 0x573   :  { %v6299_v59 = vrot.slane %v6292_v42, %v14530_v38 }
 0x575   :  { %v6301_v4 = vmul.f32 %v6299_v59, %v6133_v46 }
 0x577   :  { %v6306_v40 = vrot.slane %v6301_v4, %v15422_v33  ;;  %v6310_v36 = vrot.slane %v6301_v4, %v14537_v48 }
 0x579   :  { %v6316_v51 = vrot.slane %v6306_v40, %v15422_v33  ;;  %v6320_v1 = vrot.slane %v6310_v36, %v15422_v33 }
 0x57b   :  { %v6321_v3 = vmul.f32 %v6316_v51, %v14385_v9  ;;  %v6322_v23 = vmul.f32 %v6320_v1, %v14430_v45  ;;  %v6323_v24 = vmul.f32 %v6316_v51, %v14388_v25  ;;  %v6324_v43 = vmul.f32 %v6320_v1, %v14433_v47 }
 0x57c   :  { %v6325_v62 = vmul.f32 %v6316_v51, %v14391_v31  ;;  %v6326_v63 = vmul.f32 %v6320_v1, %v14436_v50  ;;  %v6327_v18 = vmul.f32 %v6316_v51, %v14394_v37  ;;  %v6328_v58 = vmul.f32 %v6320_v1, %v14439_v54 }
 0x57d   :  { %v6329_v20 = vmul.f32 %v6316_v51, %v14397_v30  ;;  %v6330_v35 = vmul.f32 %v6320_v1, %v14442_v17  ;;  %v6331_v9 = vmul.f32 %v6316_v51, %v14399_v27  ;;  %v6332_v45 = vmul.f32 %v6320_v1, %v14445_v11 }
 0x57e   :  { %v6333_v25 = vmul.f32 %v6316_v51, %v14401_v39  ;;  %v6334_v47 = vmul.f32 %v6320_v1, %v14448_v60  ;;  %v6335_v31 = vmul.f32 %v6316_v51, %v14403_v10  ;;  %v6336_v50 = vmul.f32 %v6320_v1, %v14451_v15 }
 0x57f   :  { %v6337_v37 = vmul.f32 %v6316_v51, %v14405_v16  ;;  %v6338_v54 = vmul.f32 %v6320_v1, %v14454_v26  ;;  %v6339_v30 = vmul.f32 %v6316_v51, %v14407_v57  ;;  %v6340_v17 = vmul.f32 %v6320_v1, %v14457_v5 }
 0x580   :  { %v6341_v27 = vmul.f32 %v6316_v51, %v14409_v22  ;;  %v6342_v11 = vmul.f32 %v6320_v1, %v14460_v21  ;;  %v6343_v39 = vmul.f32 %v6316_v51, %v14411_v13  ;;  %v6344_v60 = vmul.f32 %v6320_v1, %v14463_v7 }
 0x581   :  { %v6345_v10 = vmul.f32 %v6316_v51, %v14413_v52  ;;  %v6346_v15 = vmul.f32 %v6320_v1, %v14465_v32  ;;  %v6347_v16 = vmul.f32 %v6316_v51, %v14415_v6  ;;  %v6348_v26 = vmul.f32 %v6320_v1, %v14467_v0 }
 0x582   :  { %v6349_v57 = vmul.f32 %v6316_v51, %v14417_v49  ;;  %v6350_v5 = vmul.f32 %v6320_v1, %v14471_v61  ;;  %v6351_v22 = vmul.f32 %v6316_v51, %v14419_v19  ;;  %v6352_v21 = vmul.f32 %v6320_v1, %v14473_v28 }
 0x583   :  { %v14584_v13 = vadd.f32 %v14546_v12, %v6321_v3  ;;  %v14587_v7 = vadd.f32 %v14549_v8, %v6322_v23  ;;  %v14590_v52 = vadd.f32 %v14546_v12, %v6323_v24  ;;  %v14593_v6 = vadd.f32 %v14549_v8, %v6324_v43 }
 0x584   :  { %v14596_v49 = vadd.f32 %v14546_v12, %v6325_v62  ;;  %v14599_v32 = vadd.f32 %v14549_v8, %v6326_v63  ;;  %v6378_v19 = vadd.f32 %v14546_v12, %v6327_v18  ;;  %v6379_v0 = vadd.f32 %v14549_v8, %v6328_v58 }
 0x585   :  { %v6380_v61 = vadd.f32 %v14546_v12, %v6329_v20  ;;  %v6381_v28 = vadd.f32 %v14549_v8, %v6330_v35  ;;  %v6382_v34 = vadd.f32 %v14546_v12, %v6331_v9  ;;  %v6383_v53 = vadd.f32 %v14549_v8, %v6332_v45 }
 0x586   :  { %v6384_v56 = vadd.f32 %v14546_v12, %v6333_v25  ;;  %v6385_v2 = vadd.f32 %v14549_v8, %v6334_v47  ;;  %v6386_v42 = vadd.f32 %v14546_v12, %v6335_v31  ;;  %v6387_v46 = vadd.f32 %v14549_v8, %v6336_v50 }
 0x587   :  { %v6388_v59 = vadd.f32 %v14546_v12, %v6337_v37  ;;  %v6389_v4 = vadd.f32 %v14549_v8, %v6338_v54  ;;  %v6390_v29 = vadd.f32 %v14546_v12, %v6339_v30  ;;  %v6391_v44 = vadd.f32 %v14549_v8, %v6340_v17 }
 0x588   :  { %v6392_v40 = vadd.f32 %v14546_v12, %v6341_v27  ;;  %v6393_v36 = vadd.f32 %v14549_v8, %v6342_v11  ;;  %v6394_v51 = vadd.f32 %v14546_v12, %v6343_v39  ;;  %v6395_v1 = vadd.f32 %v14549_v8, %v6344_v60 }
 0x589   :  { %v6396_v3 = vadd.f32 %v14546_v12, %v6345_v10  ;;  %v6397_v23 = vadd.f32 %v14549_v8, %v6346_v15  ;;  %v6398_v24 = vadd.f32 %v14546_v12, %v6347_v16  ;;  %v6399_v43 = vadd.f32 %v14549_v8, %v6348_v26 }
 0x58a   :  { %v6400_v62 = vadd.f32 %v14546_v12, %v6349_v57  ;;  %v6401_v63 = vadd.f32 %v14549_v8, %v6350_v5  ;;  %v6402_v18 = vadd.f32 %v14546_v12, %v6351_v22  ;;  %v6403_v58 = vadd.f32 %v14549_v8, %v6352_v21 }
 0x58b   :  { %v6404_v20 = vmax.f32 %v14584_v13, 0.0  ;;  %v6405_v35 = vmax.f32 %v14587_v7, 0.0  ;;  %v6406_v9 = vmax.f32 %v14590_v52, 0.0  ;;  %v6407_v45 = vmax.f32 %v14593_v6, 0.0 }
 0x58c   :  { %v6408_v25 = vmax.f32 %v14596_v49, 0.0  ;;  %v6409_v47 = vmax.f32 %v14599_v32, 0.0  ;;  %v6410_v31 = vmax.f32 %v6378_v19, 0.0  ;;  %v6411_v50 = vmax.f32 %v6379_v0, 0.0 }
 0x58d   :  { %v6412_v37 = vmax.f32 %v6380_v61, 0.0  ;;  %v6413_v54 = vmax.f32 %v6381_v28, 0.0  ;;  %v6414_v30 = vmax.f32 %v6382_v34, 0.0  ;;  %v6415_v12 = vmax.f32 %v6383_v53, 0.0 }
 0x58e   :  { %v6416_v17 = vmax.f32 %v6384_v56, 0.0  ;;  %v6417_v8 = vmax.f32 %v6385_v2, 0.0  ;;  %v6418_v27 = vmax.f32 %v6386_v42, 0.0  ;;  %v6419_v11 = vmax.f32 %v6387_v46, 0.0 }
 0x58f   :  { %v6420_v39 = vmax.f32 %v6388_v59, 0.0  ;;  %v6421_v60 = vmax.f32 %v6389_v4, 0.0  ;;  %v6422_v10 = vmax.f32 %v6390_v29, 0.0  ;;  %v6423_v15 = vmax.f32 %v6391_v44, 0.0 }
 0x590   :  { %v6424_v16 = vmax.f32 %v6392_v40, 0.0  ;;  %v6425_v26 = vmax.f32 %v6393_v36, 0.0  ;;  %v6426_v57 = vmax.f32 %v6394_v51, 0.0  ;;  %v6427_v5 = vmax.f32 %v6395_v1, 0.0 }
 0x591   :  { %v6428_v22 = vmax.f32 %v6396_v3, 0.0  ;;  %v6429_v21 = vmax.f32 %v6397_v23, 0.0  ;;  %v6430_v13 = vmax.f32 %v6398_v24, 0.0  ;;  %v6431_v7 = vmax.f32 %v6399_v43, 0.0 }
 0x592   :  { %v6432_v52 = vmax.f32 %v6400_v62, 0.0  ;;  %v6433_v6 = vmax.f32 %v6401_v63, 0.0  ;;  %v6434_v49 = vmax.f32 %v6402_v18, 0.0  ;;  %v6435_v32 = vmax.f32 %v6403_v58, 0.0 }
 0x593   :  { %v14633_v19 = vpack.c.bf16 %v6406_v9, %v6404_v20  ;;  %v6437_v0 = vpack.c.bf16 %v6407_v45, %v6405_v35  ;;  %v14635_v61 = vpack.c.bf16 %v6410_v31, %v6408_v25  ;;  %v14637_v28 = vpack.c.bf16 %v6411_v50, %v6409_v47 }
 0x594   :  { %v14639_v34 = vpack.c.bf16 %v6414_v30, %v6412_v37  ;;  %v14641_v53 = vpack.c.bf16 %v6415_v12, %v6413_v54  ;;  %v14643_v56 = vpack.c.bf16 %v6418_v27, %v6416_v17  ;;  %v14645_v2 = vpack.c.bf16 %v6419_v11, %v6417_v8 }
 0x595   :  { %v14647_v42 = vpack.c.bf16 %v6422_v10, %v6420_v39  ;;  %v14649_v46 = vpack.c.bf16 %v6423_v15, %v6421_v60  ;;  %v14651_v59 = vpack.c.bf16 %v6426_v57, %v6424_v16  ;;  %v14653_v4 = vpack.c.bf16 %v6427_v5, %v6425_v26 }
 0x596   :  { %v14655_v29 = vpack.c.bf16 %v6430_v13, %v6428_v22  ;;  %v14657_v44 = vpack.c.bf16 %v6431_v7, %v6429_v21  ;;  %v14659_v40 = vpack.c.bf16 %v6434_v49, %v6432_v52  ;;  %v14661_v36 = vpack.c.bf16 %v6435_v32, %v6433_v6 }
 0x597   :  { %11555 = dma.done.wait [#allocation7], 32768 }
 0x598   :  { %11556 = vsyncadd [#allocation7], 4294934528  ;;  %6776 = vmatprep.mubr.bf16.mxu0 %v6437_v0  ;;  %6988 = vmatprep.mubr.bf16.mxu1 %v6437_v0  ;;  %v6489_v51 = vld [vmem:[#allocation5 + $0x8] sm:$0xff]  ;;  %v6491_v1 = vld [vmem:[#allocation5 + $0x18] sm:$0xff] }
 0x599   :  { %v6488_v3 = vld [vmem:[#allocation5] sm:$0xff]  ;;  %6744 = vmatprep.subr.bf16.mxu0 %v6489_v51  ;;  %6956 = vmatprep.subr.bf16.mxu1 %v6491_v1  ;;  %v6490_v23 = vld [vmem:[#allocation5 + $0x10] sm:$0xff]  ;;  %v6493_v24 = vld [vmem:[#allocation5 + $0x28] sm:$0xff] }
 0x59a   :  { %v6495_v43 = vld [vmem:[#allocation5 + $0x38] sm:$0xff]  ;;  %6745 = vmatpush1.bf16.msra.mxu0 %v6488_v3  ;;  %6957 = vmatpush1.bf16.msra.mxu1 %v6490_v23  ;;  %v6492_v62 = vld [vmem:[#allocation5 + $0x20] sm:$0xff]  ;;  %v6494_v63 = vld [vmem:[#allocation5 + $0x30] sm:$0xff] }
 0x59b   :  { %6746 = vmatprep.subr.bf16.mxu0 %v6493_v24  ;;  %6958 = vmatprep.subr.bf16.mxu1 %v6495_v43  ;;  %v6497_v18 = vld [vmem:[#allocation5 + $0x48] sm:$0xff]  ;;  %v6499_v58 = vld [vmem:[#allocation5 + $0x58] sm:$0xff]  ;;  %v6496_v20 = vld [vmem:[#allocation5 + $0x40] sm:$0xff] }
 0x59c   :  { %v6498_v35 = vld [vmem:[#allocation5 + $0x50] sm:$0xff]  ;;  %v6501_v9 = vld [vmem:[#allocation5 + $0x68] sm:$0xff]  ;;  %v6503_v45 = vld [vmem:[#allocation5 + $0x78] sm:$0xff] }
 0x59d   :  { %v6500_v25 = vld [vmem:[#allocation5 + $0x60] sm:$0xff]  ;;  %v6502_v47 = vld [vmem:[#allocation5 + $0x70] sm:$0xff]  ;;  %v6505_v31 = vld [vmem:[#allocation5 + $0x88] sm:$0xff] }
 0x59e   :  { %6747 = vmatpush1.bf16.msra.mxu0 %v6492_v62  ;;  %6959 = vmatpush1.bf16.msra.mxu1 %v6494_v63  ;;  %v6507_v50 = vld [vmem:[#allocation5 + $0x98] sm:$0xff]  ;;  %v6504_v37 = vld [vmem:[#allocation5 + $0x80] sm:$0xff]  ;;  %v6506_v54 = vld [vmem:[#allocation5 + $0x90] sm:$0xff] }
 0x59f   :  { %6748 = vmatprep.subr.bf16.mxu0 %v6497_v18  ;;  %6960 = vmatprep.subr.bf16.mxu1 %v6499_v58  ;;  %v6509_v30 = vld [vmem:[#allocation5 + $0xa8] sm:$0xff]  ;;  %v6511_v12 = vld [vmem:[#allocation5 + $0xb8] sm:$0xff]  ;;  %v6508_v17 = vld [vmem:[#allocation5 + $0xa0] sm:$0xff] }
 0x5a0   :  { %v6510_v8 = vld [vmem:[#allocation5 + $0xb0] sm:$0xff]  ;;  %v6513_v27 = vld [vmem:[#allocation5 + $0xc8] sm:$0xff]  ;;  %v6515_v11 = vld [vmem:[#allocation5 + $0xd8] sm:$0xff] }
 0x5a1   :  { %v6512_v39 = vld [vmem:[#allocation5 + $0xc0] sm:$0xff]  ;;  %v6514_v60 = vld [vmem:[#allocation5 + $0xd0] sm:$0xff]  ;;  %v6517_v10 = vld [vmem:[#allocation5 + $0xe8] sm:$0xff] }
 0x5a2   :  { %6749 = vmatpush1.bf16.msra.mxu0 %v6496_v20  ;;  %6961 = vmatpush1.bf16.msra.mxu1 %v6498_v35  ;;  %v6519_v15 = vld [vmem:[#allocation5 + $0xf8] sm:$0xff]  ;;  %v6516_v16 = vld [vmem:[#allocation5 + $0xe0] sm:$0xff]  ;;  %v6518_v26 = vld [vmem:[#allocation5 + $0xf0] sm:$0xff] }
 0x5a3   :  { %6750 = vmatprep.subr.bf16.mxu0 %v6501_v9  ;;  %6962 = vmatprep.subr.bf16.mxu1 %v6503_v45  ;;  %v6521_v57 = vld [vmem:[#allocation5 + $0x108] sm:$0xff]  ;;  %v6523_v5 = vld [vmem:[#allocation5 + $0x118] sm:$0xff]  ;;  %v6520_v22 = vld [vmem:[#allocation5 + $0x100] sm:$0xff] }
 0x5a4   :  { %v6522_v21 = vld [vmem:[#allocation5 + $0x110] sm:$0xff]  ;;  %v6525_v13 = vld [vmem:[#allocation5 + $0x128] sm:$0xff]  ;;  %v6527_v7 = vld [vmem:[#allocation5 + $0x138] sm:$0xff] }
 0x5a5   :  { %v6524_v52 = vld [vmem:[#allocation5 + $0x120] sm:$0xff]  ;;  %v6526_v6 = vld [vmem:[#allocation5 + $0x130] sm:$0xff]  ;;  %v6529_v49 = vld [vmem:[#allocation5 + $0x148] sm:$0xff] }
 0x5a6   :  { %6751 = vmatpush1.bf16.msra.mxu0 %v6500_v25  ;;  %6963 = vmatpush1.bf16.msra.mxu1 %v6502_v47  ;;  %v6531_v32 = vld [vmem:[#allocation5 + $0x158] sm:$0xff]  ;;  %v6528_v0 = vld [vmem:[#allocation5 + $0x140] sm:$0xff]  ;;  %v6530_v51 = vld [vmem:[#allocation5 + $0x150] sm:$0xff] }
 0x5a7   :  { %6752 = vmatprep.subr.bf16.mxu0 %v6505_v31  ;;  %6964 = vmatprep.subr.bf16.mxu1 %v6507_v50  ;;  %v6533_v1 = vld [vmem:[#allocation5 + $0x168] sm:$0xff]  ;;  %v6535_v3 = vld [vmem:[#allocation5 + $0x178] sm:$0xff]  ;;  %v6532_v23 = vld [vmem:[#allocation5 + $0x160] sm:$0xff] }
 0x5a8   :  { %v6534_v24 = vld [vmem:[#allocation5 + $0x170] sm:$0xff]  ;;  %v6537_v43 = vld [vmem:[#allocation5 + $0x188] sm:$0xff]  ;;  %v6539_v62 = vld [vmem:[#allocation5 + $0x198] sm:$0xff] }
 0x5a9   :  { %v6536_v63 = vld [vmem:[#allocation5 + $0x180] sm:$0xff]  ;;  %v6538_v18 = vld [vmem:[#allocation5 + $0x190] sm:$0xff]  ;;  %v6541_v58 = vld [vmem:[#allocation5 + $0x1a8] sm:$0xff] }
 0x5aa   :  { %6753 = vmatpush1.bf16.msra.mxu0 %v6504_v37  ;;  %6965 = vmatpush1.bf16.msra.mxu1 %v6506_v54  ;;  %v6543_v20 = vld [vmem:[#allocation5 + $0x1b8] sm:$0xff]  ;;  %v6540_v35 = vld [vmem:[#allocation5 + $0x1a0] sm:$0xff]  ;;  %v6542_v9 = vld [vmem:[#allocation5 + $0x1b0] sm:$0xff] }
 0x5ab   :  { %6754 = vmatprep.subr.bf16.mxu0 %v6509_v30  ;;  %6966 = vmatprep.subr.bf16.mxu1 %v6511_v12  ;;  %v6545_v45 = vld [vmem:[#allocation5 + $0x1c8] sm:$0xff]  ;;  %v6547_v25 = vld [vmem:[#allocation5 + $0x1d8] sm:$0xff]  ;;  %v6544_v47 = vld [vmem:[#allocation5 + $0x1c0] sm:$0xff] }
 0x5ac   :  { %v6546_v31 = vld [vmem:[#allocation5 + $0x1d0] sm:$0xff]  ;;  %v6549_v50 = vld [vmem:[#allocation5 + $0x1e8] sm:$0xff]  ;;  %v6551_v37 = vld [vmem:[#allocation5 + $0x1f8] sm:$0xff] }
 0x5ad   :  { %v6548_v54 = vld [vmem:[#allocation5 + $0x1e0] sm:$0xff]  ;;  %v6550_v30 = vld [vmem:[#allocation5 + $0x1f0] sm:$0xff]  ;;  %v6553_v12 = vld [vmem:[#allocation5 + $0x208] sm:$0xff] }
 0x5ae   :  { %6755 = vmatpush1.bf16.msra.mxu0 %v6508_v17  ;;  %6967 = vmatpush1.bf16.msra.mxu1 %v6510_v8  ;;  %v6555_v17 = vld [vmem:[#allocation5 + $0x218] sm:$0xff]  ;;  %v6552_v8 = vld [vmem:[#allocation5 + $0x200] sm:$0xff] }
 0x5af   :  { %6756 = vmatprep.subr.bf16.mxu0 %v6513_v27  ;;  %6968 = vmatprep.subr.bf16.mxu1 %v6515_v11  ;;  %v6554_v27 = vld [vmem:[#allocation5 + $0x210] sm:$0xff]  ;;  %v6557_v11 = vld [vmem:[#allocation5 + $0x228] sm:$0xff] }
 0x5b2   :  { %6757 = vmatpush1.bf16.msra.mxu0 %v6512_v39  ;;  %6969 = vmatpush1.bf16.msra.mxu1 %v6514_v60  ;;  %v6559_v39 = vld [vmem:[#allocation5 + $0x238] sm:$0xff]  ;;  %v6556_v60 = vld [vmem:[#allocation5 + $0x220] sm:$0xff] }
 0x5b3   :  { %6758 = vmatprep.subr.bf16.mxu0 %v6517_v10  ;;  %6970 = vmatprep.subr.bf16.mxu1 %v6519_v15  ;;  %v6558_v10 = vld [vmem:[#allocation5 + $0x230] sm:$0xff]  ;;  %v6561_v15 = vld [vmem:[#allocation5 + $0x248] sm:$0xff] }
 0x5b6   :  { %6759 = vmatpush1.bf16.msra.mxu0 %v6516_v16  ;;  %6971 = vmatpush1.bf16.msra.mxu1 %v6518_v26  ;;  %v6563_v16 = vld [vmem:[#allocation5 + $0x258] sm:$0xff]  ;;  %v6560_v26 = vld [vmem:[#allocation5 + $0x240] sm:$0xff] }
 0x5b7   :  { %6760 = vmatprep.subr.bf16.mxu0 %v6521_v57  ;;  %6972 = vmatprep.subr.bf16.mxu1 %v6523_v5  ;;  %v6562_v57 = vld [vmem:[#allocation5 + $0x250] sm:$0xff]  ;;  %v6565_v5 = vld [vmem:[#allocation5 + $0x268] sm:$0xff] }
 0x5ba   :  { %6761 = vmatpush1.bf16.msra.mxu0 %v6520_v22  ;;  %6973 = vmatpush1.bf16.msra.mxu1 %v6522_v21  ;;  %v6564_v22 = vld [vmem:[#allocation5 + $0x260] sm:$0xff]  ;;  %v6566_v21 = vld [vmem:[#allocation5 + $0x270] sm:$0xff] }
 0x5bb   :  { %6762 = vmatprep.subr.bf16.mxu0 %v6525_v13  ;;  %6974 = vmatprep.subr.bf16.mxu1 %v6527_v7  ;;  %v6569_v13 = vld [vmem:[#allocation5 + $0x288] sm:$0xff]  ;;  %v6568_v7 = vld [vmem:[#allocation5 + $0x280] sm:$0xff] }
 0x5be   :  { %6763 = vmatpush1.bf16.msra.mxu0 %v6524_v52  ;;  %6975 = vmatpush1.bf16.msra.mxu1 %v6526_v6  ;;  %v6570_v52 = vld [vmem:[#allocation5 + $0x290] sm:$0xff]  ;;  %v6573_v6 = vld [vmem:[#allocation5 + $0x2a8] sm:$0xff] }
 0x5bf   :  { %6764 = vmatprep.subr.bf16.mxu0 %v6529_v49  ;;  %6976 = vmatprep.subr.bf16.mxu1 %v6531_v32  ;;  %v6572_v49 = vld [vmem:[#allocation5 + $0x2a0] sm:$0xff]  ;;  %v6574_v32 = vld [vmem:[#allocation5 + $0x2b0] sm:$0xff] }
 0x5c2   :  { %6765 = vmatpush1.bf16.msra.mxu0 %v6528_v0  ;;  %6977 = vmatpush1.bf16.msra.mxu1 %v6530_v51  ;;  %v6577_v0 = vld [vmem:[#allocation5 + $0x2c8] sm:$0xff]  ;;  %v6579_v51 = vld [vmem:[#allocation5 + $0x2d8] sm:$0xff] }
 0x5c3   :  { %6766 = vmatprep.subr.bf16.mxu0 %v6533_v1  ;;  %6978 = vmatprep.subr.bf16.mxu1 %v6535_v3  ;;  %v6578_v1 = vld [vmem:[#allocation5 + $0x2d0] sm:$0xff]  ;;  %v6581_v3 = vld [vmem:[#allocation5 + $0x2e8] sm:$0xff] }
 0x5c6   :  { %6767 = vmatpush1.bf16.msra.mxu0 %v6532_v23  ;;  %6979 = vmatpush1.bf16.msra.mxu1 %v6534_v24  ;;  %v6583_v23 = vld [vmem:[#allocation5 + $0x2f8] sm:$0xff]  ;;  %v6580_v24 = vld [vmem:[#allocation5 + $0x2e0] sm:$0xff] }
 0x5c7   :  { %6768 = vmatprep.subr.bf16.mxu0 %v6537_v43  ;;  %6980 = vmatprep.subr.bf16.mxu1 %v6539_v62  ;;  %v6582_v43 = vld [vmem:[#allocation5 + $0x2f0] sm:$0xff]  ;;  %v6585_v62 = vld [vmem:[#allocation5 + $0x308] sm:$0xff] }
 0x5ca   :  { %6769 = vmatpush1.bf16.msra.mxu0 %v6536_v63  ;;  %6981 = vmatpush1.bf16.msra.mxu1 %v6538_v18  ;;  %v6587_v63 = vld [vmem:[#allocation5 + $0x318] sm:$0xff]  ;;  %v6584_v18 = vld [vmem:[#allocation5 + $0x300] sm:$0xff] }
 0x5cb   :  { %6770 = vmatprep.subr.bf16.mxu0 %v6541_v58  ;;  %6982 = vmatprep.subr.bf16.mxu1 %v6543_v20  ;;  %v6586_v58 = vld [vmem:[#allocation5 + $0x310] sm:$0xff]  ;;  %v6589_v20 = vld [vmem:[#allocation5 + $0x328] sm:$0xff] }
 0x5ce   :  { %6771 = vmatpush1.bf16.msra.mxu0 %v6540_v35  ;;  %6983 = vmatpush1.bf16.msra.mxu1 %v6542_v9  ;;  %v6591_v35 = vld [vmem:[#allocation5 + $0x338] sm:$0xff]  ;;  %v6588_v9 = vld [vmem:[#allocation5 + $0x320] sm:$0xff] }
 0x5cf   :  { %6772 = vmatprep.subr.bf16.mxu0 %v6545_v45  ;;  %6984 = vmatprep.subr.bf16.mxu1 %v6547_v25  ;;  %v6590_v45 = vld [vmem:[#allocation5 + $0x330] sm:$0xff]  ;;  %v6593_v25 = vld [vmem:[#allocation5 + $0x348] sm:$0xff] }
 0x5d2   :  { %6773 = vmatpush1.bf16.msra.mxu0 %v6544_v47  ;;  %6985 = vmatpush1.bf16.msra.mxu1 %v6546_v31  ;;  %v6595_v47 = vld [vmem:[#allocation5 + $0x358] sm:$0xff]  ;;  %v6592_v31 = vld [vmem:[#allocation5 + $0x340] sm:$0xff] }
 0x5d3   :  { %6774 = vmatprep.subr.bf16.mxu0 %v6549_v50  ;;  %6986 = vmatprep.subr.bf16.mxu1 %v6551_v37  ;;  %v6594_v50 = vld [vmem:[#allocation5 + $0x350] sm:$0xff]  ;;  %v6597_v37 = vld [vmem:[#allocation5 + $0x368] sm:$0xff] }
 0x5d6   :  { %6775 = vmatpush1.bf16.msra.mxu0 %v6548_v54  ;;  %6987 = vmatpush1.bf16.msra.mxu1 %v6550_v30  ;;  %v6599_v54 = vld [vmem:[#allocation5 + $0x378] sm:$0xff]  ;;  %v6596_v30 = vld [vmem:[#allocation5 + $0x360] sm:$0xff] }
 0x5d7   :  { %6797 = vmatprep.subr.bf16.mxu0 %v6553_v12  ;;  %7009 = vmatprep.subr.bf16.mxu1 %v6555_v17  ;;  %v6598_v12 = vld [vmem:[#allocation5 + $0x370] sm:$0xff]  ;;  %v6601_v17 = vld [vmem:[#allocation5 + $0x388] sm:$0xff] }
 0x5d9   :  { %6777 = vmatmul.mubr.bf16.vlgmr.msra.gmra.mrb[64].mxu0 %v14633_v19  ;;  %6989 = vmatmul.mubr.bf16.vlgmr.msra.gmra.mrb[32].mxu1 %v14633_v19  ;;  %v6567_v19 = vld [vmem:[#allocation5 + $0x278] sm:$0xff] }
 0x5da   :  { %6798 = vmatpush1.bf16.msra.mxu0 %v6552_v8  ;;  %7010 = vmatpush1.bf16.msra.mxu1 %v6554_v27  ;;  %v6603_v8 = vld [vmem:[#allocation5 + $0x398] sm:$0xff]  ;;  %v6600_v27 = vld [vmem:[#allocation5 + $0x380] sm:$0xff] }
 0x5db   :  { %6799 = vmatprep.subr.bf16.mxu0 %v6557_v11  ;;  %7011 = vmatprep.subr.bf16.mxu1 %v6559_v39  ;;  %v6602_v11 = vld [vmem:[#allocation5 + $0x390] sm:$0xff]  ;;  %v6605_v39 = vld [vmem:[#allocation5 + $0x3a8] sm:$0xff] }
 0x5dc   :  { %6786 = vmatprep.mubr.bf16.mxu0 %v14637_v28  ;;  %6998 = vmatprep.mubr.bf16.mxu1 %v14637_v28  ;;  %v6571_v28 = vld [vmem:[#allocation5 + $0x298] sm:$0xff] }
 0x5de   :  { %6800 = vmatpush1.bf16.msra.mxu0 %v6556_v60  ;;  %7012 = vmatpush1.bf16.msra.mxu1 %v6558_v10  ;;  %v6607_v60 = vld [vmem:[#allocation5 + $0x3b8] sm:$0xff]  ;;  %v6604_v10 = vld [vmem:[#allocation5 + $0x3a0] sm:$0xff] }
 0x5df   :  { %6801 = vmatprep.subr.bf16.mxu0 %v6561_v15  ;;  %7013 = vmatprep.subr.bf16.mxu1 %v6563_v16  ;;  %v6606_v15 = vld [vmem:[#allocation5 + $0x3b0] sm:$0xff]  ;;  %v6609_v16 = vld [vmem:[#allocation5 + $0x3c8] sm:$0xff] }
 0x5e1   :  { %6787 = vmatmul.mubr.bf16.gmra.mrb[68].mxu0 %v14635_v61  ;;  %6999 = vmatmul.mubr.bf16.gmra.mrb[36].mxu1 %v14635_v61  ;;  %v6575_v61 = vld [vmem:[#allocation5 + $0x2b8] sm:$0xff] }
 0x5e2   :  { %6802 = vmatpush1.bf16.msra.mxu0 %v6560_v26  ;;  %7014 = vmatpush1.bf16.msra.mxu1 %v6562_v57  ;;  %v6611_v26 = vld [vmem:[#allocation5 + $0x3d8] sm:$0xff]  ;;  %v6608_v57 = vld [vmem:[#allocation5 + $0x3c0] sm:$0xff] }
 0x5e3   :  { %6803 = vmatprep.subr.bf16.mxu0 %v6565_v5  ;;  %7015 = vmatprep.subr.bf16.mxu1 %v6567_v19  ;;  %v6610_v5 = vld [vmem:[#allocation5 + $0x3d0] sm:$0xff]  ;;  %v6613_v19 = vld [vmem:[#allocation5 + $0x3e8] sm:$0xff] }
 0x5e4   :  { %6829 = vmatprep.mubr.bf16.mxu0 %v14641_v53  ;;  %7041 = vmatprep.mubr.bf16.mxu1 %v14641_v53  ;;  %v6576_v53 = vld [vmem:[#allocation5 + $0x2c0] sm:$0xff] }
 0x5e6   :  { %6804 = vmatpush1.bf16.msra.mxu0 %v6564_v22  ;;  %7016 = vmatpush1.bf16.msra.mxu1 %v6566_v21  ;;  %v6615_v22 = vld [vmem:[#allocation5 + $0x3f8] sm:$0xff]  ;;  %v6612_v21 = vld [vmem:[#allocation5 + $0x3e0] sm:$0xff] }
 0x5e7   :  { %6805 = vmatprep.subr.bf16.mxu0 %v6569_v13  ;;  %7017 = vmatprep.subr.bf16.mxu1 %v6571_v28  ;;  %v6614_v13 = vld [vmem:[#allocation5 + $0x3f0] sm:$0xff]  ;;  %v6617_v28 = vld [vmem:[#allocation5 + $0x408] sm:$0xff] }
 0x5ea   :  { %6806 = vmatpush1.bf16.msra.mxu0 %v6568_v7  ;;  %7018 = vmatpush1.bf16.msra.mxu1 %v6570_v52  ;;  %v6619_v7 = vld [vmem:[#allocation5 + $0x418] sm:$0xff]  ;;  %v6616_v52 = vld [vmem:[#allocation5 + $0x400] sm:$0xff] }
 0x5eb   :  { %6807 = vmatprep.subr.bf16.mxu0 %v6573_v6  ;;  %7019 = vmatprep.subr.bf16.mxu1 %v6575_v61  ;;  %v6618_v6 = vld [vmem:[#allocation5 + $0x410] sm:$0xff]  ;;  %v6621_v61 = vld [vmem:[#allocation5 + $0x428] sm:$0xff] }
 0x5ee   :  { %6808 = vmatpush1.bf16.msra.mxu0 %v6572_v49  ;;  %7020 = vmatpush1.bf16.msra.mxu1 %v6574_v32  ;;  %v6623_v49 = vld [vmem:[#allocation5 + $0x438] sm:$0xff]  ;;  %v6620_v32 = vld [vmem:[#allocation5 + $0x420] sm:$0xff] }
 0x5ef   :  { %6809 = vmatprep.subr.bf16.mxu0 %v6577_v0  ;;  %7021 = vmatprep.subr.bf16.mxu1 %v6579_v51  ;;  %v6622_v0 = vld [vmem:[#allocation5 + $0x430] sm:$0xff]  ;;  %v6625_v51 = vld [vmem:[#allocation5 + $0x448] sm:$0xff] }
 0x5f2   :  { %6810 = vmatpush1.bf16.msra.mxu0 %v6576_v53  ;;  %7022 = vmatpush1.bf16.msra.mxu1 %v6578_v1  ;;  %v6627_v53 = vld [vmem:[#allocation5 + $0x458] sm:$0xff]  ;;  %v6624_v1 = vld [vmem:[#allocation5 + $0x440] sm:$0xff] }
 0x5f3   :  { %6811 = vmatprep.subr.bf16.mxu0 %v6581_v3  ;;  %7023 = vmatprep.subr.bf16.mxu1 %v6583_v23  ;;  %v6626_v3 = vld [vmem:[#allocation5 + $0x450] sm:$0xff]  ;;  %v6629_v23 = vld [vmem:[#allocation5 + $0x468] sm:$0xff] }
 0x5f6   :  { %6812 = vmatpush1.bf16.msra.mxu0 %v6580_v24  ;;  %7024 = vmatpush1.bf16.msra.mxu1 %v6582_v43  ;;  %v6628_v24 = vld [vmem:[#allocation5 + $0x460] sm:$0xff]  ;;  %v6630_v43 = vld [vmem:[#allocation5 + $0x470] sm:$0xff] }
 0x5f7   :  { %6813 = vmatprep.subr.bf16.mxu0 %v6585_v62  ;;  %7025 = vmatprep.subr.bf16.mxu1 %v6587_v63  ;;  %v6633_v62 = vld [vmem:[#allocation5 + $0x488] sm:$0xff]  ;;  %v6632_v63 = vld [vmem:[#allocation5 + $0x480] sm:$0xff] }
 0x5fa   :  { %6814 = vmatpush1.bf16.msra.mxu0 %v6584_v18  ;;  %7026 = vmatpush1.bf16.msra.mxu1 %v6586_v58  ;;  %v6634_v18 = vld [vmem:[#allocation5 + $0x490] sm:$0xff]  ;;  %v6637_v58 = vld [vmem:[#allocation5 + $0x4a8] sm:$0xff] }
 0x5fb   :  { %6815 = vmatprep.subr.bf16.mxu0 %v6589_v20  ;;  %7027 = vmatprep.subr.bf16.mxu1 %v6591_v35  ;;  %v6636_v20 = vld [vmem:[#allocation5 + $0x4a0] sm:$0xff]  ;;  %v6638_v35 = vld [vmem:[#allocation5 + $0x4b0] sm:$0xff] }
 0x5fe   :  { %6816 = vmatpush1.bf16.msra.mxu0 %v6588_v9  ;;  %7028 = vmatpush1.bf16.msra.mxu1 %v6590_v45  ;;  %v6641_v9 = vld [vmem:[#allocation5 + $0x4c8] sm:$0xff]  ;;  %v6643_v45 = vld [vmem:[#allocation5 + $0x4d8] sm:$0xff] }
 0x5ff   :  { %6817 = vmatprep.subr.bf16.mxu0 %v6593_v25  ;;  %7029 = vmatprep.subr.bf16.mxu1 %v6595_v47  ;;  %v6642_v25 = vld [vmem:[#allocation5 + $0x4d0] sm:$0xff]  ;;  %v6645_v47 = vld [vmem:[#allocation5 + $0x4e8] sm:$0xff] }
 0x602   :  { %6818 = vmatpush1.bf16.msra.mxu0 %v6592_v31  ;;  %7030 = vmatpush1.bf16.msra.mxu1 %v6594_v50  ;;  %v6647_v31 = vld [vmem:[#allocation5 + $0x4f8] sm:$0xff]  ;;  %v6644_v50 = vld [vmem:[#allocation5 + $0x4e0] sm:$0xff] }
 0x603   :  { %6819 = vmatprep.subr.bf16.mxu0 %v6597_v37  ;;  %7031 = vmatprep.subr.bf16.mxu1 %v6599_v54  ;;  %v6646_v37 = vld [vmem:[#allocation5 + $0x4f0] sm:$0xff]  ;;  %v6649_v54 = vld [vmem:[#allocation5 + $0x508] sm:$0xff] }
 0x606   :  { %6820 = vmatpush1.bf16.msra.mxu0 %v6596_v30  ;;  %7032 = vmatpush1.bf16.msra.mxu1 %v6598_v12  ;;  %v6651_v30 = vld [vmem:[#allocation5 + $0x518] sm:$0xff]  ;;  %v6648_v12 = vld [vmem:[#allocation5 + $0x500] sm:$0xff] }
 0x607   :  { %6821 = vmatprep.subr.bf16.mxu0 %v6601_v17  ;;  %7033 = vmatprep.subr.bf16.mxu1 %v6603_v8  ;;  %v6650_v17 = vld [vmem:[#allocation5 + $0x510] sm:$0xff]  ;;  %v6653_v8 = vld [vmem:[#allocation5 + $0x528] sm:$0xff] }
 0x60a   :  { %6822 = vmatpush1.bf16.msra.mxu0 %v6600_v27  ;;  %7034 = vmatpush1.bf16.msra.mxu1 %v6602_v11  ;;  %v6655_v27 = vld [vmem:[#allocation5 + $0x538] sm:$0xff]  ;;  %v6652_v11 = vld [vmem:[#allocation5 + $0x520] sm:$0xff] }
 0x60b   :  { %6823 = vmatprep.subr.bf16.mxu0 %v6605_v39  ;;  %7035 = vmatprep.subr.bf16.mxu1 %v6607_v60  ;;  %v6654_v39 = vld [vmem:[#allocation5 + $0x530] sm:$0xff]  ;;  %v6657_v60 = vld [vmem:[#allocation5 + $0x548] sm:$0xff] }
 0x60e   :  { %6824 = vmatpush1.bf16.msra.mxu0 %v6604_v10  ;;  %7036 = vmatpush1.bf16.msra.mxu1 %v6606_v15  ;;  %v6659_v10 = vld [vmem:[#allocation5 + $0x558] sm:$0xff]  ;;  %v6656_v15 = vld [vmem:[#allocation5 + $0x540] sm:$0xff] }
 0x60f   :  { %6825 = vmatprep.subr.bf16.mxu0 %v6609_v16  ;;  %7037 = vmatprep.subr.bf16.mxu1 %v6611_v26  ;;  %v6658_v16 = vld [vmem:[#allocation5 + $0x550] sm:$0xff]  ;;  %v6661_v26 = vld [vmem:[#allocation5 + $0x568] sm:$0xff] }
 0x612   :  { %6826 = vmatpush1.bf16.msra.mxu0 %v6608_v57  ;;  %7038 = vmatpush1.bf16.msra.mxu1 %v6610_v5  ;;  %v6663_v57 = vld [vmem:[#allocation5 + $0x578] sm:$0xff]  ;;  %v6660_v5 = vld [vmem:[#allocation5 + $0x560] sm:$0xff] }
 0x613   :  { %6827 = vmatprep.subr.bf16.mxu0 %v6613_v19  ;;  %7039 = vmatprep.subr.bf16.mxu1 %v6615_v22  ;;  %v6662_v19 = vld [vmem:[#allocation5 + $0x570] sm:$0xff]  ;;  %v6665_v22 = vld [vmem:[#allocation5 + $0x588] sm:$0xff] }
 0x616   :  { %6828 = vmatpush1.bf16.msra.mxu0 %v6612_v21  ;;  %7040 = vmatpush1.bf16.msra.mxu1 %v6614_v13  ;;  %v6667_v21 = vld [vmem:[#allocation5 + $0x598] sm:$0xff]  ;;  %v6664_v13 = vld [vmem:[#allocation5 + $0x580] sm:$0xff] }
 0x617   :  { %6850 = vmatprep.subr.bf16.mxu0 %v6617_v28  ;;  %7062 = vmatprep.subr.bf16.mxu1 %v6619_v7  ;;  %v6666_v28 = vld [vmem:[#allocation5 + $0x590] sm:$0xff]  ;;  %v6669_v7 = vld [vmem:[#allocation5 + $0x5a8] sm:$0xff] }
 0x619   :  { %6830 = vmatmul.mubr.bf16.vlgmr.msra.gmra.mrb[64].mxu0 %v14639_v34  ;;  %7042 = vmatmul.mubr.bf16.vlgmr.msra.gmra.mrb[32].mxu1 %v14639_v34  ;;  %v6631_v34 = vld [vmem:[#allocation5 + $0x478] sm:$0xff] }
 0x61a   :  { %6851 = vmatpush1.bf16.msra.mxu0 %v6616_v52  ;;  %7063 = vmatpush1.bf16.msra.mxu1 %v6618_v6  ;;  %v6671_v52 = vld [vmem:[#allocation5 + $0x5b8] sm:$0xff]  ;;  %v6668_v6 = vld [vmem:[#allocation5 + $0x5a0] sm:$0xff] }
 0x61b   :  { %6852 = vmatprep.subr.bf16.mxu0 %v6621_v61  ;;  %7064 = vmatprep.subr.bf16.mxu1 %v6623_v49  ;;  %v6670_v61 = vld [vmem:[#allocation5 + $0x5b0] sm:$0xff]  ;;  %v6673_v49 = vld [vmem:[#allocation5 + $0x5c8] sm:$0xff] }
 0x61c   :  { %6839 = vmatprep.mubr.bf16.mxu0 %v14645_v2  ;;  %7051 = vmatprep.mubr.bf16.mxu1 %v14645_v2  ;;  %v6635_v2 = vld [vmem:[#allocation5 + $0x498] sm:$0xff] }
 0x61e   :  { %6853 = vmatpush1.bf16.msra.mxu0 %v6620_v32  ;;  %7065 = vmatpush1.bf16.msra.mxu1 %v6622_v0  ;;  %v6675_v32 = vld [vmem:[#allocation5 + $0x5d8] sm:$0xff]  ;;  %v6672_v0 = vld [vmem:[#allocation5 + $0x5c0] sm:$0xff] }
 0x61f   :  { %6854 = vmatprep.subr.bf16.mxu0 %v6625_v51  ;;  %7066 = vmatprep.subr.bf16.mxu1 %v6627_v53  ;;  %v6674_v51 = vld [vmem:[#allocation5 + $0x5d0] sm:$0xff]  ;;  %v6677_v53 = vld [vmem:[#allocation5 + $0x5e8] sm:$0xff] }
 0x621   :  { %6840 = vmatmul.mubr.bf16.gmra.mrb[68].mxu0 %v14643_v56  ;;  %7052 = vmatmul.mubr.bf16.gmra.mrb[36].mxu1 %v14643_v56  ;;  %v6639_v56 = vld [vmem:[#allocation5 + $0x4b8] sm:$0xff] }
 0x622   :  { %6855 = vmatpush1.bf16.msra.mxu0 %v6624_v1  ;;  %7067 = vmatpush1.bf16.msra.mxu1 %v6626_v3  ;;  %v6679_v1 = vld [vmem:[#allocation5 + $0x5f8] sm:$0xff]  ;;  %v6676_v3 = vld [vmem:[#allocation5 + $0x5e0] sm:$0xff] }
 0x623   :  { %6856 = vmatprep.subr.bf16.mxu0 %v6629_v23  ;;  %7068 = vmatprep.subr.bf16.mxu1 %v6631_v34  ;;  %v6678_v23 = vld [vmem:[#allocation5 + $0x5f0] sm:$0xff]  ;;  %v6681_v34 = vld [vmem:[#allocation5 + $0x608] sm:$0xff] }
 0x624   :  { %6882 = vmatprep.mubr.bf16.mxu0 %v14649_v46  ;;  %7094 = vmatprep.mubr.bf16.mxu1 %v14649_v46  ;;  %v6640_v46 = vld [vmem:[#allocation5 + $0x4c0] sm:$0xff] }
 0x626   :  { %6857 = vmatpush1.bf16.msra.mxu0 %v6628_v24  ;;  %7069 = vmatpush1.bf16.msra.mxu1 %v6630_v43  ;;  %v6683_v24 = vld [vmem:[#allocation5 + $0x618] sm:$0xff]  ;;  %v6680_v43 = vld [vmem:[#allocation5 + $0x600] sm:$0xff] }
 0x627   :  { %6858 = vmatprep.subr.bf16.mxu0 %v6633_v62  ;;  %7070 = vmatprep.subr.bf16.mxu1 %v6635_v2  ;;  %v6682_v62 = vld [vmem:[#allocation5 + $0x610] sm:$0xff]  ;;  %v6685_v2 = vld [vmem:[#allocation5 + $0x628] sm:$0xff] }
 0x62a   :  { %6859 = vmatpush1.bf16.msra.mxu0 %v6632_v63  ;;  %7071 = vmatpush1.bf16.msra.mxu1 %v6634_v18  ;;  %v6687_v63 = vld [vmem:[#allocation5 + $0x638] sm:$0xff]  ;;  %v6684_v18 = vld [vmem:[#allocation5 + $0x620] sm:$0xff] }
 0x62b   :  { %6860 = vmatprep.subr.bf16.mxu0 %v6637_v58  ;;  %7072 = vmatprep.subr.bf16.mxu1 %v6639_v56  ;;  %v6686_v58 = vld [vmem:[#allocation5 + $0x630] sm:$0xff]  ;;  %v6689_v56 = vld [vmem:[#allocation5 + $0x648] sm:$0xff] }
 0x62e   :  { %6861 = vmatpush1.bf16.msra.mxu0 %v6636_v20  ;;  %7073 = vmatpush1.bf16.msra.mxu1 %v6638_v35  ;;  %v6691_v20 = vld [vmem:[#allocation5 + $0x658] sm:$0xff]  ;;  %v6688_v35 = vld [vmem:[#allocation5 + $0x640] sm:$0xff] }
 0x62f   :  { %6862 = vmatprep.subr.bf16.mxu0 %v6641_v9  ;;  %7074 = vmatprep.subr.bf16.mxu1 %v6643_v45  ;;  %v6690_v9 = vld [vmem:[#allocation5 + $0x650] sm:$0xff]  ;;  %v6693_v45 = vld [vmem:[#allocation5 + $0x668] sm:$0xff] }
 0x632   :  { %6863 = vmatpush1.bf16.msra.mxu0 %v6640_v46  ;;  %7075 = vmatpush1.bf16.msra.mxu1 %v6642_v25  ;;  %v6692_v46 = vld [vmem:[#allocation5 + $0x660] sm:$0xff]  ;;  %v6694_v25 = vld [vmem:[#allocation5 + $0x670] sm:$0xff] }
 0x633   :  { %6864 = vmatprep.subr.bf16.mxu0 %v6645_v47  ;;  %7076 = vmatprep.subr.bf16.mxu1 %v6647_v31  ;;  %v6697_v47 = vld [vmem:[#allocation5 + $0x688] sm:$0xff]  ;;  %v6696_v31 = vld [vmem:[#allocation5 + $0x680] sm:$0xff] }
 0x636   :  { %6865 = vmatpush1.bf16.msra.mxu0 %v6644_v50  ;;  %7077 = vmatpush1.bf16.msra.mxu1 %v6646_v37  ;;  %v6698_v50 = vld [vmem:[#allocation5 + $0x690] sm:$0xff]  ;;  %v6701_v37 = vld [vmem:[#allocation5 + $0x6a8] sm:$0xff] }
 0x637   :  { %6866 = vmatprep.subr.bf16.mxu0 %v6649_v54  ;;  %7078 = vmatprep.subr.bf16.mxu1 %v6651_v30  ;;  %v6700_v54 = vld [vmem:[#allocation5 + $0x6a0] sm:$0xff]  ;;  %v6702_v30 = vld [vmem:[#allocation5 + $0x6b0] sm:$0xff] }
 0x63a   :  { %6867 = vmatpush1.bf16.msra.mxu0 %v6648_v12  ;;  %7079 = vmatpush1.bf16.msra.mxu1 %v6650_v17  ;;  %v6705_v12 = vld [vmem:[#allocation5 + $0x6c8] sm:$0xff]  ;;  %v6707_v17 = vld [vmem:[#allocation5 + $0x6d8] sm:$0xff] }
 0x63b   :  { %6868 = vmatprep.subr.bf16.mxu0 %v6653_v8  ;;  %7080 = vmatprep.subr.bf16.mxu1 %v6655_v27  ;;  %v6706_v8 = vld [vmem:[#allocation5 + $0x6d0] sm:$0xff]  ;;  %v6709_v27 = vld [vmem:[#allocation5 + $0x6e8] sm:$0xff] }
 0x63e   :  { %6869 = vmatpush1.bf16.msra.mxu0 %v6652_v11  ;;  %7081 = vmatpush1.bf16.msra.mxu1 %v6654_v39  ;;  %v6711_v11 = vld [vmem:[#allocation5 + $0x6f8] sm:$0xff]  ;;  %v6708_v39 = vld [vmem:[#allocation5 + $0x6e0] sm:$0xff] }
 0x63f   :  { %6870 = vmatprep.subr.bf16.mxu0 %v6657_v60  ;;  %7082 = vmatprep.subr.bf16.mxu1 %v6659_v10  ;;  %v6710_v60 = vld [vmem:[#allocation5 + $0x6f0] sm:$0xff]  ;;  %v6713_v10 = vld [vmem:[#allocation5 + $0x708] sm:$0xff] }
 0x642   :  { %6871 = vmatpush1.bf16.msra.mxu0 %v6656_v15  ;;  %7083 = vmatpush1.bf16.msra.mxu1 %v6658_v16  ;;  %v6715_v15 = vld [vmem:[#allocation5 + $0x718] sm:$0xff]  ;;  %v6712_v16 = vld [vmem:[#allocation5 + $0x700] sm:$0xff] }
 0x643   :  { %6872 = vmatprep.subr.bf16.mxu0 %v6661_v26  ;;  %7084 = vmatprep.subr.bf16.mxu1 %v6663_v57  ;;  %v6714_v26 = vld [vmem:[#allocation5 + $0x710] sm:$0xff]  ;;  %v6717_v57 = vld [vmem:[#allocation5 + $0x728] sm:$0xff] }
 0x646   :  { %6873 = vmatpush1.bf16.msra.mxu0 %v6660_v5  ;;  %7085 = vmatpush1.bf16.msra.mxu1 %v6662_v19  ;;  %v6719_v5 = vld [vmem:[#allocation5 + $0x738] sm:$0xff]  ;;  %v6716_v19 = vld [vmem:[#allocation5 + $0x720] sm:$0xff] }
 0x647   :  { %6874 = vmatprep.subr.bf16.mxu0 %v6665_v22  ;;  %7086 = vmatprep.subr.bf16.mxu1 %v6667_v21  ;;  %v6718_v22 = vld [vmem:[#allocation5 + $0x730] sm:$0xff]  ;;  %v6721_v21 = vld [vmem:[#allocation5 + $0x748] sm:$0xff] }
 0x64a   :  { %6875 = vmatpush1.bf16.msra.mxu0 %v6664_v13  ;;  %7087 = vmatpush1.bf16.msra.mxu1 %v6666_v28  ;;  %v6723_v13 = vld [vmem:[#allocation5 + $0x758] sm:$0xff]  ;;  %v6720_v28 = vld [vmem:[#allocation5 + $0x740] sm:$0xff] }
 0x64b   :  { %6876 = vmatprep.subr.bf16.mxu0 %v6669_v7  ;;  %7088 = vmatprep.subr.bf16.mxu1 %v6671_v52  ;;  %v6722_v7 = vld [vmem:[#allocation5 + $0x750] sm:$0xff]  ;;  %v6725_v52 = vld [vmem:[#allocation5 + $0x768] sm:$0xff] }
 0x64e   :  { %6877 = vmatpush1.bf16.msra.mxu0 %v6668_v6  ;;  %7089 = vmatpush1.bf16.msra.mxu1 %v6670_v61  ;;  %v6727_v6 = vld [vmem:[#allocation5 + $0x778] sm:$0xff]  ;;  %v6724_v61 = vld [vmem:[#allocation5 + $0x760] sm:$0xff] }
 0x64f   :  { %6878 = vmatprep.subr.bf16.mxu0 %v6673_v49  ;;  %7090 = vmatprep.subr.bf16.mxu1 %v6675_v32  ;;  %v6726_v49 = vld [vmem:[#allocation5 + $0x770] sm:$0xff]  ;;  %v6729_v32 = vld [vmem:[#allocation5 + $0x788] sm:$0xff] }
 0x652   :  { %6879 = vmatpush1.bf16.msra.mxu0 %v6672_v0  ;;  %7091 = vmatpush1.bf16.msra.mxu1 %v6674_v51  ;;  %v6731_v0 = vld [vmem:[#allocation5 + $0x798] sm:$0xff]  ;;  %v6728_v51 = vld [vmem:[#allocation5 + $0x780] sm:$0xff] }
 0x653   :  { %6880 = vmatprep.subr.bf16.mxu0 %v6677_v53  ;;  %7092 = vmatprep.subr.bf16.mxu1 %v6679_v1  ;;  %v6730_v53 = vld [vmem:[#allocation5 + $0x790] sm:$0xff]  ;;  %v6733_v1 = vld [vmem:[#allocation5 + $0x7a8] sm:$0xff] }
 0x656   :  { %6881 = vmatpush1.bf16.msra.mxu0 %v6676_v3  ;;  %7093 = vmatpush1.bf16.msra.mxu1 %v6678_v23  ;;  %v6735_v3 = vld [vmem:[#allocation5 + $0x7b8] sm:$0xff]  ;;  %v6732_v23 = vld [vmem:[#allocation5 + $0x7a0] sm:$0xff] }
 0x657   :  { %6903 = vmatprep.subr.bf16.mxu0 %v6681_v34  ;;  %7115 = vmatprep.subr.bf16.mxu1 %v6683_v24  ;;  %v6734_v34 = vld [vmem:[#allocation5 + $0x7b0] sm:$0xff]  ;;  %v6737_v24 = vld [vmem:[#allocation5 + $0x7c8] sm:$0xff] }
 0x659   :  { %6883 = vmatmul.mubr.bf16.vlgmr.msra.gmra.mrb[64].mxu0 %v14647_v42  ;;  %7095 = vmatmul.mubr.bf16.vlgmr.msra.gmra.mrb[32].mxu1 %v14647_v42  ;;  %v6695_v42 = vld [vmem:[#allocation5 + $0x678] sm:$0xff] }
 0x65a   :  { %6904 = vmatpush1.bf16.msra.mxu0 %v6680_v43  ;;  %7116 = vmatpush1.bf16.msra.mxu1 %v6682_v62  ;;  %v6739_v43 = vld [vmem:[#allocation5 + $0x7d8] sm:$0xff]  ;;  %v6736_v62 = vld [vmem:[#allocation5 + $0x7c0] sm:$0xff] }
 0x65b   :  { %6905 = vmatprep.subr.bf16.mxu0 %v6685_v2  ;;  %7117 = vmatprep.subr.bf16.mxu1 %v6687_v63  ;;  %v6738_v2 = vld [vmem:[#allocation5 + $0x7d0] sm:$0xff]  ;;  %v6741_v63 = vld [vmem:[#allocation5 + $0x7e8] sm:$0xff] }
 0x65c   :  { %6892 = vmatprep.mubr.bf16.mxu0 %v14653_v4  ;;  %7104 = vmatprep.mubr.bf16.mxu1 %v14653_v4  ;;  %v6699_v4 = vld [vmem:[#allocation5 + $0x698] sm:$0xff] }
 0x65e   :  { %6906 = vmatpush1.bf16.msra.mxu0 %v6684_v18  ;;  %7118 = vmatpush1.bf16.msra.mxu1 %v6686_v58  ;;  %v6743_v18 = vld [vmem:[#allocation5 + $0x7f8] sm:$0xff]  ;;  %v6740_v58 = vld [vmem:[#allocation5 + $0x7e0] sm:$0xff] }
 0x65f   :  { %6907 = vmatprep.subr.bf16.mxu0 %v6689_v56  ;;  %7119 = vmatprep.subr.bf16.mxu1 %v6691_v20  ;;  %v6742_v56 = vld [vmem:[#allocation5 + $0x7f0] sm:$0xff] }
 0x661   :  { %6893 = vmatmul.mubr.bf16.gmra.mrb[68].mxu0 %v14651_v59  ;;  %7105 = vmatmul.mubr.bf16.gmra.mrb[36].mxu1 %v14651_v59  ;;  %v6703_v59 = vld [vmem:[#allocation5 + $0x6b8] sm:$0xff] }
 0x662   :  { %6908 = vmatpush1.bf16.msra.mxu0 %v6688_v35  ;;  %7120 = vmatpush1.bf16.msra.mxu1 %v6690_v9 }
 0x663   :  { %6909 = vmatprep.subr.bf16.mxu0 %v6693_v45  ;;  %7121 = vmatprep.subr.bf16.mxu1 %v6695_v42 }
 0x664   :  { %6935 = vmatprep.mubr.bf16.mxu0 %v14657_v44  ;;  %7147 = vmatprep.mubr.bf16.mxu1 %v14657_v44  ;;  %v6704_v44 = vld [vmem:[#allocation5 + $0x6c0] sm:$0xff] }
 0x666   :  { %6910 = vmatpush1.bf16.msra.mxu0 %v6692_v46  ;;  %7122 = vmatpush1.bf16.msra.mxu1 %v6694_v25 }
 0x667   :  { %6911 = vmatprep.subr.bf16.mxu0 %v6697_v47  ;;  %7123 = vmatprep.subr.bf16.mxu1 %v6699_v4 }
 0x66a   :  { %6912 = vmatpush1.bf16.msra.mxu0 %v6696_v31  ;;  %7124 = vmatpush1.bf16.msra.mxu1 %v6698_v50 }
 0x66b   :  { %6913 = vmatprep.subr.bf16.mxu0 %v6701_v37  ;;  %7125 = vmatprep.subr.bf16.mxu1 %v6703_v59 }
 0x66e   :  { %6914 = vmatpush1.bf16.msra.mxu0 %v6700_v54  ;;  %7126 = vmatpush1.bf16.msra.mxu1 %v6702_v30 }
 0x66f   :  { %6915 = vmatprep.subr.bf16.mxu0 %v6705_v12  ;;  %7127 = vmatprep.subr.bf16.mxu1 %v6707_v17 }
 0x672   :  { %6916 = vmatpush1.bf16.msra.mxu0 %v6704_v44  ;;  %7128 = vmatpush1.bf16.msra.mxu1 %v6706_v8 }
 0x673   :  { %6917 = vmatprep.subr.bf16.mxu0 %v6709_v27  ;;  %7129 = vmatprep.subr.bf16.mxu1 %v6711_v11 }
 0x676   :  { %6918 = vmatpush1.bf16.msra.mxu0 %v6708_v39  ;;  %7130 = vmatpush1.bf16.msra.mxu1 %v6710_v60 }
 0x677   :  { %6919 = vmatprep.subr.bf16.mxu0 %v6713_v10  ;;  %7131 = vmatprep.subr.bf16.mxu1 %v6715_v15 }
 0x67a   :  { %6920 = vmatpush1.bf16.msra.mxu0 %v6712_v16  ;;  %7132 = vmatpush1.bf16.msra.mxu1 %v6714_v26 }
 0x67b   :  { %6921 = vmatprep.subr.bf16.mxu0 %v6717_v57  ;;  %7133 = vmatprep.subr.bf16.mxu1 %v6719_v5 }
 0x67e   :  { %6922 = vmatpush1.bf16.msra.mxu0 %v6716_v19  ;;  %7134 = vmatpush1.bf16.msra.mxu1 %v6718_v22 }
 0x67f   :  { %6923 = vmatprep.subr.bf16.mxu0 %v6721_v21  ;;  %7135 = vmatprep.subr.bf16.mxu1 %v6723_v13 }
 0x682   :  { %6924 = vmatpush1.bf16.msra.mxu0 %v6720_v28  ;;  %7136 = vmatpush1.bf16.msra.mxu1 %v6722_v7 }
 0x683   :  { %6925 = vmatprep.subr.bf16.mxu0 %v6725_v52  ;;  %7137 = vmatprep.subr.bf16.mxu1 %v6727_v6 }
 0x686   :  { %6926 = vmatpush1.bf16.msra.mxu0 %v6724_v61  ;;  %7138 = vmatpush1.bf16.msra.mxu1 %v6726_v49 }
 0x687   :  { %6927 = vmatprep.subr.bf16.mxu0 %v6729_v32  ;;  %7139 = vmatprep.subr.bf16.mxu1 %v6731_v0 }
 0x68a   :  { %6928 = vmatpush1.bf16.msra.mxu0 %v6728_v51  ;;  %7140 = vmatpush1.bf16.msra.mxu1 %v6730_v53 }
 0x68b   :  { %6929 = vmatprep.subr.bf16.mxu0 %v6733_v1  ;;  %7141 = vmatprep.subr.bf16.mxu1 %v6735_v3 }
 0x68e   :  { %6930 = vmatpush1.bf16.msra.mxu0 %v6732_v23  ;;  %7142 = vmatpush1.bf16.msra.mxu1 %v6734_v34 }
 0x68f   :  { %6931 = vmatprep.subr.bf16.mxu0 %v6737_v24  ;;  %7143 = vmatprep.subr.bf16.mxu1 %v6739_v43 }
 0x692   :  { %6932 = vmatpush1.bf16.msra.mxu0 %v6736_v62  ;;  %7144 = vmatpush1.bf16.msra.mxu1 %v6738_v2 }
 0x693   :  { %6933 = vmatprep.subr.bf16.mxu0 %v6741_v63  ;;  %7145 = vmatprep.subr.bf16.mxu1 %v6743_v18 }
 0x696   :  { %6934 = vmatpush1.bf16.msra.mxu0 %v6740_v58  ;;  %7146 = vmatpush1.bf16.msra.mxu1 %v6742_v56 }
 0x699   :  { %6936 = vmatmul.mubr.bf16.vlgmr.msra.gmra.mrb[64].mxu0 %v14655_v29  ;;  %7148 = vmatmul.mubr.bf16.vlgmr.msra.gmra.mrb[32].mxu1 %v14655_v29 }
 0x69a   :  { %6945 = vmatprep.mubr.bf16.mxu0 %v14661_v36  ;;  %7157 = vmatprep.mubr.bf16.mxu1 %v14661_v36 }
 0x6a1   :  { %6946 = vmatmul.mubr.bf16.gmra.mrb[68].mxu0 %v14659_v40  ;;  %7158 = vmatmul.mubr.bf16.gmra.mrb[36].mxu1 %v14659_v40 }
 0x76c   :  { %v6937_v20 = vpop.f32.mrb[64].mxu0  ;;  %v7149_v35 = vpop.f32.mrb[32].mxu1 }
 0x76d   :  { %v14693_v9 = vpop.f32.mrb[65].mxu0  ;;  %v14695_v45 = vpop.f32.mrb[33].mxu1 }
 0x76e   :  { %v6941_v42 = vpop.f32.mrb[66].mxu0  ;;  %v7153_v46 = vpop.f32.mrb[34].mxu1 }
 0x76f   :  { %v7169_v25 = vadd.f32 %v6941_v42, %v6937_v20  ;;  %v7187_v47 = vadd.f32 %v7153_v46, %v7149_v35  ;;  %v14697_v4 = vpop.f32.mrb[67].mxu0  ;;  %v14699_v29 = vpop.f32.mrb[35].mxu1 }
 0x770   :  { %v7178_v36 = vadd.f32 %v14697_v4, %v14693_v9  ;;  %v7196_v40 = vadd.f32 %v14699_v29, %v14695_v45 }
 0x774   :  { %v6947_v31 = vpop.f32.mrb[68].mxu0  ;;  %v7159_v50 = vpop.f32.mrb[36].mxu1 }
 0x775   :  { %v7170_v37 = vadd.f32 %v7169_v25, %v6947_v31  ;;  %v7188_v59 = vadd.f32 %v7187_v47, %v7159_v50  ;;  %v6949_v54 = vpop.f32.mrb[69].mxu0  ;;  %v14705_v30 = vpop.f32.mrb[37].mxu1 }
 0x776   :  { %v7179_v12 = vadd.f32 %v7178_v36, %v6949_v54  ;;  %v7197_v17 = vadd.f32 %v7196_v40, %v14705_v30  ;;  %v6951_v44 = vpop.f32.mrb[70].mxu0  ;;  %v7163_v8 = vpop.f32.mrb[38].mxu1 }
 0x777   :  { %v7171_v27 = vadd.f32 %v7170_v37, %v6951_v44  ;;  %v7189_v11 = vadd.f32 %v7188_v59, %v7163_v8  ;;  %v6953_v39 = vpop.f32.mrb[71].mxu0  ;;  %v7165_v60 = vpop.f32.mrb[39].mxu1 }
 0x778   :  { %v7180_v10 = vadd.f32 %v7179_v12, %v6953_v39  ;;  %v7198_v15 = vadd.f32 %v7197_v17, %v7165_v60 }
 0x779   :  { %v7172_v16 = vrot.slane %v7171_v27, 4  ;;  %v7190_v26 = vrot.slane %v7189_v11, 4 }
 0x77a   :  { %v7181_v57 = vrot.slane %v7180_v10, 4  ;;  %v7199_v5 = vrot.slane %v7198_v15, 4 }
 0x77b   :  { %v7173_v19 = vadd.f32 %v7172_v16, %v7171_v27  ;;  %v7191_v22 = vadd.f32 %v7190_v26, %v7189_v11 }
 0x77c   :  { %v7182_v21 = vadd.f32 %v7181_v57, %v7180_v10  ;;  %v7200_v13 = vadd.f32 %v7199_v5, %v7198_v15 }
 0x77d   :  { %v7174_v28 = vrot.slane %v7173_v19, 2  ;;  %v7192_v7 = vrot.slane %v7191_v22, 2 }
 0x77e   :  { %v7183_v52 = vrot.slane %v7182_v21, 2  ;;  %v7201_v6 = vrot.slane %v7200_v13, 2 }
 0x77f   :  { %v7175_v61 = vadd.f32 %v7174_v28, %v7173_v19  ;;  %v7193_v49 = vadd.f32 %v7192_v7, %v7191_v22 }
 0x780   :  { %v7184_v32 = vadd.f32 %v7183_v52, %v7182_v21  ;;  %v7202_v0 = vadd.f32 %v7201_v6, %v7200_v13 }
 0x781   :  { %v7176_v51 = vrot.slane %v7175_v61, 1  ;;  %v7194_v53 = vrot.slane %v7193_v49, 1 }
 0x782   :  { %v7185_v1 = vrot.slane %v7184_v32, 1  ;;  %v7203_v3 = vrot.slane %v7202_v0, 1 }
 0x783   :  { %v7177_v23 = vadd.f32 %v7176_v51, %v7175_v61  ;;  %v7195_v34 = vadd.f32 %v7194_v53, %v7193_v49 }
 0x784   :  { %v7186_v24 = vadd.f32 %v7185_v1, %v7184_v32  ;;  %v7204_v43 = vadd.f32 %v7203_v3, %v7202_v0 }
 0x785   :  { %v7205_v62 = vmul.f32 0.03125, %v7177_v23  ;;  %v7207_v2 = vmul.f32 0.03125, %v7195_v34 }
 0x786   :  { %v7206_v63 = vmul.f32 0.03125, %v7186_v24  ;;  %v7208_v18 = vmul.f32 0.03125, %v7204_v43 }
 0x787   :  { %v14708_v58 = vsub.f32 %v6937_v20, %v7205_v62  ;;  %v14710_v56 = vsub.f32 %v6941_v42, %v7205_v62  ;;  %v14712_v25 = vsub.f32 %v6947_v31, %v7205_v62  ;;  %v14714_v47 = vsub.f32 %v6951_v44, %v7205_v62 }
 0x788   :  { %v14716_v36 = vsub.f32 %v7149_v35, %v7207_v2  ;;  %v14718_v40 = vsub.f32 %v7153_v46, %v7207_v2  ;;  %v14720_v37 = vsub.f32 %v7159_v50, %v7207_v2  ;;  %v14722_v59 = vsub.f32 %v7163_v8, %v7207_v2 }
 0x789   :  { %v7225_v12 = vmul.f32 %v14708_v58, %v14708_v58  ;;  %v7229_v20 = vmul.f32 %v14710_v56, %v14710_v56  ;;  %v7233_v42 = vmul.f32 %v14712_v25, %v14712_v25  ;;  %v7237_v31 = vmul.f32 %v14714_v47, %v14714_v47 }
 0x78a   :  { %v7227_v35 = vmul.f32 %v14716_v36, %v14716_v36  ;;  %v7231_v46 = vmul.f32 %v14718_v40, %v14718_v40  ;;  %v7235_v50 = vmul.f32 %v14720_v37, %v14720_v37  ;;  %v14739_v44 = vsub.f32 %v14693_v9, %v7206_v63 }
 0x78b   :  { %v7241_v17 = vadd.f32 %v7229_v20, %v7225_v12  ;;  %v14742_v8 = vsub.f32 %v14697_v4, %v7206_v63  ;;  %v14744_v27 = vsub.f32 %v6949_v54, %v7206_v63  ;;  %v14746_v10 = vsub.f32 %v6953_v39, %v7206_v63 }
 0x78c   :  { %v7259_v11 = vadd.f32 %v7231_v46, %v7227_v35  ;;  %v14749_v15 = vsub.f32 %v14695_v45, %v7208_v18  ;;  %v14752_v16 = vsub.f32 %v14699_v29, %v7208_v18  ;;  %v7239_v57 = vmul.f32 %v14722_v59, %v14722_v59 }
 0x78d   :  { %v7242_v26 = vadd.f32 %v7241_v17, %v7233_v42  ;;  %v7226_v9 = vmul.f32 %v14739_v44, %v14739_v44  ;;  %v7230_v4 = vmul.f32 %v14742_v8, %v14742_v8  ;;  %v7234_v39 = vmul.f32 %v14744_v27, %v14744_v27 }
 0x78e   :  { %v7260_v54 = vadd.f32 %v7259_v11, %v7235_v50  ;;  %v14763_v45 = vsub.f32 %v14705_v30, %v7208_v18  ;;  %v14765_v5 = vsub.f32 %v7165_v60, %v7208_v18  ;;  %v7228_v22 = vmul.f32 %v14749_v15, %v14749_v15 }
 0x78f   :  { %v7243_v29 = vadd.f32 %v7242_v26, %v7237_v31  ;;  %v7250_v19 = vadd.f32 %v7230_v4, %v7226_v9  ;;  %v7232_v21 = vmul.f32 %v14752_v16, %v14752_v16  ;;  %v7238_v28 = vmul.f32 %v14746_v10, %v14746_v10 }
 0x790   :  { %v7261_v13 = vadd.f32 %v7260_v54, %v7239_v57  ;;  %v7236_v30 = vmul.f32 %v14763_v45, %v14763_v45  ;;  %v7240_v32 = vmul.f32 %v14765_v5, %v14765_v5 }
 0x791   :  { %v7244_v7 = vrot.slane %v7243_v29, 4  ;;  %v7251_v52 = vadd.f32 %v7250_v19, %v7234_v39  ;;  %v7268_v6 = vadd.f32 %v7232_v21, %v7228_v22 }
 0x792   :  { %v7262_v60 = vrot.slane %v7261_v13, 4 }
 0x793   :  { %v7245_v61 = vadd.f32 %v7244_v7, %v7243_v29  ;;  %v7252_v49 = vadd.f32 %v7251_v52, %v7238_v28  ;;  %v7269_v0 = vadd.f32 %v7268_v6, %v7236_v30 }
 0x794   :  { %v7263_v51 = vadd.f32 %v7262_v60, %v7261_v13 }
 0x795   :  { %v7246_v53 = vrot.slane %v7245_v61, 2  ;;  %v7253_v1 = vrot.slane %v7252_v49, 4  ;;  %v7270_v3 = vadd.f32 %v7269_v0, %v7240_v32  ;;  %v14783_v32 = vsub.s32 7, %v13869_v14 }
 0x796   :  { %v7264_v23 = vrot.slane %v7263_v51, 2 }
 0x797   :  { %v7247_v34 = vadd.f32 %v7246_v53, %v7245_v61  ;;  %v7254_v24 = vadd.f32 %v7253_v1, %v7252_v49  ;;  %v7271_v43 = vrot.slane %v7270_v3, 4  ;;  %v7168_v61 = vld [vmem:[#allocation14] sm:$0xff]  ;;  %v14780_v49 = vsub.s32 5, %v13869_v14 }
 0x798   :  { %v7265_v62 = vadd.f32 %v7264_v23, %v7263_v51  ;;  %v14786_v51 = vsub.s32 4, %v13869_v14  ;;  %v14789_v53 = vsub.s32 6, %v13869_v14  ;;  %v7373_v23 = vrot.slane %v7168_v61, %v14533_v55 }
 0x799   :  { %v7248_v2 = vrot.slane %v7247_v34, 1  ;;  %v7255_v63 = vrot.slane %v7254_v24, 2  ;;  %v7272_v18 = vadd.f32 %v7271_v43, %v7270_v3  ;;  %v7369_v3 = vrot.slane %v7168_v61, %v13875_v41 }
 0x79a   :  { %v7266_v12 = vrot.slane %v7265_v62, 1 }
 0x79b   :  { %v7249_v20 = vadd.f32 %v7248_v2, %v7247_v34  ;;  %v7256_v42 = vadd.f32 %v7255_v63, %v7254_v24  ;;  %v7273_v31 = vrot.slane %v7272_v18, 2  ;;  %v7377_v34 = vrot.slane %v7168_v61, %v14780_v49 }
 0x79c   :  { %v7267_v35 = vadd.f32 %v7266_v12, %v7265_v62  ;;  %v7381_v24 = vrot.slane %v7168_v61, %v14783_v32 }
 0x79d   :  { %v7277_v46 = vmul.f32 0.03125, %v7249_v20  ;;  %v7257_v50 = vrot.slane %v7256_v42, 1  ;;  %v7274_v17 = vadd.f32 %v7273_v31, %v7272_v18  ;;  %v7393_v31 = vrot.slane %v7373_v23, %v13875_v41 }
 0x79e   :  { %v7279_v11 = vmul.f32 0.03125, %v7267_v35  ;;  %v7397_v35 = vrot.slane %v7377_v34, %v13875_v41 }
 0x79f   :  { %v7281_v26 = vadd.f32 1e-05, %v7277_v46  ;;  %v7258_v57 = vadd.f32 %v7257_v50, %v7256_v42  ;;  %v7275_v9 = vrot.slane %v7274_v17, 1  ;;  %v7389_v42 = vrot.slane %v7369_v3, %v13875_v41 }
 0x7a0   :  { %v7283_v4 = vadd.f32 1e-05, %v7279_v11  ;;  %v7401_v46 = vrot.slane %v7381_v24, %v13875_v41 }
 0x7a1   :  { %v7278_v54 = vmul.f32 0.03125, %v7258_v57  ;;  %v7276_v39 = vadd.f32 %v7275_v9, %v7274_v17  ;;  %11387 = vrsqrt.f32 %v7281_v26 }
 0x7a2   :  { %11389 = vrsqrt.f32 %v7283_v4 }
 0x7a3   :  { %v7282_v29 = vadd.f32 1e-05, %v7278_v54  ;;  %v7280_v19 = vmul.f32 0.03125, %v7276_v39 }
 0x7a5   :  { %11391 = vrsqrt.f32 %v7282_v29  ;;  %v7284_v22 = vadd.f32 1e-05, %v7280_v19 }
 0x7a7   :  { %11393 = vrsqrt.f32 %v7284_v22 }
 0x7ab   :  { %v11388_v21 = vpop.eup %11387 }
 0x7ac   :  { %v11390_v13 = vpop.eup %11389 }
 0x7af   :  { %v11392_v28 = vpop.eup %11391 }
 0x7b0   :  { %v7293_v7 = vcombine.low %v11388_v21, %v11392_v28 }
 0x7b1   :  { %v11394_v52 = vpop.eup %11393 }
 0x7b2   :  { %v7294_v30 = vcombine.low %v11390_v13, %v11394_v52  ;;  %v7301_v6 = vrot.slane %v7293_v7, %v14530_v38 }
 0x7b4   :  { %v7308_v60 = vrot.slane %v7294_v30, %v14530_v38 }
 0x7b6   :  { %v7309_v0 = vcombine.low %v7301_v6, %v7308_v60 }
 0x7b8   :  { %v7311_v1 = vmul.f32 %v7309_v0, %v7168_v61 }
 0x7ba   :  { %v7316_v43 = vrot.slane %v7311_v1, %v15422_v33  ;;  %v7320_v62 = vrot.slane %v7311_v1, %v14537_v48  ;;  %v7324_v2 = vrot.slane %v7311_v1, %v14786_v51  ;;  %v7328_v63 = vrot.slane %v7311_v1, %v14789_v53 }
 0x7bc   :  { %v7336_v14 = vrot.slane %v7316_v43, %v15422_v33  ;;  %v7340_v18 = vrot.slane %v7320_v62, %v15422_v33  ;;  %v7344_v12 = vrot.slane %v7324_v2, %v15422_v33  ;;  %v7348_v20 = vrot.slane %v7328_v63, %v15422_v33 }
 0x7be   :  { %v7349_v50 = vmul.f32 %v7336_v14, %v14708_v58  ;;  %v7350_v17 = vmul.f32 %v7340_v18, %v14739_v44  ;;  %v7351_v11 = vmul.f32 %v7344_v12, %v14716_v36  ;;  %v7352_v26 = vmul.f32 %v7348_v20, %v14749_v15 }
 0x7bf   :  { %v7353_v57 = vmul.f32 %v7336_v14, %v14710_v56  ;;  %v7354_v9 = vmul.f32 %v7340_v18, %v14742_v8  ;;  %v7355_v4 = vmul.f32 %v7344_v12, %v14718_v40  ;;  %v7356_v54 = vmul.f32 %v7348_v20, %v14752_v16 }
 0x7c0   :  { %v7357_v39 = vmul.f32 %v7336_v14, %v14712_v25  ;;  %v7358_v29 = vmul.f32 %v7340_v18, %v14744_v27  ;;  %v7359_v58 = vmul.f32 %v7344_v12, %v14720_v37  ;;  %v7360_v44 = vmul.f32 %v7348_v20, %v14763_v45 }
 0x7c1   :  { %v7361_v36 = vmul.f32 %v7336_v14, %v14714_v47  ;;  %v7362_v15 = vmul.f32 %v7340_v18, %v14746_v10  ;;  %v7363_v56 = vmul.f32 %v7344_v12, %v14722_v59  ;;  %v7364_v8 = vmul.f32 %v7348_v20, %v14765_v5 }
 0x7c2   :  { %v14823_v19 = vadd.f32 %v7389_v42, %v7349_v50  ;;  %v7403_v40 = vadd.f32 %v7393_v31, %v7350_v17  ;;  %v14825_v16 = vadd.f32 %v7397_v35, %v7351_v11  ;;  %v14827_v25 = vadd.f32 %v7401_v46, %v7352_v26 }
 0x7c3   :  { %v14829_v27 = vadd.f32 %v7389_v42, %v7353_v57  ;;  %v14831_v37 = vadd.f32 %v7393_v31, %v7354_v9  ;;  %v14833_v45 = vadd.f32 %v7397_v35, %v7355_v4  ;;  %v14835_v47 = vadd.f32 %v7401_v46, %v7356_v54 }
 0x7c4   :  { %v14837_v10 = vadd.f32 %v7389_v42, %v7357_v39  ;;  %v14839_v59 = vadd.f32 %v7393_v31, %v7358_v29  ;;  %v14841_v5 = vadd.f32 %v7397_v35, %v7359_v58  ;;  %v14843_v22 = vadd.f32 %v7401_v46, %v7360_v44 }
 0x7c5   :  { %v14845_v21 = vadd.f32 %v7389_v42, %v7361_v36  ;;  %v14847_v13 = vadd.f32 %v7393_v31, %v7362_v15  ;;  %v14849_v28 = vadd.f32 %v7397_v35, %v7363_v56  ;;  %v14851_v7 = vadd.f32 %v7401_v46, %v7364_v8 }
 0x7c6   :  { %v7418_v52 = vmax.f32 %v14823_v19, 0.0  ;;  %v7419_v30 = vmax.f32 %v7403_v40, 0.0  ;;  %v7420_v6 = vmax.f32 %v14825_v16, 0.0  ;;  %v7421_v60 = vmax.f32 %v14827_v25, 0.0 }
 0x7c7   :  { %v7422_v61 = vmax.f32 %v14829_v27, 0.0  ;;  %v7423_v0 = vmax.f32 %v14831_v37, 0.0  ;;  %v7424_v1 = vmax.f32 %v14833_v45, 0.0  ;;  %v7425_v3 = vmax.f32 %v14835_v47, 0.0 }
 0x7c8   :  { %v7426_v23 = vmax.f32 %v14837_v10, 0.0  ;;  %v7427_v34 = vmax.f32 %v14839_v59, 0.0  ;;  %v7428_v24 = vmax.f32 %v14841_v5, 0.0  ;;  %v7429_v43 = vmax.f32 %v14843_v22, 0.0 }
 0x7c9   :  { %v7430_v62 = vmax.f32 %v14845_v21, 0.0  ;;  %v7431_v2 = vmax.f32 %v14847_v13, 0.0  ;;  %v7432_v63 = vmax.f32 %v14849_v28, 0.0  ;;  %v7433_v14 = vmax.f32 %v14851_v7, 0.0 }
 0x7ca   :  { %11557 = dma.done.wait [#allocation7 + $0x1], 131072 }
 0x7cb   :  { %11558 = vsyncadd [#allocation7 + $0x1], 4294836224  ;;  %v14868_v18 = vpack.c.bf16 %v7419_v30, %v7419_v30  ;;  %v7503_v12 = vld [vmem:[#allocation6 + $0x8] sm:$0xff]  ;;  %v7505_v20 = vld [vmem:[#allocation6 + $0x18] sm:$0xff]  ;;  %vm10542_vm1 = vcmask 1045508   ;;  %vm10444_vm2 = vcmask 1043458  }
 0x7cc   :  { %v7502_v42 = vld [vmem:[#allocation6] sm:$0xff]  ;;  %8582 = vmatprep.subr.bf16.mxu0 %v7503_v12  ;;  %8910 = vmatprep.subr.bf16.mxu1 %v7505_v20  ;;  %v7504_v31 = vld [vmem:[#allocation6 + $0x10] sm:$0xff]  ;;  %v7511_v35 = vld [vmem:[#allocation6 + $0x48] sm:$0xff]  ;;  %vm10640_vm3 = vcmask 1047558   ;;  %vm10346_vm4 = vcmask 1041408   ;;  %vm10679_vm5 = vcmask 1024  }
 0x7cd   :  { %8614 = vmatprep.mubr.bf16.mxu0 %v14868_v18  ;;  %8942 = vmatprep.mubr.bf16.mxu1 %v14868_v18  ;;  %v7513_v46 = vld [vmem:[#allocation6 + $0x58] sm:$0xff]  ;;  %v7510_v50 = vld [vmem:[#allocation6 + $0x40] sm:$0xff]  ;;  %v7512_v17 = vld [vmem:[#allocation6 + $0x50] sm:$0xff] }
 0x7ce   :  { %8583 = vmatpush1.bf16.msra.mxu0 %v7502_v42  ;;  %8911 = vmatpush1.bf16.msra.mxu1 %v7504_v31  ;;  %v7519_v11 = vld [vmem:[#allocation6 + $0x88] sm:$0xff]  ;;  %v7521_v26 = vld [vmem:[#allocation6 + $0x98] sm:$0xff]  ;;  %v7518_v57 = vld [vmem:[#allocation6 + $0x80] sm:$0xff] }
 0x7cf   :  { %8584 = vmatprep.subr.bf16.mxu0 %v7511_v35  ;;  %8912 = vmatprep.subr.bf16.mxu1 %v7513_v46  ;;  %v7520_v9 = vld [vmem:[#allocation6 + $0x90] sm:$0xff]  ;;  %v7527_v4 = vld [vmem:[#allocation6 + $0xc8] sm:$0xff]  ;;  %v7529_v54 = vld [vmem:[#allocation6 + $0xd8] sm:$0xff] }
 0x7d0   :  { %v7526_v39 = vld [vmem:[#allocation6 + $0xc0] sm:$0xff]  ;;  %v7528_v29 = vld [vmem:[#allocation6 + $0xd0] sm:$0xff]  ;;  %v7535_v58 = vld [vmem:[#allocation6 + $0x108] sm:$0xff] }
 0x7d1   :  { %v7537_v44 = vld [vmem:[#allocation6 + $0x118] sm:$0xff]  ;;  %v7534_v36 = vld [vmem:[#allocation6 + $0x100] sm:$0xff]  ;;  %v7536_v15 = vld [vmem:[#allocation6 + $0x110] sm:$0xff] }
 0x7d2   :  { %8585 = vmatpush1.bf16.msra.mxu0 %v7510_v50  ;;  %8913 = vmatpush1.bf16.msra.mxu1 %v7512_v17  ;;  %v7543_v56 = vld [vmem:[#allocation6 + $0x148] sm:$0xff]  ;;  %v7545_v8 = vld [vmem:[#allocation6 + $0x158] sm:$0xff]  ;;  %v7542_v40 = vld [vmem:[#allocation6 + $0x140] sm:$0xff] }
 0x7d3   :  { %8586 = vmatprep.subr.bf16.mxu0 %v7519_v11  ;;  %8914 = vmatprep.subr.bf16.mxu1 %v7521_v26  ;;  %v7544_v30 = vld [vmem:[#allocation6 + $0x150] sm:$0xff]  ;;  %v7551_v12 = vld [vmem:[#allocation6 + $0x188] sm:$0xff]  ;;  %v7553_v20 = vld [vmem:[#allocation6 + $0x198] sm:$0xff] }
 0x7d4   :  { %v7550_v42 = vld [vmem:[#allocation6 + $0x180] sm:$0xff]  ;;  %v7552_v31 = vld [vmem:[#allocation6 + $0x190] sm:$0xff]  ;;  %v7559_v35 = vld [vmem:[#allocation6 + $0x1c8] sm:$0xff] }
 0x7d5   :  { %v7561_v46 = vld [vmem:[#allocation6 + $0x1d8] sm:$0xff]  ;;  %v7558_v50 = vld [vmem:[#allocation6 + $0x1c0] sm:$0xff]  ;;  %v7560_v17 = vld [vmem:[#allocation6 + $0x1d0] sm:$0xff] }
 0x7d6   :  { %8587 = vmatpush1.bf16.msra.mxu0 %v7518_v57  ;;  %8915 = vmatpush1.bf16.msra.mxu1 %v7520_v9  ;;  %v7567_v11 = vld [vmem:[#allocation6 + $0x208] sm:$0xff]  ;;  %v7569_v26 = vld [vmem:[#allocation6 + $0x218] sm:$0xff]  ;;  %v7566_v57 = vld [vmem:[#allocation6 + $0x200] sm:$0xff] }
 0x7d7   :  { %8588 = vmatprep.subr.bf16.mxu0 %v7527_v4  ;;  %8916 = vmatprep.subr.bf16.mxu1 %v7529_v54  ;;  %v7568_v9 = vld [vmem:[#allocation6 + $0x210] sm:$0xff]  ;;  %v7575_v4 = vld [vmem:[#allocation6 + $0x248] sm:$0xff]  ;;  %v7577_v54 = vld [vmem:[#allocation6 + $0x258] sm:$0xff] }
 0x7d8   :  { %v7638_v19 = vld [vmem:[#allocation6 + $0x440] sm:$0xff] }
 0x7d9   :  { %v7646_v25 = vld [vmem:[#allocation6 + $0x480] sm:$0xff] }
 0x7da   :  { %8589 = vmatpush1.bf16.msra.mxu0 %v7526_v39  ;;  %8917 = vmatpush1.bf16.msra.mxu1 %v7528_v29  ;;  %v7574_v39 = vld [vmem:[#allocation6 + $0x240] sm:$0xff]  ;;  %v7576_v29 = vld [vmem:[#allocation6 + $0x250] sm:$0xff] }
 0x7db   :  { %8590 = vmatprep.subr.bf16.mxu0 %v7535_v58  ;;  %8918 = vmatprep.subr.bf16.mxu1 %v7537_v44  ;;  %v7583_v58 = vld [vmem:[#allocation6 + $0x288] sm:$0xff]  ;;  %v7585_v44 = vld [vmem:[#allocation6 + $0x298] sm:$0xff]  ;;  %v7766_v16 = vld [vmem:[#allocation6 + $0x840] sm:$0xff] }
 0x7dc   :  { %v7774_v37 = vld [vmem:[#allocation6 + $0x880] sm:$0xff] }
 0x7dd   :  { %v7894_v27 = vld [vmem:[#allocation6 + $0xc40] sm:$0xff] }
 0x7de   :  { %8591 = vmatpush1.bf16.msra.mxu0 %v7534_v36  ;;  %8919 = vmatpush1.bf16.msra.mxu1 %v7536_v15  ;;  %v7582_v36 = vld [vmem:[#allocation6 + $0x280] sm:$0xff]  ;;  %v7584_v15 = vld [vmem:[#allocation6 + $0x290] sm:$0xff] }
 0x7df   :  { %8592 = vmatprep.subr.bf16.mxu0 %v7543_v56  ;;  %8920 = vmatprep.subr.bf16.mxu1 %v7545_v8  ;;  %v7591_v56 = vld [vmem:[#allocation6 + $0x2c8] sm:$0xff]  ;;  %v7593_v8 = vld [vmem:[#allocation6 + $0x2d8] sm:$0xff]  ;;  %v7902_v47 = vld [vmem:[#allocation6 + $0xc80] sm:$0xff] }
 0x7e0   :  { %v8022_v45 = vld [vmem:[#allocation6 + $0x1040] sm:$0xff] }
 0x7e1   :  { %v8030_v59 = vld [vmem:[#allocation6 + $0x1080] sm:$0xff] }
 0x7e2   :  { %8593 = vmatpush1.bf16.msra.mxu0 %v7542_v40  ;;  %8921 = vmatpush1.bf16.msra.mxu1 %v7544_v30  ;;  %v7590_v40 = vld [vmem:[#allocation6 + $0x2c0] sm:$0xff]  ;;  %v7592_v30 = vld [vmem:[#allocation6 + $0x2d0] sm:$0xff] }
 0x7e3   :  { %8594 = vmatprep.subr.bf16.mxu0 %v7551_v12  ;;  %8922 = vmatprep.subr.bf16.mxu1 %v7553_v20  ;;  %v7599_v12 = vld [vmem:[#allocation6 + $0x308] sm:$0xff]  ;;  %v7601_v20 = vld [vmem:[#allocation6 + $0x318] sm:$0xff]  ;;  %v8150_v10 = vld [vmem:[#allocation6 + $0x1440] sm:$0xff] }
 0x7e4   :  { %v8158_v22 = vld [vmem:[#allocation6 + $0x1480] sm:$0xff] }
 0x7e5   :  { %v8278_v5 = vld [vmem:[#allocation6 + $0x1840] sm:$0xff] }
 0x7e6   :  { %8595 = vmatpush1.bf16.msra.mxu0 %v7550_v42  ;;  %8923 = vmatpush1.bf16.msra.mxu1 %v7552_v31  ;;  %v7598_v42 = vld [vmem:[#allocation6 + $0x300] sm:$0xff]  ;;  %v7600_v31 = vld [vmem:[#allocation6 + $0x310] sm:$0xff] }
 0x7e7   :  { %8596 = vmatprep.subr.bf16.mxu0 %v7559_v35  ;;  %8924 = vmatprep.subr.bf16.mxu1 %v7561_v46  ;;  %v7607_v35 = vld [vmem:[#allocation6 + $0x348] sm:$0xff]  ;;  %v7609_v46 = vld [vmem:[#allocation6 + $0x358] sm:$0xff]  ;;  %v8286_v13 = vld [vmem:[#allocation6 + $0x1880] sm:$0xff] }
 0x7e8   :  { %v8406_v21 = vld [vmem:[#allocation6 + $0x1c40] sm:$0xff] }
 0x7e9   :  { %v8414_v7 = vld [vmem:[#allocation6 + $0x1c80] sm:$0xff] }
 0x7ea   :  { %8597 = vmatpush1.bf16.msra.mxu0 %v7558_v50  ;;  %8925 = vmatpush1.bf16.msra.mxu1 %v7560_v17  ;;  %v7606_v50 = vld [vmem:[#allocation6 + $0x340] sm:$0xff]  ;;  %v7608_v17 = vld [vmem:[#allocation6 + $0x350] sm:$0xff] }
 0x7eb   :  { %8598 = vmatprep.subr.bf16.mxu0 %v7567_v11  ;;  %8926 = vmatprep.subr.bf16.mxu1 %v7569_v26  ;;  %v7615_v11 = vld [vmem:[#allocation6 + $0x388] sm:$0xff]  ;;  %v7617_v26 = vld [vmem:[#allocation6 + $0x398] sm:$0xff]  ;;  %v7514_v28 = vld [vmem:[#allocation6 + $0x60] sm:$0xff] }
 0x7ee   :  { %8599 = vmatpush1.bf16.msra.mxu0 %v7566_v57  ;;  %8927 = vmatpush1.bf16.msra.mxu1 %v7568_v9  ;;  %v7614_v57 = vld [vmem:[#allocation6 + $0x380] sm:$0xff]  ;;  %v7616_v9 = vld [vmem:[#allocation6 + $0x390] sm:$0xff] }
 0x7ef   :  { %8600 = vmatprep.subr.bf16.mxu0 %v7575_v4  ;;  %8928 = vmatprep.subr.bf16.mxu1 %v7577_v54  ;;  %v7623_v4 = vld [vmem:[#allocation6 + $0x3c8] sm:$0xff]  ;;  %v7625_v54 = vld [vmem:[#allocation6 + $0x3d8] sm:$0xff] }
 0x7f2   :  { %8601 = vmatpush1.bf16.msra.mxu0 %v7574_v39  ;;  %8929 = vmatpush1.bf16.msra.mxu1 %v7576_v29  ;;  %v7622_v39 = vld [vmem:[#allocation6 + $0x3c0] sm:$0xff]  ;;  %v7624_v29 = vld [vmem:[#allocation6 + $0x3d0] sm:$0xff] }
 0x7f3   :  { %8602 = vmatprep.subr.bf16.mxu0 %v7583_v58  ;;  %8930 = vmatprep.subr.bf16.mxu1 %v7585_v44  ;;  %v7631_v58 = vld [vmem:[#allocation6 + $0x408] sm:$0xff]  ;;  %v7633_v44 = vld [vmem:[#allocation6 + $0x418] sm:$0xff] }
 0x7f6   :  { %8603 = vmatpush1.bf16.msra.mxu0 %v7582_v36  ;;  %8931 = vmatpush1.bf16.msra.mxu1 %v7584_v15  ;;  %v14875_v36 = vpack.c.bf16 %v7418_v52, %v7418_v52  ;;  %v7630_v15 = vld [vmem:[#allocation6 + $0x400] sm:$0xff]  ;;  %v7640_v52 = vld [vmem:[#allocation6 + $0x450] sm:$0xff] }
 0x7f7   :  { %8604 = vmatprep.subr.bf16.mxu0 %v7591_v56  ;;  %8932 = vmatprep.subr.bf16.mxu1 %v7593_v8  ;;  %v7632_v56 = vld [vmem:[#allocation6 + $0x410] sm:$0xff]  ;;  %v7639_v8 = vld [vmem:[#allocation6 + $0x448] sm:$0xff] }
 0x7fa   :  { %8605 = vmatpush1.bf16.msra.mxu0 %v7590_v40  ;;  %8933 = vmatpush1.bf16.msra.mxu1 %v7592_v30  ;;  %v7641_v40 = vld [vmem:[#allocation6 + $0x458] sm:$0xff]  ;;  %v14880_v30 = vpack.c.bf16 %v7421_v60, %v7421_v60  ;;  %v7648_v60 = vld [vmem:[#allocation6 + $0x490] sm:$0xff] }
 0x7fb   :  { %8606 = vmatprep.subr.bf16.mxu0 %v7599_v12  ;;  %8934 = vmatprep.subr.bf16.mxu1 %v7601_v20  ;;  %v7647_v12 = vld [vmem:[#allocation6 + $0x488] sm:$0xff]  ;;  %v7649_v20 = vld [vmem:[#allocation6 + $0x498] sm:$0xff] }
 0x7fe   :  { %8607 = vmatpush1.bf16.msra.mxu0 %v7598_v42  ;;  %8935 = vmatpush1.bf16.msra.mxu1 %v7600_v31  ;;  %v7655_v42 = vld [vmem:[#allocation6 + $0x4c8] sm:$0xff]  ;;  %v7657_v31 = vld [vmem:[#allocation6 + $0x4d8] sm:$0xff] }
 0x7ff   :  { %8608 = vmatprep.subr.bf16.mxu0 %v7607_v35  ;;  %8936 = vmatprep.subr.bf16.mxu1 %v7609_v46  ;;  %v7654_v35 = vld [vmem:[#allocation6 + $0x4c0] sm:$0xff]  ;;  %v7656_v46 = vld [vmem:[#allocation6 + $0x4d0] sm:$0xff] }
 0x802   :  { %8609 = vmatpush1.bf16.msra.mxu0 %v7606_v50  ;;  %8937 = vmatpush1.bf16.msra.mxu1 %v7608_v17  ;;  %v7663_v50 = vld [vmem:[#allocation6 + $0x508] sm:$0xff]  ;;  %v7665_v17 = vld [vmem:[#allocation6 + $0x518] sm:$0xff] }
 0x803   :  { %8610 = vmatprep.subr.bf16.mxu0 %v7615_v11  ;;  %8938 = vmatprep.subr.bf16.mxu1 %v7617_v26  ;;  %v7662_v11 = vld [vmem:[#allocation6 + $0x500] sm:$0xff]  ;;  %v7664_v26 = vld [vmem:[#allocation6 + $0x510] sm:$0xff] }
 0x806   :  { %8611 = vmatpush1.bf16.msra.mxu0 %v7614_v57  ;;  %8939 = vmatpush1.bf16.msra.mxu1 %v7616_v9  ;;  %v7671_v57 = vld [vmem:[#allocation6 + $0x548] sm:$0xff]  ;;  %v7673_v9 = vld [vmem:[#allocation6 + $0x558] sm:$0xff] }
 0x807   :  { %8612 = vmatprep.subr.bf16.mxu0 %v7623_v4  ;;  %8940 = vmatprep.subr.bf16.mxu1 %v7625_v54  ;;  %v7670_v4 = vld [vmem:[#allocation6 + $0x540] sm:$0xff]  ;;  %v7672_v54 = vld [vmem:[#allocation6 + $0x550] sm:$0xff] }
 0x80a   :  { %8613 = vmatpush1.bf16.msra.mxu0 %v7622_v39  ;;  %8941 = vmatpush1.bf16.msra.mxu1 %v7624_v29  ;;  %v7679_v39 = vld [vmem:[#allocation6 + $0x588] sm:$0xff]  ;;  %v7681_v29 = vld [vmem:[#allocation6 + $0x598] sm:$0xff] }
 0x80b   :  { %8623 = vmatprep.subr.bf16.mxu0 %v7631_v58  ;;  %8951 = vmatprep.subr.bf16.mxu1 %v7633_v44  ;;  %v7678_v58 = vld [vmem:[#allocation6 + $0x580] sm:$0xff]  ;;  %v7680_v44 = vld [vmem:[#allocation6 + $0x590] sm:$0xff] }
 0x80d   :  { %8615 = vmatmul.mubr.bf16.vlgmr.msra.gmra.mrb[72].mxu0 %v14875_v36  ;;  %8943 = vmatmul.mubr.bf16.vlgmr.msra.gmra.mrb[40].mxu1 %v14875_v36 }
 0x80e   :  { %8624 = vmatpush1.bf16.msra.mxu0 %v7630_v15  ;;  %8952 = vmatpush1.bf16.msra.mxu1 %v7632_v56  ;;  %v7687_v15 = vld [vmem:[#allocation6 + $0x5c8] sm:$0xff]  ;;  %v7689_v56 = vld [vmem:[#allocation6 + $0x5d8] sm:$0xff] }
 0x80f   :  { %8625 = vmatprep.subr.bf16.mxu0 %v7639_v8  ;;  %8953 = vmatprep.subr.bf16.mxu1 %v7641_v40  ;;  %v7686_v8 = vld [vmem:[#allocation6 + $0x5c0] sm:$0xff]  ;;  %v7688_v40 = vld [vmem:[#allocation6 + $0x5d0] sm:$0xff] }
 0x810   :  { %8655 = vmatprep.mubr.bf16.mxu0 %v14880_v30  ;;  %8983 = vmatprep.mubr.bf16.mxu1 %v14880_v30 }
 0x812   :  { %8626 = vmatpush1.bf16.msra.mxu0 %v7638_v19  ;;  %8954 = vmatpush1.bf16.msra.mxu1 %v7640_v52  ;;  %v7695_v19 = vld [vmem:[#allocation6 + $0x608] sm:$0xff]  ;;  %v7697_v52 = vld [vmem:[#allocation6 + $0x618] sm:$0xff] }
 0x813   :  { %8627 = vmatprep.subr.bf16.mxu0 %v7647_v12  ;;  %8955 = vmatprep.subr.bf16.mxu1 %v7649_v20  ;;  %v7694_v12 = vld [vmem:[#allocation6 + $0x600] sm:$0xff]  ;;  %v7696_v20 = vld [vmem:[#allocation6 + $0x610] sm:$0xff] }
 0x816   :  { %8628 = vmatpush1.bf16.msra.mxu0 %v7646_v25  ;;  %8956 = vmatpush1.bf16.msra.mxu1 %v7648_v60  ;;  %v7703_v25 = vld [vmem:[#allocation6 + $0x648] sm:$0xff]  ;;  %v7705_v60 = vld [vmem:[#allocation6 + $0x658] sm:$0xff] }
 0x817   :  { %8629 = vmatprep.subr.bf16.mxu0 %v7655_v42  ;;  %8957 = vmatprep.subr.bf16.mxu1 %v7657_v31  ;;  %v7702_v42 = vld [vmem:[#allocation6 + $0x640] sm:$0xff]  ;;  %v7704_v31 = vld [vmem:[#allocation6 + $0x650] sm:$0xff] }
 0x81a   :  { %8630 = vmatpush1.bf16.msra.mxu0 %v7654_v35  ;;  %8958 = vmatpush1.bf16.msra.mxu1 %v7656_v46  ;;  %v7711_v35 = vld [vmem:[#allocation6 + $0x688] sm:$0xff]  ;;  %v7713_v46 = vld [vmem:[#allocation6 + $0x698] sm:$0xff] }
 0x81b   :  { %8631 = vmatprep.subr.bf16.mxu0 %v7663_v50  ;;  %8959 = vmatprep.subr.bf16.mxu1 %v7665_v17  ;;  %v7710_v50 = vld [vmem:[#allocation6 + $0x680] sm:$0xff]  ;;  %v7712_v17 = vld [vmem:[#allocation6 + $0x690] sm:$0xff] }
 0x81e   :  { %8632 = vmatpush1.bf16.msra.mxu0 %v7662_v11  ;;  %8960 = vmatpush1.bf16.msra.mxu1 %v7664_v26  ;;  %v7719_v11 = vld [vmem:[#allocation6 + $0x6c8] sm:$0xff]  ;;  %v7721_v26 = vld [vmem:[#allocation6 + $0x6d8] sm:$0xff] }
 0x81f   :  { %8633 = vmatprep.subr.bf16.mxu0 %v7671_v57  ;;  %8961 = vmatprep.subr.bf16.mxu1 %v7673_v9  ;;  %v7718_v57 = vld [vmem:[#allocation6 + $0x6c0] sm:$0xff]  ;;  %v7720_v9 = vld [vmem:[#allocation6 + $0x6d0] sm:$0xff] }
 0x822   :  { %8634 = vmatpush1.bf16.msra.mxu0 %v7670_v4  ;;  %8962 = vmatpush1.bf16.msra.mxu1 %v7672_v54  ;;  %v7727_v4 = vld [vmem:[#allocation6 + $0x708] sm:$0xff]  ;;  %v7729_v54 = vld [vmem:[#allocation6 + $0x718] sm:$0xff] }
 0x823   :  { %8635 = vmatprep.subr.bf16.mxu0 %v7679_v39  ;;  %8963 = vmatprep.subr.bf16.mxu1 %v7681_v29  ;;  %v7726_v39 = vld [vmem:[#allocation6 + $0x700] sm:$0xff]  ;;  %v7728_v29 = vld [vmem:[#allocation6 + $0x710] sm:$0xff] }
 0x826   :  { %8636 = vmatpush1.bf16.msra.mxu0 %v7678_v58  ;;  %8964 = vmatpush1.bf16.msra.mxu1 %v7680_v44  ;;  %v7735_v58 = vld [vmem:[#allocation6 + $0x748] sm:$0xff]  ;;  %v7737_v44 = vld [vmem:[#allocation6 + $0x758] sm:$0xff] }
 0x827   :  { %8637 = vmatprep.subr.bf16.mxu0 %v7687_v15  ;;  %8965 = vmatprep.subr.bf16.mxu1 %v7689_v56  ;;  %v7734_v15 = vld [vmem:[#allocation6 + $0x740] sm:$0xff]  ;;  %v7736_v56 = vld [vmem:[#allocation6 + $0x750] sm:$0xff] }
 0x82a   :  { %8638 = vmatpush1.bf16.msra.mxu0 %v7686_v8  ;;  %8966 = vmatpush1.bf16.msra.mxu1 %v7688_v40  ;;  %v7743_v8 = vld [vmem:[#allocation6 + $0x788] sm:$0xff]  ;;  %v7745_v40 = vld [vmem:[#allocation6 + $0x798] sm:$0xff] }
 0x82b   :  { %8639 = vmatprep.subr.bf16.mxu0 %v7695_v19  ;;  %8967 = vmatprep.subr.bf16.mxu1 %v7697_v52  ;;  %v7742_v19 = vld [vmem:[#allocation6 + $0x780] sm:$0xff]  ;;  %v7744_v52 = vld [vmem:[#allocation6 + $0x790] sm:$0xff] }
 0x82e   :  { %8640 = vmatpush1.bf16.msra.mxu0 %v7694_v12  ;;  %8968 = vmatpush1.bf16.msra.mxu1 %v7696_v20  ;;  %v7751_v12 = vld [vmem:[#allocation6 + $0x7c8] sm:$0xff]  ;;  %v7753_v20 = vld [vmem:[#allocation6 + $0x7d8] sm:$0xff] }
 0x82f   :  { %8641 = vmatprep.subr.bf16.mxu0 %v7703_v25  ;;  %8969 = vmatprep.subr.bf16.mxu1 %v7705_v60  ;;  %v7750_v25 = vld [vmem:[#allocation6 + $0x7c0] sm:$0xff]  ;;  %v7752_v60 = vld [vmem:[#allocation6 + $0x7d0] sm:$0xff] }
 0x832   :  { %8642 = vmatpush1.bf16.msra.mxu0 %v7702_v42  ;;  %8970 = vmatpush1.bf16.msra.mxu1 %v7704_v31  ;;  %v7759_v42 = vld [vmem:[#allocation6 + $0x808] sm:$0xff]  ;;  %v7761_v31 = vld [vmem:[#allocation6 + $0x818] sm:$0xff] }
 0x833   :  { %8643 = vmatprep.subr.bf16.mxu0 %v7711_v35  ;;  %8971 = vmatprep.subr.bf16.mxu1 %v7713_v46  ;;  %v14889_v35 = vpack.c.bf16 %v7420_v6, %v7420_v6  ;;  %v7758_v46 = vld [vmem:[#allocation6 + $0x800] sm:$0xff]  ;;  %v7768_v6 = vld [vmem:[#allocation6 + $0x850] sm:$0xff] }
 0x836   :  { %8644 = vmatpush1.bf16.msra.mxu0 %v7710_v50  ;;  %8972 = vmatpush1.bf16.msra.mxu1 %v7712_v17  ;;  %v7760_v50 = vld [vmem:[#allocation6 + $0x810] sm:$0xff]  ;;  %v7767_v17 = vld [vmem:[#allocation6 + $0x848] sm:$0xff] }
 0x837   :  { %8645 = vmatprep.subr.bf16.mxu0 %v7719_v11  ;;  %8973 = vmatprep.subr.bf16.mxu1 %v7721_v26  ;;  %v7769_v11 = vld [vmem:[#allocation6 + $0x858] sm:$0xff]  ;;  %v14894_v26 = vpack.c.bf16 %v7423_v0, %v7423_v0  ;;  %v7776_v0 = vld [vmem:[#allocation6 + $0x890] sm:$0xff] }
 0x83a   :  { %8646 = vmatpush1.bf16.msra.mxu0 %v7718_v57  ;;  %8974 = vmatpush1.bf16.msra.mxu1 %v7720_v9  ;;  %v7775_v57 = vld [vmem:[#allocation6 + $0x888] sm:$0xff]  ;;  %v7777_v9 = vld [vmem:[#allocation6 + $0x898] sm:$0xff] }
 0x83b   :  { %8647 = vmatprep.subr.bf16.mxu0 %v7727_v4  ;;  %8975 = vmatprep.subr.bf16.mxu1 %v7729_v54  ;;  %v7783_v4 = vld [vmem:[#allocation6 + $0x8c8] sm:$0xff]  ;;  %v7785_v54 = vld [vmem:[#allocation6 + $0x8d8] sm:$0xff] }
 0x83e   :  { %8648 = vmatpush1.bf16.msra.mxu0 %v7726_v39  ;;  %8976 = vmatpush1.bf16.msra.mxu1 %v7728_v29  ;;  %v7782_v39 = vld [vmem:[#allocation6 + $0x8c0] sm:$0xff]  ;;  %v7784_v29 = vld [vmem:[#allocation6 + $0x8d0] sm:$0xff] }
 0x83f   :  { %8649 = vmatprep.subr.bf16.mxu0 %v7735_v58  ;;  %8977 = vmatprep.subr.bf16.mxu1 %v7737_v44  ;;  %v7791_v58 = vld [vmem:[#allocation6 + $0x908] sm:$0xff]  ;;  %v7793_v44 = vld [vmem:[#allocation6 + $0x918] sm:$0xff] }
 0x842   :  { %8650 = vmatpush1.bf16.msra.mxu0 %v7734_v15  ;;  %8978 = vmatpush1.bf16.msra.mxu1 %v7736_v56  ;;  %v7790_v15 = vld [vmem:[#allocation6 + $0x900] sm:$0xff]  ;;  %v7792_v56 = vld [vmem:[#allocation6 + $0x910] sm:$0xff] }
 0x843   :  { %8651 = vmatprep.subr.bf16.mxu0 %v7743_v8  ;;  %8979 = vmatprep.subr.bf16.mxu1 %v7745_v40  ;;  %v7799_v8 = vld [vmem:[#allocation6 + $0x948] sm:$0xff]  ;;  %v7801_v40 = vld [vmem:[#allocation6 + $0x958] sm:$0xff] }
 0x846   :  { %8652 = vmatpush1.bf16.msra.mxu0 %v7742_v19  ;;  %8980 = vmatpush1.bf16.msra.mxu1 %v7744_v52  ;;  %v7798_v19 = vld [vmem:[#allocation6 + $0x940] sm:$0xff]  ;;  %v7800_v52 = vld [vmem:[#allocation6 + $0x950] sm:$0xff] }
 0x847   :  { %8653 = vmatprep.subr.bf16.mxu0 %v7751_v12  ;;  %8981 = vmatprep.subr.bf16.mxu1 %v7753_v20  ;;  %v7807_v12 = vld [vmem:[#allocation6 + $0x988] sm:$0xff]  ;;  %v7809_v20 = vld [vmem:[#allocation6 + $0x998] sm:$0xff] }
 0x84a   :  { %8654 = vmatpush1.bf16.msra.mxu0 %v7750_v25  ;;  %8982 = vmatpush1.bf16.msra.mxu1 %v7752_v60  ;;  %v7806_v25 = vld [vmem:[#allocation6 + $0x980] sm:$0xff]  ;;  %v7808_v60 = vld [vmem:[#allocation6 + $0x990] sm:$0xff] }
 0x84b   :  { %8664 = vmatprep.subr.bf16.mxu0 %v7759_v42  ;;  %8992 = vmatprep.subr.bf16.mxu1 %v7761_v31  ;;  %v7815_v42 = vld [vmem:[#allocation6 + $0x9c8] sm:$0xff]  ;;  %v7817_v31 = vld [vmem:[#allocation6 + $0x9d8] sm:$0xff] }
 0x84d   :  { %8656 = vmatmul.mubr.bf16.vlgmr.msra.gmra.mrb[72].mxu0 %v14889_v35  ;;  %8984 = vmatmul.mubr.bf16.vlgmr.msra.gmra.mrb[40].mxu1 %v14889_v35 }
 0x84e   :  { %8665 = vmatpush1.bf16.msra.mxu0 %v7758_v46  ;;  %8993 = vmatpush1.bf16.msra.mxu1 %v7760_v50  ;;  %v7814_v46 = vld [vmem:[#allocation6 + $0x9c0] sm:$0xff]  ;;  %v7816_v50 = vld [vmem:[#allocation6 + $0x9d0] sm:$0xff] }
 0x84f   :  { %8666 = vmatprep.subr.bf16.mxu0 %v7767_v17  ;;  %8994 = vmatprep.subr.bf16.mxu1 %v7769_v11  ;;  %v7823_v17 = vld [vmem:[#allocation6 + $0xa08] sm:$0xff]  ;;  %v7825_v11 = vld [vmem:[#allocation6 + $0xa18] sm:$0xff] }
 0x850   :  { %8696 = vmatprep.mubr.bf16.mxu0 %v14894_v26  ;;  %9024 = vmatprep.mubr.bf16.mxu1 %v14894_v26 }
 0x852   :  { %8667 = vmatpush1.bf16.msra.mxu0 %v7766_v16  ;;  %8995 = vmatpush1.bf16.msra.mxu1 %v7768_v6  ;;  %v7822_v16 = vld [vmem:[#allocation6 + $0xa00] sm:$0xff]  ;;  %v7824_v6 = vld [vmem:[#allocation6 + $0xa10] sm:$0xff] }
 0x853   :  { %8668 = vmatprep.subr.bf16.mxu0 %v7775_v57  ;;  %8996 = vmatprep.subr.bf16.mxu1 %v7777_v9  ;;  %v7831_v57 = vld [vmem:[#allocation6 + $0xa48] sm:$0xff]  ;;  %v7833_v9 = vld [vmem:[#allocation6 + $0xa58] sm:$0xff] }
 0x856   :  { %8669 = vmatpush1.bf16.msra.mxu0 %v7774_v37  ;;  %8997 = vmatpush1.bf16.msra.mxu1 %v7776_v0  ;;  %v7830_v37 = vld [vmem:[#allocation6 + $0xa40] sm:$0xff]  ;;  %v7832_v0 = vld [vmem:[#allocation6 + $0xa50] sm:$0xff] }
 0x857   :  { %8670 = vmatprep.subr.bf16.mxu0 %v7783_v4  ;;  %8998 = vmatprep.subr.bf16.mxu1 %v7785_v54  ;;  %v7839_v4 = vld [vmem:[#allocation6 + $0xa88] sm:$0xff]  ;;  %v7841_v54 = vld [vmem:[#allocation6 + $0xa98] sm:$0xff] }
 0x85a   :  { %8671 = vmatpush1.bf16.msra.mxu0 %v7782_v39  ;;  %8999 = vmatpush1.bf16.msra.mxu1 %v7784_v29  ;;  %v7838_v39 = vld [vmem:[#allocation6 + $0xa80] sm:$0xff]  ;;  %v7840_v29 = vld [vmem:[#allocation6 + $0xa90] sm:$0xff] }
 0x85b   :  { %8672 = vmatprep.subr.bf16.mxu0 %v7791_v58  ;;  %9000 = vmatprep.subr.bf16.mxu1 %v7793_v44  ;;  %v7847_v58 = vld [vmem:[#allocation6 + $0xac8] sm:$0xff]  ;;  %v7849_v44 = vld [vmem:[#allocation6 + $0xad8] sm:$0xff] }
 0x85e   :  { %8673 = vmatpush1.bf16.msra.mxu0 %v7790_v15  ;;  %9001 = vmatpush1.bf16.msra.mxu1 %v7792_v56  ;;  %v7846_v15 = vld [vmem:[#allocation6 + $0xac0] sm:$0xff]  ;;  %v7848_v56 = vld [vmem:[#allocation6 + $0xad0] sm:$0xff] }
 0x85f   :  { %8674 = vmatprep.subr.bf16.mxu0 %v7799_v8  ;;  %9002 = vmatprep.subr.bf16.mxu1 %v7801_v40  ;;  %v7855_v8 = vld [vmem:[#allocation6 + $0xb08] sm:$0xff]  ;;  %v7857_v40 = vld [vmem:[#allocation6 + $0xb18] sm:$0xff] }
 0x862   :  { %8675 = vmatpush1.bf16.msra.mxu0 %v7798_v19  ;;  %9003 = vmatpush1.bf16.msra.mxu1 %v7800_v52  ;;  %v7854_v19 = vld [vmem:[#allocation6 + $0xb00] sm:$0xff]  ;;  %v7856_v52 = vld [vmem:[#allocation6 + $0xb10] sm:$0xff] }
 0x863   :  { %8676 = vmatprep.subr.bf16.mxu0 %v7807_v12  ;;  %9004 = vmatprep.subr.bf16.mxu1 %v7809_v20  ;;  %v7863_v12 = vld [vmem:[#allocation6 + $0xb48] sm:$0xff]  ;;  %v7865_v20 = vld [vmem:[#allocation6 + $0xb58] sm:$0xff] }
 0x866   :  { %8677 = vmatpush1.bf16.msra.mxu0 %v7806_v25  ;;  %9005 = vmatpush1.bf16.msra.mxu1 %v7808_v60  ;;  %v7862_v25 = vld [vmem:[#allocation6 + $0xb40] sm:$0xff]  ;;  %v7864_v60 = vld [vmem:[#allocation6 + $0xb50] sm:$0xff] }
 0x867   :  { %8678 = vmatprep.subr.bf16.mxu0 %v7815_v42  ;;  %9006 = vmatprep.subr.bf16.mxu1 %v7817_v31  ;;  %v7871_v42 = vld [vmem:[#allocation6 + $0xb88] sm:$0xff]  ;;  %v7873_v31 = vld [vmem:[#allocation6 + $0xb98] sm:$0xff] }
 0x86a   :  { %8679 = vmatpush1.bf16.msra.mxu0 %v7814_v46  ;;  %9007 = vmatpush1.bf16.msra.mxu1 %v7816_v50  ;;  %v7870_v46 = vld [vmem:[#allocation6 + $0xb80] sm:$0xff]  ;;  %v7872_v50 = vld [vmem:[#allocation6 + $0xb90] sm:$0xff] }
 0x86b   :  { %8680 = vmatprep.subr.bf16.mxu0 %v7823_v17  ;;  %9008 = vmatprep.subr.bf16.mxu1 %v7825_v11  ;;  %v7879_v17 = vld [vmem:[#allocation6 + $0xbc8] sm:$0xff]  ;;  %v7881_v11 = vld [vmem:[#allocation6 + $0xbd8] sm:$0xff] }
 0x86e   :  { %8681 = vmatpush1.bf16.msra.mxu0 %v7822_v16  ;;  %9009 = vmatpush1.bf16.msra.mxu1 %v7824_v6  ;;  %v7878_v16 = vld [vmem:[#allocation6 + $0xbc0] sm:$0xff]  ;;  %v7880_v6 = vld [vmem:[#allocation6 + $0xbd0] sm:$0xff] }
 0x86f   :  { %8682 = vmatprep.subr.bf16.mxu0 %v7831_v57  ;;  %9010 = vmatprep.subr.bf16.mxu1 %v7833_v9  ;;  %v7887_v57 = vld [vmem:[#allocation6 + $0xc08] sm:$0xff]  ;;  %v7889_v9 = vld [vmem:[#allocation6 + $0xc18] sm:$0xff] }
 0x872   :  { %8683 = vmatpush1.bf16.msra.mxu0 %v7830_v37  ;;  %9011 = vmatpush1.bf16.msra.mxu1 %v7832_v0  ;;  %v14903_v37 = vpack.c.bf16 %v7422_v61, %v7422_v61  ;;  %v7886_v0 = vld [vmem:[#allocation6 + $0xc00] sm:$0xff]  ;;  %v7896_v61 = vld [vmem:[#allocation6 + $0xc50] sm:$0xff] }
 0x873   :  { %8684 = vmatprep.subr.bf16.mxu0 %v7839_v4  ;;  %9012 = vmatprep.subr.bf16.mxu1 %v7841_v54  ;;  %v7888_v4 = vld [vmem:[#allocation6 + $0xc10] sm:$0xff]  ;;  %v7895_v54 = vld [vmem:[#allocation6 + $0xc48] sm:$0xff] }
 0x876   :  { %8685 = vmatpush1.bf16.msra.mxu0 %v7838_v39  ;;  %9013 = vmatpush1.bf16.msra.mxu1 %v7840_v29  ;;  %v7897_v39 = vld [vmem:[#allocation6 + $0xc58] sm:$0xff]  ;;  %v14908_v29 = vpack.c.bf16 %v7425_v3, %v7425_v3  ;;  %v7904_v3 = vld [vmem:[#allocation6 + $0xc90] sm:$0xff] }
 0x877   :  { %8686 = vmatprep.subr.bf16.mxu0 %v7847_v58  ;;  %9014 = vmatprep.subr.bf16.mxu1 %v7849_v44  ;;  %v7903_v58 = vld [vmem:[#allocation6 + $0xc88] sm:$0xff]  ;;  %v7905_v44 = vld [vmem:[#allocation6 + $0xc98] sm:$0xff] }
 0x87a   :  { %8687 = vmatpush1.bf16.msra.mxu0 %v7846_v15  ;;  %9015 = vmatpush1.bf16.msra.mxu1 %v7848_v56  ;;  %v7911_v15 = vld [vmem:[#allocation6 + $0xcc8] sm:$0xff]  ;;  %v7913_v56 = vld [vmem:[#allocation6 + $0xcd8] sm:$0xff] }
 0x87b   :  { %8688 = vmatprep.subr.bf16.mxu0 %v7855_v8  ;;  %9016 = vmatprep.subr.bf16.mxu1 %v7857_v40  ;;  %v7910_v8 = vld [vmem:[#allocation6 + $0xcc0] sm:$0xff]  ;;  %v7912_v40 = vld [vmem:[#allocation6 + $0xcd0] sm:$0xff] }
 0x87e   :  { %8689 = vmatpush1.bf16.msra.mxu0 %v7854_v19  ;;  %9017 = vmatpush1.bf16.msra.mxu1 %v7856_v52  ;;  %v7919_v19 = vld [vmem:[#allocation6 + $0xd08] sm:$0xff]  ;;  %v7921_v52 = vld [vmem:[#allocation6 + $0xd18] sm:$0xff] }
 0x87f   :  { %8690 = vmatprep.subr.bf16.mxu0 %v7863_v12  ;;  %9018 = vmatprep.subr.bf16.mxu1 %v7865_v20  ;;  %v7918_v12 = vld [vmem:[#allocation6 + $0xd00] sm:$0xff]  ;;  %v7920_v20 = vld [vmem:[#allocation6 + $0xd10] sm:$0xff] }
 0x882   :  { %8691 = vmatpush1.bf16.msra.mxu0 %v7862_v25  ;;  %9019 = vmatpush1.bf16.msra.mxu1 %v7864_v60  ;;  %v7927_v25 = vld [vmem:[#allocation6 + $0xd48] sm:$0xff]  ;;  %v7929_v60 = vld [vmem:[#allocation6 + $0xd58] sm:$0xff] }
 0x883   :  { %8692 = vmatprep.subr.bf16.mxu0 %v7871_v42  ;;  %9020 = vmatprep.subr.bf16.mxu1 %v7873_v31  ;;  %v7926_v42 = vld [vmem:[#allocation6 + $0xd40] sm:$0xff]  ;;  %v7928_v31 = vld [vmem:[#allocation6 + $0xd50] sm:$0xff] }
 0x886   :  { %8693 = vmatpush1.bf16.msra.mxu0 %v7870_v46  ;;  %9021 = vmatpush1.bf16.msra.mxu1 %v7872_v50  ;;  %v7935_v46 = vld [vmem:[#allocation6 + $0xd88] sm:$0xff]  ;;  %v7937_v50 = vld [vmem:[#allocation6 + $0xd98] sm:$0xff] }
 0x887   :  { %8694 = vmatprep.subr.bf16.mxu0 %v7879_v17  ;;  %9022 = vmatprep.subr.bf16.mxu1 %v7881_v11  ;;  %v7934_v17 = vld [vmem:[#allocation6 + $0xd80] sm:$0xff]  ;;  %v7936_v11 = vld [vmem:[#allocation6 + $0xd90] sm:$0xff] }
 0x88a   :  { %8695 = vmatpush1.bf16.msra.mxu0 %v7878_v16  ;;  %9023 = vmatpush1.bf16.msra.mxu1 %v7880_v6  ;;  %v7943_v16 = vld [vmem:[#allocation6 + $0xdc8] sm:$0xff]  ;;  %v7945_v6 = vld [vmem:[#allocation6 + $0xdd8] sm:$0xff] }
 0x88b   :  { %8705 = vmatprep.subr.bf16.mxu0 %v7887_v57  ;;  %9033 = vmatprep.subr.bf16.mxu1 %v7889_v9  ;;  %v7942_v57 = vld [vmem:[#allocation6 + $0xdc0] sm:$0xff]  ;;  %v7944_v9 = vld [vmem:[#allocation6 + $0xdd0] sm:$0xff] }
 0x88d   :  { %8697 = vmatmul.mubr.bf16.vlgmr.msra.gmra.mrb[72].mxu0 %v14903_v37  ;;  %9025 = vmatmul.mubr.bf16.vlgmr.msra.gmra.mrb[40].mxu1 %v14903_v37 }
 0x88e   :  { %8706 = vmatpush1.bf16.msra.mxu0 %v7886_v0  ;;  %9034 = vmatpush1.bf16.msra.mxu1 %v7888_v4  ;;  %v7951_v0 = vld [vmem:[#allocation6 + $0xe08] sm:$0xff]  ;;  %v7953_v4 = vld [vmem:[#allocation6 + $0xe18] sm:$0xff] }
 0x88f   :  { %8707 = vmatprep.subr.bf16.mxu0 %v7895_v54  ;;  %9035 = vmatprep.subr.bf16.mxu1 %v7897_v39  ;;  %v7950_v54 = vld [vmem:[#allocation6 + $0xe00] sm:$0xff]  ;;  %v7952_v39 = vld [vmem:[#allocation6 + $0xe10] sm:$0xff] }
 0x890   :  { %8737 = vmatprep.mubr.bf16.mxu0 %v14908_v29  ;;  %9065 = vmatprep.mubr.bf16.mxu1 %v14908_v29 }
 0x892   :  { %8708 = vmatpush1.bf16.msra.mxu0 %v7894_v27  ;;  %9036 = vmatpush1.bf16.msra.mxu1 %v7896_v61  ;;  %v7959_v27 = vld [vmem:[#allocation6 + $0xe48] sm:$0xff]  ;;  %v7961_v61 = vld [vmem:[#allocation6 + $0xe58] sm:$0xff] }
 0x893   :  { %8709 = vmatprep.subr.bf16.mxu0 %v7903_v58  ;;  %9037 = vmatprep.subr.bf16.mxu1 %v7905_v44  ;;  %v7958_v58 = vld [vmem:[#allocation6 + $0xe40] sm:$0xff]  ;;  %v7960_v44 = vld [vmem:[#allocation6 + $0xe50] sm:$0xff] }
 0x896   :  { %8710 = vmatpush1.bf16.msra.mxu0 %v7902_v47  ;;  %9038 = vmatpush1.bf16.msra.mxu1 %v7904_v3  ;;  %v7967_v47 = vld [vmem:[#allocation6 + $0xe88] sm:$0xff]  ;;  %v7969_v3 = vld [vmem:[#allocation6 + $0xe98] sm:$0xff] }
 0x897   :  { %8711 = vmatprep.subr.bf16.mxu0 %v7911_v15  ;;  %9039 = vmatprep.subr.bf16.mxu1 %v7913_v56  ;;  %v7966_v15 = vld [vmem:[#allocation6 + $0xe80] sm:$0xff]  ;;  %v7968_v56 = vld [vmem:[#allocation6 + $0xe90] sm:$0xff] }
 0x89a   :  { %8712 = vmatpush1.bf16.msra.mxu0 %v7910_v8  ;;  %9040 = vmatpush1.bf16.msra.mxu1 %v7912_v40  ;;  %v7975_v8 = vld [vmem:[#allocation6 + $0xec8] sm:$0xff]  ;;  %v7977_v40 = vld [vmem:[#allocation6 + $0xed8] sm:$0xff] }
 0x89b   :  { %8713 = vmatprep.subr.bf16.mxu0 %v7919_v19  ;;  %9041 = vmatprep.subr.bf16.mxu1 %v7921_v52  ;;  %v7974_v19 = vld [vmem:[#allocation6 + $0xec0] sm:$0xff]  ;;  %v7976_v52 = vld [vmem:[#allocation6 + $0xed0] sm:$0xff] }
 0x89e   :  { %8714 = vmatpush1.bf16.msra.mxu0 %v7918_v12  ;;  %9042 = vmatpush1.bf16.msra.mxu1 %v7920_v20  ;;  %v7983_v12 = vld [vmem:[#allocation6 + $0xf08] sm:$0xff]  ;;  %v7985_v20 = vld [vmem:[#allocation6 + $0xf18] sm:$0xff] }
 0x89f   :  { %8715 = vmatprep.subr.bf16.mxu0 %v7927_v25  ;;  %9043 = vmatprep.subr.bf16.mxu1 %v7929_v60  ;;  %v7982_v25 = vld [vmem:[#allocation6 + $0xf00] sm:$0xff]  ;;  %v7984_v60 = vld [vmem:[#allocation6 + $0xf10] sm:$0xff] }
 0x8a2   :  { %8716 = vmatpush1.bf16.msra.mxu0 %v7926_v42  ;;  %9044 = vmatpush1.bf16.msra.mxu1 %v7928_v31  ;;  %v7991_v42 = vld [vmem:[#allocation6 + $0xf48] sm:$0xff]  ;;  %v7993_v31 = vld [vmem:[#allocation6 + $0xf58] sm:$0xff] }
 0x8a3   :  { %8717 = vmatprep.subr.bf16.mxu0 %v7935_v46  ;;  %9045 = vmatprep.subr.bf16.mxu1 %v7937_v50  ;;  %v7990_v46 = vld [vmem:[#allocation6 + $0xf40] sm:$0xff]  ;;  %v7992_v50 = vld [vmem:[#allocation6 + $0xf50] sm:$0xff] }
 0x8a6   :  { %8718 = vmatpush1.bf16.msra.mxu0 %v7934_v17  ;;  %9046 = vmatpush1.bf16.msra.mxu1 %v7936_v11  ;;  %v7999_v17 = vld [vmem:[#allocation6 + $0xf88] sm:$0xff]  ;;  %v8001_v11 = vld [vmem:[#allocation6 + $0xf98] sm:$0xff] }
 0x8a7   :  { %8719 = vmatprep.subr.bf16.mxu0 %v7943_v16  ;;  %9047 = vmatprep.subr.bf16.mxu1 %v7945_v6  ;;  %v7998_v16 = vld [vmem:[#allocation6 + $0xf80] sm:$0xff]  ;;  %v8000_v6 = vld [vmem:[#allocation6 + $0xf90] sm:$0xff] }
 0x8aa   :  { %8720 = vmatpush1.bf16.msra.mxu0 %v7942_v57  ;;  %9048 = vmatpush1.bf16.msra.mxu1 %v7944_v9  ;;  %v8007_v57 = vld [vmem:[#allocation6 + $0xfc8] sm:$0xff]  ;;  %v8009_v9 = vld [vmem:[#allocation6 + $0xfd8] sm:$0xff] }
 0x8ab   :  { %8721 = vmatprep.subr.bf16.mxu0 %v7951_v0  ;;  %9049 = vmatprep.subr.bf16.mxu1 %v7953_v4  ;;  %v8006_v0 = vld [vmem:[#allocation6 + $0xfc0] sm:$0xff]  ;;  %v8008_v4 = vld [vmem:[#allocation6 + $0xfd0] sm:$0xff] }
 0x8ae   :  { %8722 = vmatpush1.bf16.msra.mxu0 %v7950_v54  ;;  %9050 = vmatpush1.bf16.msra.mxu1 %v7952_v39  ;;  %v8015_v54 = vld [vmem:[#allocation6 + $0x1008] sm:$0xff]  ;;  %v8017_v39 = vld [vmem:[#allocation6 + $0x1018] sm:$0xff] }
 0x8af   :  { %8723 = vmatprep.subr.bf16.mxu0 %v7959_v27  ;;  %9051 = vmatprep.subr.bf16.mxu1 %v7961_v61  ;;  %v14917_v27 = vpack.c.bf16 %v7424_v1, %v7424_v1  ;;  %v8014_v61 = vld [vmem:[#allocation6 + $0x1000] sm:$0xff]  ;;  %v8024_v1 = vld [vmem:[#allocation6 + $0x1050] sm:$0xff] }
 0x8b2   :  { %8724 = vmatpush1.bf16.msra.mxu0 %v7958_v58  ;;  %9052 = vmatpush1.bf16.msra.mxu1 %v7960_v44  ;;  %v8016_v58 = vld [vmem:[#allocation6 + $0x1010] sm:$0xff]  ;;  %v8023_v44 = vld [vmem:[#allocation6 + $0x1048] sm:$0xff] }
 0x8b3   :  { %8725 = vmatprep.subr.bf16.mxu0 %v7967_v47  ;;  %9053 = vmatprep.subr.bf16.mxu1 %v7969_v3  ;;  %v8025_v47 = vld [vmem:[#allocation6 + $0x1058] sm:$0xff]  ;;  %v14922_v3 = vpack.c.bf16 %v7427_v34, %v7427_v34  ;;  %v8032_v34 = vld [vmem:[#allocation6 + $0x1090] sm:$0xff] }
 0x8b6   :  { %8726 = vmatpush1.bf16.msra.mxu0 %v7966_v15  ;;  %9054 = vmatpush1.bf16.msra.mxu1 %v7968_v56  ;;  %v8031_v15 = vld [vmem:[#allocation6 + $0x1088] sm:$0xff]  ;;  %v8033_v56 = vld [vmem:[#allocation6 + $0x1098] sm:$0xff] }
 0x8b7   :  { %8727 = vmatprep.subr.bf16.mxu0 %v7975_v8  ;;  %9055 = vmatprep.subr.bf16.mxu1 %v7977_v40  ;;  %v8039_v8 = vld [vmem:[#allocation6 + $0x10c8] sm:$0xff]  ;;  %v8041_v40 = vld [vmem:[#allocation6 + $0x10d8] sm:$0xff] }
 0x8ba   :  { %8728 = vmatpush1.bf16.msra.mxu0 %v7974_v19  ;;  %9056 = vmatpush1.bf16.msra.mxu1 %v7976_v52  ;;  %v8038_v19 = vld [vmem:[#allocation6 + $0x10c0] sm:$0xff]  ;;  %v8040_v52 = vld [vmem:[#allocation6 + $0x10d0] sm:$0xff] }
 0x8bb   :  { %8729 = vmatprep.subr.bf16.mxu0 %v7983_v12  ;;  %9057 = vmatprep.subr.bf16.mxu1 %v7985_v20  ;;  %v8047_v12 = vld [vmem:[#allocation6 + $0x1108] sm:$0xff]  ;;  %v8049_v20 = vld [vmem:[#allocation6 + $0x1118] sm:$0xff] }
 0x8be   :  { %8730 = vmatpush1.bf16.msra.mxu0 %v7982_v25  ;;  %9058 = vmatpush1.bf16.msra.mxu1 %v7984_v60  ;;  %v8046_v25 = vld [vmem:[#allocation6 + $0x1100] sm:$0xff]  ;;  %v8048_v60 = vld [vmem:[#allocation6 + $0x1110] sm:$0xff] }
 0x8bf   :  { %8731 = vmatprep.subr.bf16.mxu0 %v7991_v42  ;;  %9059 = vmatprep.subr.bf16.mxu1 %v7993_v31  ;;  %v8055_v42 = vld [vmem:[#allocation6 + $0x1148] sm:$0xff]  ;;  %v8057_v31 = vld [vmem:[#allocation6 + $0x1158] sm:$0xff] }
 0x8c2   :  { %8732 = vmatpush1.bf16.msra.mxu0 %v7990_v46  ;;  %9060 = vmatpush1.bf16.msra.mxu1 %v7992_v50  ;;  %v8054_v46 = vld [vmem:[#allocation6 + $0x1140] sm:$0xff]  ;;  %v8056_v50 = vld [vmem:[#allocation6 + $0x1150] sm:$0xff] }
 0x8c3   :  { %8733 = vmatprep.subr.bf16.mxu0 %v7999_v17  ;;  %9061 = vmatprep.subr.bf16.mxu1 %v8001_v11  ;;  %v8063_v17 = vld [vmem:[#allocation6 + $0x1188] sm:$0xff]  ;;  %v8065_v11 = vld [vmem:[#allocation6 + $0x1198] sm:$0xff] }
 0x8c6   :  { %8734 = vmatpush1.bf16.msra.mxu0 %v7998_v16  ;;  %9062 = vmatpush1.bf16.msra.mxu1 %v8000_v6  ;;  %v8062_v16 = vld [vmem:[#allocation6 + $0x1180] sm:$0xff]  ;;  %v8064_v6 = vld [vmem:[#allocation6 + $0x1190] sm:$0xff] }
 0x8c7   :  { %8735 = vmatprep.subr.bf16.mxu0 %v8007_v57  ;;  %9063 = vmatprep.subr.bf16.mxu1 %v8009_v9  ;;  %v8071_v57 = vld [vmem:[#allocation6 + $0x11c8] sm:$0xff]  ;;  %v8073_v9 = vld [vmem:[#allocation6 + $0x11d8] sm:$0xff] }
 0x8ca   :  { %8736 = vmatpush1.bf16.msra.mxu0 %v8006_v0  ;;  %9064 = vmatpush1.bf16.msra.mxu1 %v8008_v4  ;;  %v8070_v0 = vld [vmem:[#allocation6 + $0x11c0] sm:$0xff]  ;;  %v8072_v4 = vld [vmem:[#allocation6 + $0x11d0] sm:$0xff] }
 0x8cb   :  { %8746 = vmatprep.subr.bf16.mxu0 %v8015_v54  ;;  %9074 = vmatprep.subr.bf16.mxu1 %v8017_v39  ;;  %v8079_v54 = vld [vmem:[#allocation6 + $0x1208] sm:$0xff]  ;;  %v8081_v39 = vld [vmem:[#allocation6 + $0x1218] sm:$0xff] }
 0x8cd   :  { %8738 = vmatmul.mubr.bf16.vlgmr.msra.gmra.mrb[72].mxu0 %v14917_v27  ;;  %9066 = vmatmul.mubr.bf16.vlgmr.msra.gmra.mrb[40].mxu1 %v14917_v27 }
 0x8ce   :  { %8747 = vmatpush1.bf16.msra.mxu0 %v8014_v61  ;;  %9075 = vmatpush1.bf16.msra.mxu1 %v8016_v58  ;;  %v8078_v61 = vld [vmem:[#allocation6 + $0x1200] sm:$0xff]  ;;  %v8080_v58 = vld [vmem:[#allocation6 + $0x1210] sm:$0xff] }
 0x8cf   :  { %8748 = vmatprep.subr.bf16.mxu0 %v8023_v44  ;;  %9076 = vmatprep.subr.bf16.mxu1 %v8025_v47  ;;  %v8087_v44 = vld [vmem:[#allocation6 + $0x1248] sm:$0xff]  ;;  %v8089_v47 = vld [vmem:[#allocation6 + $0x1258] sm:$0xff] }
 0x8d0   :  { %8778 = vmatprep.mubr.bf16.mxu0 %v14922_v3  ;;  %9106 = vmatprep.mubr.bf16.mxu1 %v14922_v3 }
 0x8d2   :  { %8749 = vmatpush1.bf16.msra.mxu0 %v8022_v45  ;;  %9077 = vmatpush1.bf16.msra.mxu1 %v8024_v1  ;;  %v8086_v45 = vld [vmem:[#allocation6 + $0x1240] sm:$0xff]  ;;  %v8088_v1 = vld [vmem:[#allocation6 + $0x1250] sm:$0xff] }
 0x8d3   :  { %8750 = vmatprep.subr.bf16.mxu0 %v8031_v15  ;;  %9078 = vmatprep.subr.bf16.mxu1 %v8033_v56  ;;  %v8095_v15 = vld [vmem:[#allocation6 + $0x1288] sm:$0xff]  ;;  %v8097_v56 = vld [vmem:[#allocation6 + $0x1298] sm:$0xff] }
 0x8d6   :  { %8751 = vmatpush1.bf16.msra.mxu0 %v8030_v59  ;;  %9079 = vmatpush1.bf16.msra.mxu1 %v8032_v34  ;;  %v8094_v59 = vld [vmem:[#allocation6 + $0x1280] sm:$0xff]  ;;  %v8096_v34 = vld [vmem:[#allocation6 + $0x1290] sm:$0xff] }
 0x8d7   :  { %8752 = vmatprep.subr.bf16.mxu0 %v8039_v8  ;;  %9080 = vmatprep.subr.bf16.mxu1 %v8041_v40  ;;  %v8103_v8 = vld [vmem:[#allocation6 + $0x12c8] sm:$0xff]  ;;  %v8105_v40 = vld [vmem:[#allocation6 + $0x12d8] sm:$0xff] }
 0x8da   :  { %8753 = vmatpush1.bf16.msra.mxu0 %v8038_v19  ;;  %9081 = vmatpush1.bf16.msra.mxu1 %v8040_v52  ;;  %v8102_v19 = vld [vmem:[#allocation6 + $0x12c0] sm:$0xff]  ;;  %v8104_v52 = vld [vmem:[#allocation6 + $0x12d0] sm:$0xff] }
 0x8db   :  { %8754 = vmatprep.subr.bf16.mxu0 %v8047_v12  ;;  %9082 = vmatprep.subr.bf16.mxu1 %v8049_v20  ;;  %v8111_v12 = vld [vmem:[#allocation6 + $0x1308] sm:$0xff]  ;;  %v8113_v20 = vld [vmem:[#allocation6 + $0x1318] sm:$0xff] }
 0x8de   :  { %8755 = vmatpush1.bf16.msra.mxu0 %v8046_v25  ;;  %9083 = vmatpush1.bf16.msra.mxu1 %v8048_v60  ;;  %v8110_v25 = vld [vmem:[#allocation6 + $0x1300] sm:$0xff]  ;;  %v8112_v60 = vld [vmem:[#allocation6 + $0x1310] sm:$0xff] }
 0x8df   :  { %8756 = vmatprep.subr.bf16.mxu0 %v8055_v42  ;;  %9084 = vmatprep.subr.bf16.mxu1 %v8057_v31  ;;  %v8119_v42 = vld [vmem:[#allocation6 + $0x1348] sm:$0xff]  ;;  %v8121_v31 = vld [vmem:[#allocation6 + $0x1358] sm:$0xff] }
 0x8e2   :  { %8757 = vmatpush1.bf16.msra.mxu0 %v8054_v46  ;;  %9085 = vmatpush1.bf16.msra.mxu1 %v8056_v50  ;;  %v8118_v46 = vld [vmem:[#allocation6 + $0x1340] sm:$0xff]  ;;  %v8120_v50 = vld [vmem:[#allocation6 + $0x1350] sm:$0xff] }
 0x8e3   :  { %8758 = vmatprep.subr.bf16.mxu0 %v8063_v17  ;;  %9086 = vmatprep.subr.bf16.mxu1 %v8065_v11  ;;  %v8127_v17 = vld [vmem:[#allocation6 + $0x1388] sm:$0xff]  ;;  %v8129_v11 = vld [vmem:[#allocation6 + $0x1398] sm:$0xff] }
 0x8e6   :  { %8759 = vmatpush1.bf16.msra.mxu0 %v8062_v16  ;;  %9087 = vmatpush1.bf16.msra.mxu1 %v8064_v6  ;;  %v8126_v16 = vld [vmem:[#allocation6 + $0x1380] sm:$0xff]  ;;  %v8128_v6 = vld [vmem:[#allocation6 + $0x1390] sm:$0xff] }
 0x8e7   :  { %8760 = vmatprep.subr.bf16.mxu0 %v8071_v57  ;;  %9088 = vmatprep.subr.bf16.mxu1 %v8073_v9  ;;  %v8135_v57 = vld [vmem:[#allocation6 + $0x13c8] sm:$0xff]  ;;  %v8137_v9 = vld [vmem:[#allocation6 + $0x13d8] sm:$0xff] }
 0x8ea   :  { %8761 = vmatpush1.bf16.msra.mxu0 %v8070_v0  ;;  %9089 = vmatpush1.bf16.msra.mxu1 %v8072_v4  ;;  %v8134_v0 = vld [vmem:[#allocation6 + $0x13c0] sm:$0xff]  ;;  %v8136_v4 = vld [vmem:[#allocation6 + $0x13d0] sm:$0xff] }
 0x8eb   :  { %8762 = vmatprep.subr.bf16.mxu0 %v8079_v54  ;;  %9090 = vmatprep.subr.bf16.mxu1 %v8081_v39  ;;  %v8143_v54 = vld [vmem:[#allocation6 + $0x1408] sm:$0xff]  ;;  %v8145_v39 = vld [vmem:[#allocation6 + $0x1418] sm:$0xff] }
 0x8ee   :  { %8763 = vmatpush1.bf16.msra.mxu0 %v8078_v61  ;;  %9091 = vmatpush1.bf16.msra.mxu1 %v8080_v58  ;;  %v14931_v61 = vpack.c.bf16 %v7426_v23, %v7426_v23  ;;  %v8142_v58 = vld [vmem:[#allocation6 + $0x1400] sm:$0xff]  ;;  %v8152_v23 = vld [vmem:[#allocation6 + $0x1450] sm:$0xff] }
 0x8ef   :  { %8764 = vmatprep.subr.bf16.mxu0 %v8087_v44  ;;  %9092 = vmatprep.subr.bf16.mxu1 %v8089_v47  ;;  %v8144_v44 = vld [vmem:[#allocation6 + $0x1410] sm:$0xff]  ;;  %v8151_v47 = vld [vmem:[#allocation6 + $0x1448] sm:$0xff] }
 0x8f2   :  { %8765 = vmatpush1.bf16.msra.mxu0 %v8086_v45  ;;  %9093 = vmatpush1.bf16.msra.mxu1 %v8088_v1  ;;  %v8153_v45 = vld [vmem:[#allocation6 + $0x1458] sm:$0xff]  ;;  %v14936_v1 = vpack.c.bf16 %v7429_v43, %v7429_v43  ;;  %v8160_v43 = vld [vmem:[#allocation6 + $0x1490] sm:$0xff] }
 0x8f3   :  { %8766 = vmatprep.subr.bf16.mxu0 %v8095_v15  ;;  %9094 = vmatprep.subr.bf16.mxu1 %v8097_v56  ;;  %v8159_v15 = vld [vmem:[#allocation6 + $0x1488] sm:$0xff]  ;;  %v8161_v56 = vld [vmem:[#allocation6 + $0x1498] sm:$0xff] }
 0x8f6   :  { %8767 = vmatpush1.bf16.msra.mxu0 %v8094_v59  ;;  %9095 = vmatpush1.bf16.msra.mxu1 %v8096_v34  ;;  %v8167_v59 = vld [vmem:[#allocation6 + $0x14c8] sm:$0xff]  ;;  %v8169_v34 = vld [vmem:[#allocation6 + $0x14d8] sm:$0xff] }
 0x8f7   :  { %8768 = vmatprep.subr.bf16.mxu0 %v8103_v8  ;;  %9096 = vmatprep.subr.bf16.mxu1 %v8105_v40  ;;  %v8166_v8 = vld [vmem:[#allocation6 + $0x14c0] sm:$0xff]  ;;  %v8168_v40 = vld [vmem:[#allocation6 + $0x14d0] sm:$0xff] }
 0x8fa   :  { %8769 = vmatpush1.bf16.msra.mxu0 %v8102_v19  ;;  %9097 = vmatpush1.bf16.msra.mxu1 %v8104_v52  ;;  %v8175_v19 = vld [vmem:[#allocation6 + $0x1508] sm:$0xff]  ;;  %v8177_v52 = vld [vmem:[#allocation6 + $0x1518] sm:$0xff] }
 0x8fb   :  { %8770 = vmatprep.subr.bf16.mxu0 %v8111_v12  ;;  %9098 = vmatprep.subr.bf16.mxu1 %v8113_v20  ;;  %v8174_v12 = vld [vmem:[#allocation6 + $0x1500] sm:$0xff]  ;;  %v8176_v20 = vld [vmem:[#allocation6 + $0x1510] sm:$0xff] }
 0x8fe   :  { %8771 = vmatpush1.bf16.msra.mxu0 %v8110_v25  ;;  %9099 = vmatpush1.bf16.msra.mxu1 %v8112_v60  ;;  %v8183_v25 = vld [vmem:[#allocation6 + $0x1548] sm:$0xff]  ;;  %v8185_v60 = vld [vmem:[#allocation6 + $0x1558] sm:$0xff] }
 0x8ff   :  { %8772 = vmatprep.subr.bf16.mxu0 %v8119_v42  ;;  %9100 = vmatprep.subr.bf16.mxu1 %v8121_v31  ;;  %v8182_v42 = vld [vmem:[#allocation6 + $0x1540] sm:$0xff]  ;;  %v8184_v31 = vld [vmem:[#allocation6 + $0x1550] sm:$0xff] }
 0x902   :  { %8773 = vmatpush1.bf16.msra.mxu0 %v8118_v46  ;;  %9101 = vmatpush1.bf16.msra.mxu1 %v8120_v50  ;;  %v8191_v46 = vld [vmem:[#allocation6 + $0x1588] sm:$0xff]  ;;  %v8193_v50 = vld [vmem:[#allocation6 + $0x1598] sm:$0xff] }
 0x903   :  { %8774 = vmatprep.subr.bf16.mxu0 %v8127_v17  ;;  %9102 = vmatprep.subr.bf16.mxu1 %v8129_v11  ;;  %v8190_v17 = vld [vmem:[#allocation6 + $0x1580] sm:$0xff]  ;;  %v8192_v11 = vld [vmem:[#allocation6 + $0x1590] sm:$0xff] }
 0x906   :  { %8775 = vmatpush1.bf16.msra.mxu0 %v8126_v16  ;;  %9103 = vmatpush1.bf16.msra.mxu1 %v8128_v6  ;;  %v8199_v16 = vld [vmem:[#allocation6 + $0x15c8] sm:$0xff]  ;;  %v8201_v6 = vld [vmem:[#allocation6 + $0x15d8] sm:$0xff] }
 0x907   :  { %8776 = vmatprep.subr.bf16.mxu0 %v8135_v57  ;;  %9104 = vmatprep.subr.bf16.mxu1 %v8137_v9  ;;  %v8198_v57 = vld [vmem:[#allocation6 + $0x15c0] sm:$0xff]  ;;  %v8200_v9 = vld [vmem:[#allocation6 + $0x15d0] sm:$0xff] }
 0x90a   :  { %8777 = vmatpush1.bf16.msra.mxu0 %v8134_v0  ;;  %9105 = vmatpush1.bf16.msra.mxu1 %v8136_v4  ;;  %v8207_v0 = vld [vmem:[#allocation6 + $0x1608] sm:$0xff]  ;;  %v8209_v4 = vld [vmem:[#allocation6 + $0x1618] sm:$0xff] }
 0x90b   :  { %8787 = vmatprep.subr.bf16.mxu0 %v8143_v54  ;;  %9115 = vmatprep.subr.bf16.mxu1 %v8145_v39  ;;  %v8206_v54 = vld [vmem:[#allocation6 + $0x1600] sm:$0xff]  ;;  %v8208_v39 = vld [vmem:[#allocation6 + $0x1610] sm:$0xff] }
 0x90d   :  { %8779 = vmatmul.mubr.bf16.vlgmr.msra.gmra.mrb[72].mxu0 %v14931_v61  ;;  %9107 = vmatmul.mubr.bf16.vlgmr.msra.gmra.mrb[40].mxu1 %v14931_v61 }
 0x90e   :  { %8788 = vmatpush1.bf16.msra.mxu0 %v8142_v58  ;;  %9116 = vmatpush1.bf16.msra.mxu1 %v8144_v44  ;;  %v8215_v58 = vld [vmem:[#allocation6 + $0x1648] sm:$0xff]  ;;  %v8217_v44 = vld [vmem:[#allocation6 + $0x1658] sm:$0xff] }
 0x90f   :  { %8789 = vmatprep.subr.bf16.mxu0 %v8151_v47  ;;  %9117 = vmatprep.subr.bf16.mxu1 %v8153_v45  ;;  %v8214_v47 = vld [vmem:[#allocation6 + $0x1640] sm:$0xff]  ;;  %v8216_v45 = vld [vmem:[#allocation6 + $0x1650] sm:$0xff] }
 0x910   :  { %8819 = vmatprep.mubr.bf16.mxu0 %v14936_v1  ;;  %9147 = vmatprep.mubr.bf16.mxu1 %v14936_v1 }
 0x912   :  { %8790 = vmatpush1.bf16.msra.mxu0 %v8150_v10  ;;  %9118 = vmatpush1.bf16.msra.mxu1 %v8152_v23  ;;  %v8223_v10 = vld [vmem:[#allocation6 + $0x1688] sm:$0xff]  ;;  %v8225_v23 = vld [vmem:[#allocation6 + $0x1698] sm:$0xff] }
 0x913   :  { %8791 = vmatprep.subr.bf16.mxu0 %v8159_v15  ;;  %9119 = vmatprep.subr.bf16.mxu1 %v8161_v56  ;;  %v8222_v15 = vld [vmem:[#allocation6 + $0x1680] sm:$0xff]  ;;  %v8224_v56 = vld [vmem:[#allocation6 + $0x1690] sm:$0xff] }
 0x916   :  { %8792 = vmatpush1.bf16.msra.mxu0 %v8158_v22  ;;  %9120 = vmatpush1.bf16.msra.mxu1 %v8160_v43  ;;  %v8231_v22 = vld [vmem:[#allocation6 + $0x16c8] sm:$0xff]  ;;  %v8233_v43 = vld [vmem:[#allocation6 + $0x16d8] sm:$0xff] }
 0x917   :  { %8793 = vmatprep.subr.bf16.mxu0 %v8167_v59  ;;  %9121 = vmatprep.subr.bf16.mxu1 %v8169_v34  ;;  %v8230_v59 = vld [vmem:[#allocation6 + $0x16c0] sm:$0xff]  ;;  %v8232_v34 = vld [vmem:[#allocation6 + $0x16d0] sm:$0xff] }
 0x91a   :  { %8794 = vmatpush1.bf16.msra.mxu0 %v8166_v8  ;;  %9122 = vmatpush1.bf16.msra.mxu1 %v8168_v40  ;;  %v8239_v8 = vld [vmem:[#allocation6 + $0x1708] sm:$0xff]  ;;  %v8241_v40 = vld [vmem:[#allocation6 + $0x1718] sm:$0xff] }
 0x91b   :  { %8795 = vmatprep.subr.bf16.mxu0 %v8175_v19  ;;  %9123 = vmatprep.subr.bf16.mxu1 %v8177_v52  ;;  %v8238_v19 = vld [vmem:[#allocation6 + $0x1700] sm:$0xff]  ;;  %v8240_v52 = vld [vmem:[#allocation6 + $0x1710] sm:$0xff] }
 0x91e   :  { %8796 = vmatpush1.bf16.msra.mxu0 %v8174_v12  ;;  %9124 = vmatpush1.bf16.msra.mxu1 %v8176_v20  ;;  %v8247_v12 = vld [vmem:[#allocation6 + $0x1748] sm:$0xff]  ;;  %v8249_v20 = vld [vmem:[#allocation6 + $0x1758] sm:$0xff] }
 0x91f   :  { %8797 = vmatprep.subr.bf16.mxu0 %v8183_v25  ;;  %9125 = vmatprep.subr.bf16.mxu1 %v8185_v60  ;;  %v8246_v25 = vld [vmem:[#allocation6 + $0x1740] sm:$0xff]  ;;  %v8248_v60 = vld [vmem:[#allocation6 + $0x1750] sm:$0xff] }
 0x922   :  { %8798 = vmatpush1.bf16.msra.mxu0 %v8182_v42  ;;  %9126 = vmatpush1.bf16.msra.mxu1 %v8184_v31  ;;  %v8255_v42 = vld [vmem:[#allocation6 + $0x1788] sm:$0xff]  ;;  %v8257_v31 = vld [vmem:[#allocation6 + $0x1798] sm:$0xff] }
 0x923   :  { %8799 = vmatprep.subr.bf16.mxu0 %v8191_v46  ;;  %9127 = vmatprep.subr.bf16.mxu1 %v8193_v50  ;;  %v8254_v46 = vld [vmem:[#allocation6 + $0x1780] sm:$0xff]  ;;  %v8256_v50 = vld [vmem:[#allocation6 + $0x1790] sm:$0xff] }
 0x926   :  { %8800 = vmatpush1.bf16.msra.mxu0 %v8190_v17  ;;  %9128 = vmatpush1.bf16.msra.mxu1 %v8192_v11  ;;  %v8263_v17 = vld [vmem:[#allocation6 + $0x17c8] sm:$0xff]  ;;  %v8265_v11 = vld [vmem:[#allocation6 + $0x17d8] sm:$0xff] }
 0x927   :  { %8801 = vmatprep.subr.bf16.mxu0 %v8199_v16  ;;  %9129 = vmatprep.subr.bf16.mxu1 %v8201_v6  ;;  %v8262_v16 = vld [vmem:[#allocation6 + $0x17c0] sm:$0xff]  ;;  %v8264_v6 = vld [vmem:[#allocation6 + $0x17d0] sm:$0xff] }
 0x92a   :  { %8802 = vmatpush1.bf16.msra.mxu0 %v8198_v57  ;;  %9130 = vmatpush1.bf16.msra.mxu1 %v8200_v9  ;;  %v8271_v57 = vld [vmem:[#allocation6 + $0x1808] sm:$0xff]  ;;  %v8273_v9 = vld [vmem:[#allocation6 + $0x1818] sm:$0xff] }
 0x92b   :  { %8803 = vmatprep.subr.bf16.mxu0 %v8207_v0  ;;  %9131 = vmatprep.subr.bf16.mxu1 %v8209_v4  ;;  %v14945_v0 = vpack.c.bf16 %v7428_v24, %v7428_v24  ;;  %v8270_v4 = vld [vmem:[#allocation6 + $0x1800] sm:$0xff]  ;;  %v8280_v24 = vld [vmem:[#allocation6 + $0x1850] sm:$0xff] }
 0x92e   :  { %8804 = vmatpush1.bf16.msra.mxu0 %v8206_v54  ;;  %9132 = vmatpush1.bf16.msra.mxu1 %v8208_v39  ;;  %v8272_v54 = vld [vmem:[#allocation6 + $0x1810] sm:$0xff]  ;;  %v8279_v39 = vld [vmem:[#allocation6 + $0x1848] sm:$0xff] }
 0x92f   :  { %8805 = vmatprep.subr.bf16.mxu0 %v8215_v58  ;;  %9133 = vmatprep.subr.bf16.mxu1 %v8217_v44  ;;  %v8281_v58 = vld [vmem:[#allocation6 + $0x1858] sm:$0xff]  ;;  %v14950_v44 = vpack.c.bf16 %v7431_v2, %v7431_v2  ;;  %v8288_v2 = vld [vmem:[#allocation6 + $0x1890] sm:$0xff] }
 0x932   :  { %8806 = vmatpush1.bf16.msra.mxu0 %v8214_v47  ;;  %9134 = vmatpush1.bf16.msra.mxu1 %v8216_v45  ;;  %v8287_v47 = vld [vmem:[#allocation6 + $0x1888] sm:$0xff]  ;;  %v8289_v45 = vld [vmem:[#allocation6 + $0x1898] sm:$0xff] }
 0x933   :  { %8807 = vmatprep.subr.bf16.mxu0 %v8223_v10  ;;  %9135 = vmatprep.subr.bf16.mxu1 %v8225_v23  ;;  %v8295_v10 = vld [vmem:[#allocation6 + $0x18c8] sm:$0xff]  ;;  %v8297_v23 = vld [vmem:[#allocation6 + $0x18d8] sm:$0xff] }
 0x936   :  { %8808 = vmatpush1.bf16.msra.mxu0 %v8222_v15  ;;  %9136 = vmatpush1.bf16.msra.mxu1 %v8224_v56  ;;  %v8294_v15 = vld [vmem:[#allocation6 + $0x18c0] sm:$0xff]  ;;  %v8296_v56 = vld [vmem:[#allocation6 + $0x18d0] sm:$0xff] }
 0x937   :  { %8809 = vmatprep.subr.bf16.mxu0 %v8231_v22  ;;  %9137 = vmatprep.subr.bf16.mxu1 %v8233_v43  ;;  %v8303_v22 = vld [vmem:[#allocation6 + $0x1908] sm:$0xff]  ;;  %v8305_v43 = vld [vmem:[#allocation6 + $0x1918] sm:$0xff] }
 0x93a   :  { %8810 = vmatpush1.bf16.msra.mxu0 %v8230_v59  ;;  %9138 = vmatpush1.bf16.msra.mxu1 %v8232_v34  ;;  %v8302_v59 = vld [vmem:[#allocation6 + $0x1900] sm:$0xff]  ;;  %v8304_v34 = vld [vmem:[#allocation6 + $0x1910] sm:$0xff] }
 0x93b   :  { %8811 = vmatprep.subr.bf16.mxu0 %v8239_v8  ;;  %9139 = vmatprep.subr.bf16.mxu1 %v8241_v40  ;;  %v8311_v8 = vld [vmem:[#allocation6 + $0x1948] sm:$0xff]  ;;  %v8313_v40 = vld [vmem:[#allocation6 + $0x1958] sm:$0xff] }
 0x93e   :  { %8812 = vmatpush1.bf16.msra.mxu0 %v8238_v19  ;;  %9140 = vmatpush1.bf16.msra.mxu1 %v8240_v52  ;;  %v8310_v19 = vld [vmem:[#allocation6 + $0x1940] sm:$0xff]  ;;  %v8312_v52 = vld [vmem:[#allocation6 + $0x1950] sm:$0xff] }
 0x93f   :  { %8813 = vmatprep.subr.bf16.mxu0 %v8247_v12  ;;  %9141 = vmatprep.subr.bf16.mxu1 %v8249_v20  ;;  %v8319_v12 = vld [vmem:[#allocation6 + $0x1988] sm:$0xff]  ;;  %v8321_v20 = vld [vmem:[#allocation6 + $0x1998] sm:$0xff] }
 0x942   :  { %8814 = vmatpush1.bf16.msra.mxu0 %v8246_v25  ;;  %9142 = vmatpush1.bf16.msra.mxu1 %v8248_v60  ;;  %v8318_v25 = vld [vmem:[#allocation6 + $0x1980] sm:$0xff]  ;;  %v8320_v60 = vld [vmem:[#allocation6 + $0x1990] sm:$0xff] }
 0x943   :  { %8815 = vmatprep.subr.bf16.mxu0 %v8255_v42  ;;  %9143 = vmatprep.subr.bf16.mxu1 %v8257_v31  ;;  %v8327_v42 = vld [vmem:[#allocation6 + $0x19c8] sm:$0xff]  ;;  %v8329_v31 = vld [vmem:[#allocation6 + $0x19d8] sm:$0xff] }
 0x946   :  { %8816 = vmatpush1.bf16.msra.mxu0 %v8254_v46  ;;  %9144 = vmatpush1.bf16.msra.mxu1 %v8256_v50  ;;  %v8326_v46 = vld [vmem:[#allocation6 + $0x19c0] sm:$0xff]  ;;  %v8328_v50 = vld [vmem:[#allocation6 + $0x19d0] sm:$0xff] }
 0x947   :  { %8817 = vmatprep.subr.bf16.mxu0 %v8263_v17  ;;  %9145 = vmatprep.subr.bf16.mxu1 %v8265_v11  ;;  %v8335_v17 = vld [vmem:[#allocation6 + $0x1a08] sm:$0xff]  ;;  %v8337_v11 = vld [vmem:[#allocation6 + $0x1a18] sm:$0xff] }
 0x94a   :  { %8818 = vmatpush1.bf16.msra.mxu0 %v8262_v16  ;;  %9146 = vmatpush1.bf16.msra.mxu1 %v8264_v6  ;;  %v8334_v16 = vld [vmem:[#allocation6 + $0x1a00] sm:$0xff]  ;;  %v8336_v6 = vld [vmem:[#allocation6 + $0x1a10] sm:$0xff] }
 0x94b   :  { %8828 = vmatprep.subr.bf16.mxu0 %v8271_v57  ;;  %9156 = vmatprep.subr.bf16.mxu1 %v8273_v9  ;;  %v8343_v57 = vld [vmem:[#allocation6 + $0x1a48] sm:$0xff]  ;;  %v8345_v9 = vld [vmem:[#allocation6 + $0x1a58] sm:$0xff] }
 0x94d   :  { %8820 = vmatmul.mubr.bf16.vlgmr.msra.gmra.mrb[72].mxu0 %v14945_v0  ;;  %9148 = vmatmul.mubr.bf16.vlgmr.msra.gmra.mrb[40].mxu1 %v14945_v0 }
 0x94e   :  { %8829 = vmatpush1.bf16.msra.mxu0 %v8270_v4  ;;  %9157 = vmatpush1.bf16.msra.mxu1 %v8272_v54  ;;  %v8342_v4 = vld [vmem:[#allocation6 + $0x1a40] sm:$0xff]  ;;  %v8344_v54 = vld [vmem:[#allocation6 + $0x1a50] sm:$0xff] }
 0x94f   :  { %8830 = vmatprep.subr.bf16.mxu0 %v8279_v39  ;;  %9158 = vmatprep.subr.bf16.mxu1 %v8281_v58  ;;  %v8351_v39 = vld [vmem:[#allocation6 + $0x1a88] sm:$0xff]  ;;  %v8353_v58 = vld [vmem:[#allocation6 + $0x1a98] sm:$0xff] }
 0x950   :  { %8860 = vmatprep.mubr.bf16.mxu0 %v14950_v44  ;;  %9188 = vmatprep.mubr.bf16.mxu1 %v14950_v44 }
 0x952   :  { %8831 = vmatpush1.bf16.msra.mxu0 %v8278_v5  ;;  %9159 = vmatpush1.bf16.msra.mxu1 %v8280_v24  ;;  %v8350_v5 = vld [vmem:[#allocation6 + $0x1a80] sm:$0xff]  ;;  %v8352_v24 = vld [vmem:[#allocation6 + $0x1a90] sm:$0xff] }
 0x953   :  { %8832 = vmatprep.subr.bf16.mxu0 %v8287_v47  ;;  %9160 = vmatprep.subr.bf16.mxu1 %v8289_v45  ;;  %v8359_v47 = vld [vmem:[#allocation6 + $0x1ac8] sm:$0xff]  ;;  %v8361_v45 = vld [vmem:[#allocation6 + $0x1ad8] sm:$0xff] }
 0x956   :  { %8833 = vmatpush1.bf16.msra.mxu0 %v8286_v13  ;;  %9161 = vmatpush1.bf16.msra.mxu1 %v8288_v2  ;;  %v8358_v13 = vld [vmem:[#allocation6 + $0x1ac0] sm:$0xff]  ;;  %v8360_v2 = vld [vmem:[#allocation6 + $0x1ad0] sm:$0xff] }
 0x957   :  { %8834 = vmatprep.subr.bf16.mxu0 %v8295_v10  ;;  %9162 = vmatprep.subr.bf16.mxu1 %v8297_v23  ;;  %v8367_v10 = vld [vmem:[#allocation6 + $0x1b08] sm:$0xff]  ;;  %v8369_v23 = vld [vmem:[#allocation6 + $0x1b18] sm:$0xff] }
 0x95a   :  { %8835 = vmatpush1.bf16.msra.mxu0 %v8294_v15  ;;  %9163 = vmatpush1.bf16.msra.mxu1 %v8296_v56  ;;  %v8366_v15 = vld [vmem:[#allocation6 + $0x1b00] sm:$0xff]  ;;  %v8368_v56 = vld [vmem:[#allocation6 + $0x1b10] sm:$0xff] }
 0x95b   :  { %8836 = vmatprep.subr.bf16.mxu0 %v8303_v22  ;;  %9164 = vmatprep.subr.bf16.mxu1 %v8305_v43  ;;  %v8375_v22 = vld [vmem:[#allocation6 + $0x1b48] sm:$0xff]  ;;  %v8377_v43 = vld [vmem:[#allocation6 + $0x1b58] sm:$0xff] }
 0x95e   :  { %8837 = vmatpush1.bf16.msra.mxu0 %v8302_v59  ;;  %9165 = vmatpush1.bf16.msra.mxu1 %v8304_v34  ;;  %v8374_v59 = vld [vmem:[#allocation6 + $0x1b40] sm:$0xff]  ;;  %v8376_v34 = vld [vmem:[#allocation6 + $0x1b50] sm:$0xff] }
 0x95f   :  { %8838 = vmatprep.subr.bf16.mxu0 %v8311_v8  ;;  %9166 = vmatprep.subr.bf16.mxu1 %v8313_v40  ;;  %v8383_v8 = vld [vmem:[#allocation6 + $0x1b88] sm:$0xff]  ;;  %v8385_v40 = vld [vmem:[#allocation6 + $0x1b98] sm:$0xff] }
 0x962   :  { %8839 = vmatpush1.bf16.msra.mxu0 %v8310_v19  ;;  %9167 = vmatpush1.bf16.msra.mxu1 %v8312_v52  ;;  %v8382_v19 = vld [vmem:[#allocation6 + $0x1b80] sm:$0xff]  ;;  %v8384_v52 = vld [vmem:[#allocation6 + $0x1b90] sm:$0xff] }
 0x963   :  { %8840 = vmatprep.subr.bf16.mxu0 %v8319_v12  ;;  %9168 = vmatprep.subr.bf16.mxu1 %v8321_v20  ;;  %v8391_v12 = vld [vmem:[#allocation6 + $0x1bc8] sm:$0xff]  ;;  %v8393_v20 = vld [vmem:[#allocation6 + $0x1bd8] sm:$0xff] }
 0x966   :  { %8841 = vmatpush1.bf16.msra.mxu0 %v8318_v25  ;;  %9169 = vmatpush1.bf16.msra.mxu1 %v8320_v60  ;;  %v8390_v25 = vld [vmem:[#allocation6 + $0x1bc0] sm:$0xff]  ;;  %v8392_v60 = vld [vmem:[#allocation6 + $0x1bd0] sm:$0xff] }
 0x967   :  { %8842 = vmatprep.subr.bf16.mxu0 %v8327_v42  ;;  %9170 = vmatprep.subr.bf16.mxu1 %v8329_v31  ;;  %v8399_v42 = vld [vmem:[#allocation6 + $0x1c08] sm:$0xff]  ;;  %v8401_v31 = vld [vmem:[#allocation6 + $0x1c18] sm:$0xff] }
 0x96a   :  { %8843 = vmatpush1.bf16.msra.mxu0 %v8326_v46  ;;  %9171 = vmatpush1.bf16.msra.mxu1 %v8328_v50  ;;  %v14959_v46 = vpack.c.bf16 %v7430_v62, %v7430_v62  ;;  %v8398_v50 = vld [vmem:[#allocation6 + $0x1c00] sm:$0xff]  ;;  %v8408_v62 = vld [vmem:[#allocation6 + $0x1c50] sm:$0xff] }
 0x96b   :  { %8844 = vmatprep.subr.bf16.mxu0 %v8335_v17  ;;  %9172 = vmatprep.subr.bf16.mxu1 %v8337_v11  ;;  %v8400_v17 = vld [vmem:[#allocation6 + $0x1c10] sm:$0xff]  ;;  %v8407_v11 = vld [vmem:[#allocation6 + $0x1c48] sm:$0xff] }
 0x96e   :  { %8845 = vmatpush1.bf16.msra.mxu0 %v8334_v16  ;;  %9173 = vmatpush1.bf16.msra.mxu1 %v8336_v6  ;;  %v8409_v16 = vld [vmem:[#allocation6 + $0x1c58] sm:$0xff]  ;;  %v14964_v6 = vpack.c.bf16 %v7433_v14, %v7433_v14  ;;  %v8416_v14 = vld [vmem:[#allocation6 + $0x1c90] sm:$0xff] }
 0x96f   :  { %8846 = vmatprep.subr.bf16.mxu0 %v8343_v57  ;;  %9174 = vmatprep.subr.bf16.mxu1 %v8345_v9  ;;  %v8415_v57 = vld [vmem:[#allocation6 + $0x1c88] sm:$0xff]  ;;  %v8417_v9 = vld [vmem:[#allocation6 + $0x1c98] sm:$0xff] }
 0x972   :  { %8847 = vmatpush1.bf16.msra.mxu0 %v8342_v4  ;;  %9175 = vmatpush1.bf16.msra.mxu1 %v8344_v54  ;;  %v8423_v4 = vld [vmem:[#allocation6 + $0x1cc8] sm:$0xff]  ;;  %v8425_v54 = vld [vmem:[#allocation6 + $0x1cd8] sm:$0xff] }
 0x973   :  { %8848 = vmatprep.subr.bf16.mxu0 %v8351_v39  ;;  %9176 = vmatprep.subr.bf16.mxu1 %v8353_v58  ;;  %v8422_v39 = vld [vmem:[#allocation6 + $0x1cc0] sm:$0xff]  ;;  %v8424_v58 = vld [vmem:[#allocation6 + $0x1cd0] sm:$0xff] }
 0x976   :  { %8849 = vmatpush1.bf16.msra.mxu0 %v8350_v5  ;;  %9177 = vmatpush1.bf16.msra.mxu1 %v8352_v24  ;;  %v8431_v5 = vld [vmem:[#allocation6 + $0x1d08] sm:$0xff]  ;;  %v8433_v24 = vld [vmem:[#allocation6 + $0x1d18] sm:$0xff] }
 0x977   :  { %8850 = vmatprep.subr.bf16.mxu0 %v8359_v47  ;;  %9178 = vmatprep.subr.bf16.mxu1 %v8361_v45  ;;  %v8430_v47 = vld [vmem:[#allocation6 + $0x1d00] sm:$0xff]  ;;  %v8432_v45 = vld [vmem:[#allocation6 + $0x1d10] sm:$0xff] }
 0x97a   :  { %8851 = vmatpush1.bf16.msra.mxu0 %v8358_v13  ;;  %9179 = vmatpush1.bf16.msra.mxu1 %v8360_v2  ;;  %v8439_v13 = vld [vmem:[#allocation6 + $0x1d48] sm:$0xff]  ;;  %v8441_v2 = vld [vmem:[#allocation6 + $0x1d58] sm:$0xff] }
 0x97b   :  { %8852 = vmatprep.subr.bf16.mxu0 %v8367_v10  ;;  %9180 = vmatprep.subr.bf16.mxu1 %v8369_v23  ;;  %v8438_v10 = vld [vmem:[#allocation6 + $0x1d40] sm:$0xff]  ;;  %v8440_v23 = vld [vmem:[#allocation6 + $0x1d50] sm:$0xff] }
 0x97e   :  { %8853 = vmatpush1.bf16.msra.mxu0 %v8366_v15  ;;  %9181 = vmatpush1.bf16.msra.mxu1 %v8368_v56  ;;  %v8447_v15 = vld [vmem:[#allocation6 + $0x1d88] sm:$0xff]  ;;  %v8449_v56 = vld [vmem:[#allocation6 + $0x1d98] sm:$0xff] }
 0x97f   :  { %8854 = vmatprep.subr.bf16.mxu0 %v8375_v22  ;;  %9182 = vmatprep.subr.bf16.mxu1 %v8377_v43  ;;  %v8446_v22 = vld [vmem:[#allocation6 + $0x1d80] sm:$0xff]  ;;  %v8448_v43 = vld [vmem:[#allocation6 + $0x1d90] sm:$0xff] }
 0x982   :  { %8855 = vmatpush1.bf16.msra.mxu0 %v8374_v59  ;;  %9183 = vmatpush1.bf16.msra.mxu1 %v8376_v34  ;;  %v8455_v59 = vld [vmem:[#allocation6 + $0x1dc8] sm:$0xff]  ;;  %v8457_v34 = vld [vmem:[#allocation6 + $0x1dd8] sm:$0xff] }
 0x983   :  { %8856 = vmatprep.subr.bf16.mxu0 %v8383_v8  ;;  %9184 = vmatprep.subr.bf16.mxu1 %v8385_v40  ;;  %v8454_v8 = vld [vmem:[#allocation6 + $0x1dc0] sm:$0xff]  ;;  %v8456_v40 = vld [vmem:[#allocation6 + $0x1dd0] sm:$0xff] }
 0x986   :  { %8857 = vmatpush1.bf16.msra.mxu0 %v8382_v19  ;;  %9185 = vmatpush1.bf16.msra.mxu1 %v8384_v52  ;;  %v8463_v19 = vld [vmem:[#allocation6 + $0x1e08] sm:$0xff]  ;;  %v8465_v52 = vld [vmem:[#allocation6 + $0x1e18] sm:$0xff] }
 0x987   :  { %8858 = vmatprep.subr.bf16.mxu0 %v8391_v12  ;;  %9186 = vmatprep.subr.bf16.mxu1 %v8393_v20  ;;  %v8462_v12 = vld [vmem:[#allocation6 + $0x1e00] sm:$0xff]  ;;  %v8464_v20 = vld [vmem:[#allocation6 + $0x1e10] sm:$0xff] }
 0x98a   :  { %8859 = vmatpush1.bf16.msra.mxu0 %v8390_v25  ;;  %9187 = vmatpush1.bf16.msra.mxu1 %v8392_v60  ;;  %v8471_v25 = vld [vmem:[#allocation6 + $0x1e48] sm:$0xff]  ;;  %v8473_v60 = vld [vmem:[#allocation6 + $0x1e58] sm:$0xff] }
 0x98b   :  { %8869 = vmatprep.subr.bf16.mxu0 %v8399_v42  ;;  %9197 = vmatprep.subr.bf16.mxu1 %v8401_v31  ;;  %v8470_v42 = vld [vmem:[#allocation6 + $0x1e40] sm:$0xff]  ;;  %v8472_v31 = vld [vmem:[#allocation6 + $0x1e50] sm:$0xff] }
 0x98d   :  { %8861 = vmatmul.mubr.bf16.vlgmr.msra.gmra.mrb[72].mxu0 %v14959_v46  ;;  %9189 = vmatmul.mubr.bf16.vlgmr.msra.gmra.mrb[40].mxu1 %v14959_v46 }
 0x98e   :  { %8870 = vmatpush1.bf16.msra.mxu0 %v8398_v50  ;;  %9198 = vmatpush1.bf16.msra.mxu1 %v8400_v17  ;;  %v8479_v50 = vld [vmem:[#allocation6 + $0x1e88] sm:$0xff]  ;;  %v8481_v17 = vld [vmem:[#allocation6 + $0x1e98] sm:$0xff] }
 0x98f   :  { %8871 = vmatprep.subr.bf16.mxu0 %v8407_v11  ;;  %9199 = vmatprep.subr.bf16.mxu1 %v8409_v16  ;;  %v8478_v11 = vld [vmem:[#allocation6 + $0x1e80] sm:$0xff]  ;;  %v8480_v16 = vld [vmem:[#allocation6 + $0x1e90] sm:$0xff] }
 0x990   :  { %8901 = vmatprep.mubr.bf16.mxu0 %v14964_v6  ;;  %9229 = vmatprep.mubr.bf16.mxu1 %v14964_v6 }
 0x992   :  { %8872 = vmatpush1.bf16.msra.mxu0 %v8406_v21  ;;  %9200 = vmatpush1.bf16.msra.mxu1 %v8408_v62  ;;  %v8487_v21 = vld [vmem:[#allocation6 + $0x1ec8] sm:$0xff]  ;;  %v8489_v62 = vld [vmem:[#allocation6 + $0x1ed8] sm:$0xff] }
 0x993   :  { %8873 = vmatprep.subr.bf16.mxu0 %v8415_v57  ;;  %9201 = vmatprep.subr.bf16.mxu1 %v8417_v9  ;;  %v8486_v57 = vld [vmem:[#allocation6 + $0x1ec0] sm:$0xff]  ;;  %v8488_v9 = vld [vmem:[#allocation6 + $0x1ed0] sm:$0xff] }
 0x996   :  { %8874 = vmatpush1.bf16.msra.mxu0 %v8414_v7  ;;  %9202 = vmatpush1.bf16.msra.mxu1 %v8416_v14  ;;  %v8495_v7 = vld [vmem:[#allocation6 + $0x1f08] sm:$0xff]  ;;  %v8497_v14 = vld [vmem:[#allocation6 + $0x1f18] sm:$0xff] }
 0x997   :  { %8875 = vmatprep.subr.bf16.mxu0 %v8423_v4  ;;  %9203 = vmatprep.subr.bf16.mxu1 %v8425_v54  ;;  %v8494_v4 = vld [vmem:[#allocation6 + $0x1f00] sm:$0xff]  ;;  %v8496_v54 = vld [vmem:[#allocation6 + $0x1f10] sm:$0xff] }
 0x99a   :  { %8876 = vmatpush1.bf16.msra.mxu0 %v8422_v39  ;;  %9204 = vmatpush1.bf16.msra.mxu1 %v8424_v58  ;;  %v8503_v39 = vld [vmem:[#allocation6 + $0x1f48] sm:$0xff]  ;;  %v8505_v58 = vld [vmem:[#allocation6 + $0x1f58] sm:$0xff] }
 0x99b   :  { %8877 = vmatprep.subr.bf16.mxu0 %v8431_v5  ;;  %9205 = vmatprep.subr.bf16.mxu1 %v8433_v24  ;;  %v8502_v5 = vld [vmem:[#allocation6 + $0x1f40] sm:$0xff]  ;;  %v8504_v24 = vld [vmem:[#allocation6 + $0x1f50] sm:$0xff] }
 0x99e   :  { %8878 = vmatpush1.bf16.msra.mxu0 %v8430_v47  ;;  %9206 = vmatpush1.bf16.msra.mxu1 %v8432_v45  ;;  %v8511_v47 = vld [vmem:[#allocation6 + $0x1f88] sm:$0xff]  ;;  %v8513_v45 = vld [vmem:[#allocation6 + $0x1f98] sm:$0xff] }
 0x99f   :  { %8879 = vmatprep.subr.bf16.mxu0 %v8439_v13  ;;  %9207 = vmatprep.subr.bf16.mxu1 %v8441_v2  ;;  %v8510_v13 = vld [vmem:[#allocation6 + $0x1f80] sm:$0xff]  ;;  %v8512_v2 = vld [vmem:[#allocation6 + $0x1f90] sm:$0xff] }
 0x9a2   :  { %8880 = vmatpush1.bf16.msra.mxu0 %v8438_v10  ;;  %9208 = vmatpush1.bf16.msra.mxu1 %v8440_v23  ;;  %v8519_v10 = vld [vmem:[#allocation6 + $0x1fc8] sm:$0xff]  ;;  %v8521_v23 = vld [vmem:[#allocation6 + $0x1fd8] sm:$0xff] }
 0x9a3   :  { %8881 = vmatprep.subr.bf16.mxu0 %v8447_v15  ;;  %9209 = vmatprep.subr.bf16.mxu1 %v8449_v56  ;;  %v8518_v15 = vld [vmem:[#allocation6 + $0x1fc0] sm:$0xff]  ;;  %v8520_v56 = vld [vmem:[#allocation6 + $0x1fd0] sm:$0xff] }
 0x9a6   :  { %8882 = vmatpush1.bf16.msra.mxu0 %v8446_v22  ;;  %9210 = vmatpush1.bf16.msra.mxu1 %v8448_v43  ;;  %v7507_v22 = vld [vmem:[#allocation6 + $0x28] sm:$0xff]  ;;  %v7509_v43 = vld [vmem:[#allocation6 + $0x38] sm:$0xff] }
 0x9a7   :  { %8883 = vmatprep.subr.bf16.mxu0 %v8455_v59  ;;  %9211 = vmatprep.subr.bf16.mxu1 %v8457_v34  ;;  %v14973_v59 = vpack.c.bf16 %v7432_v63, %v7432_v63  ;;  %v7506_v34 = vld [vmem:[#allocation6 + $0x20] sm:$0xff]  ;;  %v7523_v63 = vld [vmem:[#allocation6 + $0xa8] sm:$0xff] }
 0x9aa   :  { %8884 = vmatpush1.bf16.msra.mxu0 %v8454_v8  ;;  %9212 = vmatpush1.bf16.msra.mxu1 %v8456_v40  ;;  %v7508_v8 = vld [vmem:[#allocation6 + $0x30] sm:$0xff]  ;;  %v7515_v40 = vld [vmem:[#allocation6 + $0x68] sm:$0xff] }
 0x9ab   :  { %8885 = vmatprep.subr.bf16.mxu0 %v8463_v19  ;;  %9213 = vmatprep.subr.bf16.mxu1 %v8465_v52  ;;  %v7517_v19 = vld [vmem:[#allocation6 + $0x78] sm:$0xff]  ;;  %v7516_v52 = vld [vmem:[#allocation6 + $0x70] sm:$0xff] }
 0x9ae   :  { %8886 = vmatpush1.bf16.msra.mxu0 %v8462_v12  ;;  %9214 = vmatpush1.bf16.msra.mxu1 %v8464_v20  ;;  %v7525_v12 = vld [vmem:[#allocation6 + $0xb8] sm:$0xff]  ;;  %v7522_v20 = vld [vmem:[#allocation6 + $0xa0] sm:$0xff] }
 0x9af   :  { %8887 = vmatprep.subr.bf16.mxu0 %v8471_v25  ;;  %9215 = vmatprep.subr.bf16.mxu1 %v8473_v60  ;;  %v7524_v25 = vld [vmem:[#allocation6 + $0xb0] sm:$0xff]  ;;  %v7531_v60 = vld [vmem:[#allocation6 + $0xe8] sm:$0xff] }
 0x9b2   :  { %8888 = vmatpush1.bf16.msra.mxu0 %v8470_v42  ;;  %9216 = vmatpush1.bf16.msra.mxu1 %v8472_v31  ;;  %v7533_v42 = vld [vmem:[#allocation6 + $0xf8] sm:$0xff]  ;;  %v7530_v31 = vld [vmem:[#allocation6 + $0xe0] sm:$0xff] }
 0x9b3   :  { %8889 = vmatprep.subr.bf16.mxu0 %v8479_v50  ;;  %9217 = vmatprep.subr.bf16.mxu1 %v8481_v17  ;;  %v7532_v50 = vld [vmem:[#allocation6 + $0xf0] sm:$0xff]  ;;  %v7539_v17 = vld [vmem:[#allocation6 + $0x128] sm:$0xff] }
 0x9b6   :  { %8890 = vmatpush1.bf16.msra.mxu0 %v8478_v11  ;;  %9218 = vmatpush1.bf16.msra.mxu1 %v8480_v16  ;;  %v7541_v11 = vld [vmem:[#allocation6 + $0x138] sm:$0xff]  ;;  %v7540_v16 = vld [vmem:[#allocation6 + $0x130] sm:$0xff] }
 0x9b7   :  { %8891 = vmatprep.subr.bf16.mxu0 %v8487_v21  ;;  %9219 = vmatprep.subr.bf16.mxu1 %v8489_v62  ;;  %v7547_v21 = vld [vmem:[#allocation6 + $0x168] sm:$0xff]  ;;  %v7549_v62 = vld [vmem:[#allocation6 + $0x178] sm:$0xff] }
 0x9ba   :  { %8892 = vmatpush1.bf16.msra.mxu0 %v8486_v57  ;;  %9220 = vmatpush1.bf16.msra.mxu1 %v8488_v9  ;;  %v7546_v57 = vld [vmem:[#allocation6 + $0x160] sm:$0xff]  ;;  %v7548_v9 = vld [vmem:[#allocation6 + $0x170] sm:$0xff] }
 0x9bb   :  { %8893 = vmatprep.subr.bf16.mxu0 %v8495_v7  ;;  %9221 = vmatprep.subr.bf16.mxu1 %v8497_v14  ;;  %v7555_v7 = vld [vmem:[#allocation6 + $0x1a8] sm:$0xff]  ;;  %v7557_v14 = vld [vmem:[#allocation6 + $0x1b8] sm:$0xff] }
 0x9be   :  { %8894 = vmatpush1.bf16.msra.mxu0 %v8494_v4  ;;  %9222 = vmatpush1.bf16.msra.mxu1 %v8496_v54  ;;  %v7554_v4 = vld [vmem:[#allocation6 + $0x1a0] sm:$0xff]  ;;  %v7556_v54 = vld [vmem:[#allocation6 + $0x1b0] sm:$0xff] }
 0x9bf   :  { %8895 = vmatprep.subr.bf16.mxu0 %v8503_v39  ;;  %9223 = vmatprep.subr.bf16.mxu1 %v8505_v58  ;;  %v7563_v39 = vld [vmem:[#allocation6 + $0x1e8] sm:$0xff]  ;;  %v7565_v58 = vld [vmem:[#allocation6 + $0x1f8] sm:$0xff] }
 0x9c2   :  { %8896 = vmatpush1.bf16.msra.mxu0 %v8502_v5  ;;  %9224 = vmatpush1.bf16.msra.mxu1 %v8504_v24  ;;  %v7562_v5 = vld [vmem:[#allocation6 + $0x1e0] sm:$0xff]  ;;  %v7564_v24 = vld [vmem:[#allocation6 + $0x1f0] sm:$0xff] }
 0x9c3   :  { %8897 = vmatprep.subr.bf16.mxu0 %v8511_v47  ;;  %9225 = vmatprep.subr.bf16.mxu1 %v8513_v45  ;;  %v7571_v47 = vld [vmem:[#allocation6 + $0x228] sm:$0xff]  ;;  %v7573_v45 = vld [vmem:[#allocation6 + $0x238] sm:$0xff] }
 0x9c6   :  { %8898 = vmatpush1.bf16.msra.mxu0 %v8510_v13  ;;  %9226 = vmatpush1.bf16.msra.mxu1 %v8512_v2  ;;  %v7570_v13 = vld [vmem:[#allocation6 + $0x220] sm:$0xff]  ;;  %v7572_v2 = vld [vmem:[#allocation6 + $0x230] sm:$0xff] }
 0x9c7   :  { %8899 = vmatprep.subr.bf16.mxu0 %v8519_v10  ;;  %9227 = vmatprep.subr.bf16.mxu1 %v8521_v23  ;;  %v7579_v10 = vld [vmem:[#allocation6 + $0x268] sm:$0xff]  ;;  %v7581_v23 = vld [vmem:[#allocation6 + $0x278] sm:$0xff] }
 0x9ca   :  { %8900 = vmatpush1.bf16.msra.mxu0 %v8518_v15  ;;  %9228 = vmatpush1.bf16.msra.mxu1 %v8520_v56  ;;  %v7578_v15 = vld [vmem:[#allocation6 + $0x260] sm:$0xff]  ;;  %v7580_v56 = vld [vmem:[#allocation6 + $0x270] sm:$0xff] }
 0x9cb   :  { %9238 = vmatprep.subr.bf16.mxu0 %v7507_v22  ;;  %9566 = vmatprep.subr.bf16.mxu1 %v7509_v43  ;;  %v7587_v22 = vld [vmem:[#allocation6 + $0x2a8] sm:$0xff]  ;;  %v7589_v43 = vld [vmem:[#allocation6 + $0x2b8] sm:$0xff] }
 0x9cd   :  { %8902 = vmatmul.mubr.bf16.vlgmr.msra.gmra.mrb[72].mxu0 %v14973_v59  ;;  %9230 = vmatmul.mubr.bf16.vlgmr.msra.gmra.mrb[40].mxu1 %v14973_v59 }
 0x9ce   :  { %9239 = vmatpush1.bf16.msra.mxu0 %v7506_v34  ;;  %9567 = vmatpush1.bf16.msra.mxu1 %v7508_v8  ;;  %v7586_v34 = vld [vmem:[#allocation6 + $0x2a0] sm:$0xff]  ;;  %v7588_v8 = vld [vmem:[#allocation6 + $0x2b0] sm:$0xff] }
 0x9cf   :  { %9240 = vmatprep.subr.bf16.mxu0 %v7515_v40  ;;  %9568 = vmatprep.subr.bf16.mxu1 %v7517_v19  ;;  %v7595_v40 = vld [vmem:[#allocation6 + $0x2e8] sm:$0xff]  ;;  %v7597_v19 = vld [vmem:[#allocation6 + $0x2f8] sm:$0xff] }
 0x9d0   :  { %9270 = vmatprep.mubr.bf16.mxu0 %v14868_v18  ;;  %9598 = vmatprep.mubr.bf16.mxu1 %v14868_v18  ;;  %v7538_v18 = vld [vmem:[#allocation6 + $0x120] sm:$0xff] }
 0x9d2   :  { %9241 = vmatpush1.bf16.msra.mxu0 %v7514_v28  ;;  %9569 = vmatpush1.bf16.msra.mxu1 %v7516_v52  ;;  %v7594_v28 = vld [vmem:[#allocation6 + $0x2e0] sm:$0xff]  ;;  %v7596_v52 = vld [vmem:[#allocation6 + $0x2f0] sm:$0xff] }
 0x9d3   :  { %9242 = vmatprep.subr.bf16.mxu0 %v7523_v63  ;;  %9570 = vmatprep.subr.bf16.mxu1 %v7525_v12  ;;  %v7603_v63 = vld [vmem:[#allocation6 + $0x328] sm:$0xff]  ;;  %v7605_v12 = vld [vmem:[#allocation6 + $0x338] sm:$0xff] }
 0x9d6   :  { %9243 = vmatpush1.bf16.msra.mxu0 %v7522_v20  ;;  %9571 = vmatpush1.bf16.msra.mxu1 %v7524_v25  ;;  %v7602_v20 = vld [vmem:[#allocation6 + $0x320] sm:$0xff]  ;;  %v7604_v25 = vld [vmem:[#allocation6 + $0x330] sm:$0xff] }
 0x9d7   :  { %9244 = vmatprep.subr.bf16.mxu0 %v7531_v60  ;;  %9572 = vmatprep.subr.bf16.mxu1 %v7533_v42  ;;  %v7611_v60 = vld [vmem:[#allocation6 + $0x368] sm:$0xff]  ;;  %v7613_v42 = vld [vmem:[#allocation6 + $0x378] sm:$0xff] }
 0x9da   :  { %9245 = vmatpush1.bf16.msra.mxu0 %v7530_v31  ;;  %9573 = vmatpush1.bf16.msra.mxu1 %v7532_v50  ;;  %v7610_v31 = vld [vmem:[#allocation6 + $0x360] sm:$0xff]  ;;  %v7612_v50 = vld [vmem:[#allocation6 + $0x370] sm:$0xff] }
 0x9db   :  { %9246 = vmatprep.subr.bf16.mxu0 %v7539_v17  ;;  %9574 = vmatprep.subr.bf16.mxu1 %v7541_v11  ;;  %v7619_v17 = vld [vmem:[#allocation6 + $0x3a8] sm:$0xff]  ;;  %v7621_v11 = vld [vmem:[#allocation6 + $0x3b8] sm:$0xff] }
 0x9de   :  { %9247 = vmatpush1.bf16.msra.mxu0 %v7538_v18  ;;  %9575 = vmatpush1.bf16.msra.mxu1 %v7540_v16  ;;  %v7618_v18 = vld [vmem:[#allocation6 + $0x3a0] sm:$0xff]  ;;  %v7620_v16 = vld [vmem:[#allocation6 + $0x3b0] sm:$0xff] }
 0x9df   :  { %9248 = vmatprep.subr.bf16.mxu0 %v7547_v21  ;;  %9576 = vmatprep.subr.bf16.mxu1 %v7549_v62  ;;  %v7627_v21 = vld [vmem:[#allocation6 + $0x3e8] sm:$0xff]  ;;  %v7629_v62 = vld [vmem:[#allocation6 + $0x3f8] sm:$0xff] }
 0x9e2   :  { %9249 = vmatpush1.bf16.msra.mxu0 %v7546_v57  ;;  %9577 = vmatpush1.bf16.msra.mxu1 %v7548_v9  ;;  %v7626_v57 = vld [vmem:[#allocation6 + $0x3e0] sm:$0xff]  ;;  %v7628_v9 = vld [vmem:[#allocation6 + $0x3f0] sm:$0xff] }
 0x9e3   :  { %9250 = vmatprep.subr.bf16.mxu0 %v7555_v7  ;;  %9578 = vmatprep.subr.bf16.mxu1 %v7557_v14  ;;  %v7635_v7 = vld [vmem:[#allocation6 + $0x428] sm:$0xff]  ;;  %v7637_v14 = vld [vmem:[#allocation6 + $0x438] sm:$0xff] }
 0x9e6   :  { %9251 = vmatpush1.bf16.msra.mxu0 %v7554_v4  ;;  %9579 = vmatpush1.bf16.msra.mxu1 %v7556_v54  ;;  %v7634_v4 = vld [vmem:[#allocation6 + $0x420] sm:$0xff]  ;;  %v7636_v54 = vld [vmem:[#allocation6 + $0x430] sm:$0xff] }
 0x9e7   :  { %9252 = vmatprep.subr.bf16.mxu0 %v7563_v39  ;;  %9580 = vmatprep.subr.bf16.mxu1 %v7565_v58  ;;  %v7643_v39 = vld [vmem:[#allocation6 + $0x468] sm:$0xff]  ;;  %v7645_v58 = vld [vmem:[#allocation6 + $0x478] sm:$0xff] }
 0x9ea   :  { %9253 = vmatpush1.bf16.msra.mxu0 %v7562_v5  ;;  %9581 = vmatpush1.bf16.msra.mxu1 %v7564_v24  ;;  %v7642_v5 = vld [vmem:[#allocation6 + $0x460] sm:$0xff]  ;;  %v7644_v24 = vld [vmem:[#allocation6 + $0x470] sm:$0xff] }
 0x9eb   :  { %9254 = vmatprep.subr.bf16.mxu0 %v7571_v47  ;;  %9582 = vmatprep.subr.bf16.mxu1 %v7573_v45  ;;  %v7651_v47 = vld [vmem:[#allocation6 + $0x4a8] sm:$0xff]  ;;  %v7653_v45 = vld [vmem:[#allocation6 + $0x4b8] sm:$0xff] }
 0x9ee   :  { %9255 = vmatpush1.bf16.msra.mxu0 %v7570_v13  ;;  %9583 = vmatpush1.bf16.msra.mxu1 %v7572_v2  ;;  %v7650_v13 = vld [vmem:[#allocation6 + $0x4a0] sm:$0xff]  ;;  %v7652_v2 = vld [vmem:[#allocation6 + $0x4b0] sm:$0xff] }
 0x9ef   :  { %9256 = vmatprep.subr.bf16.mxu0 %v7579_v10  ;;  %9584 = vmatprep.subr.bf16.mxu1 %v7581_v23  ;;  %v7659_v10 = vld [vmem:[#allocation6 + $0x4e8] sm:$0xff]  ;;  %v7658_v23 = vld [vmem:[#allocation6 + $0x4e0] sm:$0xff] }
 0x9f2   :  { %9257 = vmatpush1.bf16.msra.mxu0 %v7578_v15  ;;  %9585 = vmatpush1.bf16.msra.mxu1 %v7580_v56  ;;  %v7660_v15 = vld [vmem:[#allocation6 + $0x4f0] sm:$0xff]  ;;  %v7667_v56 = vld [vmem:[#allocation6 + $0x528] sm:$0xff] }
 0x9f3   :  { %9258 = vmatprep.subr.bf16.mxu0 %v7587_v22  ;;  %9586 = vmatprep.subr.bf16.mxu1 %v7589_v43  ;;  %v7669_v22 = vld [vmem:[#allocation6 + $0x538] sm:$0xff]  ;;  %v7668_v43 = vld [vmem:[#allocation6 + $0x530] sm:$0xff] }
 0x9f6   :  { %9259 = vmatpush1.bf16.msra.mxu0 %v7586_v34  ;;  %9587 = vmatpush1.bf16.msra.mxu1 %v7588_v8  ;;  %v7675_v34 = vld [vmem:[#allocation6 + $0x568] sm:$0xff]  ;;  %v7677_v8 = vld [vmem:[#allocation6 + $0x578] sm:$0xff] }
 0x9f7   :  { %9260 = vmatprep.subr.bf16.mxu0 %v7595_v40  ;;  %9588 = vmatprep.subr.bf16.mxu1 %v7597_v19  ;;  %v7674_v40 = vld [vmem:[#allocation6 + $0x560] sm:$0xff]  ;;  %v7676_v19 = vld [vmem:[#allocation6 + $0x570] sm:$0xff] }
 0x9fa   :  { %9261 = vmatpush1.bf16.msra.mxu0 %v7594_v28  ;;  %9589 = vmatpush1.bf16.msra.mxu1 %v7596_v52  ;;  %v7683_v28 = vld [vmem:[#allocation6 + $0x5a8] sm:$0xff]  ;;  %v7685_v52 = vld [vmem:[#allocation6 + $0x5b8] sm:$0xff] }
 0x9fb   :  { %9262 = vmatprep.subr.bf16.mxu0 %v7603_v63  ;;  %9590 = vmatprep.subr.bf16.mxu1 %v7605_v12  ;;  %v7682_v63 = vld [vmem:[#allocation6 + $0x5a0] sm:$0xff]  ;;  %v7684_v12 = vld [vmem:[#allocation6 + $0x5b0] sm:$0xff] }
 0x9fe   :  { %9263 = vmatpush1.bf16.msra.mxu0 %v7602_v20  ;;  %9591 = vmatpush1.bf16.msra.mxu1 %v7604_v25  ;;  %v7691_v20 = vld [vmem:[#allocation6 + $0x5e8] sm:$0xff]  ;;  %v7693_v25 = vld [vmem:[#allocation6 + $0x5f8] sm:$0xff] }
 0x9ff   :  { %9264 = vmatprep.subr.bf16.mxu0 %v7611_v60  ;;  %9592 = vmatprep.subr.bf16.mxu1 %v7613_v42  ;;  %v7690_v60 = vld [vmem:[#allocation6 + $0x5e0] sm:$0xff]  ;;  %v7692_v42 = vld [vmem:[#allocation6 + $0x5f0] sm:$0xff] }
 0xa02   :  { %9265 = vmatpush1.bf16.msra.mxu0 %v7610_v31  ;;  %9593 = vmatpush1.bf16.msra.mxu1 %v7612_v50  ;;  %v7699_v31 = vld [vmem:[#allocation6 + $0x628] sm:$0xff]  ;;  %v7701_v50 = vld [vmem:[#allocation6 + $0x638] sm:$0xff] }
 0xa03   :  { %9266 = vmatprep.subr.bf16.mxu0 %v7619_v17  ;;  %9594 = vmatprep.subr.bf16.mxu1 %v7621_v11  ;;  %v7698_v17 = vld [vmem:[#allocation6 + $0x620] sm:$0xff]  ;;  %v7700_v11 = vld [vmem:[#allocation6 + $0x630] sm:$0xff] }
 0xa06   :  { %9267 = vmatpush1.bf16.msra.mxu0 %v7618_v18  ;;  %9595 = vmatpush1.bf16.msra.mxu1 %v7620_v16  ;;  %v7707_v18 = vld [vmem:[#allocation6 + $0x668] sm:$0xff]  ;;  %v7709_v16 = vld [vmem:[#allocation6 + $0x678] sm:$0xff] }
 0xa07   :  { %9268 = vmatprep.subr.bf16.mxu0 %v7627_v21  ;;  %9596 = vmatprep.subr.bf16.mxu1 %v7629_v62  ;;  %v7706_v21 = vld [vmem:[#allocation6 + $0x660] sm:$0xff]  ;;  %v7708_v62 = vld [vmem:[#allocation6 + $0x670] sm:$0xff] }
 0xa0a   :  { %9269 = vmatpush1.bf16.msra.mxu0 %v7626_v57  ;;  %9597 = vmatpush1.bf16.msra.mxu1 %v7628_v9  ;;  %v7715_v57 = vld [vmem:[#allocation6 + $0x6a8] sm:$0xff]  ;;  %v7717_v9 = vld [vmem:[#allocation6 + $0x6b8] sm:$0xff] }
 0xa0b   :  { %9279 = vmatprep.subr.bf16.mxu0 %v7635_v7  ;;  %9607 = vmatprep.subr.bf16.mxu1 %v7637_v14  ;;  %v7714_v7 = vld [vmem:[#allocation6 + $0x6a0] sm:$0xff]  ;;  %v7716_v14 = vld [vmem:[#allocation6 + $0x6b0] sm:$0xff] }
 0xa0d   :  { %9271 = vmatmul.mubr.bf16.vlgmr.msra.gmra.mrb[76].mxu0 %v14875_v36  ;;  %9599 = vmatmul.mubr.bf16.vlgmr.msra.gmra.mrb[44].mxu1 %v14875_v36  ;;  %v7661_v36 = vld [vmem:[#allocation6 + $0x4f8] sm:$0xff] }
 0xa0e   :  { %9280 = vmatpush1.bf16.msra.mxu0 %v7634_v4  ;;  %9608 = vmatpush1.bf16.msra.mxu1 %v7636_v54  ;;  %v7723_v4 = vld [vmem:[#allocation6 + $0x6e8] sm:$0xff]  ;;  %v7725_v54 = vld [vmem:[#allocation6 + $0x6f8] sm:$0xff] }
 0xa0f   :  { %9281 = vmatprep.subr.bf16.mxu0 %v7643_v39  ;;  %9609 = vmatprep.subr.bf16.mxu1 %v7645_v58  ;;  %v7722_v39 = vld [vmem:[#allocation6 + $0x6e0] sm:$0xff]  ;;  %v7724_v58 = vld [vmem:[#allocation6 + $0x6f0] sm:$0xff] }
 0xa10   :  { %9311 = vmatprep.mubr.bf16.mxu0 %v14880_v30  ;;  %9639 = vmatprep.mubr.bf16.mxu1 %v14880_v30  ;;  %v7666_v30 = vld [vmem:[#allocation6 + $0x520] sm:$0xff] }
 0xa12   :  { %9282 = vmatpush1.bf16.msra.mxu0 %v7642_v5  ;;  %9610 = vmatpush1.bf16.msra.mxu1 %v7644_v24  ;;  %v7731_v5 = vld [vmem:[#allocation6 + $0x728] sm:$0xff]  ;;  %v7733_v24 = vld [vmem:[#allocation6 + $0x738] sm:$0xff] }
 0xa13   :  { %9283 = vmatprep.subr.bf16.mxu0 %v7651_v47  ;;  %9611 = vmatprep.subr.bf16.mxu1 %v7653_v45  ;;  %v7730_v47 = vld [vmem:[#allocation6 + $0x720] sm:$0xff]  ;;  %v7732_v45 = vld [vmem:[#allocation6 + $0x730] sm:$0xff] }
 0xa16   :  { %9284 = vmatpush1.bf16.msra.mxu0 %v7650_v13  ;;  %9612 = vmatpush1.bf16.msra.mxu1 %v7652_v2  ;;  %v7739_v13 = vld [vmem:[#allocation6 + $0x768] sm:$0xff]  ;;  %v7741_v2 = vld [vmem:[#allocation6 + $0x778] sm:$0xff] }
 0xa17   :  { %9285 = vmatprep.subr.bf16.mxu0 %v7659_v10  ;;  %9613 = vmatprep.subr.bf16.mxu1 %v7661_v36  ;;  %v7738_v10 = vld [vmem:[#allocation6 + $0x760] sm:$0xff]  ;;  %v7740_v36 = vld [vmem:[#allocation6 + $0x770] sm:$0xff] }
 0xa1a   :  { %9286 = vmatpush1.bf16.msra.mxu0 %v7658_v23  ;;  %9614 = vmatpush1.bf16.msra.mxu1 %v7660_v15  ;;  %v7747_v23 = vld [vmem:[#allocation6 + $0x7a8] sm:$0xff]  ;;  %v7749_v15 = vld [vmem:[#allocation6 + $0x7b8] sm:$0xff] }
 0xa1b   :  { %9287 = vmatprep.subr.bf16.mxu0 %v7667_v56  ;;  %9615 = vmatprep.subr.bf16.mxu1 %v7669_v22  ;;  %v7746_v56 = vld [vmem:[#allocation6 + $0x7a0] sm:$0xff]  ;;  %v7748_v22 = vld [vmem:[#allocation6 + $0x7b0] sm:$0xff] }
 0xa1e   :  { %9288 = vmatpush1.bf16.msra.mxu0 %v7666_v30  ;;  %9616 = vmatpush1.bf16.msra.mxu1 %v7668_v43  ;;  %v7755_v30 = vld [vmem:[#allocation6 + $0x7e8] sm:$0xff]  ;;  %v7757_v43 = vld [vmem:[#allocation6 + $0x7f8] sm:$0xff] }
 0xa1f   :  { %9289 = vmatprep.subr.bf16.mxu0 %v7675_v34  ;;  %9617 = vmatprep.subr.bf16.mxu1 %v7677_v8  ;;  %v7754_v34 = vld [vmem:[#allocation6 + $0x7e0] sm:$0xff]  ;;  %v7756_v8 = vld [vmem:[#allocation6 + $0x7f0] sm:$0xff] }
 0xa22   :  { %9290 = vmatpush1.bf16.msra.mxu0 %v7674_v40  ;;  %9618 = vmatpush1.bf16.msra.mxu1 %v7676_v19  ;;  %v7763_v40 = vld [vmem:[#allocation6 + $0x828] sm:$0xff]  ;;  %v7765_v19 = vld [vmem:[#allocation6 + $0x838] sm:$0xff] }
 0xa23   :  { %9291 = vmatprep.subr.bf16.mxu0 %v7683_v28  ;;  %9619 = vmatprep.subr.bf16.mxu1 %v7685_v52  ;;  %v7762_v28 = vld [vmem:[#allocation6 + $0x820] sm:$0xff]  ;;  %v7764_v52 = vld [vmem:[#allocation6 + $0x830] sm:$0xff] }
 0xa26   :  { %9292 = vmatpush1.bf16.msra.mxu0 %v7682_v63  ;;  %9620 = vmatpush1.bf16.msra.mxu1 %v7684_v12  ;;  %v7771_v63 = vld [vmem:[#allocation6 + $0x868] sm:$0xff]  ;;  %v7773_v12 = vld [vmem:[#allocation6 + $0x878] sm:$0xff] }
 0xa27   :  { %9293 = vmatprep.subr.bf16.mxu0 %v7691_v20  ;;  %9621 = vmatprep.subr.bf16.mxu1 %v7693_v25  ;;  %v7770_v20 = vld [vmem:[#allocation6 + $0x860] sm:$0xff]  ;;  %v7772_v25 = vld [vmem:[#allocation6 + $0x870] sm:$0xff] }
 0xa2a   :  { %9294 = vmatpush1.bf16.msra.mxu0 %v7690_v60  ;;  %9622 = vmatpush1.bf16.msra.mxu1 %v7692_v42  ;;  %v7779_v60 = vld [vmem:[#allocation6 + $0x8a8] sm:$0xff]  ;;  %v7781_v42 = vld [vmem:[#allocation6 + $0x8b8] sm:$0xff] }
 0xa2b   :  { %9295 = vmatprep.subr.bf16.mxu0 %v7699_v31  ;;  %9623 = vmatprep.subr.bf16.mxu1 %v7701_v50  ;;  %v7778_v31 = vld [vmem:[#allocation6 + $0x8a0] sm:$0xff]  ;;  %v7780_v50 = vld [vmem:[#allocation6 + $0x8b0] sm:$0xff] }
 0xa2e   :  { %9296 = vmatpush1.bf16.msra.mxu0 %v7698_v17  ;;  %9624 = vmatpush1.bf16.msra.mxu1 %v7700_v11  ;;  %v7787_v17 = vld [vmem:[#allocation6 + $0x8e8] sm:$0xff]  ;;  %v7786_v11 = vld [vmem:[#allocation6 + $0x8e0] sm:$0xff] }
 0xa2f   :  { %9297 = vmatprep.subr.bf16.mxu0 %v7707_v18  ;;  %9625 = vmatprep.subr.bf16.mxu1 %v7709_v16  ;;  %v7788_v18 = vld [vmem:[#allocation6 + $0x8f0] sm:$0xff]  ;;  %v7795_v16 = vld [vmem:[#allocation6 + $0x928] sm:$0xff] }
 0xa32   :  { %9298 = vmatpush1.bf16.msra.mxu0 %v7706_v21  ;;  %9626 = vmatpush1.bf16.msra.mxu1 %v7708_v62  ;;  %v7797_v21 = vld [vmem:[#allocation6 + $0x938] sm:$0xff]  ;;  %v7796_v62 = vld [vmem:[#allocation6 + $0x930] sm:$0xff] }
 0xa33   :  { %9299 = vmatprep.subr.bf16.mxu0 %v7715_v57  ;;  %9627 = vmatprep.subr.bf16.mxu1 %v7717_v9  ;;  %v7803_v57 = vld [vmem:[#allocation6 + $0x968] sm:$0xff]  ;;  %v7805_v9 = vld [vmem:[#allocation6 + $0x978] sm:$0xff] }
 0xa36   :  { %9300 = vmatpush1.bf16.msra.mxu0 %v7714_v7  ;;  %9628 = vmatpush1.bf16.msra.mxu1 %v7716_v14  ;;  %v7802_v7 = vld [vmem:[#allocation6 + $0x960] sm:$0xff]  ;;  %v7804_v14 = vld [vmem:[#allocation6 + $0x970] sm:$0xff] }
 0xa37   :  { %9301 = vmatprep.subr.bf16.mxu0 %v7723_v4  ;;  %9629 = vmatprep.subr.bf16.mxu1 %v7725_v54  ;;  %v7811_v4 = vld [vmem:[#allocation6 + $0x9a8] sm:$0xff]  ;;  %v7813_v54 = vld [vmem:[#allocation6 + $0x9b8] sm:$0xff] }
 0xa3a   :  { %9302 = vmatpush1.bf16.msra.mxu0 %v7722_v39  ;;  %9630 = vmatpush1.bf16.msra.mxu1 %v7724_v58  ;;  %v7810_v39 = vld [vmem:[#allocation6 + $0x9a0] sm:$0xff]  ;;  %v7812_v58 = vld [vmem:[#allocation6 + $0x9b0] sm:$0xff] }
 0xa3b   :  { %9303 = vmatprep.subr.bf16.mxu0 %v7731_v5  ;;  %9631 = vmatprep.subr.bf16.mxu1 %v7733_v24  ;;  %v7819_v5 = vld [vmem:[#allocation6 + $0x9e8] sm:$0xff]  ;;  %v7821_v24 = vld [vmem:[#allocation6 + $0x9f8] sm:$0xff] }
 0xa3e   :  { %9304 = vmatpush1.bf16.msra.mxu0 %v7730_v47  ;;  %9632 = vmatpush1.bf16.msra.mxu1 %v7732_v45  ;;  %v7818_v47 = vld [vmem:[#allocation6 + $0x9e0] sm:$0xff]  ;;  %v7820_v45 = vld [vmem:[#allocation6 + $0x9f0] sm:$0xff] }
 0xa3f   :  { %9305 = vmatprep.subr.bf16.mxu0 %v7739_v13  ;;  %9633 = vmatprep.subr.bf16.mxu1 %v7741_v2  ;;  %v7827_v13 = vld [vmem:[#allocation6 + $0xa28] sm:$0xff]  ;;  %v7829_v2 = vld [vmem:[#allocation6 + $0xa38] sm:$0xff] }
 0xa42   :  { %9306 = vmatpush1.bf16.msra.mxu0 %v7738_v10  ;;  %9634 = vmatpush1.bf16.msra.mxu1 %v7740_v36  ;;  %v7826_v10 = vld [vmem:[#allocation6 + $0xa20] sm:$0xff]  ;;  %v7828_v36 = vld [vmem:[#allocation6 + $0xa30] sm:$0xff] }
 0xa43   :  { %9307 = vmatprep.subr.bf16.mxu0 %v7747_v23  ;;  %9635 = vmatprep.subr.bf16.mxu1 %v7749_v15  ;;  %v7835_v23 = vld [vmem:[#allocation6 + $0xa68] sm:$0xff]  ;;  %v7837_v15 = vld [vmem:[#allocation6 + $0xa78] sm:$0xff] }
 0xa46   :  { %9308 = vmatpush1.bf16.msra.mxu0 %v7746_v56  ;;  %9636 = vmatpush1.bf16.msra.mxu1 %v7748_v22  ;;  %v7834_v56 = vld [vmem:[#allocation6 + $0xa60] sm:$0xff]  ;;  %v7836_v22 = vld [vmem:[#allocation6 + $0xa70] sm:$0xff] }
 0xa47   :  { %9309 = vmatprep.subr.bf16.mxu0 %v7755_v30  ;;  %9637 = vmatprep.subr.bf16.mxu1 %v7757_v43  ;;  %v7843_v30 = vld [vmem:[#allocation6 + $0xaa8] sm:$0xff]  ;;  %v7845_v43 = vld [vmem:[#allocation6 + $0xab8] sm:$0xff] }
 0xa4a   :  { %9310 = vmatpush1.bf16.msra.mxu0 %v7754_v34  ;;  %9638 = vmatpush1.bf16.msra.mxu1 %v7756_v8  ;;  %v7842_v34 = vld [vmem:[#allocation6 + $0xaa0] sm:$0xff]  ;;  %v7844_v8 = vld [vmem:[#allocation6 + $0xab0] sm:$0xff] }
 0xa4b   :  { %9320 = vmatprep.subr.bf16.mxu0 %v7763_v40  ;;  %9648 = vmatprep.subr.bf16.mxu1 %v7765_v19  ;;  %v7851_v40 = vld [vmem:[#allocation6 + $0xae8] sm:$0xff]  ;;  %v7853_v19 = vld [vmem:[#allocation6 + $0xaf8] sm:$0xff] }
 0xa4d   :  { %9312 = vmatmul.mubr.bf16.vlgmr.msra.gmra.mrb[76].mxu0 %v14889_v35  ;;  %9640 = vmatmul.mubr.bf16.vlgmr.msra.gmra.mrb[44].mxu1 %v14889_v35  ;;  %v7789_v35 = vld [vmem:[#allocation6 + $0x8f8] sm:$0xff] }
 0xa4e   :  { %9321 = vmatpush1.bf16.msra.mxu0 %v7762_v28  ;;  %9649 = vmatpush1.bf16.msra.mxu1 %v7764_v52  ;;  %v7850_v28 = vld [vmem:[#allocation6 + $0xae0] sm:$0xff]  ;;  %v7852_v52 = vld [vmem:[#allocation6 + $0xaf0] sm:$0xff] }
 0xa4f   :  { %9322 = vmatprep.subr.bf16.mxu0 %v7771_v63  ;;  %9650 = vmatprep.subr.bf16.mxu1 %v7773_v12  ;;  %v7859_v63 = vld [vmem:[#allocation6 + $0xb28] sm:$0xff]  ;;  %v7861_v12 = vld [vmem:[#allocation6 + $0xb38] sm:$0xff] }
 0xa50   :  { %9352 = vmatprep.mubr.bf16.mxu0 %v14894_v26  ;;  %9680 = vmatprep.mubr.bf16.mxu1 %v14894_v26  ;;  %v7794_v26 = vld [vmem:[#allocation6 + $0x920] sm:$0xff] }
 0xa52   :  { %9323 = vmatpush1.bf16.msra.mxu0 %v7770_v20  ;;  %9651 = vmatpush1.bf16.msra.mxu1 %v7772_v25  ;;  %v7858_v20 = vld [vmem:[#allocation6 + $0xb20] sm:$0xff]  ;;  %v7860_v25 = vld [vmem:[#allocation6 + $0xb30] sm:$0xff] }
 0xa53   :  { %9324 = vmatprep.subr.bf16.mxu0 %v7779_v60  ;;  %9652 = vmatprep.subr.bf16.mxu1 %v7781_v42  ;;  %v7867_v60 = vld [vmem:[#allocation6 + $0xb68] sm:$0xff]  ;;  %v7869_v42 = vld [vmem:[#allocation6 + $0xb78] sm:$0xff] }
 0xa56   :  { %9325 = vmatpush1.bf16.msra.mxu0 %v7778_v31  ;;  %9653 = vmatpush1.bf16.msra.mxu1 %v7780_v50  ;;  %v7866_v31 = vld [vmem:[#allocation6 + $0xb60] sm:$0xff]  ;;  %v7868_v50 = vld [vmem:[#allocation6 + $0xb70] sm:$0xff] }
 0xa57   :  { %9326 = vmatprep.subr.bf16.mxu0 %v7787_v17  ;;  %9654 = vmatprep.subr.bf16.mxu1 %v7789_v35  ;;  %v7875_v17 = vld [vmem:[#allocation6 + $0xba8] sm:$0xff]  ;;  %v7877_v35 = vld [vmem:[#allocation6 + $0xbb8] sm:$0xff] }
 0xa5a   :  { %9327 = vmatpush1.bf16.msra.mxu0 %v7786_v11  ;;  %9655 = vmatpush1.bf16.msra.mxu1 %v7788_v18  ;;  %v7874_v11 = vld [vmem:[#allocation6 + $0xba0] sm:$0xff]  ;;  %v7876_v18 = vld [vmem:[#allocation6 + $0xbb0] sm:$0xff] }
 0xa5b   :  { %9328 = vmatprep.subr.bf16.mxu0 %v7795_v16  ;;  %9656 = vmatprep.subr.bf16.mxu1 %v7797_v21  ;;  %v7883_v16 = vld [vmem:[#allocation6 + $0xbe8] sm:$0xff]  ;;  %v7885_v21 = vld [vmem:[#allocation6 + $0xbf8] sm:$0xff] }
 0xa5e   :  { %9329 = vmatpush1.bf16.msra.mxu0 %v7794_v26  ;;  %9657 = vmatpush1.bf16.msra.mxu1 %v7796_v62  ;;  %v7882_v26 = vld [vmem:[#allocation6 + $0xbe0] sm:$0xff]  ;;  %v7884_v62 = vld [vmem:[#allocation6 + $0xbf0] sm:$0xff] }
 0xa5f   :  { %9330 = vmatprep.subr.bf16.mxu0 %v7803_v57  ;;  %9658 = vmatprep.subr.bf16.mxu1 %v7805_v9  ;;  %v7891_v57 = vld [vmem:[#allocation6 + $0xc28] sm:$0xff]  ;;  %v7893_v9 = vld [vmem:[#allocation6 + $0xc38] sm:$0xff] }
 0xa62   :  { %9331 = vmatpush1.bf16.msra.mxu0 %v7802_v7  ;;  %9659 = vmatpush1.bf16.msra.mxu1 %v7804_v14  ;;  %v7890_v7 = vld [vmem:[#allocation6 + $0xc20] sm:$0xff]  ;;  %v7892_v14 = vld [vmem:[#allocation6 + $0xc30] sm:$0xff] }
 0xa63   :  { %9332 = vmatprep.subr.bf16.mxu0 %v7811_v4  ;;  %9660 = vmatprep.subr.bf16.mxu1 %v7813_v54  ;;  %v7899_v4 = vld [vmem:[#allocation6 + $0xc68] sm:$0xff]  ;;  %v7901_v54 = vld [vmem:[#allocation6 + $0xc78] sm:$0xff] }
 0xa66   :  { %9333 = vmatpush1.bf16.msra.mxu0 %v7810_v39  ;;  %9661 = vmatpush1.bf16.msra.mxu1 %v7812_v58  ;;  %v7898_v39 = vld [vmem:[#allocation6 + $0xc60] sm:$0xff]  ;;  %v7900_v58 = vld [vmem:[#allocation6 + $0xc70] sm:$0xff] }
 0xa67   :  { %9334 = vmatprep.subr.bf16.mxu0 %v7819_v5  ;;  %9662 = vmatprep.subr.bf16.mxu1 %v7821_v24  ;;  %v7907_v5 = vld [vmem:[#allocation6 + $0xca8] sm:$0xff]  ;;  %v7909_v24 = vld [vmem:[#allocation6 + $0xcb8] sm:$0xff] }
 0xa6a   :  { %9335 = vmatpush1.bf16.msra.mxu0 %v7818_v47  ;;  %9663 = vmatpush1.bf16.msra.mxu1 %v7820_v45  ;;  %v7906_v47 = vld [vmem:[#allocation6 + $0xca0] sm:$0xff]  ;;  %v7908_v45 = vld [vmem:[#allocation6 + $0xcb0] sm:$0xff] }
 0xa6b   :  { %9336 = vmatprep.subr.bf16.mxu0 %v7827_v13  ;;  %9664 = vmatprep.subr.bf16.mxu1 %v7829_v2  ;;  %v7915_v13 = vld [vmem:[#allocation6 + $0xce8] sm:$0xff]  ;;  %v7914_v2 = vld [vmem:[#allocation6 + $0xce0] sm:$0xff] }
 0xa6e   :  { %9337 = vmatpush1.bf16.msra.mxu0 %v7826_v10  ;;  %9665 = vmatpush1.bf16.msra.mxu1 %v7828_v36  ;;  %v7916_v10 = vld [vmem:[#allocation6 + $0xcf0] sm:$0xff]  ;;  %v7923_v36 = vld [vmem:[#allocation6 + $0xd28] sm:$0xff] }
 0xa6f   :  { %9338 = vmatprep.subr.bf16.mxu0 %v7835_v23  ;;  %9666 = vmatprep.subr.bf16.mxu1 %v7837_v15  ;;  %v7925_v23 = vld [vmem:[#allocation6 + $0xd38] sm:$0xff]  ;;  %v7924_v15 = vld [vmem:[#allocation6 + $0xd30] sm:$0xff] }
 0xa72   :  { %9339 = vmatpush1.bf16.msra.mxu0 %v7834_v56  ;;  %9667 = vmatpush1.bf16.msra.mxu1 %v7836_v22  ;;  %v7931_v56 = vld [vmem:[#allocation6 + $0xd68] sm:$0xff]  ;;  %v7933_v22 = vld [vmem:[#allocation6 + $0xd78] sm:$0xff] }
 0xa73   :  { %9340 = vmatprep.subr.bf16.mxu0 %v7843_v30  ;;  %9668 = vmatprep.subr.bf16.mxu1 %v7845_v43  ;;  %v7930_v30 = vld [vmem:[#allocation6 + $0xd60] sm:$0xff]  ;;  %v7932_v43 = vld [vmem:[#allocation6 + $0xd70] sm:$0xff] }
 0xa76   :  { %9341 = vmatpush1.bf16.msra.mxu0 %v7842_v34  ;;  %9669 = vmatpush1.bf16.msra.mxu1 %v7844_v8 }
 0xa77   :  { %9342 = vmatprep.subr.bf16.mxu0 %v7851_v40  ;;  %9670 = vmatprep.subr.bf16.mxu1 %v7853_v19  ;;  %v7939_v40 = vld [vmem:[#allocation6 + $0xda8] sm:$0xff]  ;;  %v7941_v19 = vld [vmem:[#allocation6 + $0xdb8] sm:$0xff] }
 0xa7a   :  { %9343 = vmatpush1.bf16.msra.mxu0 %v7850_v28  ;;  %9671 = vmatpush1.bf16.msra.mxu1 %v7852_v52 }
 0xa7b   :  { %9344 = vmatprep.subr.bf16.mxu0 %v7859_v63  ;;  %9672 = vmatprep.subr.bf16.mxu1 %v7861_v12 }
 0xa7e   :  { %9345 = vmatpush1.bf16.msra.mxu0 %v7858_v20  ;;  %9673 = vmatpush1.bf16.msra.mxu1 %v7860_v25 }
 0xa7f   :  { %9346 = vmatprep.subr.bf16.mxu0 %v7867_v60  ;;  %9674 = vmatprep.subr.bf16.mxu1 %v7869_v42 }
 0xa82   :  { %9347 = vmatpush1.bf16.msra.mxu0 %v7866_v31  ;;  %9675 = vmatpush1.bf16.msra.mxu1 %v7868_v50 }
 0xa83   :  { %9348 = vmatprep.subr.bf16.mxu0 %v7875_v17  ;;  %9676 = vmatprep.subr.bf16.mxu1 %v7877_v35 }
 0xa86   :  { %9349 = vmatpush1.bf16.msra.mxu0 %v7874_v11  ;;  %9677 = vmatpush1.bf16.msra.mxu1 %v7876_v18  ;;  %v7938_v11 = vld [vmem:[#allocation6 + $0xda0] sm:$0xff]  ;;  %v7940_v18 = vld [vmem:[#allocation6 + $0xdb0] sm:$0xff] }
 0xa87   :  { %9350 = vmatprep.subr.bf16.mxu0 %v7883_v16  ;;  %9678 = vmatprep.subr.bf16.mxu1 %v7885_v21 }
 0xa8a   :  { %9351 = vmatpush1.bf16.msra.mxu0 %v7882_v26  ;;  %9679 = vmatpush1.bf16.msra.mxu1 %v7884_v62  ;;  %v7947_v26 = vld [vmem:[#allocation6 + $0xde8] sm:$0xff]  ;;  %v7949_v62 = vld [vmem:[#allocation6 + $0xdf8] sm:$0xff] }
 0xa8b   :  { %9361 = vmatprep.subr.bf16.mxu0 %v7891_v57  ;;  %9689 = vmatprep.subr.bf16.mxu1 %v7893_v9 }
 0xa8d   :  { %9353 = vmatmul.mubr.bf16.vlgmr.msra.gmra.mrb[76].mxu0 %v14903_v37  ;;  %9681 = vmatmul.mubr.bf16.vlgmr.msra.gmra.mrb[44].mxu1 %v14903_v37  ;;  %v7917_v37 = vld [vmem:[#allocation6 + $0xcf8] sm:$0xff] }
 0xa8e   :  { %9362 = vmatpush1.bf16.msra.mxu0 %v7890_v7  ;;  %9690 = vmatpush1.bf16.msra.mxu1 %v7892_v14 }
 0xa8f   :  { %9363 = vmatprep.subr.bf16.mxu0 %v7899_v4  ;;  %9691 = vmatprep.subr.bf16.mxu1 %v7901_v54 }
 0xa90   :  { %9393 = vmatprep.mubr.bf16.mxu0 %v14908_v29  ;;  %9721 = vmatprep.mubr.bf16.mxu1 %v14908_v29  ;;  %v7922_v29 = vld [vmem:[#allocation6 + $0xd20] sm:$0xff] }
 0xa92   :  { %9364 = vmatpush1.bf16.msra.mxu0 %v7898_v39  ;;  %9692 = vmatpush1.bf16.msra.mxu1 %v7900_v58  ;;  %v7946_v39 = vld [vmem:[#allocation6 + $0xde0] sm:$0xff]  ;;  %v7948_v58 = vld [vmem:[#allocation6 + $0xdf0] sm:$0xff] }
 0xa93   :  { %9365 = vmatprep.subr.bf16.mxu0 %v7907_v5  ;;  %9693 = vmatprep.subr.bf16.mxu1 %v7909_v24 }
 0xa96   :  { %9366 = vmatpush1.bf16.msra.mxu0 %v7906_v47  ;;  %9694 = vmatpush1.bf16.msra.mxu1 %v7908_v45  ;;  %v7955_v47 = vld [vmem:[#allocation6 + $0xe28] sm:$0xff]  ;;  %v7957_v45 = vld [vmem:[#allocation6 + $0xe38] sm:$0xff] }
 0xa97   :  { %9367 = vmatprep.subr.bf16.mxu0 %v7915_v13  ;;  %9695 = vmatprep.subr.bf16.mxu1 %v7917_v37 }
 0xa9a   :  { %9368 = vmatpush1.bf16.msra.mxu0 %v7914_v2  ;;  %9696 = vmatpush1.bf16.msra.mxu1 %v7916_v10 }
 0xa9b   :  { %9369 = vmatprep.subr.bf16.mxu0 %v7923_v36  ;;  %9697 = vmatprep.subr.bf16.mxu1 %v7925_v23 }
 0xa9e   :  { %9370 = vmatpush1.bf16.msra.mxu0 %v7922_v29  ;;  %9698 = vmatpush1.bf16.msra.mxu1 %v7924_v15  ;;  %v7954_v29 = vld [vmem:[#allocation6 + $0xe20] sm:$0xff]  ;;  %v7956_v15 = vld [vmem:[#allocation6 + $0xe30] sm:$0xff] }
 0xa9f   :  { %9371 = vmatprep.subr.bf16.mxu0 %v7931_v56  ;;  %9699 = vmatprep.subr.bf16.mxu1 %v7933_v22 }
 0xaa0   :  { %v14991_v34 = vpop.f32.mrb[72].mxu0  ;;  %v14993_v8 = vpop.f32.mrb[40].mxu1 }
 0xaa1   :  { %v9896_v28 = vrot.slane %v14991_v34, 4  ;;  %v9908_v52 = vrot.slane %v14993_v8, 4  ;;  %v14997_v63 = vpop.f32.mrb[73].mxu0  ;;  %v14999_v12 = vpop.f32.mrb[41].mxu1 }
 0xaa2   :  { %v9902_v20 = vrot.slane %v14997_v63, 4  ;;  %v9914_v25 = vrot.slane %v14999_v12, 4  ;;  %v8907_v60 = vpop.f32.mrb[74].mxu0  ;;  %v9235_v42 = vpop.f32.mrb[42].mxu1  ;;  %9372 = vmatpush1.bf16.msra.mxu0 %v7930_v30  ;;  %9700 = vmatpush1.bf16.msra.mxu1 %v7932_v43  ;;  %v7963_v30 = vld [vmem:[#allocation6 + $0xe68] sm:$0xff]  ;;  %v7965_v43 = vld [vmem:[#allocation6 + $0xe78] sm:$0xff] }
 0xaa3   :  { %v9897_v31 = vadd.f32 %v9896_v28, %v14991_v34  ;;  %v9909_v50 = vadd.f32 %v9908_v52, %v14993_v8  ;;  %v8908_v17 = vpop.f32.mrb[75].mxu0  ;;  %v9236_v35 = vpop.f32.mrb[43].mxu1  ;;  %9373 = vmatprep.subr.bf16.mxu0 %v7939_v40  ;;  %9701 = vmatprep.subr.bf16.mxu1 %v7941_v19  ;;  %v7962_v60 = vld [vmem:[#allocation6 + $0xe60] sm:$0xff]  ;;  %v7964_v42 = vld [vmem:[#allocation6 + $0xe70] sm:$0xff] }
 0xaa4   :  { %v9903_v16 = vadd.f32 %v9902_v20, %v14997_v63  ;;  %v9915_v21 = vadd.f32 %v9914_v25, %v14999_v12  ;;  %v7971_v17 = vld [vmem:[#allocation6 + $0xea8] sm:$0xff]  ;;  %v7973_v35 = vld [vmem:[#allocation6 + $0xeb8] sm:$0xff] }
 0xaa5   :  { %v9898_v57 = vrot.slane %v9897_v31, 2  ;;  %v9910_v9 = vrot.slane %v9909_v50, 2 }
 0xaa6   :  { %v9904_v7 = vrot.slane %v9903_v16, 2  ;;  %v9916_v14 = vrot.slane %v9915_v21, 2  ;;  %9374 = vmatpush1.bf16.msra.mxu0 %v7938_v11  ;;  %9702 = vmatpush1.bf16.msra.mxu1 %v7940_v18 }
 0xaa7   :  { %v9899_v4 = vadd.f32 %v9898_v57, %v9897_v31  ;;  %v9911_v54 = vadd.f32 %v9910_v9, %v9909_v50  ;;  %9375 = vmatprep.subr.bf16.mxu0 %v7947_v26  ;;  %9703 = vmatprep.subr.bf16.mxu1 %v7949_v62  ;;  %v7979_v57 = vld [vmem:[#allocation6 + $0xee8] sm:$0xff]  ;;  %v7981_v9 = vld [vmem:[#allocation6 + $0xef8] sm:$0xff] }
 0xaa8   :  { %v9905_v5 = vadd.f32 %v9904_v7, %v9903_v16  ;;  %v9917_v24 = vadd.f32 %v9916_v14, %v9915_v21  ;;  %v7972_v21 = vld [vmem:[#allocation6 + $0xeb0] sm:$0xff] }
 0xaa9   :  { %v9900_v13 = vrot.slane %v9899_v4, 1  ;;  %v9912_v37 = vrot.slane %v9911_v54, 1 }
 0xaaa   :  { %v9906_v2 = vrot.slane %v9905_v5, 1  ;;  %v9918_v10 = vrot.slane %v9917_v24, 1  ;;  %9376 = vmatpush1.bf16.msra.mxu0 %v7946_v39  ;;  %9704 = vmatpush1.bf16.msra.mxu1 %v7948_v58 }
 0xaab   :  { %v9901_v36 = vadd.f32 %v9900_v13, %v9899_v4  ;;  %v9913_v23 = vadd.f32 %v9912_v37, %v9911_v54  ;;  %9377 = vmatprep.subr.bf16.mxu0 %v7955_v47  ;;  %9705 = vmatprep.subr.bf16.mxu1 %v7957_v45  ;;  %v7987_v13 = vld [vmem:[#allocation6 + $0xf28] sm:$0xff]  ;;  %v7989_v37 = vld [vmem:[#allocation6 + $0xf38] sm:$0xff] }
 0xaac   :  { %v9907_v56 = vadd.f32 %v9906_v2, %v9905_v5  ;;  %v9919_v22 = vadd.f32 %v9918_v10, %v9917_v24  ;;  %v7978_v5 = vld [vmem:[#allocation6 + $0xee0] sm:$0xff]  ;;  %v7980_v24 = vld [vmem:[#allocation6 + $0xef0] sm:$0xff] }
 0xaad   :  { %v9944_v40 = vmul.f32 0.125, %v9901_v36  ;;  %v9946_v19 = vmul.f32 0.125, %v9913_v23 }
 0xaae   :  { %v9945_v28 = vmul.f32 0.125, %v9907_v56  ;;  %v9947_v52 = vmul.f32 0.125, %v9919_v22  ;;  %9378 = vmatpush1.bf16.msra.mxu0 %v7954_v29  ;;  %9706 = vmatpush1.bf16.msra.mxu1 %v7956_v15  ;;  %v7986_v56 = vld [vmem:[#allocation6 + $0xf20] sm:$0xff]  ;;  %v7988_v22 = vld [vmem:[#allocation6 + $0xf30] sm:$0xff] }
 0xaaf   :  { %v15008_v20 = vsub.f32 %v14991_v34, %v9944_v40  ;;  %v15011_v25 = vsub.f32 %v14993_v8, %v9946_v19  ;;  %9379 = vmatprep.subr.bf16.mxu0 %v7963_v30  ;;  %9707 = vmatprep.subr.bf16.mxu1 %v7965_v43  ;;  %v7995_v40 = vld [vmem:[#allocation6 + $0xf68] sm:$0xff]  ;;  %v7997_v19 = vld [vmem:[#allocation6 + $0xf78] sm:$0xff] }
 0xab0   :  { %v15014_v31 = vsub.f32 %v14997_v63, %v9945_v28  ;;  %v15017_v50 = vsub.f32 %v14999_v12, %v9947_v52  ;;  %v7970_v12 = vld [vmem:[#allocation6 + $0xea0] sm:$0xff] }
 0xab1   :  { %v9960_v11 = vmul.f32 %v15008_v20, %v15008_v20  ;;  %v9962_v34 = vmul.f32 %v15011_v25, %v15011_v25 }
 0xab2   :  { %v9961_v8 = vmul.f32 %v15014_v31, %v15014_v31  ;;  %v9963_v18 = vmul.f32 %v15017_v50, %v15017_v50  ;;  %9380 = vmatpush1.bf16.msra.mxu0 %v7962_v60  ;;  %9708 = vmatpush1.bf16.msra.mxu1 %v7964_v42 }
 0xab3   :  { %v9968_v63 = vrot.slane %v9960_v11, 4  ;;  %v9980_v16 = vrot.slane %v9962_v34, 4  ;;  %9381 = vmatprep.subr.bf16.mxu0 %v7971_v17  ;;  %9709 = vmatprep.subr.bf16.mxu1 %v7973_v35 }
 0xab4   :  { %v9974_v26 = vrot.slane %v9961_v8, 4  ;;  %v9986_v62 = vrot.slane %v9963_v18, 4 }
 0xab5   :  { %v9969_v7 = vadd.f32 %v9968_v63, %v9960_v11  ;;  %v9981_v14 = vadd.f32 %v9980_v16, %v9962_v34  ;;  %v7994_v11 = vld [vmem:[#allocation6 + $0xf60] sm:$0xff]  ;;  %v7996_v34 = vld [vmem:[#allocation6 + $0xf70] sm:$0xff]  ;;  %v8003_v63 = vld [vmem:[#allocation6 + $0xfa8] sm:$0xff] }
 0xab6   :  { %v9975_v4 = vadd.f32 %v9974_v26, %v9961_v8  ;;  %v9987_v54 = vadd.f32 %v9986_v62, %v9963_v18  ;;  %9382 = vmatpush1.bf16.msra.mxu0 %v7970_v12  ;;  %9710 = vmatpush1.bf16.msra.mxu1 %v7972_v21  ;;  %v8005_v16 = vld [vmem:[#allocation6 + $0xfb8] sm:$0xff] }
 0xab7   :  { %v9970_v39 = vrot.slane %v9969_v7, 2  ;;  %v9982_v58 = vrot.slane %v9981_v14, 2  ;;  %9383 = vmatprep.subr.bf16.mxu0 %v7979_v57  ;;  %9711 = vmatprep.subr.bf16.mxu1 %v7981_v9  ;;  %v8002_v57 = vld [vmem:[#allocation6 + $0xfa0] sm:$0xff]  ;;  %v8004_v9 = vld [vmem:[#allocation6 + $0xfb0] sm:$0xff] }
 0xab8   :  { %v9976_v47 = vrot.slane %v9975_v4, 2  ;;  %v9988_v45 = vrot.slane %v9987_v54, 2 }
 0xab9   :  { %v9971_v2 = vadd.f32 %v9970_v39, %v9969_v7  ;;  %v9983_v10 = vadd.f32 %v9982_v58, %v9981_v14  ;;  %v8011_v7 = vld [vmem:[#allocation6 + $0xfe8] sm:$0xff]  ;;  %v8013_v14 = vld [vmem:[#allocation6 + $0xff8] sm:$0xff] }
 0xaba   :  { %v9977_v36 = vadd.f32 %v9976_v47, %v9975_v4  ;;  %v9989_v23 = vadd.f32 %v9988_v45, %v9987_v54  ;;  %9384 = vmatpush1.bf16.msra.mxu0 %v7978_v5  ;;  %9712 = vmatpush1.bf16.msra.mxu1 %v7980_v24  ;;  %v8010_v4 = vld [vmem:[#allocation6 + $0xfe0] sm:$0xff]  ;;  %v8012_v54 = vld [vmem:[#allocation6 + $0xff0] sm:$0xff]  ;;  %v8019_v39 = vld [vmem:[#allocation6 + $0x1028] sm:$0xff] }
 0xabb   :  { %v9972_v29 = vrot.slane %v9971_v2, 1  ;;  %v9984_v15 = vrot.slane %v9983_v10, 1  ;;  %9385 = vmatprep.subr.bf16.mxu0 %v7987_v13  ;;  %9713 = vmatprep.subr.bf16.mxu1 %v7989_v37  ;;  %v8021_v58 = vld [vmem:[#allocation6 + $0x1038] sm:$0xff]  ;;  %v8018_v5 = vld [vmem:[#allocation6 + $0x1020] sm:$0xff]  ;;  %v8020_v24 = vld [vmem:[#allocation6 + $0x1030] sm:$0xff] }
 0xabc   :  { %v9978_v30 = vrot.slane %v9977_v36, 1  ;;  %v9990_v43 = vrot.slane %v9989_v23, 1  ;;  %v8027_v47 = vld [vmem:[#allocation6 + $0x1068] sm:$0xff]  ;;  %v8029_v45 = vld [vmem:[#allocation6 + $0x1078] sm:$0xff] }
 0xabd   :  { %v9973_v28 = vadd.f32 %v9972_v29, %v9971_v2  ;;  %v9985_v52 = vadd.f32 %v9984_v15, %v9983_v10  ;;  %v9894_v10 = vld [vmem:[#allocation16] sm:$0xff] }
 0xabe   :  { %v9979_v60 = vadd.f32 %v9978_v30, %v9977_v36  ;;  %v9991_v42 = vadd.f32 %v9990_v43, %v9989_v23  ;;  %9386 = vmatpush1.bf16.msra.mxu0 %v7986_v56  ;;  %9714 = vmatpush1.bf16.msra.mxu1 %v7988_v22  ;;  %v8026_v36 = vld [vmem:[#allocation6 + $0x1060] sm:$0xff]  ;;  %v8028_v23 = vld [vmem:[#allocation6 + $0x1070] sm:$0xff]  ;;  %v8035_v56 = vld [vmem:[#allocation6 + $0x10a8] sm:$0xff]  ;;  %v10173_v43 = vrot.slane %v9894_v10, %v13875_v41 }
 0xabf   :  { %v10016_v17 = vmul.f32 0.125, %v9973_v28  ;;  %v10018_v35 = vmul.f32 0.125, %v9985_v52  ;;  %9387 = vmatprep.subr.bf16.mxu0 %v7995_v40  ;;  %9715 = vmatprep.subr.bf16.mxu1 %v7997_v19  ;;  %v8037_v22 = vld [vmem:[#allocation6 + $0x10b8] sm:$0xff]  ;;  %v10177_v40 = vrot.slane %v9894_v10, %v14533_v55  ;;  %v10181_v19 = vrot.slane %v9894_v10, %v14780_v49 }
 0xac0   :  { %v10017_v8 = vmul.f32 0.125, %v9979_v60  ;;  %v10019_v18 = vmul.f32 0.125, %v9991_v42  ;;  %v15031_v30 = vld [vmem:[#allocation17] sm:$0xff]  ;;  %v15036_v28 = vld [vmem:[#allocation17 + $0x8] sm:$0xff]  ;;  %v10185_v60 = vrot.slane %v9894_v10, %v14783_v32 }
 0xac1   :  { %v10024_v12 = vadd.f32 1e-05, %v10016_v17  ;;  %v10026_v21 = vadd.f32 1e-05, %v10018_v35  ;;  %v8036_v17 = vld [vmem:[#allocation6 + $0x10b0] sm:$0xff]  ;;  %v10465_v35 = vrot.slane %v15031_v30, %v14537_v48 }
 0xac2   :  { %v10025_v26 = vadd.f32 1e-05, %v10017_v8  ;;  %v10027_v62 = vadd.f32 1e-05, %v10019_v18  ;;  %9388 = vmatpush1.bf16.msra.mxu0 %v7994_v11  ;;  %9716 = vmatpush1.bf16.msra.mxu1 %v7996_v34  ;;  %v10469_v11 = vrot.slane %v15031_v30, %v14789_v53  ;;  %v8043_v34 = vld [vmem:[#allocation6 + $0x10e8] sm:$0xff]  ;;  %v8045_v8 = vld [vmem:[#allocation6 + $0x10f8] sm:$0xff]  ;;  %v10473_v18 = vrot.slane %v15036_v28, %v14537_v48 }
 0xac3   :  { %11395 = vrsqrt.f32 %v10024_v12  ;;  %9389 = vmatprep.subr.bf16.mxu0 %v8003_v63  ;;  %9717 = vmatprep.subr.bf16.mxu1 %v8005_v16  ;;  %v10477_v63 = vrot.slane %v15036_v28, %v14789_v53  ;;  %v10367_v16 = vrot.slane %v15031_v30, %v13875_v41  ;;  %v10371_v12 = vrot.slane %v15031_v30, %v14780_v49 }
 0xac4   :  { %11397 = vrsqrt.f32 %v10026_v21 }
 0xac5   :  { %11399 = vrsqrt.f32 %v10025_v26  ;;  %v10213_v26 = vrot.slane %v10173_v43, %v13875_v41 }
 0xac6   :  { %11401 = vrsqrt.f32 %v10027_v62  ;;  %9390 = vmatpush1.bf16.msra.mxu0 %v8002_v57  ;;  %9718 = vmatpush1.bf16.msra.mxu1 %v8004_v9  ;;  %v10217_v62 = vrot.slane %v10177_v40, %v13875_v41  ;;  %v10221_v57 = vrot.slane %v10181_v19, %v13875_v41  ;;  %v10225_v9 = vrot.slane %v10185_v60, %v13875_v41  ;;  %v8052_v60 = vld [vmem:[#allocation6 + $0x1130] sm:$0xff] }
 0xac7   :  { %9391 = vmatprep.subr.bf16.mxu0 %v8011_v7  ;;  %9719 = vmatprep.subr.bf16.mxu1 %v8013_v14  ;;  %v10375_v7 = vrot.slane %v15036_v28, %v13875_v41  ;;  %v10379_v14 = vrot.slane %v15036_v28, %v14780_v49 }
 0xaca   :  { %9392 = vmatpush1.bf16.msra.mxu0 %v8010_v4  ;;  %9720 = vmatpush1.bf16.msra.mxu1 %v8012_v54  ;;  %v8042_v54 = vld [vmem:[#allocation6 + $0x10e0] sm:$0xff] }
 0xacb   :  { %9402 = vmatprep.subr.bf16.mxu0 %v8019_v39  ;;  %9730 = vmatprep.subr.bf16.mxu1 %v8021_v58  ;;  %v8044_v39 = vld [vmem:[#allocation6 + $0x10f0] sm:$0xff]  ;;  %v15062_v58 = vrot.slane %v10465_v35, %v14537_v48  ;;  %v10571_v35 = vrot.slane %v15036_v28, %v14533_v55 }
 0xacd   :  { %v11396_v13 = vpop.eup %11395  ;;  %9394 = vmatmul.mubr.bf16.vlgmr.msra.gmra.mrb[76].mxu0 %v14917_v27  ;;  %9722 = vmatmul.mubr.bf16.vlgmr.msra.gmra.mrb[44].mxu1 %v14917_v27 }
 0xace   :  { %v11398_v37 = vpop.eup %11397  ;;  %9403 = vmatpush1.bf16.msra.mxu0 %v8018_v5  ;;  %9731 = vmatpush1.bf16.msra.mxu1 %v8020_v24  ;;  %v15065_v5 = vrot.slane %v10469_v11, %v14537_v48  ;;  %v8051_v24 = vld [vmem:[#allocation6 + $0x1128] sm:$0xff]  ;;  %v10575_v11 = vrot.slane %v15036_v28, %v14783_v32 }
 0xacf   :  { %v11400_v2 = vpop.eup %11399  ;;  %9404 = vmatprep.subr.bf16.mxu0 %v8027_v47  ;;  %9732 = vmatprep.subr.bf16.mxu1 %v8029_v45  ;;  %v15068_v47 = vrot.slane %v10473_v18, %v14537_v48  ;;  %v15071_v45 = vrot.slane %v10477_v63, %v14537_v48 }
 0xad0   :  { %v11402_v29 = vpop.eup %11401  ;;  %v10048_v15 = vcombine.low %v11396_v13, %v11400_v2  ;;  %9434 = vmatprep.mubr.bf16.mxu0 %v14922_v3  ;;  %9762 = vmatprep.mubr.bf16.mxu1 %v14922_v3  ;;  %v8034_v3 = vld [vmem:[#allocation6 + $0x10a0] sm:$0xff]  ;;  %v15074_v13 = vrot.slane %v10367_v16, %v13875_v41 }
 0xad1   :  { %v10049_v27 = vcombine.low %v11398_v37, %v11402_v29  ;;  %v15077_v37 = vrot.slane %v10371_v12, %v13875_v41  ;;  %v8053_v29 = vld [vmem:[#allocation6 + $0x1138] sm:$0xff] }
 0xad2   :  { %v10056_v52 = vrot.slane %v10048_v15, %v14530_v38  ;;  %9405 = vmatpush1.bf16.msra.mxu0 %v8026_v36  ;;  %9733 = vmatpush1.bf16.msra.mxu1 %v8028_v23  ;;  %v15084_v15 = vrot.slane %v10375_v7, %v13875_v41  ;;  %v10277_v7 = vrot.slane %v15036_v28, %v15422_v33 }
 0xad3   :  { %v10063_v42 = vrot.slane %v10049_v27, %v14530_v38  ;;  %9406 = vmatprep.subr.bf16.mxu0 %v8035_v56  ;;  %9734 = vmatprep.subr.bf16.mxu1 %v8037_v22  ;;  %v15087_v56 = vrot.slane %v10379_v14, %v13875_v41  ;;  %v10563_v22 = vrot.slane %v15031_v30, %v14533_v55 }
 0xad5   :  { %v10064_v21 = vcombine.low %v10056_v52, %v10063_v42  ;;  %v8050_v52 = vld [vmem:[#allocation6 + $0x1120] sm:$0xff]  ;;  %v8059_v42 = vld [vmem:[#allocation6 + $0x1168] sm:$0xff]  ;;  %v10603_v12 = vrot.slane %v10563_v22, %v14533_v55 }
 0xad6   :  { %9407 = vmatpush1.bf16.msra.mxu0 %v8034_v3  ;;  %9735 = vmatpush1.bf16.msra.mxu1 %v8036_v17  ;;  %v8061_v3 = vld [vmem:[#allocation6 + $0x1178] sm:$0xff]  ;;  %v10567_v17 = vrot.slane %v15031_v30, %v14783_v32  ;;  %v8066_v22 = vld [vmem:[#allocation6 + $0x11a0] sm:$0xff] }
 0xad7   :  { %v10084_v4 = vmul.f32 %v10064_v21, %v9894_v10  ;;  %9408 = vmatprep.subr.bf16.mxu0 %v8043_v34  ;;  %9736 = vmatprep.subr.bf16.mxu1 %v8045_v8  ;;  %v10269_v34 = vrot.slane %v15031_v30, %v15422_v33  ;;  %v10273_v21 = vrot.slane %v15031_v30, %v14786_v51 }
 0xad8   :  { %v10615_v30 = vrot.slane %v10575_v11, %v14533_v55 }
 0xad9   :  { %v10091_v2 = vrot.slane %v10084_v4, %v15422_v33  ;;  %v10095_v10 = vrot.slane %v10084_v4, %v14537_v48  ;;  %v10099_v36 = vrot.slane %v10084_v4, %v14786_v51  ;;  %v10103_v23 = vrot.slane %v10084_v4, %v14789_v53 }
 0xada   :  { %9409 = vmatpush1.bf16.msra.mxu0 %v8042_v54  ;;  %9737 = vmatpush1.bf16.msra.mxu1 %v8044_v39  ;;  %v8069_v54 = vld [vmem:[#allocation6 + $0x11b8] sm:$0xff] }
 0xadb   :  { %v10131_v27 = vrot.slane %v10091_v2, %v15422_v33  ;;  %v10135_v43 = vrot.slane %v10095_v10, %v15422_v33  ;;  %v10139_v40 = vrot.slane %v10099_v36, %v15422_v33  ;;  %v10143_v19 = vrot.slane %v10103_v23, %v15422_v33  ;;  %9410 = vmatprep.subr.bf16.mxu0 %v8051_v24 }
 0xadc   :  { %9738 = vmatprep.subr.bf16.mxu1 %v8053_v29  ;;  %v10607_v24 = vrot.slane %v10567_v17, %v14533_v55  ;;  %v10611_v2 = vrot.slane %v10571_v35, %v14533_v55  ;;  %v10281_v23 = vrot.slane %v15036_v28, %v14786_v51  ;;  %v10317_v29 = vrot.slane %v10277_v7, %v15422_v33 }
 0xadd   :  { %v10163_v8 = vmul.f32 %v10143_v19, %v15017_v50  ;;  %v10160_v18 = vmul.f32 %v10131_v27, %v15008_v20  ;;  %v10161_v63 = vmul.f32 %v10135_v43, %v15014_v31  ;;  %v10162_v16 = vmul.f32 %v10139_v40, %v15011_v25  ;;  %v8058_v50 = vld [vmem:[#allocation6 + $0x1160] sm:$0xff]  ;;  %v8060_v20 = vld [vmem:[#allocation6 + $0x1170] sm:$0xff]  ;;  %v8067_v25 = vld [vmem:[#allocation6 + $0x11a8] sm:$0xff] }
 0xade   :  { %9411 = vmatpush1.bf16.msra.mxu0 %v8050_v52  ;;  %9739 = vmatpush1.bf16.msra.mxu1 %v8052_v60  ;;  %v8068_v27 = vld [vmem:[#allocation6 + $0x11b0] sm:$0xff]  ;;  %v8075_v19 = vld [vmem:[#allocation6 + $0x11e8] sm:$0xff]  ;;  %v8077_v52 = vld [vmem:[#allocation6 + $0x11f8] sm:$0xff] }
 0xadf   :  { %v10245_v14 = vadd.f32 %v10225_v9, %v10163_v8  ;;  %9412 = vmatprep.subr.bf16.mxu0 %v8059_v42  ;;  %9740 = vmatprep.subr.bf16.mxu1 %v8061_v3  ;;  %v10242_v4 = vadd.f32 %v10213_v26, %v10160_v18  ;;  %v10243_v31 = vadd.f32 %v10217_v62, %v10161_v63 }
 0xae0   :  { %v10244_v39 = vadd.f32 %v10221_v57, %v10162_v16  ;;  %v10309_v62 = vrot.slane %v10269_v34, %v15422_v33  ;;  %v10313_v57 = vrot.slane %v10273_v21, %v15422_v33  ;;  %v8083_v16 = vld [vmem:[#allocation6 + $0x1228] sm:$0xff]  ;;  %v8085_v21 = vld [vmem:[#allocation6 + $0x1238] sm:$0xff] }
 0xae1   :  { %v15115_v10 = vmax.f32 %v10245_v14, 0.0  ;;  %v10250_v36 = vmax.f32 %v10242_v4, 0.0  ;;  %v10251_v9 = vmax.f32 %v10243_v31, 0.0 }
 0xae2   :  { %9413 = vmatpush1.bf16.msra.mxu0 %v8058_v50  ;;  %9741 = vmatpush1.bf16.msra.mxu1 %v8060_v20  ;;  %v10252_v26 = vmax.f32 %v10244_v39, 0.0 }
 0xae3   :  { %9414 = vmatprep.subr.bf16.mxu0 %v8067_v25  ;;  %9742 = vmatprep.subr.bf16.mxu1 %v8069_v54  ;;  %v10534_v43 = vmul.f32 %v15062_v58, %v10250_v36  ;;  %v10535_v40 = vmul.f32 %v15065_v5, %v10251_v9  ;;  %v10537_v28 = vmul.f32 %v15071_v45, %v15115_v10 }
 0xae4   :  { %v10536_v60 = vmul.f32 %v15068_v47, %v10252_v26  ;;  %v10436_v42 = vmul.f32 %v15074_v13, %v10250_v36  ;;  %v10437_v3 = vmul.f32 %v15077_v37, %v10251_v9  ;;  %v10438_v17 = vmul.f32 %v15084_v15, %v10252_v26  ;;  %v8074_v37 = vld [vmem:[#allocation6 + $0x11e0] sm:$0xff]  ;;  %v8076_v15 = vld [vmem:[#allocation6 + $0x11f0] sm:$0xff] }
 0xae5   :  { %v10543_v35 = vsel %vm10542_vm1, %v10534_v43, 0.0  ;;  %v10544_v58 = vsel %vm10542_vm1, %v10535_v40, 0.0  ;;  %v10321_v5 = vrot.slane %v10281_v23, %v15422_v33  ;;  %v10439_v11 = vmul.f32 %v15087_v56, %v15115_v10 }
 0xae6   :  { %9415 = vmatpush1.bf16.msra.mxu0 %v8066_v22  ;;  %9743 = vmatpush1.bf16.msra.mxu1 %v8068_v27  ;;  %v10545_v45 = vadd.f32 %v10544_v58, %v10543_v35  ;;  %v10445_v47 = vsel %vm10444_vm2, %v10436_v42, 0.0  ;;  %v10446_v13 = vsel %vm10444_vm2, %v10437_v3, 0.0  ;;  %v10546_v34 = vsel %vm10542_vm1, %v10536_v60, 0.0  ;;  %v8082_v22 = vld [vmem:[#allocation6 + $0x1220] sm:$0xff]  ;;  %v8101_v35 = vld [vmem:[#allocation6 + $0x12b8] sm:$0xff] }
 0xae7   :  { %9416 = vmatprep.subr.bf16.mxu0 %v8075_v19  ;;  %9744 = vmatprep.subr.bf16.mxu1 %v8077_v52  ;;  %v10548_v8 = vsel %vm10542_vm1, %v10537_v28, 0.0  ;;  %v10447_v18 = vadd.f32 %v10446_v13, %v10445_v47  ;;  %v10632_v63 = vmul.f32 %v10603_v12, %v10250_v36  ;;  %v10448_v14 = vsel %vm10444_vm2, %v10438_v17, 0.0  ;;  %v8099_v17 = vld [vmem:[#allocation6 + $0x12a8] sm:$0xff]  ;;  %v8109_v47 = vld [vmem:[#allocation6 + $0x12f8] sm:$0xff]  ;;  %v8106_v13 = vld [vmem:[#allocation6 + $0x12e0] sm:$0xff] }
 0xae8   :  { %v10547_v7 = vadd.f32 %v10546_v34, %v10545_v45  ;;  %v10633_v56 = vmul.f32 %v10607_v24, %v10251_v9  ;;  %v10634_v50 = vmul.f32 %v10611_v2, %v10252_v26  ;;  %v10338_v31 = vmul.f32 %v10309_v62, %v10250_v36  ;;  %v8084_v24 = vld [vmem:[#allocation6 + $0x1230] sm:$0xff]  ;;  %v8093_v62 = vld [vmem:[#allocation6 + $0x1278] sm:$0xff] }
 0xae9   :  { %v10449_v20 = vadd.f32 %v10448_v14, %v10447_v18  ;;  %v10641_v4 = vsel %vm10640_vm3, %v10632_v63, 0.0  ;;  %v10339_v25 = vmul.f32 %v10313_v57, %v10251_v9  ;;  %v10450_v39 = vsel %vm10444_vm2, %v10439_v11, 0.0  ;;  %v8091_v9 = vld [vmem:[#allocation6 + $0x1268] sm:$0xff]  ;;  %v8100_v45 = vld [vmem:[#allocation6 + $0x12b0] sm:$0xff]  ;;  %v8117_v34 = vld [vmem:[#allocation6 + $0x1338] sm:$0xff] }
 0xaea   :  { %9417 = vmatpush1.bf16.msra.mxu0 %v8074_v37  ;;  %9745 = vmatpush1.bf16.msra.mxu1 %v8076_v15  ;;  %v15141_v54 = vadd.f32 %v10548_v8, %v10547_v7  ;;  %v10635_v12 = vmul.f32 %v10615_v30, %v15115_v10  ;;  %v10642_v23 = vsel %vm10640_vm3, %v10633_v56, 0.0  ;;  %v10340_v43 = vmul.f32 %v10317_v29, %v10252_v26  ;;  %v8090_v26 = vld [vmem:[#allocation6 + $0x1260] sm:$0xff]  ;;  %v8092_v29 = vld [vmem:[#allocation6 + $0x1270] sm:$0xff]  ;;  %v8107_v11 = vld [vmem:[#allocation6 + $0x12e8] sm:$0xff] }
 0xaeb   :  { %9418 = vmatprep.subr.bf16.mxu0 %v8083_v16  ;;  %9746 = vmatprep.subr.bf16.mxu1 %v8085_v21  ;;  %v15146_v2 = vadd.f32 %v10450_v39, %v10449_v20  ;;  %v10643_v27 = vadd.f32 %v10642_v23, %v10641_v4  ;;  %v10347_v36 = vsel %vm10346_vm4, %v10338_v31, 0.0  ;;  %v10644_v57 = vsel %vm10640_vm3, %v10634_v50, 0.0  ;;  %v8108_v37 = vld [vmem:[#allocation6 + $0x12f0] sm:$0xff]  ;;  %v8115_v15 = vld [vmem:[#allocation6 + $0x1328] sm:$0xff]  ;;  %v8114_v8 = vld [vmem:[#allocation6 + $0x1320] sm:$0xff] }
 0xaec   :  { %v10341_v40 = vmul.f32 %v10321_v5, %v15115_v10  ;;  %v10348_v30 = vsel %vm10346_vm4, %v10339_v25, 0.0  ;;  %v10646_v52 = vsel %vm10640_vm3, %v10635_v12, 0.0  ;;  %v10350_v60 = vsel %vm10346_vm4, %v10340_v43, 0.0  ;;  %v8098_v5 = vld [vmem:[#allocation6 + $0x12a0] sm:$0xff]  ;;  %v8116_v18 = vld [vmem:[#allocation6 + $0x1330] sm:$0xff]  ;;  %v8123_v63 = vld [vmem:[#allocation6 + $0x1368] sm:$0xff] }
 0xaed   :  { %v10645_v28 = vadd.f32 %v10644_v57, %v10643_v27  ;;  %v10349_v19 = vadd.f32 %v10348_v30, %v10347_v36  ;;  %v8125_v16 = vld [vmem:[#allocation6 + $0x1378] sm:$0xff]  ;;  %v8122_v21 = vld [vmem:[#allocation6 + $0x1360] sm:$0xff]  ;;  %v8124_v7 = vld [vmem:[#allocation6 + $0x1370] sm:$0xff] }
 0xaee   :  { %9419 = vmatpush1.bf16.msra.mxu0 %v8082_v22  ;;  %9747 = vmatpush1.bf16.msra.mxu1 %v8084_v24  ;;  %v10352_v10 = vsel %vm10346_vm4, %v10341_v40, 0.0  ;;  %v8131_v14 = vld [vmem:[#allocation6 + $0x13a8] sm:$0xff]  ;;  %v8133_v56 = vld [vmem:[#allocation6 + $0x13b8] sm:$0xff]  ;;  %v8130_v50 = vld [vmem:[#allocation6 + $0x13a0] sm:$0xff] }
 0xaef   :  { %9420 = vmatprep.subr.bf16.mxu0 %v8091_v9  ;;  %9748 = vmatprep.subr.bf16.mxu1 %v8093_v62  ;;  %v15154_v42 = vadd.f32 %v10646_v52, %v10645_v28  ;;  %v10351_v3 = vadd.f32 %v10350_v60, %v10349_v19  ;;  %v8132_v20 = vld [vmem:[#allocation6 + $0x13b0] sm:$0xff]  ;;  %v8139_v4 = vld [vmem:[#allocation6 + $0x13e8] sm:$0xff]  ;;  %v8141_v31 = vld [vmem:[#allocation6 + $0x13f8] sm:$0xff] }
 0xaf0   :  { %v8138_v25 = vld [vmem:[#allocation6 + $0x13e0] sm:$0xff]  ;;  %v8140_v39 = vld [vmem:[#allocation6 + $0x13f0] sm:$0xff]  ;;  %v8147_v12 = vld [vmem:[#allocation6 + $0x1428] sm:$0xff] }
 0xaf1   :  { %v15157_v58 = vadd.f32 %v10352_v10, %v10351_v3  ;;  %v8149_v23 = vld [vmem:[#allocation6 + $0x1438] sm:$0xff]  ;;  %v8146_v22 = vld [vmem:[#allocation6 + $0x1420] sm:$0xff]  ;;  %v8148_v24 = vld [vmem:[#allocation6 + $0x1430] sm:$0xff] }
 0xaf2   :  { %9421 = vmatpush1.bf16.msra.mxu0 %v8090_v26  ;;  %9749 = vmatpush1.bf16.msra.mxu1 %v8092_v29  ;;  %v8155_v27 = vld [vmem:[#allocation6 + $0x1468] sm:$0xff]  ;;  %v8157_v43 = vld [vmem:[#allocation6 + $0x1478] sm:$0xff]  ;;  %v8154_v36 = vld [vmem:[#allocation6 + $0x1460] sm:$0xff] }
 0xaf3   :  { %9422 = vmatprep.subr.bf16.mxu0 %v8099_v17  ;;  %9750 = vmatprep.subr.bf16.mxu1 %v8101_v35  ;;  %v8156_v9 = vld [vmem:[#allocation6 + $0x1470] sm:$0xff]  ;;  %v8163_v62 = vld [vmem:[#allocation6 + $0x14a8] sm:$0xff]  ;;  %v8165_v57 = vld [vmem:[#allocation6 + $0x14b8] sm:$0xff] }
 0xaf4   :  { %v8162_v40 = vld [vmem:[#allocation6 + $0x14a0] sm:$0xff]  ;;  %v8164_v30 = vld [vmem:[#allocation6 + $0x14b0] sm:$0xff]  ;;  %v8171_v28 = vld [vmem:[#allocation6 + $0x14e8] sm:$0xff] }
 0xaf5   :  { %v8170_v19 = vld [vmem:[#allocation6 + $0x14e0] sm:$0xff]  ;;  %v8172_v52 = vld [vmem:[#allocation6 + $0x14f0] sm:$0xff]  ;;  %v8179_v60 = vld [vmem:[#allocation6 + $0x1528] sm:$0xff] }
 0xaf6   :  { %9423 = vmatpush1.bf16.msra.mxu0 %v8098_v5  ;;  %9751 = vmatpush1.bf16.msra.mxu1 %v8100_v45  ;;  %v8181_v26 = vld [vmem:[#allocation6 + $0x1538] sm:$0xff]  ;;  %v8180_v29 = vld [vmem:[#allocation6 + $0x1530] sm:$0xff]  ;;  %v8187_v3 = vld [vmem:[#allocation6 + $0x1568] sm:$0xff] }
 0xaf7   :  { %9424 = vmatprep.subr.bf16.mxu0 %v8107_v11  ;;  %9752 = vmatprep.subr.bf16.mxu1 %v8109_v47  ;;  %v8189_v17 = vld [vmem:[#allocation6 + $0x1578] sm:$0xff]  ;;  %v8186_v35 = vld [vmem:[#allocation6 + $0x1560] sm:$0xff]  ;;  %v8188_v10 = vld [vmem:[#allocation6 + $0x1570] sm:$0xff] }
 0xaf8   :  { %v8195_v5 = vld [vmem:[#allocation6 + $0x15a8] sm:$0xff]  ;;  %v8197_v45 = vld [vmem:[#allocation6 + $0x15b8] sm:$0xff]  ;;  %v8194_v11 = vld [vmem:[#allocation6 + $0x15a0] sm:$0xff] }
 0xaf9   :  { %v8196_v47 = vld [vmem:[#allocation6 + $0x15b0] sm:$0xff] }
 0xafa   :  { %9425 = vmatpush1.bf16.msra.mxu0 %v8106_v13  ;;  %9753 = vmatpush1.bf16.msra.mxu1 %v8108_v37  ;;  %v8203_v13 = vld [vmem:[#allocation6 + $0x15e8] sm:$0xff]  ;;  %v8205_v37 = vld [vmem:[#allocation6 + $0x15f8] sm:$0xff] }
 0xafb   :  { %9426 = vmatprep.subr.bf16.mxu0 %v8115_v15  ;;  %9754 = vmatprep.subr.bf16.mxu1 %v8117_v34  ;;  %v8202_v15 = vld [vmem:[#allocation6 + $0x15e0] sm:$0xff]  ;;  %v8204_v34 = vld [vmem:[#allocation6 + $0x15f0] sm:$0xff] }
 0xafe   :  { %9427 = vmatpush1.bf16.msra.mxu0 %v8114_v8  ;;  %9755 = vmatpush1.bf16.msra.mxu1 %v8116_v18  ;;  %v8211_v8 = vld [vmem:[#allocation6 + $0x1628] sm:$0xff]  ;;  %v8213_v18 = vld [vmem:[#allocation6 + $0x1638] sm:$0xff] }
 0xaff   :  { %9428 = vmatprep.subr.bf16.mxu0 %v8123_v63  ;;  %9756 = vmatprep.subr.bf16.mxu1 %v8125_v16  ;;  %v8210_v63 = vld [vmem:[#allocation6 + $0x1620] sm:$0xff]  ;;  %v8212_v16 = vld [vmem:[#allocation6 + $0x1630] sm:$0xff] }
 0xb02   :  { %9429 = vmatpush1.bf16.msra.mxu0 %v8122_v21  ;;  %9757 = vmatpush1.bf16.msra.mxu1 %v8124_v7  ;;  %v8219_v21 = vld [vmem:[#allocation6 + $0x1668] sm:$0xff]  ;;  %v8221_v7 = vld [vmem:[#allocation6 + $0x1678] sm:$0xff] }
 0xb03   :  { %9430 = vmatprep.subr.bf16.mxu0 %v8131_v14  ;;  %9758 = vmatprep.subr.bf16.mxu1 %v8133_v56  ;;  %v8218_v14 = vld [vmem:[#allocation6 + $0x1660] sm:$0xff]  ;;  %v8220_v56 = vld [vmem:[#allocation6 + $0x1670] sm:$0xff] }
 0xb06   :  { %9431 = vmatpush1.bf16.msra.mxu0 %v8130_v50  ;;  %9759 = vmatpush1.bf16.msra.mxu1 %v8132_v20  ;;  %v8227_v50 = vld [vmem:[#allocation6 + $0x16a8] sm:$0xff]  ;;  %v8229_v20 = vld [vmem:[#allocation6 + $0x16b8] sm:$0xff] }
 0xb07   :  { %9432 = vmatprep.subr.bf16.mxu0 %v8139_v4  ;;  %9760 = vmatprep.subr.bf16.mxu1 %v8141_v31  ;;  %v8226_v4 = vld [vmem:[#allocation6 + $0x16a0] sm:$0xff]  ;;  %v8228_v31 = vld [vmem:[#allocation6 + $0x16b0] sm:$0xff] }
 0xb0a   :  { %9433 = vmatpush1.bf16.msra.mxu0 %v8138_v25  ;;  %9761 = vmatpush1.bf16.msra.mxu1 %v8140_v39  ;;  %v8235_v25 = vld [vmem:[#allocation6 + $0x16e8] sm:$0xff]  ;;  %v8237_v39 = vld [vmem:[#allocation6 + $0x16f8] sm:$0xff] }
 0xb0b   :  { %9443 = vmatprep.subr.bf16.mxu0 %v8147_v12  ;;  %9771 = vmatprep.subr.bf16.mxu1 %v8149_v23  ;;  %v8234_v12 = vld [vmem:[#allocation6 + $0x16e0] sm:$0xff]  ;;  %v8236_v23 = vld [vmem:[#allocation6 + $0x16f0] sm:$0xff] }
 0xb0d   :  { %9435 = vmatmul.mubr.bf16.vlgmr.msra.gmra.mrb[76].mxu0 %v14931_v61  ;;  %9763 = vmatmul.mubr.bf16.vlgmr.msra.gmra.mrb[44].mxu1 %v14931_v61  ;;  %v8173_v61 = vld [vmem:[#allocation6 + $0x14f8] sm:$0xff] }
 0xb0e   :  { %9444 = vmatpush1.bf16.msra.mxu0 %v8146_v22  ;;  %9772 = vmatpush1.bf16.msra.mxu1 %v8148_v24  ;;  %v8243_v22 = vld [vmem:[#allocation6 + $0x1728] sm:$0xff]  ;;  %v8245_v24 = vld [vmem:[#allocation6 + $0x1738] sm:$0xff] }
 0xb0f   :  { %9445 = vmatprep.subr.bf16.mxu0 %v8155_v27  ;;  %9773 = vmatprep.subr.bf16.mxu1 %v8157_v43  ;;  %v8242_v27 = vld [vmem:[#allocation6 + $0x1720] sm:$0xff]  ;;  %v8244_v43 = vld [vmem:[#allocation6 + $0x1730] sm:$0xff] }
 0xb10   :  { %9475 = vmatprep.mubr.bf16.mxu0 %v14936_v1  ;;  %9803 = vmatprep.mubr.bf16.mxu1 %v14936_v1  ;;  %v8178_v1 = vld [vmem:[#allocation6 + $0x1520] sm:$0xff] }
 0xb12   :  { %9446 = vmatpush1.bf16.msra.mxu0 %v8154_v36  ;;  %9774 = vmatpush1.bf16.msra.mxu1 %v8156_v9  ;;  %v8251_v36 = vld [vmem:[#allocation6 + $0x1768] sm:$0xff]  ;;  %v8253_v9 = vld [vmem:[#allocation6 + $0x1778] sm:$0xff] }
 0xb13   :  { %9447 = vmatprep.subr.bf16.mxu0 %v8163_v62  ;;  %9775 = vmatprep.subr.bf16.mxu1 %v8165_v57  ;;  %v8250_v62 = vld [vmem:[#allocation6 + $0x1760] sm:$0xff]  ;;  %v8252_v57 = vld [vmem:[#allocation6 + $0x1770] sm:$0xff] }
 0xb16   :  { %9448 = vmatpush1.bf16.msra.mxu0 %v8162_v40  ;;  %9776 = vmatpush1.bf16.msra.mxu1 %v8164_v30  ;;  %v8259_v40 = vld [vmem:[#allocation6 + $0x17a8] sm:$0xff]  ;;  %v8261_v30 = vld [vmem:[#allocation6 + $0x17b8] sm:$0xff] }
 0xb17   :  { %9449 = vmatprep.subr.bf16.mxu0 %v8171_v28  ;;  %9777 = vmatprep.subr.bf16.mxu1 %v8173_v61  ;;  %v8258_v28 = vld [vmem:[#allocation6 + $0x17a0] sm:$0xff]  ;;  %v8260_v61 = vld [vmem:[#allocation6 + $0x17b0] sm:$0xff] }
 0xb1a   :  { %9450 = vmatpush1.bf16.msra.mxu0 %v8170_v19  ;;  %9778 = vmatpush1.bf16.msra.mxu1 %v8172_v52  ;;  %v8267_v19 = vld [vmem:[#allocation6 + $0x17e8] sm:$0xff]  ;;  %v8269_v52 = vld [vmem:[#allocation6 + $0x17f8] sm:$0xff] }
 0xb1b   :  { %9451 = vmatprep.subr.bf16.mxu0 %v8179_v60  ;;  %9779 = vmatprep.subr.bf16.mxu1 %v8181_v26  ;;  %v8266_v60 = vld [vmem:[#allocation6 + $0x17e0] sm:$0xff]  ;;  %v8268_v26 = vld [vmem:[#allocation6 + $0x17f0] sm:$0xff] }
 0xb1e   :  { %9452 = vmatpush1.bf16.msra.mxu0 %v8178_v1  ;;  %9780 = vmatpush1.bf16.msra.mxu1 %v8180_v29  ;;  %v8275_v1 = vld [vmem:[#allocation6 + $0x1828] sm:$0xff]  ;;  %v8277_v29 = vld [vmem:[#allocation6 + $0x1838] sm:$0xff] }
 0xb1f   :  { %9453 = vmatprep.subr.bf16.mxu0 %v8187_v3  ;;  %9781 = vmatprep.subr.bf16.mxu1 %v8189_v17  ;;  %v8274_v3 = vld [vmem:[#allocation6 + $0x1820] sm:$0xff]  ;;  %v8276_v17 = vld [vmem:[#allocation6 + $0x1830] sm:$0xff] }
 0xb22   :  { %9454 = vmatpush1.bf16.msra.mxu0 %v8186_v35  ;;  %9782 = vmatpush1.bf16.msra.mxu1 %v8188_v10  ;;  %v8283_v35 = vld [vmem:[#allocation6 + $0x1868] sm:$0xff]  ;;  %v8285_v10 = vld [vmem:[#allocation6 + $0x1878] sm:$0xff] }
 0xb23   :  { %9455 = vmatprep.subr.bf16.mxu0 %v8195_v5  ;;  %9783 = vmatprep.subr.bf16.mxu1 %v8197_v45  ;;  %v8282_v5 = vld [vmem:[#allocation6 + $0x1860] sm:$0xff]  ;;  %v8284_v45 = vld [vmem:[#allocation6 + $0x1870] sm:$0xff] }
 0xb26   :  { %9456 = vmatpush1.bf16.msra.mxu0 %v8194_v11  ;;  %9784 = vmatpush1.bf16.msra.mxu1 %v8196_v47  ;;  %v8291_v11 = vld [vmem:[#allocation6 + $0x18a8] sm:$0xff]  ;;  %v8293_v47 = vld [vmem:[#allocation6 + $0x18b8] sm:$0xff] }
 0xb27   :  { %9457 = vmatprep.subr.bf16.mxu0 %v8203_v13  ;;  %9785 = vmatprep.subr.bf16.mxu1 %v8205_v37  ;;  %v8290_v13 = vld [vmem:[#allocation6 + $0x18a0] sm:$0xff]  ;;  %v8292_v37 = vld [vmem:[#allocation6 + $0x18b0] sm:$0xff] }
 0xb2a   :  { %9458 = vmatpush1.bf16.msra.mxu0 %v8202_v15  ;;  %9786 = vmatpush1.bf16.msra.mxu1 %v8204_v34  ;;  %v8299_v15 = vld [vmem:[#allocation6 + $0x18e8] sm:$0xff]  ;;  %v8298_v34 = vld [vmem:[#allocation6 + $0x18e0] sm:$0xff] }
 0xb2b   :  { %9459 = vmatprep.subr.bf16.mxu0 %v8211_v8  ;;  %9787 = vmatprep.subr.bf16.mxu1 %v8213_v18  ;;  %v8300_v8 = vld [vmem:[#allocation6 + $0x18f0] sm:$0xff]  ;;  %v8307_v18 = vld [vmem:[#allocation6 + $0x1928] sm:$0xff] }
 0xb2e   :  { %9460 = vmatpush1.bf16.msra.mxu0 %v8210_v63  ;;  %9788 = vmatpush1.bf16.msra.mxu1 %v8212_v16  ;;  %v8309_v63 = vld [vmem:[#allocation6 + $0x1938] sm:$0xff]  ;;  %v8308_v16 = vld [vmem:[#allocation6 + $0x1930] sm:$0xff] }
 0xb2f   :  { %9461 = vmatprep.subr.bf16.mxu0 %v8219_v21  ;;  %9789 = vmatprep.subr.bf16.mxu1 %v8221_v7  ;;  %v8315_v21 = vld [vmem:[#allocation6 + $0x1968] sm:$0xff]  ;;  %v8317_v7 = vld [vmem:[#allocation6 + $0x1978] sm:$0xff] }
 0xb32   :  { %9462 = vmatpush1.bf16.msra.mxu0 %v8218_v14  ;;  %9790 = vmatpush1.bf16.msra.mxu1 %v8220_v56  ;;  %v8314_v14 = vld [vmem:[#allocation6 + $0x1960] sm:$0xff]  ;;  %v8316_v56 = vld [vmem:[#allocation6 + $0x1970] sm:$0xff] }
 0xb33   :  { %9463 = vmatprep.subr.bf16.mxu0 %v8227_v50  ;;  %9791 = vmatprep.subr.bf16.mxu1 %v8229_v20  ;;  %v8323_v50 = vld [vmem:[#allocation6 + $0x19a8] sm:$0xff]  ;;  %v8325_v20 = vld [vmem:[#allocation6 + $0x19b8] sm:$0xff] }
 0xb36   :  { %9464 = vmatpush1.bf16.msra.mxu0 %v8226_v4  ;;  %9792 = vmatpush1.bf16.msra.mxu1 %v8228_v31  ;;  %v8322_v4 = vld [vmem:[#allocation6 + $0x19a0] sm:$0xff]  ;;  %v8324_v31 = vld [vmem:[#allocation6 + $0x19b0] sm:$0xff] }
 0xb37   :  { %9465 = vmatprep.subr.bf16.mxu0 %v8235_v25  ;;  %9793 = vmatprep.subr.bf16.mxu1 %v8237_v39  ;;  %v8331_v25 = vld [vmem:[#allocation6 + $0x19e8] sm:$0xff]  ;;  %v8333_v39 = vld [vmem:[#allocation6 + $0x19f8] sm:$0xff] }
 0xb3a   :  { %9466 = vmatpush1.bf16.msra.mxu0 %v8234_v12  ;;  %9794 = vmatpush1.bf16.msra.mxu1 %v8236_v23  ;;  %v8330_v12 = vld [vmem:[#allocation6 + $0x19e0] sm:$0xff]  ;;  %v8332_v23 = vld [vmem:[#allocation6 + $0x19f0] sm:$0xff] }
 0xb3b   :  { %9467 = vmatprep.subr.bf16.mxu0 %v8243_v22  ;;  %9795 = vmatprep.subr.bf16.mxu1 %v8245_v24  ;;  %v8339_v22 = vld [vmem:[#allocation6 + $0x1a28] sm:$0xff]  ;;  %v8341_v24 = vld [vmem:[#allocation6 + $0x1a38] sm:$0xff] }
 0xb3e   :  { %9468 = vmatpush1.bf16.msra.mxu0 %v8242_v27  ;;  %9796 = vmatpush1.bf16.msra.mxu1 %v8244_v43  ;;  %v8338_v27 = vld [vmem:[#allocation6 + $0x1a20] sm:$0xff]  ;;  %v8340_v43 = vld [vmem:[#allocation6 + $0x1a30] sm:$0xff] }
 0xb3f   :  { %9469 = vmatprep.subr.bf16.mxu0 %v8251_v36  ;;  %9797 = vmatprep.subr.bf16.mxu1 %v8253_v9  ;;  %v8347_v36 = vld [vmem:[#allocation6 + $0x1a68] sm:$0xff]  ;;  %v8349_v9 = vld [vmem:[#allocation6 + $0x1a78] sm:$0xff] }
 0xb42   :  { %9470 = vmatpush1.bf16.msra.mxu0 %v8250_v62  ;;  %9798 = vmatpush1.bf16.msra.mxu1 %v8252_v57  ;;  %v8346_v62 = vld [vmem:[#allocation6 + $0x1a60] sm:$0xff]  ;;  %v8348_v57 = vld [vmem:[#allocation6 + $0x1a70] sm:$0xff] }
 0xb43   :  { %9471 = vmatprep.subr.bf16.mxu0 %v8259_v40  ;;  %9799 = vmatprep.subr.bf16.mxu1 %v8261_v30  ;;  %v8355_v40 = vld [vmem:[#allocation6 + $0x1aa8] sm:$0xff]  ;;  %v8357_v30 = vld [vmem:[#allocation6 + $0x1ab8] sm:$0xff] }
 0xb46   :  { %9472 = vmatpush1.bf16.msra.mxu0 %v8258_v28  ;;  %9800 = vmatpush1.bf16.msra.mxu1 %v8260_v61  ;;  %v8354_v28 = vld [vmem:[#allocation6 + $0x1aa0] sm:$0xff]  ;;  %v8356_v61 = vld [vmem:[#allocation6 + $0x1ab0] sm:$0xff] }
 0xb47   :  { %9473 = vmatprep.subr.bf16.mxu0 %v8267_v19  ;;  %9801 = vmatprep.subr.bf16.mxu1 %v8269_v52  ;;  %v8363_v19 = vld [vmem:[#allocation6 + $0x1ae8] sm:$0xff]  ;;  %v8365_v52 = vld [vmem:[#allocation6 + $0x1af8] sm:$0xff] }
 0xb4a   :  { %9474 = vmatpush1.bf16.msra.mxu0 %v8266_v60  ;;  %9802 = vmatpush1.bf16.msra.mxu1 %v8268_v26  ;;  %v8362_v60 = vld [vmem:[#allocation6 + $0x1ae0] sm:$0xff]  ;;  %v8364_v26 = vld [vmem:[#allocation6 + $0x1af0] sm:$0xff] }
 0xb4b   :  { %9484 = vmatprep.subr.bf16.mxu0 %v8275_v1  ;;  %9812 = vmatprep.subr.bf16.mxu1 %v8277_v29  ;;  %v8371_v1 = vld [vmem:[#allocation6 + $0x1b28] sm:$0xff]  ;;  %v8373_v29 = vld [vmem:[#allocation6 + $0x1b38] sm:$0xff] }
 0xb4d   :  { %9476 = vmatmul.mubr.bf16.vlgmr.msra.gmra.mrb[76].mxu0 %v14945_v0  ;;  %9804 = vmatmul.mubr.bf16.vlgmr.msra.gmra.mrb[44].mxu1 %v14945_v0  ;;  %v8301_v0 = vld [vmem:[#allocation6 + $0x18f8] sm:$0xff] }
 0xb4e   :  { %9485 = vmatpush1.bf16.msra.mxu0 %v8274_v3  ;;  %9813 = vmatpush1.bf16.msra.mxu1 %v8276_v17  ;;  %v8370_v3 = vld [vmem:[#allocation6 + $0x1b20] sm:$0xff]  ;;  %v8372_v17 = vld [vmem:[#allocation6 + $0x1b30] sm:$0xff] }
 0xb4f   :  { %9486 = vmatprep.subr.bf16.mxu0 %v8283_v35  ;;  %9814 = vmatprep.subr.bf16.mxu1 %v8285_v10  ;;  %v8379_v35 = vld [vmem:[#allocation6 + $0x1b68] sm:$0xff]  ;;  %v8381_v10 = vld [vmem:[#allocation6 + $0x1b78] sm:$0xff] }
 0xb50   :  { %9516 = vmatprep.mubr.bf16.mxu0 %v14950_v44  ;;  %9844 = vmatprep.mubr.bf16.mxu1 %v14950_v44  ;;  %v8306_v44 = vld [vmem:[#allocation6 + $0x1920] sm:$0xff] }
 0xb52   :  { %9487 = vmatpush1.bf16.msra.mxu0 %v8282_v5  ;;  %9815 = vmatpush1.bf16.msra.mxu1 %v8284_v45  ;;  %v8378_v5 = vld [vmem:[#allocation6 + $0x1b60] sm:$0xff]  ;;  %v8380_v45 = vld [vmem:[#allocation6 + $0x1b70] sm:$0xff] }
 0xb53   :  { %9488 = vmatprep.subr.bf16.mxu0 %v8291_v11  ;;  %9816 = vmatprep.subr.bf16.mxu1 %v8293_v47  ;;  %v8387_v11 = vld [vmem:[#allocation6 + $0x1ba8] sm:$0xff]  ;;  %v8389_v47 = vld [vmem:[#allocation6 + $0x1bb8] sm:$0xff] }
 0xb56   :  { %9489 = vmatpush1.bf16.msra.mxu0 %v8290_v13  ;;  %9817 = vmatpush1.bf16.msra.mxu1 %v8292_v37  ;;  %v8386_v13 = vld [vmem:[#allocation6 + $0x1ba0] sm:$0xff]  ;;  %v8388_v37 = vld [vmem:[#allocation6 + $0x1bb0] sm:$0xff] }
 0xb57   :  { %9490 = vmatprep.subr.bf16.mxu0 %v8299_v15  ;;  %9818 = vmatprep.subr.bf16.mxu1 %v8301_v0  ;;  %v8395_v15 = vld [vmem:[#allocation6 + $0x1be8] sm:$0xff]  ;;  %v8397_v0 = vld [vmem:[#allocation6 + $0x1bf8] sm:$0xff] }
 0xb5a   :  { %9491 = vmatpush1.bf16.msra.mxu0 %v8298_v34  ;;  %9819 = vmatpush1.bf16.msra.mxu1 %v8300_v8  ;;  %v8394_v34 = vld [vmem:[#allocation6 + $0x1be0] sm:$0xff]  ;;  %v8396_v8 = vld [vmem:[#allocation6 + $0x1bf0] sm:$0xff] }
 0xb5b   :  { %9492 = vmatprep.subr.bf16.mxu0 %v8307_v18  ;;  %9820 = vmatprep.subr.bf16.mxu1 %v8309_v63  ;;  %v8403_v18 = vld [vmem:[#allocation6 + $0x1c28] sm:$0xff]  ;;  %v8405_v63 = vld [vmem:[#allocation6 + $0x1c38] sm:$0xff] }
 0xb5e   :  { %9493 = vmatpush1.bf16.msra.mxu0 %v8306_v44  ;;  %9821 = vmatpush1.bf16.msra.mxu1 %v8308_v16  ;;  %v8402_v44 = vld [vmem:[#allocation6 + $0x1c20] sm:$0xff]  ;;  %v8404_v16 = vld [vmem:[#allocation6 + $0x1c30] sm:$0xff] }
 0xb5f   :  { %9494 = vmatprep.subr.bf16.mxu0 %v8315_v21  ;;  %9822 = vmatprep.subr.bf16.mxu1 %v8317_v7  ;;  %v8411_v21 = vld [vmem:[#allocation6 + $0x1c68] sm:$0xff]  ;;  %v8413_v7 = vld [vmem:[#allocation6 + $0x1c78] sm:$0xff] }
 0xb62   :  { %9495 = vmatpush1.bf16.msra.mxu0 %v8314_v14  ;;  %9823 = vmatpush1.bf16.msra.mxu1 %v8316_v56  ;;  %v8410_v14 = vld [vmem:[#allocation6 + $0x1c60] sm:$0xff]  ;;  %v8412_v56 = vld [vmem:[#allocation6 + $0x1c70] sm:$0xff] }
 0xb63   :  { %9496 = vmatprep.subr.bf16.mxu0 %v8323_v50  ;;  %9824 = vmatprep.subr.bf16.mxu1 %v8325_v20  ;;  %v8419_v50 = vld [vmem:[#allocation6 + $0x1ca8] sm:$0xff]  ;;  %v8421_v20 = vld [vmem:[#allocation6 + $0x1cb8] sm:$0xff] }
 0xb66   :  { %9497 = vmatpush1.bf16.msra.mxu0 %v8322_v4  ;;  %9825 = vmatpush1.bf16.msra.mxu1 %v8324_v31  ;;  %v8418_v4 = vld [vmem:[#allocation6 + $0x1ca0] sm:$0xff]  ;;  %v8420_v31 = vld [vmem:[#allocation6 + $0x1cb0] sm:$0xff] }
 0xb67   :  { %9498 = vmatprep.subr.bf16.mxu0 %v8331_v25  ;;  %9826 = vmatprep.subr.bf16.mxu1 %v8333_v39  ;;  %v8427_v25 = vld [vmem:[#allocation6 + $0x1ce8] sm:$0xff]  ;;  %v8426_v39 = vld [vmem:[#allocation6 + $0x1ce0] sm:$0xff] }
 0xb6a   :  { %9499 = vmatpush1.bf16.msra.mxu0 %v8330_v12  ;;  %9827 = vmatpush1.bf16.msra.mxu1 %v8332_v23  ;;  %v8428_v12 = vld [vmem:[#allocation6 + $0x1cf0] sm:$0xff]  ;;  %v8435_v23 = vld [vmem:[#allocation6 + $0x1d28] sm:$0xff] }
 0xb6b   :  { %9500 = vmatprep.subr.bf16.mxu0 %v8339_v22  ;;  %9828 = vmatprep.subr.bf16.mxu1 %v8341_v24  ;;  %v8437_v22 = vld [vmem:[#allocation6 + $0x1d38] sm:$0xff]  ;;  %v8436_v24 = vld [vmem:[#allocation6 + $0x1d30] sm:$0xff] }
 0xb6e   :  { %9501 = vmatpush1.bf16.msra.mxu0 %v8338_v27  ;;  %9829 = vmatpush1.bf16.msra.mxu1 %v8340_v43  ;;  %v8443_v27 = vld [vmem:[#allocation6 + $0x1d68] sm:$0xff]  ;;  %v8445_v43 = vld [vmem:[#allocation6 + $0x1d78] sm:$0xff] }
 0xb6f   :  { %9502 = vmatprep.subr.bf16.mxu0 %v8347_v36  ;;  %9830 = vmatprep.subr.bf16.mxu1 %v8349_v9  ;;  %v8442_v36 = vld [vmem:[#allocation6 + $0x1d60] sm:$0xff]  ;;  %v8444_v9 = vld [vmem:[#allocation6 + $0x1d70] sm:$0xff] }
 0xb72   :  { %9503 = vmatpush1.bf16.msra.mxu0 %v8346_v62  ;;  %9831 = vmatpush1.bf16.msra.mxu1 %v8348_v57  ;;  %v8451_v62 = vld [vmem:[#allocation6 + $0x1da8] sm:$0xff]  ;;  %v8453_v57 = vld [vmem:[#allocation6 + $0x1db8] sm:$0xff] }
 0xb73   :  { %9504 = vmatprep.subr.bf16.mxu0 %v8355_v40  ;;  %9832 = vmatprep.subr.bf16.mxu1 %v8357_v30  ;;  %v8450_v40 = vld [vmem:[#allocation6 + $0x1da0] sm:$0xff]  ;;  %v8452_v30 = vld [vmem:[#allocation6 + $0x1db0] sm:$0xff] }
 0xb76   :  { %9505 = vmatpush1.bf16.msra.mxu0 %v8354_v28  ;;  %9833 = vmatpush1.bf16.msra.mxu1 %v8356_v61  ;;  %v8459_v28 = vld [vmem:[#allocation6 + $0x1de8] sm:$0xff]  ;;  %v8461_v61 = vld [vmem:[#allocation6 + $0x1df8] sm:$0xff] }
 0xb77   :  { %9506 = vmatprep.subr.bf16.mxu0 %v8363_v19  ;;  %9834 = vmatprep.subr.bf16.mxu1 %v8365_v52  ;;  %v8458_v19 = vld [vmem:[#allocation6 + $0x1de0] sm:$0xff]  ;;  %v8460_v52 = vld [vmem:[#allocation6 + $0x1df0] sm:$0xff] }
 0xb7a   :  { %9507 = vmatpush1.bf16.msra.mxu0 %v8362_v60  ;;  %9835 = vmatpush1.bf16.msra.mxu1 %v8364_v26  ;;  %v8467_v60 = vld [vmem:[#allocation6 + $0x1e28] sm:$0xff]  ;;  %v8469_v26 = vld [vmem:[#allocation6 + $0x1e38] sm:$0xff] }
 0xb7b   :  { %9508 = vmatprep.subr.bf16.mxu0 %v8371_v1  ;;  %9836 = vmatprep.subr.bf16.mxu1 %v8373_v29  ;;  %v8466_v1 = vld [vmem:[#allocation6 + $0x1e20] sm:$0xff]  ;;  %v8468_v29 = vld [vmem:[#allocation6 + $0x1e30] sm:$0xff] }
 0xb7e   :  { %9509 = vmatpush1.bf16.msra.mxu0 %v8370_v3  ;;  %9837 = vmatpush1.bf16.msra.mxu1 %v8372_v17  ;;  %v8475_v3 = vld [vmem:[#allocation6 + $0x1e68] sm:$0xff]  ;;  %v8477_v17 = vld [vmem:[#allocation6 + $0x1e78] sm:$0xff] }
 0xb7f   :  { %9510 = vmatprep.subr.bf16.mxu0 %v8379_v35  ;;  %9838 = vmatprep.subr.bf16.mxu1 %v8381_v10  ;;  %v8474_v35 = vld [vmem:[#allocation6 + $0x1e60] sm:$0xff]  ;;  %v8476_v10 = vld [vmem:[#allocation6 + $0x1e70] sm:$0xff] }
 0xb82   :  { %9511 = vmatpush1.bf16.msra.mxu0 %v8378_v5  ;;  %9839 = vmatpush1.bf16.msra.mxu1 %v8380_v45  ;;  %v8483_v5 = vld [vmem:[#allocation6 + $0x1ea8] sm:$0xff]  ;;  %v8485_v45 = vld [vmem:[#allocation6 + $0x1eb8] sm:$0xff] }
 0xb83   :  { %9512 = vmatprep.subr.bf16.mxu0 %v8387_v11  ;;  %9840 = vmatprep.subr.bf16.mxu1 %v8389_v47  ;;  %v8482_v11 = vld [vmem:[#allocation6 + $0x1ea0] sm:$0xff]  ;;  %v8484_v47 = vld [vmem:[#allocation6 + $0x1eb0] sm:$0xff] }
 0xb86   :  { %9513 = vmatpush1.bf16.msra.mxu0 %v8386_v13  ;;  %9841 = vmatpush1.bf16.msra.mxu1 %v8388_v37  ;;  %v8491_v13 = vld [vmem:[#allocation6 + $0x1ee8] sm:$0xff]  ;;  %v8493_v37 = vld [vmem:[#allocation6 + $0x1ef8] sm:$0xff] }
 0xb87   :  { %9514 = vmatprep.subr.bf16.mxu0 %v8395_v15  ;;  %9842 = vmatprep.subr.bf16.mxu1 %v8397_v0  ;;  %v8490_v15 = vld [vmem:[#allocation6 + $0x1ee0] sm:$0xff]  ;;  %v8492_v0 = vld [vmem:[#allocation6 + $0x1ef0] sm:$0xff] }
 0xb8a   :  { %9515 = vmatpush1.bf16.msra.mxu0 %v8394_v34  ;;  %9843 = vmatpush1.bf16.msra.mxu1 %v8396_v8  ;;  %v8499_v34 = vld [vmem:[#allocation6 + $0x1f28] sm:$0xff]  ;;  %v8501_v8 = vld [vmem:[#allocation6 + $0x1f38] sm:$0xff] }
 0xb8b   :  { %9525 = vmatprep.subr.bf16.mxu0 %v8403_v18  ;;  %9853 = vmatprep.subr.bf16.mxu1 %v8405_v63  ;;  %v8498_v18 = vld [vmem:[#allocation6 + $0x1f20] sm:$0xff]  ;;  %v8500_v63 = vld [vmem:[#allocation6 + $0x1f30] sm:$0xff] }
 0xb8d   :  { %9517 = vmatmul.mubr.bf16.vlgmr.msra.gmra.mrb[76].mxu0 %v14959_v46  ;;  %9845 = vmatmul.mubr.bf16.vlgmr.msra.gmra.mrb[44].mxu1 %v14959_v46  ;;  %v8429_v46 = vld [vmem:[#allocation6 + $0x1cf8] sm:$0xff] }
 0xb8e   :  { %9526 = vmatpush1.bf16.msra.mxu0 %v8402_v44  ;;  %9854 = vmatpush1.bf16.msra.mxu1 %v8404_v16  ;;  %v8507_v44 = vld [vmem:[#allocation6 + $0x1f68] sm:$0xff]  ;;  %v8509_v16 = vld [vmem:[#allocation6 + $0x1f78] sm:$0xff] }
 0xb8f   :  { %9527 = vmatprep.subr.bf16.mxu0 %v8411_v21  ;;  %9855 = vmatprep.subr.bf16.mxu1 %v8413_v7  ;;  %v8506_v21 = vld [vmem:[#allocation6 + $0x1f60] sm:$0xff]  ;;  %v8508_v7 = vld [vmem:[#allocation6 + $0x1f70] sm:$0xff] }
 0xb90   :  { %9557 = vmatprep.mubr.bf16.mxu0 %v14964_v6  ;;  %9885 = vmatprep.mubr.bf16.mxu1 %v14964_v6  ;;  %v8434_v6 = vld [vmem:[#allocation6 + $0x1d20] sm:$0xff] }
 0xb92   :  { %9528 = vmatpush1.bf16.msra.mxu0 %v8410_v14  ;;  %9856 = vmatpush1.bf16.msra.mxu1 %v8412_v56  ;;  %v8515_v14 = vld [vmem:[#allocation6 + $0x1fa8] sm:$0xff]  ;;  %v8517_v56 = vld [vmem:[#allocation6 + $0x1fb8] sm:$0xff] }
 0xb93   :  { %9529 = vmatprep.subr.bf16.mxu0 %v8419_v50  ;;  %9857 = vmatprep.subr.bf16.mxu1 %v8421_v20  ;;  %v8514_v50 = vld [vmem:[#allocation6 + $0x1fa0] sm:$0xff]  ;;  %v8516_v20 = vld [vmem:[#allocation6 + $0x1fb0] sm:$0xff] }
 0xb96   :  { %9530 = vmatpush1.bf16.msra.mxu0 %v8418_v4  ;;  %9858 = vmatpush1.bf16.msra.mxu1 %v8420_v31  ;;  %v8523_v4 = vld [vmem:[#allocation6 + $0x1fe8] sm:$0xff]  ;;  %v8525_v31 = vld [vmem:[#allocation6 + $0x1ff8] sm:$0xff] }
 0xb97   :  { %9531 = vmatprep.subr.bf16.mxu0 %v8427_v25  ;;  %9859 = vmatprep.subr.bf16.mxu1 %v8429_v46  ;;  %v8522_v25 = vld [vmem:[#allocation6 + $0x1fe0] sm:$0xff]  ;;  %v8524_v46 = vld [vmem:[#allocation6 + $0x1ff0] sm:$0xff] }
 0xb9a   :  { %9532 = vmatpush1.bf16.msra.mxu0 %v8426_v39  ;;  %9860 = vmatpush1.bf16.msra.mxu1 %v8428_v12 }
 0xb9b   :  { %9533 = vmatprep.subr.bf16.mxu0 %v8435_v23  ;;  %9861 = vmatprep.subr.bf16.mxu1 %v8437_v22 }
 0xb9e   :  { %9534 = vmatpush1.bf16.msra.mxu0 %v8434_v6  ;;  %9862 = vmatpush1.bf16.msra.mxu1 %v8436_v24 }
 0xb9f   :  { %9535 = vmatprep.subr.bf16.mxu0 %v8443_v27  ;;  %9863 = vmatprep.subr.bf16.mxu1 %v8445_v43 }
 0xba2   :  { %9536 = vmatpush1.bf16.msra.mxu0 %v8442_v36  ;;  %9864 = vmatpush1.bf16.msra.mxu1 %v8444_v9 }
 0xba3   :  { %9537 = vmatprep.subr.bf16.mxu0 %v8451_v62  ;;  %9865 = vmatprep.subr.bf16.mxu1 %v8453_v57 }
 0xba6   :  { %9538 = vmatpush1.bf16.msra.mxu0 %v8450_v40  ;;  %9866 = vmatpush1.bf16.msra.mxu1 %v8452_v30 }
 0xba7   :  { %9539 = vmatprep.subr.bf16.mxu0 %v8459_v28  ;;  %9867 = vmatprep.subr.bf16.mxu1 %v8461_v61 }
 0xbaa   :  { %9540 = vmatpush1.bf16.msra.mxu0 %v8458_v19  ;;  %9868 = vmatpush1.bf16.msra.mxu1 %v8460_v52 }
 0xbab   :  { %9541 = vmatprep.subr.bf16.mxu0 %v8467_v60  ;;  %9869 = vmatprep.subr.bf16.mxu1 %v8469_v26 }
 0xbae   :  { %9542 = vmatpush1.bf16.msra.mxu0 %v8466_v1  ;;  %9870 = vmatpush1.bf16.msra.mxu1 %v8468_v29 }
 0xbaf   :  { %9543 = vmatprep.subr.bf16.mxu0 %v8475_v3  ;;  %9871 = vmatprep.subr.bf16.mxu1 %v8477_v17 }
 0xbb2   :  { %9544 = vmatpush1.bf16.msra.mxu0 %v8474_v35  ;;  %9872 = vmatpush1.bf16.msra.mxu1 %v8476_v10 }
 0xbb3   :  { %9545 = vmatprep.subr.bf16.mxu0 %v8483_v5  ;;  %9873 = vmatprep.subr.bf16.mxu1 %v8485_v45 }
 0xbb6   :  { %9546 = vmatpush1.bf16.msra.mxu0 %v8482_v11  ;;  %9874 = vmatpush1.bf16.msra.mxu1 %v8484_v47 }
 0xbb7   :  { %9547 = vmatprep.subr.bf16.mxu0 %v8491_v13  ;;  %9875 = vmatprep.subr.bf16.mxu1 %v8493_v37 }
 0xbba   :  { %9548 = vmatpush1.bf16.msra.mxu0 %v8490_v15  ;;  %9876 = vmatpush1.bf16.msra.mxu1 %v8492_v0 }
 0xbbb   :  { %9549 = vmatprep.subr.bf16.mxu0 %v8499_v34  ;;  %9877 = vmatprep.subr.bf16.mxu1 %v8501_v8 }
 0xbbe   :  { %9550 = vmatpush1.bf16.msra.mxu0 %v8498_v18  ;;  %9878 = vmatpush1.bf16.msra.mxu1 %v8500_v63 }
 0xbbf   :  { %9551 = vmatprep.subr.bf16.mxu0 %v8507_v44  ;;  %9879 = vmatprep.subr.bf16.mxu1 %v8509_v16 }
 0xbc2   :  { %9552 = vmatpush1.bf16.msra.mxu0 %v8506_v21  ;;  %9880 = vmatpush1.bf16.msra.mxu1 %v8508_v7 }
 0xbc3   :  { %9553 = vmatprep.subr.bf16.mxu0 %v8515_v14  ;;  %9881 = vmatprep.subr.bf16.mxu1 %v8517_v56 }
 0xbc6   :  { %9554 = vmatpush1.bf16.msra.mxu0 %v8514_v50  ;;  %9882 = vmatpush1.bf16.msra.mxu1 %v8516_v20 }
 0xbc7   :  { %9555 = vmatprep.subr.bf16.mxu0 %v8523_v4  ;;  %9883 = vmatprep.subr.bf16.mxu1 %v8525_v31 }
 0xbca   :  { %9556 = vmatpush1.bf16.msra.mxu0 %v8522_v25  ;;  %9884 = vmatpush1.bf16.msra.mxu1 %v8524_v46 }
 0xbcd   :  { %9558 = vmatmul.mubr.bf16.vlgmr.msra.gmra.mrb[76].mxu0 %v14973_v59  ;;  %9886 = vmatmul.mubr.bf16.vlgmr.msra.gmra.mrb[44].mxu1 %v14973_v59 }
 0xca0   :  { %v9559_v39 = vpop.f32.mrb[76].mxu0  ;;  %v9887_v12 = vpop.f32.mrb[44].mxu1 }
 0xca1   :  { %v9920_v23 = vrot.slane %v9559_v39, 4  ;;  %v9932_v22 = vrot.slane %v9887_v12, 4  ;;  %v9561_v6 = vpop.f32.mrb[77].mxu0  ;;  %v9889_v24 = vpop.f32.mrb[45].mxu1 }
 0xca2   :  { %v9926_v27 = vrot.slane %v9561_v6, 4  ;;  %v9938_v43 = vrot.slane %v9889_v24, 4  ;;  %v9563_v36 = vpop.f32.mrb[78].mxu0  ;;  %v9891_v9 = vpop.f32.mrb[46].mxu1 }
 0xca3   :  { %v9921_v62 = vadd.f32 %v9920_v23, %v9559_v39  ;;  %v9933_v57 = vadd.f32 %v9932_v22, %v9887_v12  ;;  %v9564_v40 = vpop.f32.mrb[79].mxu0  ;;  %v9892_v30 = vpop.f32.mrb[47].mxu1 }
 0xca4   :  { %v9927_v28 = vadd.f32 %v9926_v27, %v9561_v6  ;;  %v9939_v61 = vadd.f32 %v9938_v43, %v9889_v24 }
 0xca5   :  { %v9922_v19 = vrot.slane %v9921_v62, 2  ;;  %v9934_v52 = vrot.slane %v9933_v57, 2 }
 0xca6   :  { %v9928_v60 = vrot.slane %v9927_v28, 2  ;;  %v9940_v59 = vrot.slane %v9939_v61, 2 }
 0xca7   :  { %v9923_v26 = vadd.f32 %v9922_v19, %v9921_v62  ;;  %v9935_v1 = vadd.f32 %v9934_v52, %v9933_v57 }
 0xca8   :  { %v9929_v29 = vadd.f32 %v9928_v60, %v9927_v28  ;;  %v9941_v3 = vadd.f32 %v9940_v59, %v9939_v61 }
 0xca9   :  { %v9924_v17 = vrot.slane %v9923_v26, 1  ;;  %v9936_v35 = vrot.slane %v9935_v1, 1 }
 0xcaa   :  { %v9930_v10 = vrot.slane %v9929_v29, 1  ;;  %v9942_v5 = vrot.slane %v9941_v3, 1 }
 0xcab   :  { %v9925_v45 = vadd.f32 %v9924_v17, %v9923_v26  ;;  %v9937_v11 = vadd.f32 %v9936_v35, %v9935_v1 }
 0xcac   :  { %v9931_v47 = vadd.f32 %v9930_v10, %v9929_v29  ;;  %v9943_v13 = vadd.f32 %v9942_v5, %v9941_v3 }
 0xcad   :  { %v9948_v37 = vmul.f32 0.125, %v9925_v45  ;;  %v9950_v15 = vmul.f32 0.125, %v9937_v11  ;;  %v9895_v11 = vld [vmem:[#allocation16 + $0x8] sm:$0xff] }
 0xcae   :  { %v9949_v0 = vmul.f32 0.125, %v9931_v47  ;;  %v9951_v34 = vmul.f32 0.125, %v9943_v13 }
 0xcaf   :  { %v15173_v8 = vsub.f32 %v9559_v39, %v9948_v37  ;;  %v15175_v18 = vsub.f32 %v9887_v12, %v9950_v15  ;;  %v10201_v37 = vrot.slane %v9895_v11, %v14783_v32 }
 0xcb0   :  { %v15177_v63 = vsub.f32 %v9561_v6, %v9949_v0  ;;  %v15179_v44 = vsub.f32 %v9889_v24, %v9951_v34  ;;  %v10189_v34 = vrot.slane %v9895_v11, %v13875_v41 }
 0xcb1   :  { %v9964_v16 = vmul.f32 %v15173_v8, %v15173_v8  ;;  %v9966_v21 = vmul.f32 %v15175_v18, %v15175_v18 }
 0xcb2   :  { %v9965_v7 = vmul.f32 %v15177_v63, %v15177_v63  ;;  %v9967_v14 = vmul.f32 %v15179_v44, %v15179_v44 }
 0xcb3   :  { %v9992_v56 = vrot.slane %v9964_v16, 4  ;;  %v10004_v50 = vrot.slane %v9966_v21, 4 }
 0xcb4   :  { %v9998_v20 = vrot.slane %v9965_v7, 4  ;;  %v10010_v4 = vrot.slane %v9967_v14, 4 }
 0xcb5   :  { %v9993_v31 = vadd.f32 %v9992_v56, %v9964_v16  ;;  %v10005_v25 = vadd.f32 %v10004_v50, %v9966_v21  ;;  %v10193_v16 = vrot.slane %v9895_v11, %v14533_v55  ;;  %v10197_v21 = vrot.slane %v9895_v11, %v14780_v49 }
 0xcb6   :  { %v9999_v46 = vadd.f32 %v9998_v20, %v9965_v7  ;;  %v10011_v39 = vadd.f32 %v10010_v4, %v9967_v14  ;;  %v15195_v7 = vld [vmem:[#allocation17 + $0x10] sm:$0xff]  ;;  %v15197_v14 = vld [vmem:[#allocation17 + $0x18] sm:$0xff]  ;;  %v10241_v50 = vrot.slane %v10201_v37, %v13875_v41 }
 0xcb7   :  { %v9994_v12 = vrot.slane %v9993_v31, 2  ;;  %v10006_v23 = vrot.slane %v10005_v25, 2  ;;  %v10481_v20 = vrot.slane %v15195_v7, %v14537_v48  ;;  %v10485_v4 = vrot.slane %v15195_v7, %v14789_v53 }
 0xcb8   :  { %v10000_v22 = vrot.slane %v9999_v46, 2  ;;  %v10012_v6 = vrot.slane %v10011_v39, 2 }
 0xcb9   :  { %v9995_v24 = vadd.f32 %v9994_v12, %v9993_v31  ;;  %v10007_v27 = vadd.f32 %v10006_v23, %v10005_v25  ;;  %v10493_v31 = vrot.slane %v15197_v14, %v14789_v53  ;;  %v10237_v12 = vrot.slane %v10197_v21, %v13875_v41 }
 0xcba   :  { %v10001_v43 = vadd.f32 %v10000_v22, %v9999_v46  ;;  %v10013_v36 = vadd.f32 %v10012_v6, %v10011_v39  ;;  %v10229_v46 = vrot.slane %v10189_v34, %v13875_v41  ;;  %v10233_v39 = vrot.slane %v10193_v16, %v13875_v41 }
 0xcbb   :  { %v9996_v9 = vrot.slane %v9995_v24, 1  ;;  %v10008_v62 = vrot.slane %v10007_v27, 1  ;;  %v10383_v23 = vrot.slane %v15195_v7, %v13875_v41  ;;  %v10387_v22 = vrot.slane %v15195_v7, %v14780_v49 }
 0xcbc   :  { %v10002_v57 = vrot.slane %v10001_v43, 1  ;;  %v10014_v40 = vrot.slane %v10013_v36, 1  ;;  %v10391_v6 = vrot.slane %v15197_v14, %v13875_v41 }
 0xcbd   :  { %v9997_v30 = vadd.f32 %v9996_v9, %v9995_v24  ;;  %v10009_v28 = vadd.f32 %v10008_v62, %v10007_v27  ;;  %v10395_v24 = vrot.slane %v15197_v14, %v14780_v49  ;;  %v10521_v62 = vrot.slane %v10481_v20, %v14537_v48 }
 0xcbe   :  { %v10003_v61 = vadd.f32 %v10002_v57, %v10001_v43  ;;  %v10015_v19 = vadd.f32 %v10014_v40, %v10013_v36  ;;  %v10525_v57 = vrot.slane %v10485_v4, %v14537_v48 }
 0xcbf   :  { %v10020_v52 = vmul.f32 0.125, %v9997_v30  ;;  %v10022_v60 = vmul.f32 0.125, %v10009_v28  ;;  %v10533_v30 = vrot.slane %v10493_v31, %v14537_v48 }
 0xcc0   :  { %v10021_v59 = vmul.f32 0.125, %v10003_v61  ;;  %v10023_v26 = vmul.f32 0.125, %v10015_v19  ;;  %v10423_v19 = vrot.slane %v10383_v23, %v13875_v41 }
 0xcc1   :  { %v10028_v1 = vadd.f32 1e-05, %v10020_v52  ;;  %v10030_v29 = vadd.f32 1e-05, %v10022_v60  ;;  %v10427_v52 = vrot.slane %v10387_v22, %v13875_v41  ;;  %v10431_v60 = vrot.slane %v10391_v6, %v13875_v41 }
 0xcc2   :  { %v10029_v3 = vadd.f32 1e-05, %v10021_v59  ;;  %v10031_v17 = vadd.f32 1e-05, %v10023_v26  ;;  %v10579_v59 = vrot.slane %v15195_v7, %v14533_v55 }
 0xcc3   :  { %11403 = vrsqrt.f32 %v10028_v1 }
 0xcc4   :  { %11405 = vrsqrt.f32 %v10030_v29 }
 0xcc5   :  { %11407 = vrsqrt.f32 %v10029_v3  ;;  %v10583_v3 = vrot.slane %v15195_v7, %v14783_v32 }
 0xcc6   :  { %11409 = vrsqrt.f32 %v10031_v17  ;;  %v10587_v17 = vrot.slane %v15197_v14, %v14533_v55 }
 0xcc7   :  { %v10623_v34 = vrot.slane %v10583_v3, %v14533_v55 }
 0xcc8   :  { %v10627_v16 = vrot.slane %v10587_v17, %v14533_v55 }
 0xccd   :  { %v11404_v35 = vpop.eup %11403 }
 0xcce   :  { %v11406_v10 = vpop.eup %11405 }
 0xccf   :  { %v11408_v5 = vpop.eup %11407 }
 0xcd0   :  { %v11410_v45 = vpop.eup %11409  ;;  %v10065_v47 = vcombine.low %v11404_v35, %v11408_v5  ;;  %v10591_v35 = vrot.slane %v15197_v14, %v14783_v32 }
 0xcd1   :  { %v10066_v13 = vcombine.low %v11406_v10, %v11410_v45  ;;  %v10285_v10 = vrot.slane %v15195_v7, %v15422_v33 }
 0xcd2   :  { %v10073_v15 = vrot.slane %v10065_v47, %v14530_v38  ;;  %v10297_v47 = vrot.slane %v15197_v14, %v14786_v51 }
 0xcd3   :  { %v10080_v0 = vrot.slane %v10066_v13, %v14530_v38  ;;  %v10489_v38 = vrot.slane %v15197_v14, %v14537_v48 }
 0xcd5   :  { %v10081_v56 = vcombine.low %v10073_v15, %v10080_v0  ;;  %v10529_v40 = vrot.slane %v10489_v38, %v14537_v48  ;;  %v10619_v0 = vrot.slane %v10579_v59, %v14533_v55 }
 0xcd7   :  { %v10085_v25 = vmul.f32 %v10081_v56, %v9895_v11  ;;  %v10293_v11 = vrot.slane %v15197_v14, %v15422_v33 }
 0xcd9   :  { %v10119_v27 = vrot.slane %v10085_v25, %v14789_v53  ;;  %v10107_v43 = vrot.slane %v10085_v25, %v15422_v33  ;;  %v10111_v36 = vrot.slane %v10085_v25, %v14537_v48  ;;  %v10115_v9 = vrot.slane %v10085_v25, %v14786_v51 }
 0xcda   :  { %v10333_v25 = vrot.slane %v10293_v11, %v15422_v33 }
 0xcdb   :  { %v10159_v28 = vrot.slane %v10119_v27, %v15422_v33  ;;  %v10147_v49 = vrot.slane %v10107_v43, %v15422_v33  ;;  %v10151_v53 = vrot.slane %v10111_v36, %v15422_v33  ;;  %v10155_v61 = vrot.slane %v10115_v9, %v15422_v33 }
 0xcdd   :  { %v10167_v26 = vmul.f32 %v10159_v28, %v15179_v44  ;;  %v10164_v48 = vmul.f32 %v10147_v49, %v15173_v8  ;;  %v10165_v1 = vmul.f32 %v10151_v53, %v15177_v63  ;;  %v10166_v29 = vmul.f32 %v10155_v61, %v15175_v18 }
 0xcde   :  { %v10435_v63 = vrot.slane %v10395_v24, %v13875_v41  ;;  %v10289_v18 = vrot.slane %v15195_v7, %v14786_v51  ;;  %v10631_v41 = vrot.slane %v10591_v35, %v14533_v55 }
 0xcdf   :  { %v10249_v5 = vadd.f32 %v10241_v50, %v10167_v26  ;;  %v10246_v44 = vadd.f32 %v10229_v46, %v10164_v48  ;;  %v10247_v45 = vadd.f32 %v10233_v39, %v10165_v1  ;;  %v10248_v8 = vadd.f32 %v10237_v12, %v10166_v29 }
 0xce0   :  { %v10325_v50 = vrot.slane %v10285_v10, %v15422_v33  ;;  %v10329_v14 = vrot.slane %v10289_v18, %v15422_v33  ;;  %v10337_v46 = vrot.slane %v10297_v47, %v15422_v33 }
 0xce1   :  { %v10257_v13 = vmax.f32 %v10249_v5, 0.0  ;;  %v10254_v32 = vmax.f32 %v10246_v44, 0.0  ;;  %v10255_v37 = vmax.f32 %v10247_v45, 0.0  ;;  %v10256_v15 = vmax.f32 %v10248_v8, 0.0 }
 0xce3   :  { %v10538_v21 = vmul.f32 %v10521_v62, %v10254_v32  ;;  %v10539_v7 = vmul.f32 %v10525_v57, %v10255_v37  ;;  %v10540_v56 = vmul.f32 %v10529_v40, %v10256_v15  ;;  %v10541_v20 = vmul.f32 %v10533_v30, %v10257_v13 }
 0xce4   :  { %v10440_v4 = vmul.f32 %v10423_v19, %v10254_v32  ;;  %v10441_v51 = vmul.f32 %v10427_v52, %v10255_v37  ;;  %v10442_v31 = vmul.f32 %v10431_v60, %v10256_v15  ;;  %v10443_v12 = vmul.f32 %v10435_v63, %v10257_v13 }
 0xce5   :  { %v10550_v38 = vsel %vm10542_vm1, %v10538_v21, 0.0  ;;  %v10552_v55 = vsel %vm10542_vm1, %v10539_v7, 0.0  ;;  %v10554_v22 = vsel %vm10542_vm1, %v10540_v56, 0.0  ;;  %v10636_v24 = vmul.f32 %v10619_v0, %v10254_v32 }
 0xce6   :  { %v10551_v39 = vadd.f32 %v10550_v38, %v15141_v54  ;;  %v10452_v23 = vsel %vm10444_vm2, %v10440_v4, 0.0  ;;  %v10637_v27 = vmul.f32 %v10623_v34, %v10255_v37  ;;  %v10556_v36 = vsel %vm10542_vm1, %v10541_v20, 0.0 }
 0xce7   :  { %v10453_v6 = vadd.f32 %v10452_v23, %v15146_v2  ;;  %v10454_v9 = vsel %vm10444_vm2, %v10441_v51, 0.0  ;;  %v10342_v62 = vmul.f32 %v10325_v50, %v10254_v32  ;;  %v10638_v57 = vmul.f32 %v10627_v16, %v10256_v15 }
 0xce8   :  { %v10553_v43 = vadd.f32 %v10552_v55, %v10551_v39  ;;  %v10648_v54 = vsel %vm10640_vm3, %v10636_v24, 0.0  ;;  %v10343_v40 = vmul.f32 %v10329_v14, %v10255_v37  ;;  %v10456_v28 = vsel %vm10444_vm2, %v10442_v31, 0.0 }
 0xce9   :  { %v10455_v33 = vadd.f32 %v10454_v9, %v10453_v6  ;;  %v10639_v49 = vmul.f32 %v10631_v41, %v10257_v13  ;;  %v10649_v53 = vadd.f32 %v10648_v54, %v15154_v42  ;;  %v10650_v61 = vsel %vm10640_vm3, %v10637_v27, 0.0 }
 0xcea   :  { %v10555_v30 = vadd.f32 %v10554_v22, %v10553_v43  ;;  %v10344_v19 = vmul.f32 %v10333_v25, %v10256_v15  ;;  %v10354_v52 = vsel %vm10346_vm4, %v10342_v62, 0.0  ;;  %v10458_v59 = vsel %vm10444_vm2, %v10443_v12, 0.0 }
 0xceb   :  { %v10457_v2 = vadd.f32 %v10456_v28, %v10455_v33  ;;  %v10651_v26 = vadd.f32 %v10650_v61, %v10649_v53  ;;  %v10355_v48 = vadd.f32 %v10354_v52, %v15157_v58  ;;  %v10652_v29 = vsel %vm10640_vm3, %v10638_v57, 0.0 }
 0xcec   :  { %v10557_v60 = vadd.f32 %v10556_v36, %v10555_v30  ;;  %v10345_v3 = vmul.f32 %v10337_v46, %v10257_v13  ;;  %v10356_v17 = vsel %vm10346_vm4, %v10343_v40, 0.0  ;;  %v10654_v10 = vsel %vm10640_vm3, %v10639_v49, 0.0 }
 0xced   :  { %v10459_v1 = vadd.f32 %v10458_v59, %v10457_v2  ;;  %v10653_v42 = vadd.f32 %v10652_v29, %v10651_v26  ;;  %v10357_v35 = vadd.f32 %v10356_v17, %v10355_v48  ;;  %v10358_v5 = vsel %vm10346_vm4, %v10344_v19, 0.0 }
 0xcee   :  { %10558 = vadd.xlane.f32.xlu1 %v10557_v60  ;;  %v10360_v8 = vsel %vm10346_vm4, %v10345_v3, 0.0  ;;  %v10671_v34 = vstv %s15299_s10 }
 0xcef   :  { %10460 = vadd.xlane.f32.xlu0 %v10459_v1  ;;  %v10655_v44 = vadd.f32 %v10654_v10, %v10653_v42  ;;  %v10359_v45 = vadd.f32 %v10358_v5, %v10357_v35 }
 0xcf1   :  { %v10361_v58 = vadd.f32 %v10360_v8, %v10359_v45 }
 0xcf2   :  { %10656 = vadd.xlane.f32.xlu1 %v10655_v44 }
 0xcf3   :  { %10362 = vadd.xlane.f32.xlu0 %v10361_v58 }
 0xd7b   :  { %v10559_v63 = vpop.xlane.xlu1 %10558 }
 0xd7c   :  { %v10461_v18 = vpop.xlane.xlu0 %10460  ;;  %v10663_v32 = vrot.slane %v10559_v63, 4 }
 0xd7d   :  { %v10659_v11 = vrot.slane %v10461_v18, 2 }
 0xd7f   :  { %v10657_v47 = vpop.xlane.xlu1 %10656 }
 0xd80   :  { %v10363_v13 = vpop.xlane.xlu0 %10362  ;;  %v10667_v15 = vrot.slane %v10657_v47, 6 }
 0xd81   :  { %v10661_v37 = vadd.f32 %v10659_v11, %v10363_v13 }
 0xd83   :  { %v10665_v0 = vadd.f32 %v10663_v32, %v10661_v37 }
 0xd85   :  { %v10669_v16 = vadd.f32 %v10667_v15, %v10665_v0 }
 0xd87   :  { %v10672_v41 = vadd.f32 %v10671_v34, %v10669_v16 }
 0xd89   :  { %v10909_v21 = vmul.f32 -1.442695, %v10672_v41 }
 0xd8b   :  { %11411 = vpow2.f32 %v10909_v21 }
 0xd95   :  { %v11412_v7 = vpop.eup %11411 }
 0xd96   :  { %v10676_v56 = vadd.f32 1.0, %v11412_v7 }
 0xd98   :  { %11413 = vrcp.f32 %v10676_v56 }
 0xda2   :  { %v11414_v50 = vpop.eup %11413 }
 0xda3   :  { %10680 = vst.msk [vmem:[%s15300_s11] sm:$0x3] %vm10679_vm5, %v11414_v50 }
 0xda4   :  { %10685 = vsyncpa [#allocation10], 1 }
 0xda5   :  { %10686 = vsyncpa [#allocation12], 1 }
 0xda6   :  { %10687 = vsyncpa [#allocation15], 1 }
 0xda7   :  { %10688 = vsyncpa [#allocation18], 1 }
 0xda8   :  { %10689 = vsyncmov [#allocation7] }
 0xdab   :  { %s10690_s24 = vpop.sfrf %10689 }
 0xdac   :  { %p10910_p6 = scmp.ne.s32.totalorder %s10690_s24, 0 }
 0xdae   :  { %10694 = shalt.err (%p10910_p6)  }
 0xdaf   :  { %10696 = vsyncmov [#allocation7 + $0x1] }
 0xdb2   :  { %s10697_s10 = vpop.sfrf %10696 }
 0xdb3   :  { %p10911_p7 = scmp.ne.s32.totalorder %s10697_s10, 0 }
 0xdb5   :  { %10701 = shalt.err (%p10911_p7)  }

</bundles_post_ra>
